<compile_context>
chip_gen: v7x
topology: tpu7x:2x2x1
jax: 0.10.0
libtpu: 0.0.40
codegen_flags: <defaults>
</compile_context>

<pallas_src>
import numpy as np

import jax
import jax.numpy as jnp
from jax.experimental import pallas as pl
from jax.experimental.pallas import tpu as pltpu


# ---------------------------------------------------------------------------
# Kernel
# ---------------------------------------------------------------------------
def _conv_in_lrelu(x_f32, s_ref, w_ref, b_ref):
    """One conv block on a VMEM-resident activation.

    x_f32 : (P_in, Cin)  f32 activation (spatial flattened NHWC: p = h*W + w)
    s_ref : (9, P_out, P_in) bf16  0/1 shift matrices (one per 3x3 tap)
    w_ref : (9, Cin, Cout)   bf16  conv weight per tap
    b_ref : (1, Cout)        f32   conv bias
    returns (P_out, Cout) f32
    """
    x_bf = x_f32.astype(jnp.bfloat16)
    p_out = s_ref.shape[1]
    c_out = w_ref.shape[2]

    acc = jnp.zeros((p_out, c_out), jnp.float32)
    for t in range(9):                                    # static unroll
        tap = jnp.dot(s_ref[t], x_bf, preferred_element_type=jnp.float32)
        acc = acc + jnp.dot(tap.astype(jnp.bfloat16), w_ref[t],
                            preferred_element_type=jnp.float32)
    y = acc + b_ref[...]                                  # (P_out, Cout)

    # InstanceNorm2d (affine=False, biased var, eps=1e-5), single pass, f32.
    inv_p = 1.0 / p_out
    mean = jnp.sum(y, axis=0, keepdims=True) * inv_p
    var = jnp.sum(y * y, axis=0, keepdims=True) * inv_p - mean * mean
    var = jnp.maximum(var, 0.0)
    yn = (y - mean) * jax.lax.rsqrt(var + 1e-5)

    # LeakyReLU(0.2)
    return jnp.where(yn >= 0, yn, 0.2 * yn)


def discriminator_kernel(x_ref,
                         s1, w1, b1, s2, w2, b2, s3, w3, b3, s4, w4, b4,
                         lw_ref, lb_ref, o_ref):
    """Full forward for one batch element (grid axis = batch)."""
    x = x_ref[0].astype(jnp.float32)          # (256, 3)
    x = _conv_in_lrelu(x, s1, w1, b1)         # (256, 32)
    x = _conv_in_lrelu(x, s2, w2, b2)         # (64, 64)
    x = _conv_in_lrelu(x, s3, w3, b3)         # (16, 128)
    x = _conv_in_lrelu(x, s4, w4, b4)         # (4, 256)

    # Linear head, fused. lw is already permuted to NHWC-flatten order.
    res = jnp.sum(x * lw_ref[...], axis=1, keepdims=True)     # (4, 1)
    res = jnp.sum(res, axis=0, keepdims=True) + lb_ref[...]   # (1, 1)
    o_ref[0] = res


# ---------------------------------------------------------------------------
# Parameter preparation (host side, once)
# ---------------------------------------------------------------------------
def _shift_mats(h_in, w_in, stride):
    """9 (P_out, P_in) 0/1 matrices implementing a 3x3, pad=1 conv's taps."""
    h_out = (h_in + 2 - 3) // stride + 1
    w_out = (w_in + 2 - 3) // stride + 1
    p_out = h_out * w_out
    po = np.arange(p_out)
    oi, oj = po // w_out, po % w_out
    mats = np.zeros((9, p_out, h_in * w_in), np.float32)
    for dy in range(3):
        for dx in range(3):
            hi = stride * oi + dy - 1
            wi = stride * oj + dx - 1
            valid = (hi >= 0) & (hi < h_in) & (wi >= 0) & (wi < w_in)
            p_in = hi * w_in + wi
            mats[dy * 3 + dx, po[valid], p_in[valid]] = 1.0
    return mats, h_out, w_out


def prepare(conv_params, linear_params, size):
    """Build kernel-ready arrays: shift matrices, per-tap weights, permuted head."""
    h, w = size
    s_mats, w_taps, biases = [], [], []
    for wt, bs, stride in conv_params:
        c_out, c_in = wt.shape[0], wt.shape[1]
        s_np, h, w = _shift_mats(h, w, stride)
        s_mats.append(jnp.asarray(s_np, dtype=jnp.bfloat16))
        # (Cout, Cin, 3, 3) -> (3, 3, Cin, Cout) -> (9, Cin, Cout)
        w9 = jnp.transpose(wt, (2, 3, 1, 0)).reshape(9, c_in, c_out)
        w_taps.append(w9.astype(jnp.bfloat16))
        biases.append(bs.reshape(1, c_out).astype(jnp.float32))

    lw, lb = linear_params
    c_last = conv_params[-1][0].shape[0]
    # Permute linear-weight rows from NCHW-flatten (c, h, w) to NHWC-flatten
    # (p = h*W + w, c) so the kernel consumes the NHWC activation directly.
    lw_nhwc = jnp.transpose(lw.reshape(c_last, h, w), (1, 2, 0))
    lw_nhwc = lw_nhwc.reshape(h * w, c_last).astype(jnp.float32)
    lb2 = lb.reshape(1, 1).astype(jnp.float32)
    return s_mats, w_taps, biases, lw_nhwc, lb2


# ---------------------------------------------------------------------------
# pallas_call wrapper
# ---------------------------------------------------------------------------
def discriminator_pallas(x_flat, prepped):
    """x_flat: (N, H*W, 3) f32 (NHWC spatial-flattened)."""
    s_mats, w_taps, biases, lw, lb = prepped
    n, p_in0, c_in0 = x_flat.shape

    def const_spec(arr):
        nd = arr.ndim
        return pl.BlockSpec(arr.shape, lambda i, _nd=nd: (0,) * _nd)

    in_arrays = [x_flat]
    in_specs = [pl.BlockSpec((1, p_in0, c_in0), lambda i: (i, 0, 0))]
    for s, w9, b in zip(s_mats, w_taps, biases):
        for arr in (s, w9, b):
            in_arrays.append(arr)
            in_specs.append(const_spec(arr))
    for arr in (lw, lb):
        in_arrays.append(arr)
        in_specs.append(const_spec(arr))

    out = pl.pallas_call(
        discriminator_kernel,
        out_shape=jax.ShapeDtypeStruct((n, 1, 1), jnp.float32),
        grid=(n,),
        in_specs=in_specs,
        out_specs=pl.BlockSpec((1, 1, 1), lambda i: (i, 0, 0)),
        compiler_params=pltpu.CompilerParams(
            dimension_semantics=("parallel",)),
    )(*in_arrays)
    return out.reshape(n, 1)


@jax.jit
def discriminator_forward(x_nchw, prepped):
    n, c, h, w = x_nchw.shape
    x = jnp.transpose(x_nchw, (0, 2, 3, 1)).reshape(n, h * w, c)
    return discriminator_pallas(x, prepped)


# ---------------------------------------------------------------------------
# Synthetic parameters + pure-JAX reference (for a sanity check)
# ---------------------------------------------------------------------------
def make_params(key, size):
    dim = 32
    specs = [(3, dim, 1), (dim, 2 * dim, 2), (2 * dim, 4 * dim, 2),
             (4 * dim, 8 * dim, 2)]
    conv_params = []
    for c_in, c_out, stride in specs:
        key, k1, k2 = jax.random.split(key, 3)
        wt = jax.random.normal(k1, (c_out, c_in, 3, 3), jnp.float32) * 0.05
        bs = jax.random.normal(k2, (c_out,), jnp.float32) * 0.05
        conv_params.append((wt, bs, stride))

    h, w = size
    for _, _, s in specs:
        h = (h + 2 - 3) // s + 1
        w = (w + 2 - 3) // s + 1
    dim_flat = specs[-1][1] * h * w

    key, k1, k2 = jax.random.split(key, 3)
    lw = jax.random.normal(k1, (dim_flat, 1), jnp.float32) * 0.02
    lb = jax.random.normal(k2, (1,), jnp.float32) * 0.02
    return conv_params, (lw, lb), dim_flat


def reference_forward(x_nchw, conv_params, linear_params):
    x = x_nchw
    for wt, bs, stride in conv_params:
        x = jax.lax.conv_general_dilated(
            x, wt, window_strides=(stride, stride), padding=((1, 1), (1, 1)),
            dimension_numbers=("NCHW", "OIHW", "NCHW"))
        x = x + bs.reshape(1, -1, 1, 1)
        mean = jnp.mean(x, axis=(2, 3), keepdims=True)
        var = jnp.mean((x - mean) ** 2, axis=(2, 3), keepdims=True)
        x = (x - mean) * jax.lax.rsqrt(var + 1e-5)
        x = jnp.where(x >= 0, x, 0.2 * x)
    lw, lb = linear_params
    flat = x.reshape(x.shape[0], -1)
    return flat @ lw + lb.reshape(1, 1)


# ---------------------------------------------------------------------------
if __name__ == "__main__":
    key = jax.random.PRNGKey(0)
    k_x, k_p = jax.random.split(key)
    size = (16, 16)
    x = jax.random.normal(k_x, (2, 3, *size), jnp.float32)

    conv_params, linear_params, dim_flat = make_params(k_p, size)
    prepped = prepare(conv_params, linear_params, size)

    out = discriminator_forward(x, prepped)
    out = jax.block_until_ready(out)

    assert out.shape == (2, 1), out.shape
    assert jnp.all(jnp.isfinite(out)), "non-finite output"

    # Loose tolerance: kernel uses bf16 MXU operands (f32 accumulation/norm).
    ref = reference_forward(x, conv_params, linear_params)
    assert jnp.allclose(out, ref, rtol=1e-1, atol=1e-1), (out, ref)

    print("KERNEL_OK")
</pallas_src>

<mosaic_0001>
module attributes {stable_mosaic.version = 11 : i64} {
  func.func @discriminator_kernel(%arg0: i32, %arg1: memref<1x256x3xf32, #tpu.memory_space<vmem>>, %arg2: memref<9x256x256xbf16, #tpu.memory_space<vmem>>, %arg3: memref<9x3x32xbf16, #tpu.memory_space<vmem>>, %arg4: memref<1x32xf32, #tpu.memory_space<vmem>>, %arg5: memref<9x64x256xbf16, #tpu.memory_space<vmem>>, %arg6: memref<9x32x64xbf16, #tpu.memory_space<vmem>>, %arg7: memref<1x64xf32, #tpu.memory_space<vmem>>, %arg8: memref<9x16x64xbf16, #tpu.memory_space<vmem>>, %arg9: memref<9x64x128xbf16, #tpu.memory_space<vmem>>, %arg10: memref<1x128xf32, #tpu.memory_space<vmem>>, %arg11: memref<9x4x16xbf16, #tpu.memory_space<vmem>>, %arg12: memref<9x128x256xbf16, #tpu.memory_space<vmem>>, %arg13: memref<1x256xf32, #tpu.memory_space<vmem>>, %arg14: memref<4x256xf32, #tpu.memory_space<vmem>>, %arg15: memref<1x1xf32, #tpu.memory_space<vmem>>, %arg16: memref<1x1x1xf32, #tpu.memory_space<vmem>>) attributes {dimension_semantics = [#tpu.dimension_semantics<parallel>], iteration_bounds = array<i64: 2>, scalar_prefetch = 0 : i64, scratch_operands = 0 : i64, tpu.core_type = #tpu.core_type<tc>, window_params = [{transform_indices = @transform_0, window_bounds = array<i64: 1, 256, 3>}, {pipeline_mode = #tpu.pipeline_mode<synchronous>, transform_indices = @transform_1, window_bounds = array<i64: 9, 256, 256>}, {pipeline_mode = #tpu.pipeline_mode<synchronous>, transform_indices = @transform_2, window_bounds = array<i64: 9, 3, 32>}, {pipeline_mode = #tpu.pipeline_mode<synchronous>, transform_indices = @transform_3, window_bounds = array<i64: 1, 32>}, {pipeline_mode = #tpu.pipeline_mode<synchronous>, transform_indices = @transform_4, window_bounds = array<i64: 9, 64, 256>}, {pipeline_mode = #tpu.pipeline_mode<synchronous>, transform_indices = @transform_5, window_bounds = array<i64: 9, 32, 64>}, {pipeline_mode = #tpu.pipeline_mode<synchronous>, transform_indices = @transform_6, window_bounds = array<i64: 1, 64>}, {pipeline_mode = #tpu.pipeline_mode<synchronous>, transform_indices = @transform_7, window_bounds = array<i64: 9, 16, 64>}, {pipeline_mode = #tpu.pipeline_mode<synchronous>, transform_indices = @transform_8, window_bounds = array<i64: 9, 64, 128>}, {pipeline_mode = #tpu.pipeline_mode<synchronous>, transform_indices = @transform_9, window_bounds = array<i64: 1, 128>}, {pipeline_mode = #tpu.pipeline_mode<synchronous>, transform_indices = @transform_10, window_bounds = array<i64: 9, 4, 16>}, {pipeline_mode = #tpu.pipeline_mode<synchronous>, transform_indices = @transform_11, window_bounds = array<i64: 9, 128, 256>}, {pipeline_mode = #tpu.pipeline_mode<synchronous>, transform_indices = @transform_12, window_bounds = array<i64: 1, 256>}, {pipeline_mode = #tpu.pipeline_mode<synchronous>, transform_indices = @transform_13, window_bounds = array<i64: 4, 256>}, {pipeline_mode = #tpu.pipeline_mode<synchronous>, transform_indices = @transform_14, window_bounds = array<i64: 1, 1>}, {transform_indices = @transform_15, window_bounds = array<i64: 1, 1, 1>}]} {
    %c0 = arith.constant 0 : index
    %c0_0 = arith.constant 0 : index
    %c0_1 = arith.constant 0 : index
    %0 = vector.load %arg1[%c0, %c0_0, %c0_1] : memref<1x256x3xf32, #tpu.memory_space<vmem>>, vector<1x256x3xf32>
    %1 = vector.shape_cast %0 : vector<1x256x3xf32> to vector<256x3xf32>
    %2 = arith.truncf %1 : vector<256x3xf32> to vector<256x3xbf16>
    %cst = arith.constant 0.000000e+00 : f32
    %3 = vector.broadcast %cst : f32 to vector<256x32xf32>
    %c0_2 = arith.constant 0 : index
    %c0_3 = arith.constant 0 : index
    %c0_4 = arith.constant 0 : index
    %4 = vector.load %arg2[%c0_2, %c0_3, %c0_4] : memref<9x256x256xbf16, #tpu.memory_space<vmem>>, vector<1x256x256xbf16>
    %5 = vector.shape_cast %4 : vector<1x256x256xbf16> to vector<256x256xbf16>
    %cst_5 = arith.constant dense<0.000000e+00> : vector<256x3xf32>
    %6 = tpu.matmul %5, %2, %cst_5 {dimension_numbers = #tpu.dot_dimension_numbers<[1], [0], [0], [1], [0, 0, 1, 1], [], []>} : vector<256x256xbf16>, vector<256x3xbf16>, vector<256x3xf32> -> vector<256x3xf32>
    %7 = arith.truncf %6 : vector<256x3xf32> to vector<256x3xbf16>
    %c0_6 = arith.constant 0 : index
    %c0_7 = arith.constant 0 : index
    %c0_8 = arith.constant 0 : index
    %8 = vector.load %arg3[%c0_6, %c0_7, %c0_8] : memref<9x3x32xbf16, #tpu.memory_space<vmem>>, vector<1x3x32xbf16>
    %9 = vector.shape_cast %8 : vector<1x3x32xbf16> to vector<3x32xbf16>
    %cst_9 = arith.constant dense<0.000000e+00> : vector<256x32xf32>
    %10 = tpu.matmul %7, %9, %cst_9 {dimension_numbers = #tpu.dot_dimension_numbers<[1], [0], [0], [1], [0, 0, 1, 1], [], []>} : vector<256x3xbf16>, vector<3x32xbf16>, vector<256x32xf32> -> vector<256x32xf32>
    %11 = arith.addf %3, %10 : vector<256x32xf32>
    %c1 = arith.constant 1 : index
    %c0_10 = arith.constant 0 : index
    %c0_11 = arith.constant 0 : index
    %12 = vector.load %arg2[%c1, %c0_10, %c0_11] : memref<9x256x256xbf16, #tpu.memory_space<vmem>>, vector<1x256x256xbf16>
    %13 = vector.shape_cast %12 : vector<1x256x256xbf16> to vector<256x256xbf16>
    %cst_12 = arith.constant dense<0.000000e+00> : vector<256x3xf32>
    %14 = tpu.matmul %13, %2, %cst_12 {dimension_numbers = #tpu.dot_dimension_numbers<[1], [0], [0], [1], [0, 0, 1, 1], [], []>} : vector<256x256xbf16>, vector<256x3xbf16>, vector<256x3xf32> -> vector<256x3xf32>
    %15 = arith.truncf %14 : vector<256x3xf32> to vector<256x3xbf16>
    %c1_13 = arith.constant 1 : index
    %c0_14 = arith.constant 0 : index
    %c0_15 = arith.constant 0 : index
    %16 = vector.load %arg3[%c1_13, %c0_14, %c0_15] : memref<9x3x32xbf16, #tpu.memory_space<vmem>>, vector<1x3x32xbf16>
    %17 = vector.shape_cast %16 : vector<1x3x32xbf16> to vector<3x32xbf16>
    %cst_16 = arith.constant dense<0.000000e+00> : vector<256x32xf32>
    %18 = tpu.matmul %15, %17, %cst_16 {dimension_numbers = #tpu.dot_dimension_numbers<[1], [0], [0], [1], [0, 0, 1, 1], [], []>} : vector<256x3xbf16>, vector<3x32xbf16>, vector<256x32xf32> -> vector<256x32xf32>
    %19 = arith.addf %11, %18 : vector<256x32xf32>
    %c2 = arith.constant 2 : index
    %c0_17 = arith.constant 0 : index
    %c0_18 = arith.constant 0 : index
    %20 = vector.load %arg2[%c2, %c0_17, %c0_18] : memref<9x256x256xbf16, #tpu.memory_space<vmem>>, vector<1x256x256xbf16>
    %21 = vector.shape_cast %20 : vector<1x256x256xbf16> to vector<256x256xbf16>
    %cst_19 = arith.constant dense<0.000000e+00> : vector<256x3xf32>
    %22 = tpu.matmul %21, %2, %cst_19 {dimension_numbers = #tpu.dot_dimension_numbers<[1], [0], [0], [1], [0, 0, 1, 1], [], []>} : vector<256x256xbf16>, vector<256x3xbf16>, vector<256x3xf32> -> vector<256x3xf32>
    %23 = arith.truncf %22 : vector<256x3xf32> to vector<256x3xbf16>
    %c2_20 = arith.constant 2 : index
    %c0_21 = arith.constant 0 : index
    %c0_22 = arith.constant 0 : index
    %24 = vector.load %arg3[%c2_20, %c0_21, %c0_22] : memref<9x3x32xbf16, #tpu.memory_space<vmem>>, vector<1x3x32xbf16>
    %25 = vector.shape_cast %24 : vector<1x3x32xbf16> to vector<3x32xbf16>
    %cst_23 = arith.constant dense<0.000000e+00> : vector<256x32xf32>
    %26 = tpu.matmul %23, %25, %cst_23 {dimension_numbers = #tpu.dot_dimension_numbers<[1], [0], [0], [1], [0, 0, 1, 1], [], []>} : vector<256x3xbf16>, vector<3x32xbf16>, vector<256x32xf32> -> vector<256x32xf32>
    %27 = arith.addf %19, %26 : vector<256x32xf32>
    %c3 = arith.constant 3 : index
    %c0_24 = arith.constant 0 : index
    %c0_25 = arith.constant 0 : index
    %28 = vector.load %arg2[%c3, %c0_24, %c0_25] : memref<9x256x256xbf16, #tpu.memory_space<vmem>>, vector<1x256x256xbf16>
    %29 = vector.shape_cast %28 : vector<1x256x256xbf16> to vector<256x256xbf16>
    %cst_26 = arith.constant dense<0.000000e+00> : vector<256x3xf32>
    %30 = tpu.matmul %29, %2, %cst_26 {dimension_numbers = #tpu.dot_dimension_numbers<[1], [0], [0], [1], [0, 0, 1, 1], [], []>} : vector<256x256xbf16>, vector<256x3xbf16>, vector<256x3xf32> -> vector<256x3xf32>
    %31 = arith.truncf %30 : vector<256x3xf32> to vector<256x3xbf16>
    %c3_27 = arith.constant 3 : index
    %c0_28 = arith.constant 0 : index
    %c0_29 = arith.constant 0 : index
    %32 = vector.load %arg3[%c3_27, %c0_28, %c0_29] : memref<9x3x32xbf16, #tpu.memory_space<vmem>>, vector<1x3x32xbf16>
    %33 = vector.shape_cast %32 : vector<1x3x32xbf16> to vector<3x32xbf16>
    %cst_30 = arith.constant dense<0.000000e+00> : vector<256x32xf32>
    %34 = tpu.matmul %31, %33, %cst_30 {dimension_numbers = #tpu.dot_dimension_numbers<[1], [0], [0], [1], [0, 0, 1, 1], [], []>} : vector<256x3xbf16>, vector<3x32xbf16>, vector<256x32xf32> -> vector<256x32xf32>
    %35 = arith.addf %27, %34 : vector<256x32xf32>
    %c4 = arith.constant 4 : index
    %c0_31 = arith.constant 0 : index
    %c0_32 = arith.constant 0 : index
    %36 = vector.load %arg2[%c4, %c0_31, %c0_32] : memref<9x256x256xbf16, #tpu.memory_space<vmem>>, vector<1x256x256xbf16>
    %37 = vector.shape_cast %36 : vector<1x256x256xbf16> to vector<256x256xbf16>
    %cst_33 = arith.constant dense<0.000000e+00> : vector<256x3xf32>
    %38 = tpu.matmul %37, %2, %cst_33 {dimension_numbers = #tpu.dot_dimension_numbers<[1], [0], [0], [1], [0, 0, 1, 1], [], []>} : vector<256x256xbf16>, vector<256x3xbf16>, vector<256x3xf32> -> vector<256x3xf32>
    %39 = arith.truncf %38 : vector<256x3xf32> to vector<256x3xbf16>
    %c4_34 = arith.constant 4 : index
    %c0_35 = arith.constant 0 : index
    %c0_36 = arith.constant 0 : index
    %40 = vector.load %arg3[%c4_34, %c0_35, %c0_36] : memref<9x3x32xbf16, #tpu.memory_space<vmem>>, vector<1x3x32xbf16>
    %41 = vector.shape_cast %40 : vector<1x3x32xbf16> to vector<3x32xbf16>
    %cst_37 = arith.constant dense<0.000000e+00> : vector<256x32xf32>
    %42 = tpu.matmul %39, %41, %cst_37 {dimension_numbers = #tpu.dot_dimension_numbers<[1], [0], [0], [1], [0, 0, 1, 1], [], []>} : vector<256x3xbf16>, vector<3x32xbf16>, vector<256x32xf32> -> vector<256x32xf32>
    %43 = arith.addf %35, %42 : vector<256x32xf32>
    %c5 = arith.constant 5 : index
    %c0_38 = arith.constant 0 : index
    %c0_39 = arith.constant 0 : index
    %44 = vector.load %arg2[%c5, %c0_38, %c0_39] : memref<9x256x256xbf16, #tpu.memory_space<vmem>>, vector<1x256x256xbf16>
    %45 = vector.shape_cast %44 : vector<1x256x256xbf16> to vector<256x256xbf16>
    %cst_40 = arith.constant dense<0.000000e+00> : vector<256x3xf32>
    %46 = tpu.matmul %45, %2, %cst_40 {dimension_numbers = #tpu.dot_dimension_numbers<[1], [0], [0], [1], [0, 0, 1, 1], [], []>} : vector<256x256xbf16>, vector<256x3xbf16>, vector<256x3xf32> -> vector<256x3xf32>
    %47 = arith.truncf %46 : vector<256x3xf32> to vector<256x3xbf16>
    %c5_41 = arith.constant 5 : index
    %c0_42 = arith.constant 0 : index
    %c0_43 = arith.constant 0 : index
    %48 = vector.load %arg3[%c5_41, %c0_42, %c0_43] : memref<9x3x32xbf16, #tpu.memory_space<vmem>>, vector<1x3x32xbf16>
    %49 = vector.shape_cast %48 : vector<1x3x32xbf16> to vector<3x32xbf16>
    %cst_44 = arith.constant dense<0.000000e+00> : vector<256x32xf32>
    %50 = tpu.matmul %47, %49, %cst_44 {dimension_numbers = #tpu.dot_dimension_numbers<[1], [0], [0], [1], [0, 0, 1, 1], [], []>} : vector<256x3xbf16>, vector<3x32xbf16>, vector<256x32xf32> -> vector<256x32xf32>
    %51 = arith.addf %43, %50 : vector<256x32xf32>
    %c6 = arith.constant 6 : index
    %c0_45 = arith.constant 0 : index
    %c0_46 = arith.constant 0 : index
    %52 = vector.load %arg2[%c6, %c0_45, %c0_46] : memref<9x256x256xbf16, #tpu.memory_space<vmem>>, vector<1x256x256xbf16>
    %53 = vector.shape_cast %52 : vector<1x256x256xbf16> to vector<256x256xbf16>
    %cst_47 = arith.constant dense<0.000000e+00> : vector<256x3xf32>
    %54 = tpu.matmul %53, %2, %cst_47 {dimension_numbers = #tpu.dot_dimension_numbers<[1], [0], [0], [1], [0, 0, 1, 1], [], []>} : vector<256x256xbf16>, vector<256x3xbf16>, vector<256x3xf32> -> vector<256x3xf32>
    %55 = arith.truncf %54 : vector<256x3xf32> to vector<256x3xbf16>
    %c6_48 = arith.constant 6 : index
    %c0_49 = arith.constant 0 : index
    %c0_50 = arith.constant 0 : index
    %56 = vector.load %arg3[%c6_48, %c0_49, %c0_50] : memref<9x3x32xbf16, #tpu.memory_space<vmem>>, vector<1x3x32xbf16>
    %57 = vector.shape_cast %56 : vector<1x3x32xbf16> to vector<3x32xbf16>
    %cst_51 = arith.constant dense<0.000000e+00> : vector<256x32xf32>
    %58 = tpu.matmul %55, %57, %cst_51 {dimension_numbers = #tpu.dot_dimension_numbers<[1], [0], [0], [1], [0, 0, 1, 1], [], []>} : vector<256x3xbf16>, vector<3x32xbf16>, vector<256x32xf32> -> vector<256x32xf32>
    %59 = arith.addf %51, %58 : vector<256x32xf32>
    %c7 = arith.constant 7 : index
    %c0_52 = arith.constant 0 : index
    %c0_53 = arith.constant 0 : index
    %60 = vector.load %arg2[%c7, %c0_52, %c0_53] : memref<9x256x256xbf16, #tpu.memory_space<vmem>>, vector<1x256x256xbf16>
    %61 = vector.shape_cast %60 : vector<1x256x256xbf16> to vector<256x256xbf16>
    %cst_54 = arith.constant dense<0.000000e+00> : vector<256x3xf32>
    %62 = tpu.matmul %61, %2, %cst_54 {dimension_numbers = #tpu.dot_dimension_numbers<[1], [0], [0], [1], [0, 0, 1, 1], [], []>} : vector<256x256xbf16>, vector<256x3xbf16>, vector<256x3xf32> -> vector<256x3xf32>
    %63 = arith.truncf %62 : vector<256x3xf32> to vector<256x3xbf16>
    %c7_55 = arith.constant 7 : index
    %c0_56 = arith.constant 0 : index
    %c0_57 = arith.constant 0 : index
    %64 = vector.load %arg3[%c7_55, %c0_56, %c0_57] : memref<9x3x32xbf16, #tpu.memory_space<vmem>>, vector<1x3x32xbf16>
    %65 = vector.shape_cast %64 : vector<1x3x32xbf16> to vector<3x32xbf16>
    %cst_58 = arith.constant dense<0.000000e+00> : vector<256x32xf32>
    %66 = tpu.matmul %63, %65, %cst_58 {dimension_numbers = #tpu.dot_dimension_numbers<[1], [0], [0], [1], [0, 0, 1, 1], [], []>} : vector<256x3xbf16>, vector<3x32xbf16>, vector<256x32xf32> -> vector<256x32xf32>
    %67 = arith.addf %59, %66 : vector<256x32xf32>
    %c8 = arith.constant 8 : index
    %c0_59 = arith.constant 0 : index
    %c0_60 = arith.constant 0 : index
    %68 = vector.load %arg2[%c8, %c0_59, %c0_60] : memref<9x256x256xbf16, #tpu.memory_space<vmem>>, vector<1x256x256xbf16>
    %69 = vector.shape_cast %68 : vector<1x256x256xbf16> to vector<256x256xbf16>
    %cst_61 = arith.constant dense<0.000000e+00> : vector<256x3xf32>
    %70 = tpu.matmul %69, %2, %cst_61 {dimension_numbers = #tpu.dot_dimension_numbers<[1], [0], [0], [1], [0, 0, 1, 1], [], []>} : vector<256x256xbf16>, vector<256x3xbf16>, vector<256x3xf32> -> vector<256x3xf32>
    %71 = arith.truncf %70 : vector<256x3xf32> to vector<256x3xbf16>
    %c8_62 = arith.constant 8 : index
    %c0_63 = arith.constant 0 : index
    %c0_64 = arith.constant 0 : index
    %72 = vector.load %arg3[%c8_62, %c0_63, %c0_64] : memref<9x3x32xbf16, #tpu.memory_space<vmem>>, vector<1x3x32xbf16>
    %73 = vector.shape_cast %72 : vector<1x3x32xbf16> to vector<3x32xbf16>
    %cst_65 = arith.constant dense<0.000000e+00> : vector<256x32xf32>
    %74 = tpu.matmul %71, %73, %cst_65 {dimension_numbers = #tpu.dot_dimension_numbers<[1], [0], [0], [1], [0, 0, 1, 1], [], []>} : vector<256x3xbf16>, vector<3x32xbf16>, vector<256x32xf32> -> vector<256x32xf32>
    %75 = arith.addf %67, %74 : vector<256x32xf32>
    %c0_66 = arith.constant 0 : index
    %c0_67 = arith.constant 0 : index
    %76 = vector.load %arg4[%c0_66, %c0_67] : memref<1x32xf32, #tpu.memory_space<vmem>>, vector<1x32xf32>
    %77 = vector.broadcast %76 : vector<1x32xf32> to vector<256x32xf32>
    %78 = arith.addf %75, %77 : vector<256x32xf32>
    %cst_68 = arith.constant dense<0.000000e+00> : vector<32xf32>
    %79 = vector.multi_reduction <add>, %78, %cst_68 [0] : vector<256x32xf32> to vector<32xf32>
    %80 = vector.shape_cast %79 : vector<32xf32> to vector<1x32xf32>
    %cst_69 = arith.constant 3.906250e-03 : f32
    %81 = vector.broadcast %cst_69 : f32 to vector<1x32xf32>
    %82 = arith.mulf %80, %81 : vector<1x32xf32>
    %83 = arith.mulf %78, %78 : vector<256x32xf32>
    %cst_70 = arith.constant dense<0.000000e+00> : vector<32xf32>
    %84 = vector.multi_reduction <add>, %83, %cst_70 [0] : vector<256x32xf32> to vector<32xf32>
    %85 = vector.shape_cast %84 : vector<32xf32> to vector<1x32xf32>
    %cst_71 = arith.constant 3.906250e-03 : f32
    %86 = vector.broadcast %cst_71 : f32 to vector<1x32xf32>
    %87 = arith.mulf %85, %86 : vector<1x32xf32>
    %88 = arith.mulf %82, %82 : vector<1x32xf32>
    %89 = arith.subf %87, %88 : vector<1x32xf32>
    %cst_72 = arith.constant 0.000000e+00 : f32
    %90 = vector.broadcast %cst_72 : f32 to vector<1x32xf32>
    %91 = arith.maximumf %89, %90 : vector<1x32xf32>
    %92 = vector.broadcast %82 : vector<1x32xf32> to vector<256x32xf32>
    %93 = arith.subf %78, %92 : vector<256x32xf32>
    %cst_73 = arith.constant 9.99999974E-6 : f32
    %94 = vector.broadcast %cst_73 : f32 to vector<1x32xf32>
    %95 = arith.addf %91, %94 : vector<1x32xf32>
    %96 = math.rsqrt %95 : vector<1x32xf32>
    %97 = vector.broadcast %96 : vector<1x32xf32> to vector<256x32xf32>
    %98 = arith.mulf %93, %97 : vector<256x32xf32>
    %cst_74 = arith.constant 0.000000e+00 : f32
    %99 = vector.broadcast %cst_74 : f32 to vector<256x32xf32>
    %100 = arith.cmpf oge, %98, %99 : vector<256x32xf32>
    %cst_75 = arith.constant 2.000000e-01 : f32
    %101 = vector.broadcast %cst_75 : f32 to vector<256x32xf32>
    %102 = arith.mulf %101, %98 : vector<256x32xf32>
    %103 = arith.select %100, %98, %102 : vector<256x32xi1>, vector<256x32xf32>
    %104 = arith.truncf %103 : vector<256x32xf32> to vector<256x32xbf16>
    %cst_76 = arith.constant 0.000000e+00 : f32
    %105 = vector.broadcast %cst_76 : f32 to vector<64x64xf32>
    %c0_77 = arith.constant 0 : index
    %c0_78 = arith.constant 0 : index
    %c0_79 = arith.constant 0 : index
    %106 = vector.load %arg5[%c0_77, %c0_78, %c0_79] : memref<9x64x256xbf16, #tpu.memory_space<vmem>>, vector<1x64x256xbf16>
    %107 = vector.shape_cast %106 : vector<1x64x256xbf16> to vector<64x256xbf16>
    %cst_80 = arith.constant dense<0.000000e+00> : vector<64x32xf32>
    %108 = tpu.matmul %107, %104, %cst_80 {dimension_numbers = #tpu.dot_dimension_numbers<[1], [0], [0], [1], [0, 0, 1, 1], [], []>} : vector<64x256xbf16>, vector<256x32xbf16>, vector<64x32xf32> -> vector<64x32xf32>
    %109 = arith.truncf %108 : vector<64x32xf32> to vector<64x32xbf16>
    %c0_81 = arith.constant 0 : index
    %c0_82 = arith.constant 0 : index
    %c0_83 = arith.constant 0 : index
    %110 = vector.load %arg6[%c0_81, %c0_82, %c0_83] : memref<9x32x64xbf16, #tpu.memory_space<vmem>>, vector<1x32x64xbf16>
    %111 = vector.shape_cast %110 : vector<1x32x64xbf16> to vector<32x64xbf16>
    %cst_84 = arith.constant dense<0.000000e+00> : vector<64x64xf32>
    %112 = tpu.matmul %109, %111, %cst_84 {dimension_numbers = #tpu.dot_dimension_numbers<[1], [0], [0], [1], [0, 0, 1, 1], [], []>} : vector<64x32xbf16>, vector<32x64xbf16>, vector<64x64xf32> -> vector<64x64xf32>
    %113 = arith.addf %105, %112 : vector<64x64xf32>
    %c1_85 = arith.constant 1 : index
    %c0_86 = arith.constant 0 : index
    %c0_87 = arith.constant 0 : index
    %114 = vector.load %arg5[%c1_85, %c0_86, %c0_87] : memref<9x64x256xbf16, #tpu.memory_space<vmem>>, vector<1x64x256xbf16>
    %115 = vector.shape_cast %114 : vector<1x64x256xbf16> to vector<64x256xbf16>
    %cst_88 = arith.constant dense<0.000000e+00> : vector<64x32xf32>
    %116 = tpu.matmul %115, %104, %cst_88 {dimension_numbers = #tpu.dot_dimension_numbers<[1], [0], [0], [1], [0, 0, 1, 1], [], []>} : vector<64x256xbf16>, vector<256x32xbf16>, vector<64x32xf32> -> vector<64x32xf32>
    %117 = arith.truncf %116 : vector<64x32xf32> to vector<64x32xbf16>
    %c1_89 = arith.constant 1 : index
    %c0_90 = arith.constant 0 : index
    %c0_91 = arith.constant 0 : index
    %118 = vector.load %arg6[%c1_89, %c0_90, %c0_91] : memref<9x32x64xbf16, #tpu.memory_space<vmem>>, vector<1x32x64xbf16>
    %119 = vector.shape_cast %118 : vector<1x32x64xbf16> to vector<32x64xbf16>
    %cst_92 = arith.constant dense<0.000000e+00> : vector<64x64xf32>
    %120 = tpu.matmul %117, %119, %cst_92 {dimension_numbers = #tpu.dot_dimension_numbers<[1], [0], [0], [1], [0, 0, 1, 1], [], []>} : vector<64x32xbf16>, vector<32x64xbf16>, vector<64x64xf32> -> vector<64x64xf32>
    %121 = arith.addf %113, %120 : vector<64x64xf32>
    %c2_93 = arith.constant 2 : index
    %c0_94 = arith.constant 0 : index
    %c0_95 = arith.constant 0 : index
    %122 = vector.load %arg5[%c2_93, %c0_94, %c0_95] : memref<9x64x256xbf16, #tpu.memory_space<vmem>>, vector<1x64x256xbf16>
    %123 = vector.shape_cast %122 : vector<1x64x256xbf16> to vector<64x256xbf16>
    %cst_96 = arith.constant dense<0.000000e+00> : vector<64x32xf32>
    %124 = tpu.matmul %123, %104, %cst_96 {dimension_numbers = #tpu.dot_dimension_numbers<[1], [0], [0], [1], [0, 0, 1, 1], [], []>} : vector<64x256xbf16>, vector<256x32xbf16>, vector<64x32xf32> -> vector<64x32xf32>
    %125 = arith.truncf %124 : vector<64x32xf32> to vector<64x32xbf16>
    %c2_97 = arith.constant 2 : index
    %c0_98 = arith.constant 0 : index
    %c0_99 = arith.constant 0 : index
    %126 = vector.load %arg6[%c2_97, %c0_98, %c0_99] : memref<9x32x64xbf16, #tpu.memory_space<vmem>>, vector<1x32x64xbf16>
    %127 = vector.shape_cast %126 : vector<1x32x64xbf16> to vector<32x64xbf16>
    %cst_100 = arith.constant dense<0.000000e+00> : vector<64x64xf32>
    %128 = tpu.matmul %125, %127, %cst_100 {dimension_numbers = #tpu.dot_dimension_numbers<[1], [0], [0], [1], [0, 0, 1, 1], [], []>} : vector<64x32xbf16>, vector<32x64xbf16>, vector<64x64xf32> -> vector<64x64xf32>
    %129 = arith.addf %121, %128 : vector<64x64xf32>
    %c3_101 = arith.constant 3 : index
    %c0_102 = arith.constant 0 : index
    %c0_103 = arith.constant 0 : index
    %130 = vector.load %arg5[%c3_101, %c0_102, %c0_103] : memref<9x64x256xbf16, #tpu.memory_space<vmem>>, vector<1x64x256xbf16>
    %131 = vector.shape_cast %130 : vector<1x64x256xbf16> to vector<64x256xbf16>
    %cst_104 = arith.constant dense<0.000000e+00> : vector<64x32xf32>
    %132 = tpu.matmul %131, %104, %cst_104 {dimension_numbers = #tpu.dot_dimension_numbers<[1], [0], [0], [1], [0, 0, 1, 1], [], []>} : vector<64x256xbf16>, vector<256x32xbf16>, vector<64x32xf32> -> vector<64x32xf32>
    %133 = arith.truncf %132 : vector<64x32xf32> to vector<64x32xbf16>
    %c3_105 = arith.constant 3 : index
    %c0_106 = arith.constant 0 : index
    %c0_107 = arith.constant 0 : index
    %134 = vector.load %arg6[%c3_105, %c0_106, %c0_107] : memref<9x32x64xbf16, #tpu.memory_space<vmem>>, vector<1x32x64xbf16>
    %135 = vector.shape_cast %134 : vector<1x32x64xbf16> to vector<32x64xbf16>
    %cst_108 = arith.constant dense<0.000000e+00> : vector<64x64xf32>
    %136 = tpu.matmul %133, %135, %cst_108 {dimension_numbers = #tpu.dot_dimension_numbers<[1], [0], [0], [1], [0, 0, 1, 1], [], []>} : vector<64x32xbf16>, vector<32x64xbf16>, vector<64x64xf32> -> vector<64x64xf32>
    %137 = arith.addf %129, %136 : vector<64x64xf32>
    %c4_109 = arith.constant 4 : index
    %c0_110 = arith.constant 0 : index
    %c0_111 = arith.constant 0 : index
    %138 = vector.load %arg5[%c4_109, %c0_110, %c0_111] : memref<9x64x256xbf16, #tpu.memory_space<vmem>>, vector<1x64x256xbf16>
    %139 = vector.shape_cast %138 : vector<1x64x256xbf16> to vector<64x256xbf16>
    %cst_112 = arith.constant dense<0.000000e+00> : vector<64x32xf32>
    %140 = tpu.matmul %139, %104, %cst_112 {dimension_numbers = #tpu.dot_dimension_numbers<[1], [0], [0], [1], [0, 0, 1, 1], [], []>} : vector<64x256xbf16>, vector<256x32xbf16>, vector<64x32xf32> -> vector<64x32xf32>
    %141 = arith.truncf %140 : vector<64x32xf32> to vector<64x32xbf16>
    %c4_113 = arith.constant 4 : index
    %c0_114 = arith.constant 0 : index
    %c0_115 = arith.constant 0 : index
    %142 = vector.load %arg6[%c4_113, %c0_114, %c0_115] : memref<9x32x64xbf16, #tpu.memory_space<vmem>>, vector<1x32x64xbf16>
    %143 = vector.shape_cast %142 : vector<1x32x64xbf16> to vector<32x64xbf16>
    %cst_116 = arith.constant dense<0.000000e+00> : vector<64x64xf32>
    %144 = tpu.matmul %141, %143, %cst_116 {dimension_numbers = #tpu.dot_dimension_numbers<[1], [0], [0], [1], [0, 0, 1, 1], [], []>} : vector<64x32xbf16>, vector<32x64xbf16>, vector<64x64xf32> -> vector<64x64xf32>
    %145 = arith.addf %137, %144 : vector<64x64xf32>
    %c5_117 = arith.constant 5 : index
    %c0_118 = arith.constant 0 : index
    %c0_119 = arith.constant 0 : index
    %146 = vector.load %arg5[%c5_117, %c0_118, %c0_119] : memref<9x64x256xbf16, #tpu.memory_space<vmem>>, vector<1x64x256xbf16>
    %147 = vector.shape_cast %146 : vector<1x64x256xbf16> to vector<64x256xbf16>
    %cst_120 = arith.constant dense<0.000000e+00> : vector<64x32xf32>
    %148 = tpu.matmul %147, %104, %cst_120 {dimension_numbers = #tpu.dot_dimension_numbers<[1], [0], [0], [1], [0, 0, 1, 1], [], []>} : vector<64x256xbf16>, vector<256x32xbf16>, vector<64x32xf32> -> vector<64x32xf32>
    %149 = arith.truncf %148 : vector<64x32xf32> to vector<64x32xbf16>
    %c5_121 = arith.constant 5 : index
    %c0_122 = arith.constant 0 : index
    %c0_123 = arith.constant 0 : index
    %150 = vector.load %arg6[%c5_121, %c0_122, %c0_123] : memref<9x32x64xbf16, #tpu.memory_space<vmem>>, vector<1x32x64xbf16>
    %151 = vector.shape_cast %150 : vector<1x32x64xbf16> to vector<32x64xbf16>
    %cst_124 = arith.constant dense<0.000000e+00> : vector<64x64xf32>
    %152 = tpu.matmul %149, %151, %cst_124 {dimension_numbers = #tpu.dot_dimension_numbers<[1], [0], [0], [1], [0, 0, 1, 1], [], []>} : vector<64x32xbf16>, vector<32x64xbf16>, vector<64x64xf32> -> vector<64x64xf32>
    %153 = arith.addf %145, %152 : vector<64x64xf32>
    %c6_125 = arith.constant 6 : index
    %c0_126 = arith.constant 0 : index
    %c0_127 = arith.constant 0 : index
    %154 = vector.load %arg5[%c6_125, %c0_126, %c0_127] : memref<9x64x256xbf16, #tpu.memory_space<vmem>>, vector<1x64x256xbf16>
    %155 = vector.shape_cast %154 : vector<1x64x256xbf16> to vector<64x256xbf16>
    %cst_128 = arith.constant dense<0.000000e+00> : vector<64x32xf32>
    %156 = tpu.matmul %155, %104, %cst_128 {dimension_numbers = #tpu.dot_dimension_numbers<[1], [0], [0], [1], [0, 0, 1, 1], [], []>} : vector<64x256xbf16>, vector<256x32xbf16>, vector<64x32xf32> -> vector<64x32xf32>
    %157 = arith.truncf %156 : vector<64x32xf32> to vector<64x32xbf16>
    %c6_129 = arith.constant 6 : index
    %c0_130 = arith.constant 0 : index
    %c0_131 = arith.constant 0 : index
    %158 = vector.load %arg6[%c6_129, %c0_130, %c0_131] : memref<9x32x64xbf16, #tpu.memory_space<vmem>>, vector<1x32x64xbf16>
    %159 = vector.shape_cast %158 : vector<1x32x64xbf16> to vector<32x64xbf16>
    %cst_132 = arith.constant dense<0.000000e+00> : vector<64x64xf32>
    %160 = tpu.matmul %157, %159, %cst_132 {dimension_numbers = #tpu.dot_dimension_numbers<[1], [0], [0], [1], [0, 0, 1, 1], [], []>} : vector<64x32xbf16>, vector<32x64xbf16>, vector<64x64xf32> -> vector<64x64xf32>
    %161 = arith.addf %153, %160 : vector<64x64xf32>
    %c7_133 = arith.constant 7 : index
    %c0_134 = arith.constant 0 : index
    %c0_135 = arith.constant 0 : index
    %162 = vector.load %arg5[%c7_133, %c0_134, %c0_135] : memref<9x64x256xbf16, #tpu.memory_space<vmem>>, vector<1x64x256xbf16>
    %163 = vector.shape_cast %162 : vector<1x64x256xbf16> to vector<64x256xbf16>
    %cst_136 = arith.constant dense<0.000000e+00> : vector<64x32xf32>
    %164 = tpu.matmul %163, %104, %cst_136 {dimension_numbers = #tpu.dot_dimension_numbers<[1], [0], [0], [1], [0, 0, 1, 1], [], []>} : vector<64x256xbf16>, vector<256x32xbf16>, vector<64x32xf32> -> vector<64x32xf32>
    %165 = arith.truncf %164 : vector<64x32xf32> to vector<64x32xbf16>
    %c7_137 = arith.constant 7 : index
    %c0_138 = arith.constant 0 : index
    %c0_139 = arith.constant 0 : index
    %166 = vector.load %arg6[%c7_137, %c0_138, %c0_139] : memref<9x32x64xbf16, #tpu.memory_space<vmem>>, vector<1x32x64xbf16>
    %167 = vector.shape_cast %166 : vector<1x32x64xbf16> to vector<32x64xbf16>
    %cst_140 = arith.constant dense<0.000000e+00> : vector<64x64xf32>
    %168 = tpu.matmul %165, %167, %cst_140 {dimension_numbers = #tpu.dot_dimension_numbers<[1], [0], [0], [1], [0, 0, 1, 1], [], []>} : vector<64x32xbf16>, vector<32x64xbf16>, vector<64x64xf32> -> vector<64x64xf32>
    %169 = arith.addf %161, %168 : vector<64x64xf32>
    %c8_141 = arith.constant 8 : index
    %c0_142 = arith.constant 0 : index
    %c0_143 = arith.constant 0 : index
    %170 = vector.load %arg5[%c8_141, %c0_142, %c0_143] : memref<9x64x256xbf16, #tpu.memory_space<vmem>>, vector<1x64x256xbf16>
    %171 = vector.shape_cast %170 : vector<1x64x256xbf16> to vector<64x256xbf16>
    %cst_144 = arith.constant dense<0.000000e+00> : vector<64x32xf32>
    %172 = tpu.matmul %171, %104, %cst_144 {dimension_numbers = #tpu.dot_dimension_numbers<[1], [0], [0], [1], [0, 0, 1, 1], [], []>} : vector<64x256xbf16>, vector<256x32xbf16>, vector<64x32xf32> -> vector<64x32xf32>
    %173 = arith.truncf %172 : vector<64x32xf32> to vector<64x32xbf16>
    %c8_145 = arith.constant 8 : index
    %c0_146 = arith.constant 0 : index
    %c0_147 = arith.constant 0 : index
    %174 = vector.load %arg6[%c8_145, %c0_146, %c0_147] : memref<9x32x64xbf16, #tpu.memory_space<vmem>>, vector<1x32x64xbf16>
    %175 = vector.shape_cast %174 : vector<1x32x64xbf16> to vector<32x64xbf16>
    %cst_148 = arith.constant dense<0.000000e+00> : vector<64x64xf32>
    %176 = tpu.matmul %173, %175, %cst_148 {dimension_numbers = #tpu.dot_dimension_numbers<[1], [0], [0], [1], [0, 0, 1, 1], [], []>} : vector<64x32xbf16>, vector<32x64xbf16>, vector<64x64xf32> -> vector<64x64xf32>
    %177 = arith.addf %169, %176 : vector<64x64xf32>
    %c0_149 = arith.constant 0 : index
    %c0_150 = arith.constant 0 : index
    %178 = vector.load %arg7[%c0_149, %c0_150] : memref<1x64xf32, #tpu.memory_space<vmem>>, vector<1x64xf32>
    %179 = vector.broadcast %178 : vector<1x64xf32> to vector<64x64xf32>
    %180 = arith.addf %177, %179 : vector<64x64xf32>
    %cst_151 = arith.constant dense<0.000000e+00> : vector<64xf32>
    %181 = vector.multi_reduction <add>, %180, %cst_151 [0] : vector<64x64xf32> to vector<64xf32>
    %182 = vector.shape_cast %181 : vector<64xf32> to vector<1x64xf32>
    %cst_152 = arith.constant 1.562500e-02 : f32
    %183 = vector.broadcast %cst_152 : f32 to vector<1x64xf32>
    %184 = arith.mulf %182, %183 : vector<1x64xf32>
    %185 = arith.mulf %180, %180 : vector<64x64xf32>
    %cst_153 = arith.constant dense<0.000000e+00> : vector<64xf32>
    %186 = vector.multi_reduction <add>, %185, %cst_153 [0] : vector<64x64xf32> to vector<64xf32>
    %187 = vector.shape_cast %186 : vector<64xf32> to vector<1x64xf32>
    %cst_154 = arith.constant 1.562500e-02 : f32
    %188 = vector.broadcast %cst_154 : f32 to vector<1x64xf32>
    %189 = arith.mulf %187, %188 : vector<1x64xf32>
    %190 = arith.mulf %184, %184 : vector<1x64xf32>
    %191 = arith.subf %189, %190 : vector<1x64xf32>
    %cst_155 = arith.constant 0.000000e+00 : f32
    %192 = vector.broadcast %cst_155 : f32 to vector<1x64xf32>
    %193 = arith.maximumf %191, %192 : vector<1x64xf32>
    %194 = vector.broadcast %184 : vector<1x64xf32> to vector<64x64xf32>
    %195 = arith.subf %180, %194 : vector<64x64xf32>
    %cst_156 = arith.constant 9.99999974E-6 : f32
    %196 = vector.broadcast %cst_156 : f32 to vector<1x64xf32>
    %197 = arith.addf %193, %196 : vector<1x64xf32>
    %198 = math.rsqrt %197 : vector<1x64xf32>
    %199 = vector.broadcast %198 : vector<1x64xf32> to vector<64x64xf32>
    %200 = arith.mulf %195, %199 : vector<64x64xf32>
    %cst_157 = arith.constant 0.000000e+00 : f32
    %201 = vector.broadcast %cst_157 : f32 to vector<64x64xf32>
    %202 = arith.cmpf oge, %200, %201 : vector<64x64xf32>
    %cst_158 = arith.constant 2.000000e-01 : f32
    %203 = vector.broadcast %cst_158 : f32 to vector<64x64xf32>
    %204 = arith.mulf %203, %200 : vector<64x64xf32>
    %205 = arith.select %202, %200, %204 : vector<64x64xi1>, vector<64x64xf32>
    %206 = arith.truncf %205 : vector<64x64xf32> to vector<64x64xbf16>
    %cst_159 = arith.constant 0.000000e+00 : f32
    %207 = vector.broadcast %cst_159 : f32 to vector<16x128xf32>
    %c0_160 = arith.constant 0 : index
    %c0_161 = arith.constant 0 : index
    %c0_162 = arith.constant 0 : index
    %208 = vector.load %arg8[%c0_160, %c0_161, %c0_162] : memref<9x16x64xbf16, #tpu.memory_space<vmem>>, vector<1x16x64xbf16>
    %209 = vector.shape_cast %208 : vector<1x16x64xbf16> to vector<16x64xbf16>
    %cst_163 = arith.constant dense<0.000000e+00> : vector<16x64xf32>
    %210 = tpu.matmul %209, %206, %cst_163 {dimension_numbers = #tpu.dot_dimension_numbers<[1], [0], [0], [1], [0, 0, 1, 1], [], []>} : vector<16x64xbf16>, vector<64x64xbf16>, vector<16x64xf32> -> vector<16x64xf32>
    %211 = arith.truncf %210 : vector<16x64xf32> to vector<16x64xbf16>
    %c0_164 = arith.constant 0 : index
    %c0_165 = arith.constant 0 : index
    %c0_166 = arith.constant 0 : index
    %212 = vector.load %arg9[%c0_164, %c0_165, %c0_166] : memref<9x64x128xbf16, #tpu.memory_space<vmem>>, vector<1x64x128xbf16>
    %213 = vector.shape_cast %212 : vector<1x64x128xbf16> to vector<64x128xbf16>
    %cst_167 = arith.constant dense<0.000000e+00> : vector<16x128xf32>
    %214 = tpu.matmul %211, %213, %cst_167 {dimension_numbers = #tpu.dot_dimension_numbers<[1], [0], [0], [1], [0, 0, 1, 1], [], []>} : vector<16x64xbf16>, vector<64x128xbf16>, vector<16x128xf32> -> vector<16x128xf32>
    %215 = arith.addf %207, %214 : vector<16x128xf32>
    %c1_168 = arith.constant 1 : index
    %c0_169 = arith.constant 0 : index
    %c0_170 = arith.constant 0 : index
    %216 = vector.load %arg8[%c1_168, %c0_169, %c0_170] : memref<9x16x64xbf16, #tpu.memory_space<vmem>>, vector<1x16x64xbf16>
    %217 = vector.shape_cast %216 : vector<1x16x64xbf16> to vector<16x64xbf16>
    %cst_171 = arith.constant dense<0.000000e+00> : vector<16x64xf32>
    %218 = tpu.matmul %217, %206, %cst_171 {dimension_numbers = #tpu.dot_dimension_numbers<[1], [0], [0], [1], [0, 0, 1, 1], [], []>} : vector<16x64xbf16>, vector<64x64xbf16>, vector<16x64xf32> -> vector<16x64xf32>
    %219 = arith.truncf %218 : vector<16x64xf32> to vector<16x64xbf16>
    %c1_172 = arith.constant 1 : index
    %c0_173 = arith.constant 0 : index
    %c0_174 = arith.constant 0 : index
    %220 = vector.load %arg9[%c1_172, %c0_173, %c0_174] : memref<9x64x128xbf16, #tpu.memory_space<vmem>>, vector<1x64x128xbf16>
    %221 = vector.shape_cast %220 : vector<1x64x128xbf16> to vector<64x128xbf16>
    %cst_175 = arith.constant dense<0.000000e+00> : vector<16x128xf32>
    %222 = tpu.matmul %219, %221, %cst_175 {dimension_numbers = #tpu.dot_dimension_numbers<[1], [0], [0], [1], [0, 0, 1, 1], [], []>} : vector<16x64xbf16>, vector<64x128xbf16>, vector<16x128xf32> -> vector<16x128xf32>
    %223 = arith.addf %215, %222 : vector<16x128xf32>
    %c2_176 = arith.constant 2 : index
    %c0_177 = arith.constant 0 : index
    %c0_178 = arith.constant 0 : index
    %224 = vector.load %arg8[%c2_176, %c0_177, %c0_178] : memref<9x16x64xbf16, #tpu.memory_space<vmem>>, vector<1x16x64xbf16>
    %225 = vector.shape_cast %224 : vector<1x16x64xbf16> to vector<16x64xbf16>
    %cst_179 = arith.constant dense<0.000000e+00> : vector<16x64xf32>
    %226 = tpu.matmul %225, %206, %cst_179 {dimension_numbers = #tpu.dot_dimension_numbers<[1], [0], [0], [1], [0, 0, 1, 1], [], []>} : vector<16x64xbf16>, vector<64x64xbf16>, vector<16x64xf32> -> vector<16x64xf32>
    %227 = arith.truncf %226 : vector<16x64xf32> to vector<16x64xbf16>
    %c2_180 = arith.constant 2 : index
    %c0_181 = arith.constant 0 : index
    %c0_182 = arith.constant 0 : index
    %228 = vector.load %arg9[%c2_180, %c0_181, %c0_182] : memref<9x64x128xbf16, #tpu.memory_space<vmem>>, vector<1x64x128xbf16>
    %229 = vector.shape_cast %228 : vector<1x64x128xbf16> to vector<64x128xbf16>
    %cst_183 = arith.constant dense<0.000000e+00> : vector<16x128xf32>
    %230 = tpu.matmul %227, %229, %cst_183 {dimension_numbers = #tpu.dot_dimension_numbers<[1], [0], [0], [1], [0, 0, 1, 1], [], []>} : vector<16x64xbf16>, vector<64x128xbf16>, vector<16x128xf32> -> vector<16x128xf32>
    %231 = arith.addf %223, %230 : vector<16x128xf32>
    %c3_184 = arith.constant 3 : index
    %c0_185 = arith.constant 0 : index
    %c0_186 = arith.constant 0 : index
    %232 = vector.load %arg8[%c3_184, %c0_185, %c0_186] : memref<9x16x64xbf16, #tpu.memory_space<vmem>>, vector<1x16x64xbf16>
    %233 = vector.shape_cast %232 : vector<1x16x64xbf16> to vector<16x64xbf16>
    %cst_187 = arith.constant dense<0.000000e+00> : vector<16x64xf32>
    %234 = tpu.matmul %233, %206, %cst_187 {dimension_numbers = #tpu.dot_dimension_numbers<[1], [0], [0], [1], [0, 0, 1, 1], [], []>} : vector<16x64xbf16>, vector<64x64xbf16>, vector<16x64xf32> -> vector<16x64xf32>
    %235 = arith.truncf %234 : vector<16x64xf32> to vector<16x64xbf16>
    %c3_188 = arith.constant 3 : index
    %c0_189 = arith.constant 0 : index
    %c0_190 = arith.constant 0 : index
    %236 = vector.load %arg9[%c3_188, %c0_189, %c0_190] : memref<9x64x128xbf16, #tpu.memory_space<vmem>>, vector<1x64x128xbf16>
    %237 = vector.shape_cast %236 : vector<1x64x128xbf16> to vector<64x128xbf16>
    %cst_191 = arith.constant dense<0.000000e+00> : vector<16x128xf32>
    %238 = tpu.matmul %235, %237, %cst_191 {dimension_numbers = #tpu.dot_dimension_numbers<[1], [0], [0], [1], [0, 0, 1, 1], [], []>} : vector<16x64xbf16>, vector<64x128xbf16>, vector<16x128xf32> -> vector<16x128xf32>
    %239 = arith.addf %231, %238 : vector<16x128xf32>
    %c4_192 = arith.constant 4 : index
    %c0_193 = arith.constant 0 : index
    %c0_194 = arith.constant 0 : index
    %240 = vector.load %arg8[%c4_192, %c0_193, %c0_194] : memref<9x16x64xbf16, #tpu.memory_space<vmem>>, vector<1x16x64xbf16>
    %241 = vector.shape_cast %240 : vector<1x16x64xbf16> to vector<16x64xbf16>
    %cst_195 = arith.constant dense<0.000000e+00> : vector<16x64xf32>
    %242 = tpu.matmul %241, %206, %cst_195 {dimension_numbers = #tpu.dot_dimension_numbers<[1], [0], [0], [1], [0, 0, 1, 1], [], []>} : vector<16x64xbf16>, vector<64x64xbf16>, vector<16x64xf32> -> vector<16x64xf32>
    %243 = arith.truncf %242 : vector<16x64xf32> to vector<16x64xbf16>
    %c4_196 = arith.constant 4 : index
    %c0_197 = arith.constant 0 : index
    %c0_198 = arith.constant 0 : index
    %244 = vector.load %arg9[%c4_196, %c0_197, %c0_198] : memref<9x64x128xbf16, #tpu.memory_space<vmem>>, vector<1x64x128xbf16>
    %245 = vector.shape_cast %244 : vector<1x64x128xbf16> to vector<64x128xbf16>
    %cst_199 = arith.constant dense<0.000000e+00> : vector<16x128xf32>
    %246 = tpu.matmul %243, %245, %cst_199 {dimension_numbers = #tpu.dot_dimension_numbers<[1], [0], [0], [1], [0, 0, 1, 1], [], []>} : vector<16x64xbf16>, vector<64x128xbf16>, vector<16x128xf32> -> vector<16x128xf32>
    %247 = arith.addf %239, %246 : vector<16x128xf32>
    %c5_200 = arith.constant 5 : index
    %c0_201 = arith.constant 0 : index
    %c0_202 = arith.constant 0 : index
    %248 = vector.load %arg8[%c5_200, %c0_201, %c0_202] : memref<9x16x64xbf16, #tpu.memory_space<vmem>>, vector<1x16x64xbf16>
    %249 = vector.shape_cast %248 : vector<1x16x64xbf16> to vector<16x64xbf16>
    %cst_203 = arith.constant dense<0.000000e+00> : vector<16x64xf32>
    %250 = tpu.matmul %249, %206, %cst_203 {dimension_numbers = #tpu.dot_dimension_numbers<[1], [0], [0], [1], [0, 0, 1, 1], [], []>} : vector<16x64xbf16>, vector<64x64xbf16>, vector<16x64xf32> -> vector<16x64xf32>
    %251 = arith.truncf %250 : vector<16x64xf32> to vector<16x64xbf16>
    %c5_204 = arith.constant 5 : index
    %c0_205 = arith.constant 0 : index
    %c0_206 = arith.constant 0 : index
    %252 = vector.load %arg9[%c5_204, %c0_205, %c0_206] : memref<9x64x128xbf16, #tpu.memory_space<vmem>>, vector<1x64x128xbf16>
    %253 = vector.shape_cast %252 : vector<1x64x128xbf16> to vector<64x128xbf16>
    %cst_207 = arith.constant dense<0.000000e+00> : vector<16x128xf32>
    %254 = tpu.matmul %251, %253, %cst_207 {dimension_numbers = #tpu.dot_dimension_numbers<[1], [0], [0], [1], [0, 0, 1, 1], [], []>} : vector<16x64xbf16>, vector<64x128xbf16>, vector<16x128xf32> -> vector<16x128xf32>
    %255 = arith.addf %247, %254 : vector<16x128xf32>
    %c6_208 = arith.constant 6 : index
    %c0_209 = arith.constant 0 : index
    %c0_210 = arith.constant 0 : index
    %256 = vector.load %arg8[%c6_208, %c0_209, %c0_210] : memref<9x16x64xbf16, #tpu.memory_space<vmem>>, vector<1x16x64xbf16>
    %257 = vector.shape_cast %256 : vector<1x16x64xbf16> to vector<16x64xbf16>
    %cst_211 = arith.constant dense<0.000000e+00> : vector<16x64xf32>
    %258 = tpu.matmul %257, %206, %cst_211 {dimension_numbers = #tpu.dot_dimension_numbers<[1], [0], [0], [1], [0, 0, 1, 1], [], []>} : vector<16x64xbf16>, vector<64x64xbf16>, vector<16x64xf32> -> vector<16x64xf32>
    %259 = arith.truncf %258 : vector<16x64xf32> to vector<16x64xbf16>
    %c6_212 = arith.constant 6 : index
    %c0_213 = arith.constant 0 : index
    %c0_214 = arith.constant 0 : index
    %260 = vector.load %arg9[%c6_212, %c0_213, %c0_214] : memref<9x64x128xbf16, #tpu.memory_space<vmem>>, vector<1x64x128xbf16>
    %261 = vector.shape_cast %260 : vector<1x64x128xbf16> to vector<64x128xbf16>
    %cst_215 = arith.constant dense<0.000000e+00> : vector<16x128xf32>
    %262 = tpu.matmul %259, %261, %cst_215 {dimension_numbers = #tpu.dot_dimension_numbers<[1], [0], [0], [1], [0, 0, 1, 1], [], []>} : vector<16x64xbf16>, vector<64x128xbf16>, vector<16x128xf32> -> vector<16x128xf32>
    %263 = arith.addf %255, %262 : vector<16x128xf32>
    %c7_216 = arith.constant 7 : index
    %c0_217 = arith.constant 0 : index
    %c0_218 = arith.constant 0 : index
    %264 = vector.load %arg8[%c7_216, %c0_217, %c0_218] : memref<9x16x64xbf16, #tpu.memory_space<vmem>>, vector<1x16x64xbf16>
    %265 = vector.shape_cast %264 : vector<1x16x64xbf16> to vector<16x64xbf16>
    %cst_219 = arith.constant dense<0.000000e+00> : vector<16x64xf32>
    %266 = tpu.matmul %265, %206, %cst_219 {dimension_numbers = #tpu.dot_dimension_numbers<[1], [0], [0], [1], [0, 0, 1, 1], [], []>} : vector<16x64xbf16>, vector<64x64xbf16>, vector<16x64xf32> -> vector<16x64xf32>
    %267 = arith.truncf %266 : vector<16x64xf32> to vector<16x64xbf16>
    %c7_220 = arith.constant 7 : index
    %c0_221 = arith.constant 0 : index
    %c0_222 = arith.constant 0 : index
    %268 = vector.load %arg9[%c7_220, %c0_221, %c0_222] : memref<9x64x128xbf16, #tpu.memory_space<vmem>>, vector<1x64x128xbf16>
    %269 = vector.shape_cast %268 : vector<1x64x128xbf16> to vector<64x128xbf16>
    %cst_223 = arith.constant dense<0.000000e+00> : vector<16x128xf32>
    %270 = tpu.matmul %267, %269, %cst_223 {dimension_numbers = #tpu.dot_dimension_numbers<[1], [0], [0], [1], [0, 0, 1, 1], [], []>} : vector<16x64xbf16>, vector<64x128xbf16>, vector<16x128xf32> -> vector<16x128xf32>
    %271 = arith.addf %263, %270 : vector<16x128xf32>
    %c8_224 = arith.constant 8 : index
    %c0_225 = arith.constant 0 : index
    %c0_226 = arith.constant 0 : index
    %272 = vector.load %arg8[%c8_224, %c0_225, %c0_226] : memref<9x16x64xbf16, #tpu.memory_space<vmem>>, vector<1x16x64xbf16>
    %273 = vector.shape_cast %272 : vector<1x16x64xbf16> to vector<16x64xbf16>
    %cst_227 = arith.constant dense<0.000000e+00> : vector<16x64xf32>
    %274 = tpu.matmul %273, %206, %cst_227 {dimension_numbers = #tpu.dot_dimension_numbers<[1], [0], [0], [1], [0, 0, 1, 1], [], []>} : vector<16x64xbf16>, vector<64x64xbf16>, vector<16x64xf32> -> vector<16x64xf32>
    %275 = arith.truncf %274 : vector<16x64xf32> to vector<16x64xbf16>
    %c8_228 = arith.constant 8 : index
    %c0_229 = arith.constant 0 : index
    %c0_230 = arith.constant 0 : index
    %276 = vector.load %arg9[%c8_228, %c0_229, %c0_230] : memref<9x64x128xbf16, #tpu.memory_space<vmem>>, vector<1x64x128xbf16>
    %277 = vector.shape_cast %276 : vector<1x64x128xbf16> to vector<64x128xbf16>
    %cst_231 = arith.constant dense<0.000000e+00> : vector<16x128xf32>
    %278 = tpu.matmul %275, %277, %cst_231 {dimension_numbers = #tpu.dot_dimension_numbers<[1], [0], [0], [1], [0, 0, 1, 1], [], []>} : vector<16x64xbf16>, vector<64x128xbf16>, vector<16x128xf32> -> vector<16x128xf32>
    %279 = arith.addf %271, %278 : vector<16x128xf32>
    %c0_232 = arith.constant 0 : index
    %c0_233 = arith.constant 0 : index
    %280 = vector.load %arg10[%c0_232, %c0_233] : memref<1x128xf32, #tpu.memory_space<vmem>>, vector<1x128xf32>
    %281 = vector.broadcast %280 : vector<1x128xf32> to vector<16x128xf32>
    %282 = arith.addf %279, %281 : vector<16x128xf32>
    %cst_234 = arith.constant dense<0.000000e+00> : vector<128xf32>
    %283 = vector.multi_reduction <add>, %282, %cst_234 [0] : vector<16x128xf32> to vector<128xf32>
    %284 = vector.shape_cast %283 : vector<128xf32> to vector<1x128xf32>
    %cst_235 = arith.constant 6.250000e-02 : f32
    %285 = vector.broadcast %cst_235 : f32 to vector<1x128xf32>
    %286 = arith.mulf %284, %285 : vector<1x128xf32>
    %287 = arith.mulf %282, %282 : vector<16x128xf32>
    %cst_236 = arith.constant dense<0.000000e+00> : vector<128xf32>
    %288 = vector.multi_reduction <add>, %287, %cst_236 [0] : vector<16x128xf32> to vector<128xf32>
    %289 = vector.shape_cast %288 : vector<128xf32> to vector<1x128xf32>
    %cst_237 = arith.constant 6.250000e-02 : f32
    %290 = vector.broadcast %cst_237 : f32 to vector<1x128xf32>
    %291 = arith.mulf %289, %290 : vector<1x128xf32>
    %292 = arith.mulf %286, %286 : vector<1x128xf32>
    %293 = arith.subf %291, %292 : vector<1x128xf32>
    %cst_238 = arith.constant 0.000000e+00 : f32
    %294 = vector.broadcast %cst_238 : f32 to vector<1x128xf32>
    %295 = arith.maximumf %293, %294 : vector<1x128xf32>
    %296 = vector.broadcast %286 : vector<1x128xf32> to vector<16x128xf32>
    %297 = arith.subf %282, %296 : vector<16x128xf32>
    %cst_239 = arith.constant 9.99999974E-6 : f32
    %298 = vector.broadcast %cst_239 : f32 to vector<1x128xf32>
    %299 = arith.addf %295, %298 : vector<1x128xf32>
    %300 = math.rsqrt %299 : vector<1x128xf32>
    %301 = vector.broadcast %300 : vector<1x128xf32> to vector<16x128xf32>
    %302 = arith.mulf %297, %301 : vector<16x128xf32>
    %cst_240 = arith.constant 0.000000e+00 : f32
    %303 = vector.broadcast %cst_240 : f32 to vector<16x128xf32>
    %304 = arith.cmpf oge, %302, %303 : vector<16x128xf32>
    %cst_241 = arith.constant 2.000000e-01 : f32
    %305 = vector.broadcast %cst_241 : f32 to vector<16x128xf32>
    %306 = arith.mulf %305, %302 : vector<16x128xf32>
    %307 = arith.select %304, %302, %306 : vector<16x128xi1>, vector<16x128xf32>
    %308 = arith.truncf %307 : vector<16x128xf32> to vector<16x128xbf16>
    %cst_242 = arith.constant 0.000000e+00 : f32
    %309 = vector.broadcast %cst_242 : f32 to vector<4x256xf32>
    %c0_243 = arith.constant 0 : index
    %c0_244 = arith.constant 0 : index
    %c0_245 = arith.constant 0 : index
    %310 = vector.load %arg11[%c0_243, %c0_244, %c0_245] : memref<9x4x16xbf16, #tpu.memory_space<vmem>>, vector<1x4x16xbf16>
    %311 = vector.shape_cast %310 : vector<1x4x16xbf16> to vector<4x16xbf16>
    %cst_246 = arith.constant dense<0.000000e+00> : vector<4x128xf32>
    %312 = tpu.matmul %311, %308, %cst_246 {dimension_numbers = #tpu.dot_dimension_numbers<[1], [0], [0], [1], [0, 0, 1, 1], [], []>} : vector<4x16xbf16>, vector<16x128xbf16>, vector<4x128xf32> -> vector<4x128xf32>
    %313 = arith.truncf %312 : vector<4x128xf32> to vector<4x128xbf16>
    %c0_247 = arith.constant 0 : index
    %c0_248 = arith.constant 0 : index
    %c0_249 = arith.constant 0 : index
    %314 = vector.load %arg12[%c0_247, %c0_248, %c0_249] : memref<9x128x256xbf16, #tpu.memory_space<vmem>>, vector<1x128x256xbf16>
    %315 = vector.shape_cast %314 : vector<1x128x256xbf16> to vector<128x256xbf16>
    %cst_250 = arith.constant dense<0.000000e+00> : vector<4x256xf32>
    %316 = tpu.matmul %313, %315, %cst_250 {dimension_numbers = #tpu.dot_dimension_numbers<[1], [0], [0], [1], [0, 0, 1, 1], [], []>} : vector<4x128xbf16>, vector<128x256xbf16>, vector<4x256xf32> -> vector<4x256xf32>
    %317 = arith.addf %309, %316 : vector<4x256xf32>
    %c1_251 = arith.constant 1 : index
    %c0_252 = arith.constant 0 : index
    %c0_253 = arith.constant 0 : index
    %318 = vector.load %arg11[%c1_251, %c0_252, %c0_253] : memref<9x4x16xbf16, #tpu.memory_space<vmem>>, vector<1x4x16xbf16>
    %319 = vector.shape_cast %318 : vector<1x4x16xbf16> to vector<4x16xbf16>
    %cst_254 = arith.constant dense<0.000000e+00> : vector<4x128xf32>
    %320 = tpu.matmul %319, %308, %cst_254 {dimension_numbers = #tpu.dot_dimension_numbers<[1], [0], [0], [1], [0, 0, 1, 1], [], []>} : vector<4x16xbf16>, vector<16x128xbf16>, vector<4x128xf32> -> vector<4x128xf32>
    %321 = arith.truncf %320 : vector<4x128xf32> to vector<4x128xbf16>
    %c1_255 = arith.constant 1 : index
    %c0_256 = arith.constant 0 : index
    %c0_257 = arith.constant 0 : index
    %322 = vector.load %arg12[%c1_255, %c0_256, %c0_257] : memref<9x128x256xbf16, #tpu.memory_space<vmem>>, vector<1x128x256xbf16>
    %323 = vector.shape_cast %322 : vector<1x128x256xbf16> to vector<128x256xbf16>
    %cst_258 = arith.constant dense<0.000000e+00> : vector<4x256xf32>
    %324 = tpu.matmul %321, %323, %cst_258 {dimension_numbers = #tpu.dot_dimension_numbers<[1], [0], [0], [1], [0, 0, 1, 1], [], []>} : vector<4x128xbf16>, vector<128x256xbf16>, vector<4x256xf32> -> vector<4x256xf32>
    %325 = arith.addf %317, %324 : vector<4x256xf32>
    %c2_259 = arith.constant 2 : index
    %c0_260 = arith.constant 0 : index
    %c0_261 = arith.constant 0 : index
    %326 = vector.load %arg11[%c2_259, %c0_260, %c0_261] : memref<9x4x16xbf16, #tpu.memory_space<vmem>>, vector<1x4x16xbf16>
    %327 = vector.shape_cast %326 : vector<1x4x16xbf16> to vector<4x16xbf16>
    %cst_262 = arith.constant dense<0.000000e+00> : vector<4x128xf32>
    %328 = tpu.matmul %327, %308, %cst_262 {dimension_numbers = #tpu.dot_dimension_numbers<[1], [0], [0], [1], [0, 0, 1, 1], [], []>} : vector<4x16xbf16>, vector<16x128xbf16>, vector<4x128xf32> -> vector<4x128xf32>
    %329 = arith.truncf %328 : vector<4x128xf32> to vector<4x128xbf16>
    %c2_263 = arith.constant 2 : index
    %c0_264 = arith.constant 0 : index
    %c0_265 = arith.constant 0 : index
    %330 = vector.load %arg12[%c2_263, %c0_264, %c0_265] : memref<9x128x256xbf16, #tpu.memory_space<vmem>>, vector<1x128x256xbf16>
    %331 = vector.shape_cast %330 : vector<1x128x256xbf16> to vector<128x256xbf16>
    %cst_266 = arith.constant dense<0.000000e+00> : vector<4x256xf32>
    %332 = tpu.matmul %329, %331, %cst_266 {dimension_numbers = #tpu.dot_dimension_numbers<[1], [0], [0], [1], [0, 0, 1, 1], [], []>} : vector<4x128xbf16>, vector<128x256xbf16>, vector<4x256xf32> -> vector<4x256xf32>
    %333 = arith.addf %325, %332 : vector<4x256xf32>
    %c3_267 = arith.constant 3 : index
    %c0_268 = arith.constant 0 : index
    %c0_269 = arith.constant 0 : index
    %334 = vector.load %arg11[%c3_267, %c0_268, %c0_269] : memref<9x4x16xbf16, #tpu.memory_space<vmem>>, vector<1x4x16xbf16>
    %335 = vector.shape_cast %334 : vector<1x4x16xbf16> to vector<4x16xbf16>
    %cst_270 = arith.constant dense<0.000000e+00> : vector<4x128xf32>
    %336 = tpu.matmul %335, %308, %cst_270 {dimension_numbers = #tpu.dot_dimension_numbers<[1], [0], [0], [1], [0, 0, 1, 1], [], []>} : vector<4x16xbf16>, vector<16x128xbf16>, vector<4x128xf32> -> vector<4x128xf32>
    %337 = arith.truncf %336 : vector<4x128xf32> to vector<4x128xbf16>
    %c3_271 = arith.constant 3 : index
    %c0_272 = arith.constant 0 : index
    %c0_273 = arith.constant 0 : index
    %338 = vector.load %arg12[%c3_271, %c0_272, %c0_273] : memref<9x128x256xbf16, #tpu.memory_space<vmem>>, vector<1x128x256xbf16>
    %339 = vector.shape_cast %338 : vector<1x128x256xbf16> to vector<128x256xbf16>
    %cst_274 = arith.constant dense<0.000000e+00> : vector<4x256xf32>
    %340 = tpu.matmul %337, %339, %cst_274 {dimension_numbers = #tpu.dot_dimension_numbers<[1], [0], [0], [1], [0, 0, 1, 1], [], []>} : vector<4x128xbf16>, vector<128x256xbf16>, vector<4x256xf32> -> vector<4x256xf32>
    %341 = arith.addf %333, %340 : vector<4x256xf32>
    %c4_275 = arith.constant 4 : index
    %c0_276 = arith.constant 0 : index
    %c0_277 = arith.constant 0 : index
    %342 = vector.load %arg11[%c4_275, %c0_276, %c0_277] : memref<9x4x16xbf16, #tpu.memory_space<vmem>>, vector<1x4x16xbf16>
    %343 = vector.shape_cast %342 : vector<1x4x16xbf16> to vector<4x16xbf16>
    %cst_278 = arith.constant dense<0.000000e+00> : vector<4x128xf32>
    %344 = tpu.matmul %343, %308, %cst_278 {dimension_numbers = #tpu.dot_dimension_numbers<[1], [0], [0], [1], [0, 0, 1, 1], [], []>} : vector<4x16xbf16>, vector<16x128xbf16>, vector<4x128xf32> -> vector<4x128xf32>
    %345 = arith.truncf %344 : vector<4x128xf32> to vector<4x128xbf16>
    %c4_279 = arith.constant 4 : index
    %c0_280 = arith.constant 0 : index
    %c0_281 = arith.constant 0 : index
    %346 = vector.load %arg12[%c4_279, %c0_280, %c0_281] : memref<9x128x256xbf16, #tpu.memory_space<vmem>>, vector<1x128x256xbf16>
    %347 = vector.shape_cast %346 : vector<1x128x256xbf16> to vector<128x256xbf16>
    %cst_282 = arith.constant dense<0.000000e+00> : vector<4x256xf32>
    %348 = tpu.matmul %345, %347, %cst_282 {dimension_numbers = #tpu.dot_dimension_numbers<[1], [0], [0], [1], [0, 0, 1, 1], [], []>} : vector<4x128xbf16>, vector<128x256xbf16>, vector<4x256xf32> -> vector<4x256xf32>
    %349 = arith.addf %341, %348 : vector<4x256xf32>
    %c5_283 = arith.constant 5 : index
    %c0_284 = arith.constant 0 : index
    %c0_285 = arith.constant 0 : index
    %350 = vector.load %arg11[%c5_283, %c0_284, %c0_285] : memref<9x4x16xbf16, #tpu.memory_space<vmem>>, vector<1x4x16xbf16>
    %351 = vector.shape_cast %350 : vector<1x4x16xbf16> to vector<4x16xbf16>
    %cst_286 = arith.constant dense<0.000000e+00> : vector<4x128xf32>
    %352 = tpu.matmul %351, %308, %cst_286 {dimension_numbers = #tpu.dot_dimension_numbers<[1], [0], [0], [1], [0, 0, 1, 1], [], []>} : vector<4x16xbf16>, vector<16x128xbf16>, vector<4x128xf32> -> vector<4x128xf32>
    %353 = arith.truncf %352 : vector<4x128xf32> to vector<4x128xbf16>
    %c5_287 = arith.constant 5 : index
    %c0_288 = arith.constant 0 : index
    %c0_289 = arith.constant 0 : index
    %354 = vector.load %arg12[%c5_287, %c0_288, %c0_289] : memref<9x128x256xbf16, #tpu.memory_space<vmem>>, vector<1x128x256xbf16>
    %355 = vector.shape_cast %354 : vector<1x128x256xbf16> to vector<128x256xbf16>
    %cst_290 = arith.constant dense<0.000000e+00> : vector<4x256xf32>
    %356 = tpu.matmul %353, %355, %cst_290 {dimension_numbers = #tpu.dot_dimension_numbers<[1], [0], [0], [1], [0, 0, 1, 1], [], []>} : vector<4x128xbf16>, vector<128x256xbf16>, vector<4x256xf32> -> vector<4x256xf32>
    %357 = arith.addf %349, %356 : vector<4x256xf32>
    %c6_291 = arith.constant 6 : index
    %c0_292 = arith.constant 0 : index
    %c0_293 = arith.constant 0 : index
    %358 = vector.load %arg11[%c6_291, %c0_292, %c0_293] : memref<9x4x16xbf16, #tpu.memory_space<vmem>>, vector<1x4x16xbf16>
    %359 = vector.shape_cast %358 : vector<1x4x16xbf16> to vector<4x16xbf16>
    %cst_294 = arith.constant dense<0.000000e+00> : vector<4x128xf32>
    %360 = tpu.matmul %359, %308, %cst_294 {dimension_numbers = #tpu.dot_dimension_numbers<[1], [0], [0], [1], [0, 0, 1, 1], [], []>} : vector<4x16xbf16>, vector<16x128xbf16>, vector<4x128xf32> -> vector<4x128xf32>
    %361 = arith.truncf %360 : vector<4x128xf32> to vector<4x128xbf16>
    %c6_295 = arith.constant 6 : index
    %c0_296 = arith.constant 0 : index
    %c0_297 = arith.constant 0 : index
    %362 = vector.load %arg12[%c6_295, %c0_296, %c0_297] : memref<9x128x256xbf16, #tpu.memory_space<vmem>>, vector<1x128x256xbf16>
    %363 = vector.shape_cast %362 : vector<1x128x256xbf16> to vector<128x256xbf16>
    %cst_298 = arith.constant dense<0.000000e+00> : vector<4x256xf32>
    %364 = tpu.matmul %361, %363, %cst_298 {dimension_numbers = #tpu.dot_dimension_numbers<[1], [0], [0], [1], [0, 0, 1, 1], [], []>} : vector<4x128xbf16>, vector<128x256xbf16>, vector<4x256xf32> -> vector<4x256xf32>
    %365 = arith.addf %357, %364 : vector<4x256xf32>
    %c7_299 = arith.constant 7 : index
    %c0_300 = arith.constant 0 : index
    %c0_301 = arith.constant 0 : index
    %366 = vector.load %arg11[%c7_299, %c0_300, %c0_301] : memref<9x4x16xbf16, #tpu.memory_space<vmem>>, vector<1x4x16xbf16>
    %367 = vector.shape_cast %366 : vector<1x4x16xbf16> to vector<4x16xbf16>
    %cst_302 = arith.constant dense<0.000000e+00> : vector<4x128xf32>
    %368 = tpu.matmul %367, %308, %cst_302 {dimension_numbers = #tpu.dot_dimension_numbers<[1], [0], [0], [1], [0, 0, 1, 1], [], []>} : vector<4x16xbf16>, vector<16x128xbf16>, vector<4x128xf32> -> vector<4x128xf32>
    %369 = arith.truncf %368 : vector<4x128xf32> to vector<4x128xbf16>
    %c7_303 = arith.constant 7 : index
    %c0_304 = arith.constant 0 : index
    %c0_305 = arith.constant 0 : index
    %370 = vector.load %arg12[%c7_303, %c0_304, %c0_305] : memref<9x128x256xbf16, #tpu.memory_space<vmem>>, vector<1x128x256xbf16>
    %371 = vector.shape_cast %370 : vector<1x128x256xbf16> to vector<128x256xbf16>
    %cst_306 = arith.constant dense<0.000000e+00> : vector<4x256xf32>
    %372 = tpu.matmul %369, %371, %cst_306 {dimension_numbers = #tpu.dot_dimension_numbers<[1], [0], [0], [1], [0, 0, 1, 1], [], []>} : vector<4x128xbf16>, vector<128x256xbf16>, vector<4x256xf32> -> vector<4x256xf32>
    %373 = arith.addf %365, %372 : vector<4x256xf32>
    %c8_307 = arith.constant 8 : index
    %c0_308 = arith.constant 0 : index
    %c0_309 = arith.constant 0 : index
    %374 = vector.load %arg11[%c8_307, %c0_308, %c0_309] : memref<9x4x16xbf16, #tpu.memory_space<vmem>>, vector<1x4x16xbf16>
    %375 = vector.shape_cast %374 : vector<1x4x16xbf16> to vector<4x16xbf16>
    %cst_310 = arith.constant dense<0.000000e+00> : vector<4x128xf32>
    %376 = tpu.matmul %375, %308, %cst_310 {dimension_numbers = #tpu.dot_dimension_numbers<[1], [0], [0], [1], [0, 0, 1, 1], [], []>} : vector<4x16xbf16>, vector<16x128xbf16>, vector<4x128xf32> -> vector<4x128xf32>
    %377 = arith.truncf %376 : vector<4x128xf32> to vector<4x128xbf16>
    %c8_311 = arith.constant 8 : index
    %c0_312 = arith.constant 0 : index
    %c0_313 = arith.constant 0 : index
    %378 = vector.load %arg12[%c8_311, %c0_312, %c0_313] : memref<9x128x256xbf16, #tpu.memory_space<vmem>>, vector<1x128x256xbf16>
    %379 = vector.shape_cast %378 : vector<1x128x256xbf16> to vector<128x256xbf16>
    %cst_314 = arith.constant dense<0.000000e+00> : vector<4x256xf32>
    %380 = tpu.matmul %377, %379, %cst_314 {dimension_numbers = #tpu.dot_dimension_numbers<[1], [0], [0], [1], [0, 0, 1, 1], [], []>} : vector<4x128xbf16>, vector<128x256xbf16>, vector<4x256xf32> -> vector<4x256xf32>
    %381 = arith.addf %373, %380 : vector<4x256xf32>
    %c0_315 = arith.constant 0 : index
    %c0_316 = arith.constant 0 : index
    %382 = vector.load %arg13[%c0_315, %c0_316] : memref<1x256xf32, #tpu.memory_space<vmem>>, vector<1x256xf32>
    %383 = vector.broadcast %382 : vector<1x256xf32> to vector<4x256xf32>
    %384 = arith.addf %381, %383 : vector<4x256xf32>
    %cst_317 = arith.constant dense<0.000000e+00> : vector<256xf32>
    %385 = vector.multi_reduction <add>, %384, %cst_317 [0] : vector<4x256xf32> to vector<256xf32>
    %386 = vector.shape_cast %385 : vector<256xf32> to vector<1x256xf32>
    %cst_318 = arith.constant 2.500000e-01 : f32
    %387 = vector.broadcast %cst_318 : f32 to vector<1x256xf32>
    %388 = arith.mulf %386, %387 : vector<1x256xf32>
    %389 = arith.mulf %384, %384 : vector<4x256xf32>
    %cst_319 = arith.constant dense<0.000000e+00> : vector<256xf32>
    %390 = vector.multi_reduction <add>, %389, %cst_319 [0] : vector<4x256xf32> to vector<256xf32>
    %391 = vector.shape_cast %390 : vector<256xf32> to vector<1x256xf32>
    %cst_320 = arith.constant 2.500000e-01 : f32
    %392 = vector.broadcast %cst_320 : f32 to vector<1x256xf32>
    %393 = arith.mulf %391, %392 : vector<1x256xf32>
    %394 = arith.mulf %388, %388 : vector<1x256xf32>
    %395 = arith.subf %393, %394 : vector<1x256xf32>
    %cst_321 = arith.constant 0.000000e+00 : f32
    %396 = vector.broadcast %cst_321 : f32 to vector<1x256xf32>
    %397 = arith.maximumf %395, %396 : vector<1x256xf32>
    %398 = vector.broadcast %388 : vector<1x256xf32> to vector<4x256xf32>
    %399 = arith.subf %384, %398 : vector<4x256xf32>
    %cst_322 = arith.constant 9.99999974E-6 : f32
    %400 = vector.broadcast %cst_322 : f32 to vector<1x256xf32>
    %401 = arith.addf %397, %400 : vector<1x256xf32>
    %402 = math.rsqrt %401 : vector<1x256xf32>
    %403 = vector.broadcast %402 : vector<1x256xf32> to vector<4x256xf32>
    %404 = arith.mulf %399, %403 : vector<4x256xf32>
    %cst_323 = arith.constant 0.000000e+00 : f32
    %405 = vector.broadcast %cst_323 : f32 to vector<4x256xf32>
    %406 = arith.cmpf oge, %404, %405 : vector<4x256xf32>
    %cst_324 = arith.constant 2.000000e-01 : f32
    %407 = vector.broadcast %cst_324 : f32 to vector<4x256xf32>
    %408 = arith.mulf %407, %404 : vector<4x256xf32>
    %409 = arith.select %406, %404, %408 : vector<4x256xi1>, vector<4x256xf32>
    %c0_325 = arith.constant 0 : index
    %c0_326 = arith.constant 0 : index
    %410 = vector.load %arg14[%c0_325, %c0_326] : memref<4x256xf32, #tpu.memory_space<vmem>>, vector<4x256xf32>
    %411 = arith.mulf %409, %410 : vector<4x256xf32>
    %cst_327 = arith.constant dense<0.000000e+00> : vector<4xf32>
    %412 = vector.multi_reduction <add>, %411, %cst_327 [1] : vector<4x256xf32> to vector<4xf32>
    %413 = vector.shape_cast %412 : vector<4xf32> to vector<4x1xf32>
    %cst_328 = arith.constant dense<0.000000e+00> : vector<1xf32>
    %414 = vector.multi_reduction <add>, %413, %cst_328 [0] : vector<4x1xf32> to vector<1xf32>
    %415 = vector.shape_cast %414 : vector<1xf32> to vector<1x1xf32>
    %c0_329 = arith.constant 0 : index
    %c0_330 = arith.constant 0 : index
    %416 = vector.load %arg15[%c0_329, %c0_330] : memref<1x1xf32, #tpu.memory_space<vmem>>, vector<1x1xf32>
    %417 = arith.addf %415, %416 : vector<1x1xf32>
    %c0_331 = arith.constant 0 : index
    %c0_332 = arith.constant 0 : index
    %c0_333 = arith.constant 0 : index
    %418 = vector.load %arg16[%c0_331, %c0_332, %c0_333] : memref<1x1x1xf32, #tpu.memory_space<vmem>>, vector<1x1x1xf32>
    %419 = vector.shape_cast %418 : vector<1x1x1xf32> to vector<1x1xf32>
    %420 = vector.shape_cast %417 : vector<1x1xf32> to vector<1x1x1xf32>
    tpu.vector_store %arg16[%c0_331, %c0_332, %c0_333], %420 {strides = array<i32>} : memref<1x1x1xf32, #tpu.memory_space<vmem>>, vector<1x1x1xf32>,
    return
  }
  func.func @transform_0(%arg0: i32) -> (i32, i32, i32) {
    %c0_i32 = arith.constant 0 : i32
    %c0_i32_0 = arith.constant 0 : i32
    %c0_i32_1 = arith.constant 0 : i32
    return %arg0, %c0_i32, %c0_i32_0 : i32, i32, i32
  }
  func.func @transform_1(%arg0: i32) -> (i32, i32, i32) {
    %c0_i32 = arith.constant 0 : i32
    %c0_i32_0 = arith.constant 0 : i32
    %c0_i32_1 = arith.constant 0 : i32
    %c0_i32_2 = arith.constant 0 : i32
    return %c0_i32, %c0_i32_0, %c0_i32_1 : i32, i32, i32
  }
  func.func @transform_2(%arg0: i32) -> (i32, i32, i32) {
    %c0_i32 = arith.constant 0 : i32
    %c0_i32_0 = arith.constant 0 : i32
    %c0_i32_1 = arith.constant 0 : i32
    %c0_i32_2 = arith.constant 0 : i32
    return %c0_i32, %c0_i32_0, %c0_i32_1 : i32, i32, i32
  }
  func.func @transform_3(%arg0: i32) -> (i32, i32) {
    %c0_i32 = arith.constant 0 : i32
    %c0_i32_0 = arith.constant 0 : i32
    %c0_i32_1 = arith.constant 0 : i32
    return %c0_i32, %c0_i32_0 : i32, i32
  }
  func.func @transform_4(%arg0: i32) -> (i32, i32, i32) {
    %c0_i32 = arith.constant 0 : i32
    %c0_i32_0 = arith.constant 0 : i32
    %c0_i32_1 = arith.constant 0 : i32
    %c0_i32_2 = arith.constant 0 : i32
    return %c0_i32, %c0_i32_0, %c0_i32_1 : i32, i32, i32
  }
  func.func @transform_5(%arg0: i32) -> (i32, i32, i32) {
    %c0_i32 = arith.constant 0 : i32
    %c0_i32_0 = arith.constant 0 : i32
    %c0_i32_1 = arith.constant 0 : i32
    %c0_i32_2 = arith.constant 0 : i32
    return %c0_i32, %c0_i32_0, %c0_i32_1 : i32, i32, i32
  }
  func.func @transform_6(%arg0: i32) -> (i32, i32) {
    %c0_i32 = arith.constant 0 : i32
    %c0_i32_0 = arith.constant 0 : i32
    %c0_i32_1 = arith.constant 0 : i32
    return %c0_i32, %c0_i32_0 : i32, i32
  }
  func.func @transform_7(%arg0: i32) -> (i32, i32, i32) {
    %c0_i32 = arith.constant 0 : i32
    %c0_i32_0 = arith.constant 0 : i32
    %c0_i32_1 = arith.constant 0 : i32
    %c0_i32_2 = arith.constant 0 : i32
    return %c0_i32, %c0_i32_0, %c0_i32_1 : i32, i32, i32
  }
  func.func @transform_8(%arg0: i32) -> (i32, i32, i32) {
    %c0_i32 = arith.constant 0 : i32
    %c0_i32_0 = arith.constant 0 : i32
    %c0_i32_1 = arith.constant 0 : i32
    %c0_i32_2 = arith.constant 0 : i32
    return %c0_i32, %c0_i32_0, %c0_i32_1 : i32, i32, i32
  }
  func.func @transform_9(%arg0: i32) -> (i32, i32) {
    %c0_i32 = arith.constant 0 : i32
    %c0_i32_0 = arith.constant 0 : i32
    %c0_i32_1 = arith.constant 0 : i32
    return %c0_i32, %c0_i32_0 : i32, i32
  }
  func.func @transform_10(%arg0: i32) -> (i32, i32, i32) {
    %c0_i32 = arith.constant 0 : i32
    %c0_i32_0 = arith.constant 0 : i32
    %c0_i32_1 = arith.constant 0 : i32
    %c0_i32_2 = arith.constant 0 : i32
    return %c0_i32, %c0_i32_0, %c0_i32_1 : i32, i32, i32
  }
  func.func @transform_11(%arg0: i32) -> (i32, i32, i32) {
    %c0_i32 = arith.constant 0 : i32
    %c0_i32_0 = arith.constant 0 : i32
    %c0_i32_1 = arith.constant 0 : i32
    %c0_i32_2 = arith.constant 0 : i32
    return %c0_i32, %c0_i32_0, %c0_i32_1 : i32, i32, i32
  }
  func.func @transform_12(%arg0: i32) -> (i32, i32) {
    %c0_i32 = arith.constant 0 : i32
    %c0_i32_0 = arith.constant 0 : i32
    %c0_i32_1 = arith.constant 0 : i32
    return %c0_i32, %c0_i32_0 : i32, i32
  }
  func.func @transform_13(%arg0: i32) -> (i32, i32) {
    %c0_i32 = arith.constant 0 : i32
    %c0_i32_0 = arith.constant 0 : i32
    %c0_i32_1 = arith.constant 0 : i32
    return %c0_i32, %c0_i32_0 : i32, i32
  }
  func.func @transform_14(%arg0: i32) -> (i32, i32) {
    %c0_i32 = arith.constant 0 : i32
    %c0_i32_0 = arith.constant 0 : i32
    %c0_i32_1 = arith.constant 0 : i32
    return %c0_i32, %c0_i32_0 : i32, i32
  }
  func.func @transform_15(%arg0: i32) -> (i32, i32, i32) {
    %c0_i32 = arith.constant 0 : i32
    %c0_i32_0 = arith.constant 0 : i32
    %c0_i32_1 = arith.constant 0 : i32
    return %arg0, %c0_i32, %c0_i32_0 : i32, i32, i32
  }
}

</mosaic_0001>

<bundles_post_ra>
// kernel: discriminator_forward.1
= control target key start
LH: loop header
LB: loop body
LE: loop exit
PB: predicated region body
PF: predicated region fallthrough
CT: control target
= control target key end

     0   :  { %s19758_s0 = inlined_call_operand.vmem [shape: f32[2,256,3], index: 0, kind: input, shape index: {}]   ;;  %s19759_s1 = inlined_call_operand.hbm [shape: bf16[9,256,256], index: 1, kind: input, shape index: {}]   ;;  %s19760_s2 = inlined_call_operand.hbm [shape: bf16[9,3,32], index: 2, kind: input, shape index: {}]   ;;  %s19761_s3 = inlined_call_operand.hbm [shape: f32[1,32], index: 3, kind: input, shape index: {}]   ;;  %s19762_s4 = inlined_call_operand.hbm [shape: bf16[9,64,256], index: 4, kind: input, shape index: {}]   ;;  %s19763_s5 = inlined_call_operand.hbm [shape: bf16[9,32,64], index: 5, kind: input, shape index: {}]   ;;  %s19764_s6 = inlined_call_operand.hbm [shape: f32[1,64], index: 6, kind: input, shape index: {}]   ;;  %s19765_s7 = inlined_call_operand.hbm [shape: bf16[9,16,64], index: 7, kind: input, shape index: {}]   ;;  %s19766_s8 = inlined_call_operand.hbm [shape: bf16[9,64,128], index: 8, kind: input, shape index: {}]   ;;  %s19767_s9 = inlined_call_operand.hbm [shape: f32[1,128], index: 9, kind: input, shape index: {}]   ;;  %s19768_s10 = inlined_call_operand.hbm [shape: bf16[9,4,16], index: 10, kind: input, shape index: {}]   ;;  %s19769_s11 = inlined_call_operand.hbm [shape: bf16[9,128,256], index: 11, kind: input, shape index: {}]   ;;  %s19770_s12 = inlined_call_operand.hbm [shape: f32[1,256], index: 12, kind: input, shape index: {}]   ;;  %s19771_s13 = inlined_call_operand.hbm [shape: f32[4,256], index: 13, kind: input, shape index: {}]   ;;  %s19772_s14 = inlined_call_operand.<no memory space> [shape: f32[1,1], index: 14, kind: input, shape index: {}]   ;;  %s19773_s15 = inlined_call_operand.vmem [shape: f32[2,1,1], index: 15, kind: output, shape index: {}]  }
   0x1   :  { %19886 = sst [smem:[#allocation80_spill]] %s19758_s0  ;;  %v20_v0 = vstv %s19772_s14 }
   0x2   :  { %19887 = sst [smem:[#allocation81_spill]] %s19759_s1  ;;  %21 = vst [vmem:[#allocation2] sm:$0x1] %v20_v0 }
   0x3   :  { %19888 = sst [smem:[#allocation82_spill]] %s19760_s2 }
   0x4   :  { %19889 = sst [smem:[#allocation83_spill]] %s19773_s15 }
   0x5   :  { %22 = vsyncpa [#allocation4], 0 }
   0x6   :  { %23 = vsyncpa [#allocation6], 0 }
   0x7   :  { %24 = vsyncpa [#allocation9], 0 }
   0x8   :  { %25 = vsyncpa [#allocation12], 0 }
   0x9   :  { %26 = vsyncpa [#allocation15], 0 }
   0xa   :  { %27 = vsyncpa [#allocation18], 0 }
   0xb   :  { %28 = vsyncpa [#allocation21], 0  ;;  %s16835_s20 = smov 0  }
   0xc LB: > { %19890 = sst [smem:[#allocation30_spill]] %s16727_s20  ;;  %s16729_s21 = smov [#allocation5]   ;;  %s16727_s20 = sphi %s16835_s20, %s34_s20  }
   0xd   : > { %s410_s14 = sshll.u32 %s16729_s21, 4  ;;  %s16841_s22 = sadd.s32 4294967295, %s16727_s20   ;;  %s16846_s14 = int_to_ptr.vmem [resolvable:$true] %s410_s14 }
   0xe   : > { %p11836_p0 = scmp.ge.s32.totalorder %s16727_s20, 1  ;;  %p385_p1 = scmp.lt.s32.totalorder %s16727_s20, 3 }
   0xf   : > { %p19778_p2 = scmp.eq.s32.totalorder %s16841_s22, 0  ;;  %s16730_s25 = smov [#allocation8]  }
  0x10   : > { %p16848_p3 = pnand %p11836_p0, %p385_p1  ;;  %s434_s26 = sshll.u32 %s16730_s25, 4  ;;  %s16860_s26 = int_to_ptr.vmem [resolvable:$true] %s434_s26 }
  0x11   : > { %s16731_s27 = smov [#allocation11]   ;;  %s19893_s2 = sld [smem:[#allocation82_spill]] }
  0x12   : > { %s19891_s23 = scalar_select %p16848_p3, 1, 0 }
  0x13   : > { %p15402_p4 = pneg %p16848_p3  ;;  %s461_s28 = sshll.u32 %s16731_s27, 4  ;;  %s16862_s28 = int_to_ptr.vmem [resolvable:$true] %s461_s28 }
  0x15   : > { %p16856_p5 = pnand %p19778_p2, %p15402_p4 }
  0x17   : > { %s16329_s16 = scalar_lea.hbm %s19893_s2, 288  ;;  %p16872_p7 = pneg %p16856_p5 }
  0x18   : > { %p16330_p6 = scmp.ne.s32.totalorder %s19893_s2, %s16329_s16  ;;  %p16336_p10 = scmp.lt.u32.totalorder %s16329_s16, %s19893_s2 }
  0x1a   : > { %p16332_p8 = pnand %p16872_p7, %p16330_p6 }
  0x1c   : > { %p16333_p9 = pneg %p16332_p8 }
  0x1e   : > { %p16338_p11 = pnand %p16336_p10, %p16333_p9 }
  0x20   : > { %16341 = shalt.err (!%p16338_p11)
}
  0x21   : > { %s16342_s27 = scalar_lea.vmem %s16846_s14, 288  ;;  %p16350_p1 = scmp.lt.s32.totalorder %s16846_s14, %s16846_s14 }
  0x22   : > { %p16343_p12 = scmp.ne.s32.totalorder %s16846_s14, %s16342_s27  ;;  %p16351_p4 = scmp.lt.s32.totalorder %s16342_s27, %s16342_s27 }
  0x24   : > { %p16345_p13 = pnand %p16343_p12, %p16872_p7  ;;  %p16352_p6 = por %p16351_p4, %p16350_p1 }
  0x26   : > { %p16346_p0 = pneg %p16345_p13 }
  0x28   : > { %p16353_p8 = pnand %p16352_p6, %p16346_p0 }
  0x2a   : > { %16356 = shalt.err (!%p16353_p8)
}
  0x2b   : > { %s19775_s29 = smov 32   ;;  %s16733_s30 = smov 2  }
  0x2c   : > { %15408 = dma.hbm_to_vmem [thread:$0]  (!%p16856_p5), %s19893_s2, 288, %s16846_s14, [#allocation6], %s19775_s29, %s19775_s29, %s16733_s30  }
  0x2d   : > { %s16357_s25 = scalar_lea.hbm %s19762_s4, 9216 }
  0x2e   : > { %p16358_p9 = scmp.ne.s32.totalorder %s19762_s4, %s16357_s25  ;;  %p16364_p12 = scmp.lt.u32.totalorder %s16357_s25, %s19762_s4 }
  0x30   : > { %p16360_p10 = pnand %p16358_p9, %p16872_p7 }
  0x32   : > { %p16361_p11 = pneg %p16360_p10 }
  0x34   : > { %p16366_p13 = pnand %p16364_p12, %p16361_p11 }
  0x36   : > { %16369 = shalt.err (!%p16366_p13)
}
  0x37   : > { %s16370_s14 = scalar_lea.vmem %s16860_s26, 9216  ;;  %p16378_p6 = scmp.lt.s32.totalorder %s16860_s26, %s16860_s26 }
  0x38   : > { %p16371_p0 = scmp.ne.s32.totalorder %s16860_s26, %s16370_s14  ;;  %p16379_p8 = scmp.lt.s32.totalorder %s16370_s14, %s16370_s14 }
  0x3a   : > { %p16373_p1 = pnand %p16371_p0, %p16872_p7  ;;  %p16380_p9 = por %p16379_p8, %p16378_p6 }
  0x3c   : > { %p16374_p4 = pneg %p16373_p1 }
  0x3e   : > { %p16381_p10 = pnand %p16380_p9, %p16374_p4 }
  0x40   : > { %16384 = shalt.err (!%p16381_p10)
}
  0x41   : > { %s19776_s20 = smov 128   ;;  %s19780_s0 = smov 8  }
  0x42   : > { %15414 = dma.hbm_to_vmem [thread:$0]  (!%p16856_p5), %s19762_s4, 9216, %s16860_s26, [#allocation9], %s19776_s20, %s19776_s20, %s19780_s0  }
  0x43   : > { %s16385_s21 = scalar_lea.hbm %s19764_s6, 16 }
  0x44   : > { %p16386_p11 = scmp.ne.s32.totalorder %s19764_s6, %s16385_s21  ;;  %p16392_p0 = scmp.lt.u32.totalorder %s16385_s21, %s19764_s6 }
  0x46   : > { %p16388_p12 = pnand %p16386_p11, %p16872_p7 }
  0x48   : > { %p16389_p13 = pneg %p16388_p12 }
  0x4a   : > { %p16394_p1 = pnand %p16392_p0, %p16389_p13 }
  0x4c   : > { %16397 = shalt.err (!%p16394_p1)
}
  0x4d   : > { %s16398_s26 = scalar_lea.vmem %s16862_s28, 16  ;;  %s16405_s15 = scalar_lea.vmem %s16862_s28, 32 }
  0x4e   : > { %p16399_p4 = scmp.ne.s32.totalorder %s16862_s28, %s16398_s26  ;;  %p16406_p9 = scmp.lt.s32.totalorder %s16862_s28, %s16862_s28 }
  0x4f   : > { %p16407_p10 = scmp.lt.s32.totalorder %s16405_s15, %s16398_s26 }
  0x50   : > { %p16401_p6 = pnand %p16399_p4, %p16872_p7 }
  0x51   : > { %p16408_p11 = por %p16407_p10, %p16406_p9 }
  0x52   : > { %p16402_p8 = pneg %p16401_p6 }
  0x54   : > { %p16409_p12 = pnand %p16408_p11, %p16402_p8 }
  0x56   : > { %16412 = shalt.err (!%p16409_p12)
}
  0x57   : > { %15420 = dma.hbm_to_vmem [thread:$0]  (!%p16856_p5), %s19764_s6, 16, %s16862_s28, [#allocation12]  }
  0x58   : > { %s16736_s17 = smov [#allocation14]   ;;  %s16737_s21 = smov [#allocation17]  }
  0x59   : > { %s484_s18 = sshll.u32 %s16736_s17, 4  ;;  %s508_s25 = sshll.u32 %s16737_s21, 4  ;;  %s485_s18 = int_to_ptr.vmem [resolvable:$true] %s484_s18  ;;  %s16946_s25 = int_to_ptr.vmem [resolvable:$true] %s508_s25 }
  0x5a   : > { %s16413_s26 = scalar_lea.hbm %s19766_s8, 4608 }
  0x5b   : > { %p16414_p13 = scmp.ne.s32.totalorder %s19766_s8, %s16413_s26  ;;  %p16420_p4 = scmp.lt.u32.totalorder %s16413_s26, %s19766_s8 }
  0x5d   : > { %p16416_p0 = pnand %p16414_p13, %p16872_p7 }
  0x5f   : > { %p16417_p1 = pneg %p16416_p0 }
  0x61   : > { %p16422_p6 = pnand %p16420_p4, %p16417_p1 }
  0x63   : > { %16425 = shalt.err (!%p16422_p6)
}
  0x64   : > { %s16426_s16 = scalar_lea.vmem %s485_s18, 4608  ;;  %p16434_p11 = scmp.lt.s32.totalorder %s485_s18, %s485_s18 }
  0x65   : > { %p16427_p8 = scmp.ne.s32.totalorder %s485_s18, %s16426_s16  ;;  %p16435_p12 = scmp.lt.s32.totalorder %s16426_s16, %s16426_s16 }
  0x67   : > { %p16429_p9 = pnand %p16427_p8, %p16872_p7  ;;  %p16436_p2 = por %p16435_p12, %p16434_p11 }
  0x69   : > { %p16430_p10 = pneg %p16429_p9 }
  0x6b   : > { %p16437_p3 = pnand %p16436_p2, %p16430_p10 }
  0x6d   : > { %16440 = shalt.err (!%p16437_p3)
}
  0x6e   : > { %s19782_s20 = smov 64   ;;  %s19784_s17 = smov 4  }
  0x6f   : > { %15426 = dma.hbm_to_vmem [thread:$0]  (!%p16856_p5), %s19766_s8, 4608, %s485_s18, [#allocation15], %s19782_s20, %s19782_s20, %s19784_s17  }
  0x70   : > { %s16441_s15 = scalar_lea.hbm %s19768_s10, 288 }
  0x71   : > { %p16442_p2 = scmp.ne.s32.totalorder %s19768_s10, %s16441_s15  ;;  %p16448_p0 = scmp.lt.u32.totalorder %s16441_s15, %s19768_s10 }
  0x73   : > { %p16444_p3 = pnand %p16442_p2, %p16872_p7 }
  0x75   : > { %p16445_p13 = pneg %p16444_p3 }
  0x77   : > { %p16450_p1 = pnand %p16448_p0, %p16445_p13 }
  0x79   : > { %16453 = shalt.err (!%p16450_p1)
}
  0x7a   : > { %s16454_s18 = scalar_lea.vmem %s16946_s25, 288  ;;  %p16462_p9 = scmp.lt.s32.totalorder %s16946_s25, %s16946_s25 }
  0x7b   : > { %p16455_p4 = scmp.ne.s32.totalorder %s16946_s25, %s16454_s18  ;;  %p16463_p10 = scmp.lt.s32.totalorder %s16454_s18, %s16454_s18 }
  0x7d   : > { %p16457_p6 = pnand %p16455_p4, %p16872_p7  ;;  %p16464_p11 = por %p16463_p10, %p16462_p9 }
  0x7f   : > { %p16458_p8 = pneg %p16457_p6 }
  0x81   : > { %p16465_p12 = pnand %p16464_p11, %p16458_p8 }
  0x83   : > { %16468 = shalt.err (!%p16465_p12)
}
  0x84   : > { %s19895_s0 = smov 32   ;;  %s16740_s14 = smov [#allocation20]  }
  0x85   : > { %15432 = dma.hbm_to_vmem [thread:$0]  (!%p16856_p5), %s19768_s10, 288, %s16946_s25, [#allocation18], %s19895_s0, %s19895_s0, %s16733_s30  }
  0x86   : > { %s535_s26 = sshll.u32 %s16740_s14, 4  ;;  %s16741_s15 = smov [#allocation3]   ;;  %s536_s26 = int_to_ptr.vmem [resolvable:$true] %s535_s26 }
  0x87   : > { %s397_s29 = sshll.u32 %s16741_s15, 4  ;;  %s16469_s18 = scalar_lea.hbm %s19770_s12, 32  ;;  %s16995_s29 = int_to_ptr.vmem [resolvable:$true] %s397_s29 }
  0x88   : > { %p16470_p2 = scmp.ne.s32.totalorder %s19770_s12, %s16469_s18  ;;  %p16476_p0 = scmp.lt.u32.totalorder %s16469_s18, %s19770_s12 }
  0x8a   : > { %p16472_p3 = pnand %p16470_p2, %p16872_p7 }
  0x8c   : > { %p16473_p13 = pneg %p16472_p3 }
  0x8e   : > { %p16478_p1 = pnand %p16476_p0, %p16473_p13 }
  0x90   : > { %16481 = shalt.err (!%p16478_p1)
}
  0x91   : > { %s16482_s25 = scalar_lea.vmem %s536_s26, 32  ;;  %p16490_p9 = scmp.lt.s32.totalorder %s536_s26, %s536_s26 }
  0x92   : > { %p16483_p4 = scmp.ne.s32.totalorder %s536_s26, %s16482_s25  ;;  %p16491_p10 = scmp.lt.s32.totalorder %s16482_s25, %s16482_s25 }
  0x94   : > { %p16485_p6 = pnand %p16483_p4, %p16872_p7  ;;  %p16492_p11 = por %p16491_p10, %p16490_p9 }
  0x96   : > { %p16486_p8 = pneg %p16485_p6 }
  0x98   : > { %p16493_p12 = pnand %p16492_p11, %p16486_p8 }
  0x9a   : > { %16496 = shalt.err (!%p16493_p12)
}
  0x9b   : > { %15438 = dma.hbm_to_vmem [thread:$0]  (!%p16856_p5), %s19770_s12, 32, %s536_s26, [#allocation21]  }
  0x9c   : > { %s19896_s1 = sld [smem:[#allocation81_spill]] }
  0xa2   : > { %s16497_s14 = scalar_lea.hbm %s19896_s1, 36864 }
  0xa3   : > { %p16498_p2 = scmp.ne.s32.totalorder %s19896_s1, %s16497_s14  ;;  %p16504_p0 = scmp.lt.u32.totalorder %s16497_s14, %s19896_s1 }
  0xa5   : > { %p16500_p3 = pnand %p16498_p2, %p16872_p7 }
  0xa7   : > { %p16501_p13 = pneg %p16500_p3 }
  0xa9   : > { %p16506_p1 = pnand %p16504_p0, %p16501_p13 }
  0xab   : > { %16509 = shalt.err (!%p16506_p1)
}
  0xac   : > { %s16510_s26 = scalar_lea.vmem %s16995_s29, 36864  ;;  %p16518_p9 = scmp.lt.s32.totalorder %s16995_s29, %s16995_s29 }
  0xad   : > { %p16511_p4 = scmp.ne.s32.totalorder %s16995_s29, %s16510_s26  ;;  %p16519_p10 = scmp.lt.s32.totalorder %s16510_s26, %s16510_s26 }
  0xaf   : > { %p16513_p6 = pnand %p16511_p4, %p16872_p7  ;;  %p16520_p11 = por %p16519_p10, %p16518_p9 }
  0xb1   : > { %p16514_p8 = pneg %p16513_p6 }
  0xb3   : > { %p16521_p12 = pnand %p16520_p11, %p16514_p8 }
  0xb5   : > { %16524 = shalt.err (!%p16521_p12)
}
  0xb6   : > { %s19897_s21 = smov 8   ;;  %s19898_s30 = smov 128  }
  0xb7   : > { %15405 = dma.hbm_to_vmem [thread:$0]  (!%p16856_p5), %s19896_s1, 36864, %s16995_s29, [#allocation4], %s19898_s30, %s19898_s30, %s19897_s21  }
  0xb8   : > { %s16742_s17 = smov [#allocation7]   ;;  %s16743_s27 = smov [#allocation10]  }
  0xb9   : > { %s424_s0 = sshll.u32 %s16742_s17, 4  ;;  %s447_s14 = sshll.u32 %s16743_s27, 4  ;;  %s425_s0 = int_to_ptr.vmem [resolvable:$true] %s424_s0  ;;  %s17041_s14 = int_to_ptr.vmem [resolvable:$true] %s447_s14 }
  0xba   : > { %s16525_s16 = scalar_lea.hbm %s19761_s3, 16 }
  0xbb   : > { %p16526_p2 = scmp.ne.s32.totalorder %s19761_s3, %s16525_s16  ;;  %p16532_p0 = scmp.lt.u32.totalorder %s16525_s16, %s19761_s3 }
  0xbd   : > { %p16528_p3 = pnand %p16526_p2, %p16872_p7 }
  0xbf   : > { %p16529_p13 = pneg %p16528_p3 }
  0xc1   : > { %p16534_p1 = pnand %p16532_p0, %p16529_p13 }
  0xc3   : > { %16537 = shalt.err (!%p16534_p1)
}
  0xc4   : > { %s16538_s20 = scalar_lea.vmem %s425_s0, 16  ;;  %s16545_s17 = scalar_lea.vmem %s425_s0, 32 }
  0xc5   : > { %p16539_p4 = scmp.ne.s32.totalorder %s425_s0, %s16538_s20  ;;  %p16546_p9 = scmp.lt.s32.totalorder %s425_s0, %s425_s0 }
  0xc6   : > { %p16547_p10 = scmp.lt.s32.totalorder %s16545_s17, %s16538_s20 }
  0xc7   : > { %p16541_p6 = pnand %p16539_p4, %p16872_p7 }
  0xc8   : > { %p16548_p11 = por %p16547_p10, %p16546_p9 }
  0xc9   : > { %p16542_p8 = pneg %p16541_p6 }
  0xcb   : > { %p16549_p12 = pnand %p16548_p11, %p16542_p8 }
  0xcd   : > { %16552 = shalt.err (!%p16549_p12)
}
  0xce   : > { %15411 = dma.hbm_to_vmem [thread:$0]  (!%p16856_p5), %s19761_s3, 16, %s425_s0, [#allocation6]  }
  0xcf   : > { %s16553_s18 = scalar_lea.hbm %s19763_s5, 2304 }
  0xd0   : > { %p16554_p2 = scmp.ne.s32.totalorder %s19763_s5, %s16553_s18  ;;  %p16560_p0 = scmp.lt.u32.totalorder %s16553_s18, %s19763_s5 }
  0xd2   : > { %p16556_p3 = pnand %p16554_p2, %p16872_p7 }
  0xd4   : > { %p16557_p13 = pneg %p16556_p3 }
  0xd6   : > { %p16562_p1 = pnand %p16560_p0, %p16557_p13 }
  0xd8   : > { %16565 = shalt.err (!%p16562_p1)
}
  0xd9   : > { %s16566_s0 = scalar_lea.vmem %s17041_s14, 2304  ;;  %p16574_p9 = scmp.lt.s32.totalorder %s17041_s14, %s17041_s14 }
  0xda   : > { %p16567_p4 = scmp.ne.s32.totalorder %s17041_s14, %s16566_s0  ;;  %p16575_p10 = scmp.lt.s32.totalorder %s16566_s0, %s16566_s0 }
  0xdc   : > { %p16569_p6 = pnand %p16567_p4, %p16872_p7  ;;  %p16576_p11 = por %p16575_p10, %p16574_p9 }
  0xde   : > { %p16570_p8 = pneg %p16569_p6 }
  0xe0   : > { %p16577_p12 = pnand %p16576_p11, %p16570_p8 }
  0xe2   : > { %16580 = shalt.err (!%p16577_p12)
}
  0xe3   : > { %s19899_s17 = smov 4   ;;  %s19900_s27 = smov 64  }
  0xe4   : > { %15417 = dma.hbm_to_vmem [thread:$0]  (!%p16856_p5), %s19763_s5, 2304, %s17041_s14, [#allocation9], %s19900_s27, %s19900_s27, %s19899_s17  }
  0xe5   : > { %s16744_s16 = smov [#allocation13]   ;;  %s16745_s26 = smov [#allocation16]  }
  0xe6   : > { %s471_s18 = sshll.u32 %s16744_s16, 4  ;;  %s498_s25 = sshll.u32 %s16745_s26, 4  ;;  %s472_s18 = int_to_ptr.vmem [resolvable:$true] %s471_s18  ;;  %s17087_s25 = int_to_ptr.vmem [resolvable:$true] %s498_s25 }
  0xe7   : > { %s16581_s0 = scalar_lea.hbm %s19765_s7, 1152 }
  0xe8   : > { %p16582_p2 = scmp.ne.s32.totalorder %s19765_s7, %s16581_s0  ;;  %p16588_p0 = scmp.lt.u32.totalorder %s16581_s0, %s19765_s7 }
  0xea   : > { %p16584_p3 = pnand %p16582_p2, %p16872_p7 }
  0xec   : > { %p16585_p13 = pneg %p16584_p3 }
  0xee   : > { %p16590_p1 = pnand %p16588_p0, %p16585_p13 }
  0xf0   : > { %16593 = shalt.err (!%p16590_p1)
}
  0xf1   : > { %s16594_s28 = scalar_lea.vmem %s472_s18, 1152  ;;  %p16602_p9 = scmp.lt.s32.totalorder %s472_s18, %s472_s18 }
  0xf2   : > { %p16595_p4 = scmp.ne.s32.totalorder %s472_s18, %s16594_s28  ;;  %p16603_p10 = scmp.lt.s32.totalorder %s16594_s28, %s16594_s28 }
  0xf4   : > { %p16597_p6 = pnand %p16595_p4, %p16872_p7  ;;  %p16604_p11 = por %p16603_p10, %p16602_p9 }
  0xf6   : > { %p16598_p8 = pneg %p16597_p6 }
  0xf8   : > { %p16605_p12 = pnand %p16604_p11, %p16598_p8 }
  0xfa   : > { %16608 = shalt.err (!%p16605_p12)
}
  0xfb   : > { %15423 = dma.hbm_to_vmem [thread:$0]  (!%p16856_p5), %s19765_s7, 1152, %s472_s18, [#allocation12], %s19900_s27, %s19900_s27, %s19899_s17  }
  0xfc   : > { %s16609_s29 = scalar_lea.hbm %s19767_s9, 16 }
  0xfd   : > { %p16610_p2 = scmp.ne.s32.totalorder %s19767_s9, %s16609_s29  ;;  %p16616_p0 = scmp.lt.u32.totalorder %s16609_s29, %s19767_s9 }
  0xff   : > { %p16612_p3 = pnand %p16610_p2, %p16872_p7 }
 0x101   : > { %p16613_p13 = pneg %p16612_p3 }
 0x103   : > { %p16618_p1 = pnand %p16616_p0, %p16613_p13 }
 0x105   : > { %16621 = shalt.err (!%p16618_p1)
}
 0x106   : > { %s16622_s17 = scalar_lea.vmem %s17087_s25, 16  ;;  %s16629_s27 = scalar_lea.vmem %s17087_s25, 32 }
 0x107   : > { %p16623_p4 = scmp.ne.s32.totalorder %s17087_s25, %s16622_s17  ;;  %p16630_p9 = scmp.lt.s32.totalorder %s17087_s25, %s17087_s25 }
 0x108   : > { %p16631_p10 = scmp.lt.s32.totalorder %s16629_s27, %s16622_s17 }
 0x109   : > { %p16625_p6 = pnand %p16623_p4, %p16872_p7 }
 0x10a   : > { %p16632_p11 = por %p16631_p10, %p16630_p9 }
 0x10b   : > { %p16626_p8 = pneg %p16625_p6 }
 0x10d   : > { %p16633_p12 = pnand %p16632_p11, %p16626_p8 }
 0x10f   : > { %16636 = shalt.err (!%p16633_p12)
}
 0x110   : > { %15429 = dma.hbm_to_vmem [thread:$0]  (!%p16856_p5), %s19767_s9, 16, %s17087_s25, [#allocation15]  }
 0x111   : > { %s16746_s1 = smov [#allocation19]   ;;  %s16747_s16 = smov [#allocation22]  }
 0x112   : > { %s521_s2 = sshll.u32 %s16746_s1, 4  ;;  %s546_s26 = sshll.u32 %s16747_s16, 4  ;;  %s522_s2 = int_to_ptr.vmem [resolvable:$true] %s521_s2  ;;  %s17134_s26 = int_to_ptr.vmem [resolvable:$true] %s546_s26 }
 0x113   : > { %s16637_s0 = scalar_lea.hbm %s19769_s11, 18432 }
 0x114   : > { %p16638_p2 = scmp.ne.s32.totalorder %s19769_s11, %s16637_s0  ;;  %p16644_p0 = scmp.lt.u32.totalorder %s16637_s0, %s19769_s11 }
 0x116   : > { %p16640_p3 = pnand %p16638_p2, %p16872_p7 }
 0x118   : > { %p16641_p13 = pneg %p16640_p3 }
 0x11a   : > { %p16646_p1 = pnand %p16644_p0, %p16641_p13 }
 0x11c   : > { %16649 = shalt.err (!%p16646_p1)
}
 0x11d   : > { %s16650_s27 = scalar_lea.vmem %s522_s2, 18432  ;;  %p16658_p9 = scmp.lt.s32.totalorder %s522_s2, %s522_s2 }
 0x11e   : > { %p16651_p4 = scmp.ne.s32.totalorder %s522_s2, %s16650_s27  ;;  %p16659_p10 = scmp.lt.s32.totalorder %s16650_s27, %s16650_s27 }
 0x120   : > { %p16653_p6 = pnand %p16651_p4, %p16872_p7  ;;  %p16660_p11 = por %p16659_p10, %p16658_p9 }
 0x122   : > { %p16654_p8 = pneg %p16653_p6 }
 0x124   : > { %p16661_p12 = pnand %p16660_p11, %p16654_p8 }
 0x126   : > { %16664 = shalt.err (!%p16661_p12)
}
 0x127   : > { %15435 = dma.hbm_to_vmem [thread:$0]  (!%p16856_p5), %s19769_s11, 18432, %s522_s2, [#allocation18], %s19898_s30, %s19898_s30, %s19897_s21  }
 0x128   : > { %s16665_s29 = scalar_lea.hbm %s19771_s13, 128 }
 0x129   : > { %p16666_p2 = scmp.ne.s32.totalorder %s19771_s13, %s16665_s29  ;;  %p16672_p0 = scmp.lt.u32.totalorder %s16665_s29, %s19771_s13 }
 0x12b   : > { %p16668_p3 = pnand %p16666_p2, %p16872_p7 }
 0x12d   : > { %p16669_p13 = pneg %p16668_p3 }
 0x12f   : > { %p16674_p1 = pnand %p16672_p0, %p16669_p13 }
 0x131   : > { %16677 = shalt.err (!%p16674_p1)
}
 0x132   : > { %s16678_s21 = scalar_lea.vmem %s17134_s26, 128  ;;  %p16686_p9 = scmp.lt.s32.totalorder %s17134_s26, %s17134_s26 }
 0x133   : > { %p16679_p4 = scmp.ne.s32.totalorder %s17134_s26, %s16678_s21  ;;  %p16687_p10 = scmp.lt.s32.totalorder %s16678_s21, %s16678_s21 }
 0x135   : > { %p16681_p6 = pnand %p16679_p4, %p16872_p7  ;;  %p16688_p11 = por %p16687_p10, %p16686_p9 }
 0x137   : > { %p16682_p8 = pneg %p16681_p6 }
 0x139   : > { %p16689_p12 = pnand %p16688_p11, %p16682_p8 }
 0x13b   : > { %16692 = shalt.err (!%p16689_p12)
}
 0x13c   : > { %15441 = dma.hbm_to_vmem [thread:$0]  (!%p16856_p5), %s19771_s13, 128, %s17134_s26, [#allocation21]  }
 0x13d   : > { %p19901_p2 = scmp.ne.s32.totalorder %s19891_s23, 0 }
 0x13f   : > { %570 = sbr.rel (%p19901_p2) target bundleno = 5969 (0x1751), region = 80 }
 0x146   : > { %p19902_p3 = scmp.eq.s32.totalorder %s16841_s22, 0 }
 0x148   : > { %16698 = dma.done.wait (%p19902_p3), [#allocation4], 36864   ;;  %p19903_p7 = pmov %p19902_p3 }
 0x149   : > { %p19904_p13 = pmov %p19902_p3 }
 0x14a   : > { %16700 = vsyncadd (%p19903_p7), [#allocation4], 4294930432 }
 0x14b   : > { %16702 = dma.done.wait (%p19904_p13), [#allocation6], 304   ;;  %p19905_p0 = pmov %p19902_p3 }
 0x14d   : > { %16704 = vsyncadd (%p19905_p0), [#allocation6], 4294966992  ;;  %p19906_p1 = pmov %p19905_p0 }
 0x14e   : > { %p19907_p5 = pmov %p19905_p0 }
 0x14f   : > { %16706 = dma.done.wait (%p19906_p1), [#allocation9], 11520  }
 0x150   : > { %16708 = vsyncadd (%p19907_p5), [#allocation9], 4294955776  ;;  %p19908_p4 = pmov %p19905_p0 }
 0x151   : > { %p19909_p6 = pmov %p19905_p0 }
 0x152   : > { %16710 = dma.done.wait (%p19908_p4), [#allocation12], 1168  }
 0x153   : > { %16712 = vsyncadd (%p19909_p6), [#allocation12], 4294966128  ;;  %p19910_p8 = pmov %p19905_p0 }
 0x154   : > { %p19911_p9 = pmov %p19905_p0 }
 0x155   : > { %16714 = dma.done.wait (%p19910_p8), [#allocation15], 4624  }
 0x156   : > { %16716 = vsyncadd (%p19911_p9), [#allocation15], 4294962672  ;;  %p19912_p10 = pmov %p19905_p0 }
 0x157   : > { %p19913_p11 = pmov %p19905_p0 }
 0x158   : > { %16718 = dma.done.wait (%p19912_p10), [#allocation18], 18720  }
 0x159   : > { %16720 = vsyncadd (%p19913_p11), [#allocation18], 4294948576  ;;  %p19914_p12 = pmov %p19905_p0 }
 0x15a   : > { %p19915_p2 = pmov %p19905_p0 }
 0x15b   : > { %16722 = dma.done.wait (%p19914_p12), [#allocation21], 160  }
 0x15c   : > { %16724 = vsyncadd (%p19915_p2), [#allocation21], 4294967136  ;;  %p664_p3 = scmp.lt.s32.totalorder %s16841_s22, 1  ;;  %s19916_s26 = sld [smem:[#allocation80_spill]]  ;;  %v15501_v27 = vld [vmem:[#allocation3 + $0x4] ss:$8 sps:$4 sm:$0xff]  }
 0x15d   : > { %v15504_v31 = vld [vmem:[#allocation3 + $0x114] ss:$8 sps:$4 sm:$0xff]   ;;  %945 = vmatprep.mubr.bf16.mxu0 %v15501_v27  ;;  %v15499_v51 = vld [vmem:[#allocation3] ss:$8 sps:$4 sm:$0xff]   ;;  %v15502_v52 = vld [vmem:[#allocation3 + $0x110] ss:$8 sps:$4 sm:$0xff]  }
 0x15e   : > { %s20235_s22 = smov (!%p664_p3, %s16841_s22), 1  ;;  %1324 = vmatprep.mubr.bf16.mxu1 %v15504_v31  ;;  %v15505_v53 = vld [vmem:[#allocation3 + $0x14] ss:$8 sps:$4 sm:$0xff]   ;;  %v15508_v54 = vld [vmem:[#allocation3 + $0x124] ss:$8 sps:$4 sm:$0xff]   ;;  %vm1512_vm0 = vcmask 1040384  }
 0x15f   : > { %s12646_s23 = sshll.u32 %s20235_s22, 8  ;;  %v15507_v55 = vld [vmem:[#allocation3 + $0x10] ss:$8 sps:$4 sm:$0xff]   ;;  %v15510_v56 = vld [vmem:[#allocation3 + $0x120] ss:$8 sps:$4 sm:$0xff]   ;;  %vm1513_vm1 = vcmask 1041408  }
 0x160   : > { %v15511_v57 = vld [vmem:[#allocation3 + $0x24] ss:$8 sps:$4 sm:$0xff]   ;;  %v15514_v58 = vld [vmem:[#allocation3 + $0x134] ss:$8 sps:$4 sm:$0xff]   ;;  %v15513_v59 = vld [vmem:[#allocation3 + $0x20] ss:$8 sps:$4 sm:$0xff]  }
 0x161   : > { %v15516_v60 = vld [vmem:[#allocation3 + $0x130] ss:$8 sps:$4 sm:$0xff]   ;;  %v15517_v61 = vld [vmem:[#allocation3 + $0x34] ss:$8 sps:$4 sm:$0xff]   ;;  %v15520_v62 = vld [vmem:[#allocation3 + $0x144] ss:$8 sps:$4 sm:$0xff]  }
 0x162   : > { %s17218_s17 = scalar_lea.vmem %s19916_s26, %s12646_s23  ;;  %v15519_v63 = vld [vmem:[#allocation3 + $0x30] ss:$8 sps:$4 sm:$0xff]   ;;  %v15522_v0 = vld [vmem:[#allocation3 + $0x140] ss:$8 sps:$4 sm:$0xff]   ;;  %v15556_v31 = vld [vmem:[#allocation3 + $0x1a4] ss:$8 sps:$4 sm:$0xff]  }
 0x163   : > { %v689_v1 = vld [vmem:[%s17218_s17 + $0x80] sm:$0xff]  ;;  %v690_v2 = vld [vmem:[%s17218_s17 + $0x88] sm:$0xff]  ;;  %v691_v6 = vld [vmem:[%s17218_s17 + $0x90] sm:$0xff]  ;;  %vm1463_vm2 = vcmask 23552   ;;  %vm19883_vm3 = vcmask 261120   ;;  %s20232_s18 = sld [smem:[#allocation83_spill]] }
 0x164   : > { %v673_v3 = vld [vmem:[%s17218_s17] sm:$0xff]  ;;  %v17223_v4 = vpack.c.bf16 %v690_v2, %v689_v1  ;;  %v674_v5 = vld [vmem:[%s17218_s17 + $0x8] sm:$0xff]  ;;  %v692_v7 = vld [vmem:[%s17218_s17 + $0x98] sm:$0xff] }
 0x165   : > { %v17228_v8 = vpack.c.bf16 %v674_v5, %v673_v3  ;;  %v17230_v9 = vpack.c.bf16 %v692_v7, %v691_v6  ;;  %v675_v10 = vld [vmem:[%s17218_s17 + $0x10] sm:$0xff]  ;;  %v676_v11 = vld [vmem:[%s17218_s17 + $0x18] sm:$0xff]  ;;  %v693_v12 = vld [vmem:[%s17218_s17 + $0xa0] sm:$0xff] }
 0x166   : > { %19917 = vst [vmem:[#allocation31_spill] sm:$0xff] %v17223_v4  ;;  %12647 = vmatprep.subr.bf16.mxu0 %v17223_v4  ;;  %15014 = vmatprep.subr.bf16.mxu1 %v17223_v4  ;;  %v694_v13 = vld [vmem:[%s17218_s17 + $0xa8] sm:$0xff]  ;;  %v17239_v14 = vpack.c.bf16 %v676_v11, %v675_v10  ;;  %v677_v16 = vld [vmem:[%s17218_s17 + $0x20] sm:$0xff]  ;;  %v695_v18 = vld [vmem:[%s17218_s17 + $0xb0] sm:$0xff] }
 0x167   : > { %19918 = vst [vmem:[#allocation32_spill] sm:$0xff] %v17228_v8  ;;  %19919 = vst [vmem:[#allocation33_spill] sm:$0xff] %v17230_v9  ;;  %12648 = vmatpush3.bf16.msra.mxu0 %v17228_v8  ;;  %15022 = vmatpush3.bf16.msra.mxu1 %v17228_v8  ;;  %v17243_v15 = vpack.c.bf16 %v694_v13, %v693_v12  ;;  %v678_v17 = vld [vmem:[%s17218_s17 + $0x28] sm:$0xff]  ;;  %v696_v19 = vld [vmem:[%s17218_s17 + $0xb8] sm:$0xff] }
 0x168   : > { %19920 = vst [vmem:[#allocation34_spill] sm:$0xff] %v17239_v14  ;;  %12649 = vmatprep.subr.bf16.mxu0 %v17230_v9  ;;  %15015 = vmatprep.subr.bf16.mxu1 %v17230_v9  ;;  %v17251_v20 = vpack.c.bf16 %v678_v17, %v677_v16  ;;  %v17255_v21 = vpack.c.bf16 %v696_v19, %v695_v18  ;;  %v679_v22 = vld [vmem:[%s17218_s17 + $0x30] sm:$0xff]  ;;  %v680_v23 = vld [vmem:[%s17218_s17 + $0x38] sm:$0xff]  ;;  %v697_v24 = vld [vmem:[%s17218_s17 + $0xc0] sm:$0xff] }
 0x169   : > { %19921 = vst [vmem:[#allocation35_spill] sm:$0xff] %v17243_v15  ;;  %v698_v25 = vld [vmem:[%s17218_s17 + $0xc8] sm:$0xff]  ;;  %v681_v26 = vld [vmem:[%s17218_s17 + $0x40] sm:$0xff]  ;;  %v17264_v28 = vpack.c.bf16 %v680_v23, %v679_v22  ;;  %v699_v32 = vld [vmem:[%s17218_s17 + $0xd0] sm:$0xff]  ;;  %s671_s28 = scalar_lea.vmem %s20232_s18, %s20235_s22 }
 0x16a   : > { %19922 = vst [vmem:[#allocation36_spill] sm:$0xff] %v17251_v20  ;;  %19923 = vst [vmem:[#allocation37_spill] sm:$0xff] %v17255_v21  ;;  %v682_v29 = vld [vmem:[%s17218_s17 + $0x48] sm:$0xff]  ;;  %v17269_v30 = vpack.c.bf16 %v698_v25, %v697_v24  ;;  %v700_v33 = vld [vmem:[%s17218_s17 + $0xd8] sm:$0xff] }
 0x16b   : > { %12650 = vmatpush3.bf16.msra.mxu0 %v17239_v14  ;;  %15023 = vmatpush3.bf16.msra.mxu1 %v17239_v14  ;;  %19924 = vst [vmem:[#allocation38_spill] sm:$0xff] %v17264_v28  ;;  %v17275_v34 = vpack.c.bf16 %v682_v29, %v681_v26  ;;  %v683_v35 = vld [vmem:[%s17218_s17 + $0x50] sm:$0xff]  ;;  %v17280_v36 = vpack.c.bf16 %v700_v33, %v699_v32  ;;  %v684_v37 = vld [vmem:[%s17218_s17 + $0x58] sm:$0xff]  ;;  %v701_v38 = vld [vmem:[%s17218_s17 + $0xe0] sm:$0xff] }
 0x16c   : > { %12651 = vmatprep.subr.bf16.mxu0 %v17243_v15  ;;  %15016 = vmatprep.subr.bf16.mxu1 %v17243_v15  ;;  %19925 = vst [vmem:[#allocation39_spill] sm:$0xff] %v17269_v30  ;;  %v702_v39 = vld [vmem:[%s17218_s17 + $0xe8] sm:$0xff]  ;;  %v17287_v40 = vpack.c.bf16 %v684_v37, %v683_v35  ;;  %v685_v41 = vld [vmem:[%s17218_s17 + $0x60] sm:$0xff]  ;;  %v703_v44 = vld [vmem:[%s17218_s17 + $0xf0] sm:$0xff] }
 0x16d   : > { %19926 = vst [vmem:[#allocation40_spill] sm:$0xff] %v17275_v34  ;;  %19927 = vst [vmem:[#allocation41_spill] sm:$0xff] %v17280_v36  ;;  %v17292_v42 = vpack.c.bf16 %v702_v39, %v701_v38  ;;  %v686_v43 = vld [vmem:[%s17218_s17 + $0x68] sm:$0xff]  ;;  %v704_v45 = vld [vmem:[%s17218_s17 + $0xf8] sm:$0xff] }
 0x16e   : > { %19928 = vst [vmem:[#allocation42_spill] sm:$0xff] %v17287_v40  ;;  %v17299_v46 = vpack.c.bf16 %v686_v43, %v685_v41  ;;  %v687_v47 = vld [vmem:[%s17218_s17 + $0x70] sm:$0xff]  ;;  %v17304_v48 = vpack.c.bf16 %v704_v45, %v703_v44  ;;  %v688_v49 = vld [vmem:[%s17218_s17 + $0x78] sm:$0xff]  ;;  %v15525_v3 = vld [vmem:[#allocation3 + $0x40] ss:$8 sps:$4 sm:$0xff]  }
 0x16f   : > { %12652 = vmatpush3.bf16.msra.mxu0 %v17251_v20  ;;  %15024 = vmatpush3.bf16.msra.mxu1 %v17251_v20  ;;  %19929 = vst [vmem:[#allocation43_spill] sm:$0xff] %v17292_v42  ;;  %v17309_v50 = vpack.c.bf16 %v688_v49, %v687_v47  ;;  %v15523_v1 = vld [vmem:[#allocation3 + $0x44] ss:$8 sps:$4 sm:$0xff]   ;;  %v15526_v2 = vld [vmem:[#allocation3 + $0x154] ss:$8 sps:$4 sm:$0xff]  }
 0x170   : > { %12653 = vmatprep.subr.bf16.mxu0 %v17255_v21  ;;  %15017 = vmatprep.subr.bf16.mxu1 %v17255_v21  ;;  %19930 = vst [vmem:[#allocation44_spill] sm:$0xff] %v17299_v46  ;;  %19931 = vst [vmem:[#allocation45_spill] sm:$0xff] %v17304_v48  ;;  %v15528_v5 = vld [vmem:[#allocation3 + $0x150] ss:$8 sps:$4 sm:$0xff]   ;;  %v15529_v6 = vld [vmem:[#allocation3 + $0x54] ss:$8 sps:$4 sm:$0xff]  }
 0x171   : > { %19932 = vst [vmem:[#allocation46_spill] sm:$0xff] %v17309_v50  ;;  %v15532_v7 = vld [vmem:[#allocation3 + $0x164] ss:$8 sps:$4 sm:$0xff]   ;;  %v15531_v10 = vld [vmem:[#allocation3 + $0x50] ss:$8 sps:$4 sm:$0xff]  }
 0x172   : > { %v15534_v11 = vld [vmem:[#allocation3 + $0x160] ss:$8 sps:$4 sm:$0xff]   ;;  %v15535_v12 = vld [vmem:[#allocation3 + $0x64] ss:$8 sps:$4 sm:$0xff]   ;;  %v15538_v13 = vld [vmem:[#allocation3 + $0x174] ss:$8 sps:$4 sm:$0xff]  }
 0x173   : > { %12654 = vmatpush3.bf16.msra.mxu0 %v17264_v28  ;;  %15025 = vmatpush3.bf16.msra.mxu1 %v17264_v28  ;;  %v15537_v16 = vld [vmem:[#allocation3 + $0x60] ss:$8 sps:$4 sm:$0xff]   ;;  %v15540_v17 = vld [vmem:[#allocation3 + $0x170] ss:$8 sps:$4 sm:$0xff]   ;;  %v15541_v18 = vld [vmem:[#allocation3 + $0x74] ss:$8 sps:$4 sm:$0xff]  }
 0x174   : > { %12655 = vmatprep.subr.bf16.mxu0 %v17269_v30  ;;  %15018 = vmatprep.subr.bf16.mxu1 %v17269_v30  ;;  %v15544_v19 = vld [vmem:[#allocation3 + $0x184] ss:$8 sps:$4 sm:$0xff]   ;;  %v15543_v22 = vld [vmem:[#allocation3 + $0x70] ss:$8 sps:$4 sm:$0xff]   ;;  %v15546_v23 = vld [vmem:[#allocation3 + $0x180] ss:$8 sps:$4 sm:$0xff]  }
 0x175   : > { %v15547_v24 = vld [vmem:[#allocation3 + $0x84] ss:$8 sps:$4 sm:$0xff]   ;;  %v15550_v25 = vld [vmem:[#allocation3 + $0x194] ss:$8 sps:$4 sm:$0xff]   ;;  %v15549_v26 = vld [vmem:[#allocation3 + $0x80] ss:$8 sps:$4 sm:$0xff]  }
 0x176   : > { %v15552_v27 = vld [vmem:[#allocation3 + $0x190] ss:$8 sps:$4 sm:$0xff]   ;;  %v15553_v29 = vld [vmem:[#allocation3 + $0x94] ss:$8 sps:$4 sm:$0xff]   ;;  %v15558_v33 = vld [vmem:[#allocation3 + $0x1a0] ss:$8 sps:$4 sm:$0xff]  }
 0x177   : > { %12656 = vmatpush3.bf16.msra.mxu0 %v17275_v34  ;;  %15026 = vmatpush3.bf16.msra.mxu1 %v17275_v34  ;;  %v15555_v32 = vld [vmem:[#allocation3 + $0x90] ss:$8 sps:$4 sm:$0xff]   ;;  %v15559_v35 = vld [vmem:[#allocation3 + $0xa4] ss:$8 sps:$4 sm:$0xff]   ;;  %v15562_v37 = vld [vmem:[#allocation3 + $0x1b4] ss:$8 sps:$4 sm:$0xff]  }
 0x178   : > { %12657 = vmatprep.subr.bf16.mxu0 %v17280_v36  ;;  %15019 = vmatprep.subr.bf16.mxu1 %v17280_v36  ;;  %v15561_v38 = vld [vmem:[#allocation3 + $0xa0] ss:$8 sps:$4 sm:$0xff]   ;;  %v15564_v39 = vld [vmem:[#allocation3 + $0x1b0] ss:$8 sps:$4 sm:$0xff]   ;;  %v15565_v41 = vld [vmem:[#allocation3 + $0xb4] ss:$8 sps:$4 sm:$0xff]  }
 0x179   : > { %v15568_v43 = vld [vmem:[#allocation3 + $0x1c4] ss:$8 sps:$4 sm:$0xff]   ;;  %v15567_v44 = vld [vmem:[#allocation3 + $0xb0] ss:$8 sps:$4 sm:$0xff]   ;;  %v15570_v45 = vld [vmem:[#allocation3 + $0x1c0] ss:$8 sps:$4 sm:$0xff]  }
 0x17a   : > { %v15571_v47 = vld [vmem:[#allocation3 + $0xc4] ss:$8 sps:$4 sm:$0xff]   ;;  %v15574_v49 = vld [vmem:[#allocation3 + $0x1d4] ss:$8 sps:$4 sm:$0xff]  }
 0x17b   : > { %12658 = vmatpush3.bf16.msra.mxu0 %v17287_v40  ;;  %15027 = vmatpush3.bf16.msra.mxu1 %v17287_v40 }
 0x17c   : > { %12659 = vmatprep.subr.bf16.mxu0 %v17292_v42  ;;  %15020 = vmatprep.subr.bf16.mxu1 %v17292_v42 }
 0x17f   : > { %12660 = vmatpush3.bf16.msra.mxu0 %v17299_v46  ;;  %15028 = vmatpush3.bf16.msra.mxu1 %v17299_v46 }
 0x180   : > { %12661 = vmatprep.subr.bf16.mxu0 %v17304_v48  ;;  %15021 = vmatprep.subr.bf16.mxu1 %v17304_v48 }
 0x183   : > { %12662 = vmatpush3.bf16.msra.mxu0 %v17309_v50  ;;  %15029 = vmatpush3.bf16.msra.mxu1 %v17309_v50 }
 0x184   : > { %12905 = vmatprep.subr.bf16.mxu1 %v17223_v4  ;;  %12759 = vmatprep.subr.bf16.mxu0 %v17223_v4 }
 0x186   : > { %946 = vmatmul.mubr.bf16.vlgmr.msra.gmra.mrb[0].mxu0 %v15499_v51  ;;  %1325 = vmatmul.mubr.bf16.vlgmr.msra.gmra.mrb[0].mxu1 %v15502_v52  ;;  %v15573_v51 = vld [vmem:[#allocation3 + $0xc0] ss:$8 sps:$4 sm:$0xff]   ;;  %v15576_v52 = vld [vmem:[#allocation3 + $0x1d0] ss:$8 sps:$4 sm:$0xff]  }
 0x187   : > { %953 = vmatprep.mubr.bf16.mxu0 %v15505_v53  ;;  %1332 = vmatprep.mubr.bf16.mxu1 %v15508_v54  ;;  %v15577_v53 = vld [vmem:[#allocation3 + $0xd4] ss:$8 sps:$4 sm:$0xff]   ;;  %v15580_v54 = vld [vmem:[#allocation3 + $0x1e4] ss:$8 sps:$4 sm:$0xff]  }
 0x188   : > { %12906 = vmatpush3.bf16.msra.mxu1 %v17228_v8  ;;  %12760 = vmatpush3.bf16.msra.mxu0 %v17228_v8 }
 0x189   : > { %12907 = vmatprep.subr.bf16.mxu1 %v17230_v9  ;;  %12761 = vmatprep.subr.bf16.mxu0 %v17230_v9 }
 0x18c   : > { %12908 = vmatpush3.bf16.msra.mxu1 %v17239_v14  ;;  %12762 = vmatpush3.bf16.msra.mxu0 %v17239_v14 }
 0x18d   : > { %12909 = vmatprep.subr.bf16.mxu1 %v17243_v15  ;;  %12763 = vmatprep.subr.bf16.mxu0 %v17243_v15 }
 0x18e   : > { %954 = vmatmul.mubr.bf16.gmra.mrb[4].mxu0 %v15507_v55  ;;  %1333 = vmatmul.mubr.bf16.gmra.mrb[4].mxu1 %v15510_v56  ;;  %v15579_v55 = vld [vmem:[#allocation3 + $0xd0] ss:$8 sps:$4 sm:$0xff]   ;;  %v15582_v56 = vld [vmem:[#allocation3 + $0x1e0] ss:$8 sps:$4 sm:$0xff]  }
 0x18f   : > { %961 = vmatprep.mubr.bf16.mxu0 %v15511_v57  ;;  %1340 = vmatprep.mubr.bf16.mxu1 %v15514_v58  ;;  %v15583_v57 = vld [vmem:[#allocation3 + $0xe4] ss:$8 sps:$4 sm:$0xff]   ;;  %v15586_v58 = vld [vmem:[#allocation3 + $0x1f4] ss:$8 sps:$4 sm:$0xff]  }
 0x190   : > { %12910 = vmatpush3.bf16.msra.mxu1 %v17251_v20  ;;  %12764 = vmatpush3.bf16.msra.mxu0 %v17251_v20 }
 0x191   : > { %12911 = vmatprep.subr.bf16.mxu1 %v17255_v21  ;;  %12765 = vmatprep.subr.bf16.mxu0 %v17255_v21 }
 0x194   : > { %12912 = vmatpush3.bf16.msra.mxu1 %v17264_v28  ;;  %12766 = vmatpush3.bf16.msra.mxu0 %v17264_v28 }
 0x195   : > { %12913 = vmatprep.subr.bf16.mxu1 %v17269_v30  ;;  %12767 = vmatprep.subr.bf16.mxu0 %v17269_v30 }
 0x196   : > { %962 = vmatmul.mubr.bf16.gmra.mrb[8].mxu0 %v15513_v59  ;;  %1341 = vmatmul.mubr.bf16.gmra.mrb[8].mxu1 %v15516_v60  ;;  %v15585_v59 = vld [vmem:[#allocation3 + $0xe0] ss:$8 sps:$4 sm:$0xff]   ;;  %v15588_v60 = vld [vmem:[#allocation3 + $0x1f0] ss:$8 sps:$4 sm:$0xff]  }
 0x197   : > { %969 = vmatprep.mubr.bf16.mxu0 %v15517_v61  ;;  %1348 = vmatprep.mubr.bf16.mxu1 %v15520_v62  ;;  %v15589_v61 = vld [vmem:[#allocation3 + $0xf4] ss:$8 sps:$4 sm:$0xff]   ;;  %v15594_v62 = vld [vmem:[#allocation3 + $0x204] ss:$8 sps:$4 sm:$0xff]  }
 0x198   : > { %12914 = vmatpush3.bf16.msra.mxu1 %v17275_v34  ;;  %12768 = vmatpush3.bf16.msra.mxu0 %v17275_v34 }
 0x199   : > { %12915 = vmatprep.subr.bf16.mxu1 %v17280_v36  ;;  %12769 = vmatprep.subr.bf16.mxu0 %v17280_v36 }
 0x19c   : > { %12916 = vmatpush3.bf16.msra.mxu1 %v17287_v40  ;;  %12770 = vmatpush3.bf16.msra.mxu0 %v17287_v40 }
 0x19d   : > { %12917 = vmatprep.subr.bf16.mxu1 %v17292_v42  ;;  %12771 = vmatprep.subr.bf16.mxu0 %v17292_v42 }
 0x19e   : > { %970 = vmatmul.mubr.bf16.gmra.mrb[12].mxu0 %v15519_v63  ;;  %1349 = vmatmul.mubr.bf16.gmra.mrb[12].mxu1 %v15522_v0  ;;  %v15591_v63 = vld [vmem:[#allocation3 + $0xf0] ss:$8 sps:$4 sm:$0xff]   ;;  %v15592_v0 = vld [vmem:[#allocation3 + $0x200] ss:$8 sps:$4 sm:$0xff]  }
 0x19f   : > { %977 = vmatprep.mubr.bf16.mxu0 %v15523_v1  ;;  %1356 = vmatprep.mubr.bf16.mxu1 %v15526_v2  ;;  %v15597_v1 = vld [vmem:[#allocation3 + $0x104] ss:$8 sps:$4 sm:$0xff]   ;;  %v15598_v2 = vld [vmem:[#allocation3 + $0x214] ss:$8 sps:$4 sm:$0xff]  }
 0x1a0   : > { %12918 = vmatpush3.bf16.msra.mxu1 %v17299_v46  ;;  %12772 = vmatpush3.bf16.msra.mxu0 %v17299_v46 }
 0x1a1   : > { %12919 = vmatprep.subr.bf16.mxu1 %v17304_v48  ;;  %12773 = vmatprep.subr.bf16.mxu0 %v17304_v48 }
 0x1a4   : > { %12920 = vmatpush3.bf16.msra.mxu1 %v17309_v50  ;;  %12774 = vmatpush3.bf16.msra.mxu0 %v17309_v50 }
 0x1a5   : > { %13034 = vmatprep.subr.bf16.mxu1 %v17223_v4 }
 0x1a6   : > { %978 = vmatmul.mubr.bf16.gmra.mrb[16].mxu0 %v15525_v3  ;;  %1357 = vmatmul.mubr.bf16.gmra.mrb[16].mxu1 %v15528_v5  ;;  %v15595_v3 = vld [vmem:[#allocation3 + $0x100] ss:$8 sps:$4 sm:$0xff]   ;;  %v15600_v5 = vld [vmem:[#allocation3 + $0x210] ss:$8 sps:$4 sm:$0xff]  }
 0x1a7   : > { %985 = vmatprep.mubr.bf16.mxu0 %v15529_v6  ;;  %1364 = vmatprep.mubr.bf16.mxu1 %v15532_v7  ;;  %v15601_v6 = vld [vmem:[#allocation3 + $0x224] ss:$8 sps:$4 sm:$0xff]   ;;  %v15603_v7 = vld [vmem:[#allocation3 + $0x220] ss:$8 sps:$4 sm:$0xff]  }
 0x1ae   : > { %986 = vmatmul.mubr.bf16.gmra.mrb[20].mxu0 %v15531_v10  ;;  %1365 = vmatmul.mubr.bf16.gmra.mrb[20].mxu1 %v15534_v11  ;;  %v15604_v10 = vld [vmem:[#allocation3 + $0x234] ss:$8 sps:$4 sm:$0xff]   ;;  %v15606_v11 = vld [vmem:[#allocation3 + $0x230] ss:$8 sps:$4 sm:$0xff]  }
 0x1af   : > { %993 = vmatprep.mubr.bf16.mxu0 %v15535_v12  ;;  %1372 = vmatprep.mubr.bf16.mxu1 %v15538_v13  ;;  %v15607_v12 = vld [vmem:[#allocation3 + $0x244] ss:$8 sps:$4 sm:$0xff]   ;;  %v15609_v13 = vld [vmem:[#allocation3 + $0x240] ss:$8 sps:$4 sm:$0xff]  }
 0x1b6   : > { %994 = vmatmul.mubr.bf16.gmra.mrb[24].mxu0 %v15537_v16  ;;  %1373 = vmatmul.mubr.bf16.gmra.mrb[24].mxu1 %v15540_v17  ;;  %v15610_v16 = vld [vmem:[#allocation3 + $0x254] ss:$8 sps:$4 sm:$0xff]   ;;  %v15612_v17 = vld [vmem:[#allocation3 + $0x250] ss:$8 sps:$4 sm:$0xff]  }
 0x1b7   : > { %1001 = vmatprep.mubr.bf16.mxu0 %v15541_v18  ;;  %1380 = vmatprep.mubr.bf16.mxu1 %v15544_v19  ;;  %v15613_v18 = vld [vmem:[#allocation3 + $0x264] ss:$8 sps:$4 sm:$0xff]   ;;  %v15615_v19 = vld [vmem:[#allocation3 + $0x260] ss:$8 sps:$4 sm:$0xff]  }
 0x1be   : > { %1002 = vmatmul.mubr.bf16.gmra.mrb[28].mxu0 %v15543_v22  ;;  %1381 = vmatmul.mubr.bf16.gmra.mrb[28].mxu1 %v15546_v23  ;;  %v15616_v22 = vld [vmem:[#allocation3 + $0x274] ss:$8 sps:$4 sm:$0xff]   ;;  %v15618_v23 = vld [vmem:[#allocation3 + $0x270] ss:$8 sps:$4 sm:$0xff]  }
 0x1bf   : > { %1009 = vmatprep.mubr.bf16.mxu0 %v15547_v24  ;;  %1388 = vmatprep.mubr.bf16.mxu1 %v15550_v25  ;;  %v15619_v24 = vld [vmem:[#allocation3 + $0x284] ss:$8 sps:$4 sm:$0xff]   ;;  %v15621_v25 = vld [vmem:[#allocation3 + $0x280] ss:$8 sps:$4 sm:$0xff]  }
 0x1c6   : > { %1010 = vmatmul.mubr.bf16.gmra.mrb[32].mxu0 %v15549_v26  ;;  %1389 = vmatmul.mubr.bf16.gmra.mrb[32].mxu1 %v15552_v27  ;;  %v15622_v26 = vld [vmem:[#allocation3 + $0x294] ss:$8 sps:$4 sm:$0xff]   ;;  %v15624_v27 = vld [vmem:[#allocation3 + $0x290] ss:$8 sps:$4 sm:$0xff]  }
 0x1c7   : > { %1017 = vmatprep.mubr.bf16.mxu0 %v15553_v29  ;;  %1396 = vmatprep.mubr.bf16.mxu1 %v15556_v31  ;;  %v15625_v29 = vld [vmem:[#allocation3 + $0x2a4] ss:$8 sps:$4 sm:$0xff]   ;;  %v15627_v31 = vld [vmem:[#allocation3 + $0x2a0] ss:$8 sps:$4 sm:$0xff]  }
 0x1ce   : > { %1018 = vmatmul.mubr.bf16.gmra.mrb[36].mxu0 %v15555_v32  ;;  %1397 = vmatmul.mubr.bf16.gmra.mrb[36].mxu1 %v15558_v33  ;;  %v15628_v32 = vld [vmem:[#allocation3 + $0x2b4] ss:$8 sps:$4 sm:$0xff]   ;;  %v15630_v33 = vld [vmem:[#allocation3 + $0x2b0] ss:$8 sps:$4 sm:$0xff]  }
 0x1cf   : > { %1025 = vmatprep.mubr.bf16.mxu0 %v15559_v35  ;;  %1404 = vmatprep.mubr.bf16.mxu1 %v15562_v37  ;;  %v15631_v35 = vld [vmem:[#allocation3 + $0x2c4] ss:$8 sps:$4 sm:$0xff]  }
 0x1d6   : > { %1026 = vmatmul.mubr.bf16.gmra.mrb[40].mxu0 %v15561_v38  ;;  %1405 = vmatmul.mubr.bf16.gmra.mrb[40].mxu1 %v15564_v39  ;;  %v15633_v39 = vld [vmem:[#allocation3 + $0x2c0] ss:$8 sps:$4 sm:$0xff]  }
 0x1d7   : > { %1033 = vmatprep.mubr.bf16.mxu0 %v15565_v41  ;;  %1412 = vmatprep.mubr.bf16.mxu1 %v15568_v43 }
 0x1de   : > { %1034 = vmatmul.mubr.bf16.gmra.mrb[44].mxu0 %v15567_v44  ;;  %1413 = vmatmul.mubr.bf16.gmra.mrb[44].mxu1 %v15570_v45  ;;  %v15634_v44 = vld [vmem:[#allocation3 + $0x2d4] ss:$8 sps:$4 sm:$0xff]   ;;  %v16748_v45 = vmov 65535  }
 0x1df   : > { %1041 = vmatprep.mubr.bf16.mxu0 %v15571_v47  ;;  %1420 = vmatprep.mubr.bf16.mxu1 %v15574_v49  ;;  %v1514_v47 = vsel %vm1512_vm0, 4294967295, %v16748_v45 }
 0x1e6   : > { %1042 = vmatmul.mubr.bf16.gmra.mrb[48].mxu0 %v15573_v51  ;;  %1421 = vmatmul.mubr.bf16.gmra.mrb[48].mxu1 %v15576_v52 }
 0x1e7   : > { %1049 = vmatprep.mubr.bf16.mxu0 %v15577_v53  ;;  %1428 = vmatprep.mubr.bf16.mxu1 %v15580_v54  ;;  %v1462_v54 = vld [vmem:[#allocation5 + $0x2] sm:$0x3] }
 0x1ee   : > { %1050 = vmatmul.mubr.bf16.gmra.mrb[52].mxu0 %v15579_v55  ;;  %1429 = vmatmul.mubr.bf16.gmra.mrb[52].mxu1 %v15582_v56  ;;  %v17369_v55 = vsel %vm1513_vm1, %v1514_v47, 0 }
 0x1ef   : > { %1057 = vmatprep.mubr.bf16.mxu0 %v15583_v57  ;;  %1436 = vmatprep.mubr.bf16.mxu1 %v15586_v58  ;;  %19933 = vst [vmem:[#allocation47_spill] sm:$0xff] %v17369_v55  ;;  %v1517_v58 = vand.u32 %v17369_v55, %v1462_v54 }
 0x1f1   : > { %14330 = vmatprep.subr.bf16.mxu0 %v1517_v58 }
 0x1f6   : > { %1058 = vmatmul.mubr.bf16.gmra.mrb[56].mxu0 %v15585_v59  ;;  %1437 = vmatmul.mubr.bf16.gmra.mrb[56].mxu1 %v15588_v60 }
 0x1f7   : > { %1065 = vmatprep.mubr.bf16.mxu0 %v15589_v61  ;;  %2117 = vmatprep.mubr.bf16.mxu1 %v15594_v62 }
 0x1fe   : > { %1066 = vmatmul.mubr.bf16.gmra.mrb[60].mxu0 %v15591_v63  ;;  %2118 = vmatmul.mubr.bf16.vlgmr.msra.gmra.mrb[60].mxu1 %v15592_v0 }
 0x1ff   : > { %1316 = vmatprep.mubr.bf16.mxu0 %v15597_v1  ;;  %2125 = vmatprep.mubr.bf16.mxu1 %v15598_v2  ;;  %v15636_v1 = vld [vmem:[#allocation3 + $0x2d0] ss:$8 sps:$4 sm:$0xff]  }
 0x200   : > { %13035 = vmatpush3.bf16.msra.mxu1 %v17228_v8 }
 0x201   : > { %13036 = vmatprep.subr.bf16.mxu1 %v17230_v9 }
 0x204   : > { %13037 = vmatpush3.bf16.msra.mxu1 %v17239_v14 }
 0x205   : > { %13038 = vmatprep.subr.bf16.mxu1 %v17243_v15 }
 0x206   : > { %1317 = vmatmul.mubr.bf16.vlgmr.msra.gmra.mrb[64].mxu0 %v15595_v3  ;;  %2126 = vmatmul.mubr.bf16.gmra.mrb[64].mxu1 %v15600_v5  ;;  %v15637_v5 = vld [vmem:[#allocation3 + $0x2e4] ss:$8 sps:$4 sm:$0xff]  }
 0x207   : > { %2133 = vmatprep.mubr.bf16.mxu1 %v15601_v6  ;;  %14331 = vmatpush3.bf16.msra.mxu0 %v1517_v58 }
 0x208   : > { %13039 = vmatpush3.bf16.msra.mxu1 %v17251_v20 }
 0x209   : > { %13040 = vmatprep.subr.bf16.mxu1 %v17255_v21 }
 0x20c   : > { %13041 = vmatpush3.bf16.msra.mxu1 %v17264_v28 }
 0x20d   : > { %13042 = vmatprep.subr.bf16.mxu1 %v17269_v30 }
 0x20e   : > { %2134 = vmatmul.mubr.bf16.gmra.mrb[68].mxu1 %v15603_v7 }
 0x20f   : > { %2141 = vmatprep.mubr.bf16.mxu1 %v15604_v10 }
 0x210   : > { %13043 = vmatpush3.bf16.msra.mxu1 %v17275_v34 }
 0x211   : > { %13044 = vmatprep.subr.bf16.mxu1 %v17280_v36 }
 0x214   : > { %13045 = vmatpush3.bf16.msra.mxu1 %v17287_v40 }
 0x215   : > { %13046 = vmatprep.subr.bf16.mxu1 %v17292_v42 }
 0x216   : > { %2142 = vmatmul.mubr.bf16.gmra.mrb[72].mxu1 %v15606_v11 }
 0x217   : > { %2149 = vmatprep.mubr.bf16.mxu1 %v15607_v12 }
 0x218   : > { %13047 = vmatpush3.bf16.msra.mxu1 %v17299_v46 }
 0x219   : > { %13048 = vmatprep.subr.bf16.mxu1 %v17304_v48 }
 0x21c   : > { %13049 = vmatpush3.bf16.msra.mxu1 %v17309_v50 }
 0x21d   : > { %13292 = vmatprep.subr.bf16.mxu1 %v17223_v4 }
 0x21e   : > { %2150 = vmatmul.mubr.bf16.gmra.mrb[76].mxu1 %v15609_v13 }
 0x21f   : > { %2157 = vmatprep.mubr.bf16.mxu1 %v15610_v16 }
 0x226   : > { %2158 = vmatmul.mubr.bf16.gmra.mrb[80].mxu1 %v15612_v17 }
 0x227   : > { %2165 = vmatprep.mubr.bf16.mxu1 %v15613_v18 }
 0x22e   : > { %2166 = vmatmul.mubr.bf16.gmra.mrb[84].mxu1 %v15615_v19 }
 0x22f   : > { %2173 = vmatprep.mubr.bf16.mxu1 %v15616_v22 }
 0x236   : > { %2174 = vmatmul.mubr.bf16.gmra.mrb[88].mxu1 %v15618_v23 }
 0x237   : > { %2181 = vmatprep.mubr.bf16.mxu1 %v15619_v24 }
 0x23e   : > { %2182 = vmatmul.mubr.bf16.gmra.mrb[92].mxu1 %v15621_v25 }
 0x23f   : > { %2189 = vmatprep.mubr.bf16.mxu1 %v15622_v26  ;;  %v15639_v26 = vld [vmem:[#allocation3 + $0x2e0] ss:$8 sps:$4 sm:$0xff]  }
 0x246   : > { %2190 = vmatmul.mubr.bf16.gmra.mrb[96].mxu1 %v15624_v27 }
 0x247   : > { %2197 = vmatprep.mubr.bf16.mxu1 %v15625_v29 }
 0x24e   : > { %2198 = vmatmul.mubr.bf16.gmra.mrb[100].mxu1 %v15627_v31 }
 0x24f   : > { %2205 = vmatprep.mubr.bf16.mxu1 %v15628_v32 }
 0x256   : > { %2206 = vmatmul.mubr.bf16.gmra.mrb[104].mxu1 %v15630_v33  ;;  %v15640_v33 = vld [vmem:[#allocation3 + $0x2f4] ss:$8 sps:$4 sm:$0xff]  }
 0x257   : > { %2213 = vmatprep.mubr.bf16.mxu1 %v15631_v35 }
 0x259   : > { %v12663_v37 = vpop.f32.mrb[0].mxu0  ;;  %v12781_v38 = vpop.f32.mrb[0].mxu1 }
 0x25a   : > { %v12664_v41 = vpop.f32.mrb[1].mxu0  ;;  %v12782_v43 = vpop.f32.mrb[1].mxu1 }
 0x25b   : > { %v17365_v49 = vadd.f32 %v12664_v41, %v12663_v37  ;;  %v12666_v51 = vpop.f32.mrb[2].mxu0  ;;  %v17367_v52 = vadd.f32 %v12782_v43, %v12781_v38  ;;  %v12784_v53 = vpop.f32.mrb[2].mxu1  ;;  %v1090_v43 = vld [vmem:[#allocation5] sm:$0x3] }
 0x25c   : > { %v12667_v56 = vpop.f32.mrb[3].mxu0  ;;  %v12785_v57 = vpop.f32.mrb[3].mxu1  ;;  %v17484_v19 = vand.u32 %v17369_v55, %v1090_v43 }
 0x25d   : > { %v17372_v59 = vadd.f32 %v12667_v56, %v12666_v51  ;;  %v17374_v60 = vadd.f32 %v12785_v57, %v12784_v53  ;;  %v15642_v53 = vld [vmem:[#allocation3 + $0x2f0] ss:$8 sps:$4 sm:$0xff]  }
 0x25e   : > { %2214 = vmatmul.mubr.bf16.gmra.mrb[108].mxu1 %v15633_v39  ;;  %14364 = vmatprep.subr.bf16.mxu0 %v17484_v19 }
 0x25f   : > { %2221 = vmatprep.mubr.bf16.mxu1 %v15634_v44 }
 0x261   : > { %v12669_v63 = vpop.f32.mrb[4].mxu0  ;;  %v12787_v0 = vpop.f32.mrb[4].mxu1 }
 0x262   : > { %v12670_v2 = vpop.f32.mrb[5].mxu0  ;;  %v12788_v3 = vpop.f32.mrb[5].mxu1 }
 0x263   : > { %v17380_v6 = vadd.f32 %v12670_v2, %v12669_v63  ;;  %v12672_v7 = vpop.f32.mrb[6].mxu0  ;;  %v17382_v10 = vadd.f32 %v12788_v3, %v12787_v0  ;;  %v12790_v11 = vpop.f32.mrb[6].mxu1  ;;  %v15645_v63 = vld [vmem:[#allocation3 + $0x304] ss:$8 sps:$4 sm:$0xff]  }
 0x264   : > { %v12673_v12 = vpop.f32.mrb[7].mxu0  ;;  %v12791_v13 = vpop.f32.mrb[7].mxu1 }
 0x265   : > { %v17384_v16 = vadd.f32 %v12673_v12, %v12672_v7  ;;  %v17386_v17 = vadd.f32 %v12791_v13, %v12790_v11 }
 0x266   : > { %2222 = vmatmul.mubr.bf16.gmra.mrb[112].mxu1 %v15636_v1 }
 0x267   : > { %2229 = vmatprep.mubr.bf16.mxu1 %v15637_v5 }
 0x269   : > { %v12675_v22 = vpop.f32.mrb[8].mxu0  ;;  %v12793_v23 = vpop.f32.mrb[8].mxu1 }
 0x26a   : > { %v12676_v24 = vpop.f32.mrb[9].mxu0  ;;  %v12794_v25 = vpop.f32.mrb[9].mxu1 }
 0x26b   : > { %v17392_v27 = vadd.f32 %v12676_v24, %v12675_v22  ;;  %v12678_v29 = vpop.f32.mrb[10].mxu0  ;;  %v17394_v31 = vadd.f32 %v12794_v25, %v12793_v23  ;;  %v12796_v32 = vpop.f32.mrb[10].mxu1  ;;  %v15643_v23 = vld [vmem:[#allocation3 + $0x300] ss:$8 sps:$4 sm:$0xff]  }
 0x26c   : > { %v12679_v35 = vpop.f32.mrb[11].mxu0  ;;  %v12797_v37 = vpop.f32.mrb[11].mxu1 }
 0x26d   : > { %v17396_v38 = vadd.f32 %v12679_v35, %v12678_v29  ;;  %v17398_v39 = vadd.f32 %v12797_v37, %v12796_v32  ;;  %v15646_v32 = vld [vmem:[#allocation3 + $0x314] ss:$8 sps:$4 sm:$0xff]  }
 0x26e   : > { %2230 = vmatmul.mubr.bf16.gmra.mrb[116].mxu1 %v15639_v26 }
 0x26f   : > { %2237 = vmatprep.mubr.bf16.mxu1 %v15640_v33 }
 0x271   : > { %v12681_v44 = vpop.f32.mrb[12].mxu0  ;;  %v12799_v45 = vpop.f32.mrb[12].mxu1 }
 0x272   : > { %v12682_v47 = vpop.f32.mrb[13].mxu0  ;;  %v12800_v51 = vpop.f32.mrb[13].mxu1 }
 0x273   : > { %v17404_v54 = vadd.f32 %v12682_v47, %v12681_v44  ;;  %v12684_v56 = vpop.f32.mrb[14].mxu0  ;;  %v17406_v57 = vadd.f32 %v12800_v51, %v12799_v45  ;;  %v12802_v58 = vpop.f32.mrb[14].mxu1 }
 0x274   : > { %v12685_v0 = vpop.f32.mrb[15].mxu0  ;;  %v12803_v1 = vpop.f32.mrb[15].mxu1 }
 0x275   : > { %19934 = vst [vmem:[#allocation48_spill] sm:$0xff] %v17404_v54  ;;  %v17408_v2 = vadd.f32 %v12685_v0, %v12684_v56  ;;  %v17410_v3 = vadd.f32 %v12803_v1, %v12802_v58 }
 0x276   : > { %2238 = vmatmul.mubr.bf16.gmra.mrb[120].mxu1 %v15642_v53 }
 0x277   : > { %19935 = vst [vmem:[#allocation49_spill] sm:$0xff] %v17408_v2  ;;  %2733 = vmatprep.mubr.bf16.mxu1 %v15645_v63  ;;  %v15648_v63 = vld [vmem:[#allocation3 + $0x310] ss:$8 sps:$4 sm:$0xff]  }
 0x279   : > { %v12687_v11 = vpop.f32.mrb[16].mxu0  ;;  %v12805_v12 = vpop.f32.mrb[16].mxu1 }
 0x27a   : > { %v12688_v13 = vpop.f32.mrb[17].mxu0  ;;  %v12806_v22 = vpop.f32.mrb[17].mxu1 }
 0x27b   : > { %v17416_v24 = vadd.f32 %v12688_v13, %v12687_v11  ;;  %v12690_v25 = vpop.f32.mrb[18].mxu0  ;;  %v17418_v26 = vadd.f32 %v12806_v22, %v12805_v12  ;;  %v12808_v29 = vpop.f32.mrb[18].mxu1  ;;  %v15649_v13 = vld [vmem:[#allocation3 + $0x324] ss:$8 sps:$4 sm:$0xff]  }
 0x27c   : > { %v12691_v33 = vpop.f32.mrb[19].mxu0  ;;  %v12809_v35 = vpop.f32.mrb[19].mxu1 }
 0x27d   : > { %19936 = vst [vmem:[#allocation50_spill] sm:$0xff] %v17416_v24  ;;  %v17420_v37 = vadd.f32 %v12691_v33, %v12690_v25  ;;  %v17422_v44 = vadd.f32 %v12809_v35, %v12808_v29 }
 0x27e   : > { %2734 = vmatmul.mubr.bf16.vlgmr.msra.gmra.mrb[124].mxu1 %v15643_v23 }
 0x27f   : > { %19937 = vst [vmem:[#allocation51_spill] sm:$0xff] %v17420_v37  ;;  %2741 = vmatprep.mubr.bf16.mxu1 %v15646_v32  ;;  %13293 = vmatpush3.bf16.msra.mxu1 %v17228_v8 }
 0x280   : > { %13294 = vmatprep.subr.bf16.mxu1 %v17230_v9 }
 0x281   : > { %v12693_v51 = vpop.f32.mrb[20].mxu0  ;;  %v12811_v53 = vpop.f32.mrb[20].mxu1 }
 0x282   : > { %v12694_v56 = vpop.f32.mrb[21].mxu0  ;;  %v12812_v58 = vpop.f32.mrb[21].mxu1 }
 0x283   : > { %v17430_v0 = vadd.f32 %v12694_v56, %v12693_v51  ;;  %v12696_v1 = vpop.f32.mrb[22].mxu0  ;;  %v17432_v11 = vadd.f32 %v12812_v58, %v12811_v53  ;;  %v12814_v12 = vpop.f32.mrb[22].mxu1  ;;  %13295 = vmatpush3.bf16.msra.mxu1 %v17239_v14  ;;  %v15651_v58 = vld [vmem:[#allocation3 + $0x320] ss:$8 sps:$4 sm:$0xff]  }
 0x284   : > { %v12697_v22 = vpop.f32.mrb[23].mxu0  ;;  %v12815_v23 = vpop.f32.mrb[23].mxu1  ;;  %13296 = vmatprep.subr.bf16.mxu1 %v17243_v15 }
 0x285   : > { %19938 = vst [vmem:[#allocation52_spill] sm:$0xff] %v17430_v0  ;;  %v17436_v25 = vadd.f32 %v12697_v22, %v12696_v1  ;;  %v17438_v29 = vadd.f32 %v12815_v23, %v12814_v12  ;;  %v15652_v23 = vld [vmem:[#allocation3 + $0x334] ss:$8 sps:$4 sm:$0xff]  }
 0x286   : > { %2742 = vmatmul.mubr.bf16.gmra.mrb[128].mxu1 %v15648_v63 }
 0x287   : > { %19939 = vst [vmem:[#allocation53_spill] sm:$0xff] %v17436_v25  ;;  %2749 = vmatprep.mubr.bf16.mxu1 %v15649_v13  ;;  %13297 = vmatpush3.bf16.msra.mxu1 %v17251_v20 }
 0x288   : > { %13298 = vmatprep.subr.bf16.mxu1 %v17255_v21 }
 0x289   : > { %v12699_v35 = vpop.f32.mrb[24].mxu0  ;;  %v12817_v51 = vpop.f32.mrb[24].mxu1 }
 0x28a   : > { %v12700_v53 = vpop.f32.mrb[25].mxu0  ;;  %v12818_v56 = vpop.f32.mrb[25].mxu1 }
 0x28b   : > { %v17446_v1 = vadd.f32 %v12700_v53, %v12699_v35  ;;  %v12702_v12 = vpop.f32.mrb[26].mxu0  ;;  %v17448_v63 = vadd.f32 %v12818_v56, %v12817_v51  ;;  %v12820_v22 = vpop.f32.mrb[26].mxu1  ;;  %13299 = vmatpush3.bf16.msra.mxu1 %v17264_v28  ;;  %v15655_v35 = vld [vmem:[#allocation3 + $0x344] ss:$8 sps:$4 sm:$0xff]  }
 0x28c   : > { %v12703_v32 = vpop.f32.mrb[27].mxu0  ;;  %v12821_v13 = vpop.f32.mrb[27].mxu1  ;;  %13300 = vmatprep.subr.bf16.mxu1 %v17269_v30 }
 0x28d   : > { %19940 = vst [vmem:[#allocation54_spill] sm:$0xff] %v17446_v1  ;;  %v17452_v45 = vadd.f32 %v12703_v32, %v12702_v12  ;;  %v17454_v5 = vadd.f32 %v12821_v13, %v12820_v22  ;;  %v15654_v32 = vld [vmem:[#allocation3 + $0x330] ss:$8 sps:$4 sm:$0xff]  }
 0x28e   : > { %2750 = vmatmul.mubr.bf16.gmra.mrb[132].mxu1 %v15651_v58 }
 0x28f   : > { %19941 = vst [vmem:[#allocation55_spill] sm:$0xff] %v17452_v45  ;;  %2757 = vmatprep.mubr.bf16.mxu1 %v15652_v23  ;;  %13301 = vmatpush3.bf16.msra.mxu1 %v17275_v34 }
 0x290   : > { %13302 = vmatprep.subr.bf16.mxu1 %v17280_v36 }
 0x291   : > { %v12705_v53 = vpop.f32.mrb[28].mxu0  ;;  %v12823_v56 = vpop.f32.mrb[28].mxu1 }
 0x292   : > { %v12706_v41 = vpop.f32.mrb[29].mxu0  ;;  %v12824_v18 = vpop.f32.mrb[29].mxu1 }
 0x293   : > { %v17462_v12 = vadd.f32 %v12706_v41, %v12705_v53  ;;  %v12708_v22 = vpop.f32.mrb[30].mxu0  ;;  %v17464_v58 = vadd.f32 %v12824_v18, %v12823_v56  ;;  %v12826_v13 = vpop.f32.mrb[30].mxu1  ;;  %13303 = vmatpush3.bf16.msra.mxu1 %v17287_v40  ;;  %v15658_v41 = vld [vmem:[#allocation3 + $0x354] ss:$8 sps:$4 sm:$0xff]  }
 0x294   : > { %v12709_v61 = vpop.f32.mrb[31].mxu0  ;;  %v12827_v23 = vpop.f32.mrb[31].mxu1  ;;  %13304 = vmatprep.subr.bf16.mxu1 %v17292_v42 }
 0x295   : > { %19942 = vst [vmem:[#allocation56_spill] sm:$0xff] %v17462_v12  ;;  %v17468_v51 = vadd.f32 %v12709_v61, %v12708_v22  ;;  %v17470_v33 = vadd.f32 %v12827_v23, %v12826_v13  ;;  %v15657_v61 = vld [vmem:[#allocation3 + $0x340] ss:$8 sps:$4 sm:$0xff]  }
 0x296   : > { %2758 = vmatmul.mubr.bf16.gmra.mrb[136].mxu1 %v15654_v32 }
 0x297   : > { %19943 = vst [vmem:[#allocation57_spill] sm:$0xff] %v17468_v51  ;;  %2765 = vmatprep.mubr.bf16.mxu1 %v15655_v35  ;;  %13305 = vmatpush3.bf16.msra.mxu1 %v17299_v46  ;;  %v15660_v51 = vld [vmem:[#allocation3 + $0x350] ss:$8 sps:$4 sm:$0xff]  }
 0x298   : > { %13306 = vmatprep.subr.bf16.mxu1 %v17304_v48 }
 0x299   : > { %v12711_v53 = vpop.f32.mrb[32].mxu0  ;;  %v12829_v56 = vpop.f32.mrb[32].mxu1 }
 0x29a   : > { %v12712_v47 = vpop.f32.mrb[33].mxu0  ;;  %v12830_v7 = vpop.f32.mrb[33].mxu1 }
 0x29b   : > { %v17478_v22 = vadd.f32 %v12712_v47, %v12711_v53  ;;  %v12714_v13 = vpop.f32.mrb[34].mxu0  ;;  %v17480_v32 = vadd.f32 %v12830_v7, %v12829_v56  ;;  %v12832_v23 = vpop.f32.mrb[34].mxu1  ;;  %13307 = vmatpush3.bf16.msra.mxu1 %v17309_v50 }
 0x29c   : > { %v12715_v35 = vpop.f32.mrb[35].mxu0  ;;  %v12833_v18 = vpop.f32.mrb[35].mxu1  ;;  %13421 = vmatprep.subr.bf16.mxu1 %v17223_v4 }
 0x29d   : > { %19944 = vst [vmem:[#allocation58_spill] sm:$0xff] %v17478_v22  ;;  %v17487_v62 = vadd.f32 %v12715_v35, %v12714_v13  ;;  %v17489_v12 = vadd.f32 %v12833_v18, %v12832_v23  ;;  %v15661_v23 = vld [vmem:[#allocation3 + $0x364] ss:$8 sps:$4 sm:$0xff]   ;;  %v15663_v22 = vld [vmem:[#allocation3 + $0x360] ss:$8 sps:$4 sm:$0xff]  }
 0x29e   : > { %2766 = vmatmul.mubr.bf16.gmra.mrb[140].mxu1 %v15657_v61 }
 0x29f   : > { %19945 = vst [vmem:[#allocation59_spill] sm:$0xff] %v17487_v62  ;;  %2773 = vmatprep.mubr.bf16.mxu1 %v15658_v41 }
 0x2a1   : > { %v12717_v53 = vpop.f32.mrb[36].mxu0  ;;  %v12835_v56 = vpop.f32.mrb[36].mxu1 }
 0x2a2   : > { %v12718_v43 = vpop.f32.mrb[37].mxu0  ;;  %v12836_v50 = vpop.f32.mrb[37].mxu1 }
 0x2a3   : > { %v17496_v4 = vadd.f32 %v12718_v43, %v12717_v53  ;;  %v12720_v13 = vpop.f32.mrb[38].mxu0  ;;  %v17498_v18 = vadd.f32 %v12836_v50, %v12835_v56  ;;  %v12838_v61 = vpop.f32.mrb[38].mxu1 }
 0x2a4   : > { %v12721_v35 = vpop.f32.mrb[39].mxu0  ;;  %v12839_v48 = vpop.f32.mrb[39].mxu1 }
 0x2a5   : > { %19946 = vst [vmem:[#allocation60_spill] sm:$0xff] %v17496_v4  ;;  %v17500_v46 = vadd.f32 %v12721_v35, %v12720_v13  ;;  %v17502_v7 = vadd.f32 %v12839_v48, %v12838_v61  ;;  %v15664_v61 = vld [vmem:[#allocation3 + $0x374] ss:$8 sps:$4 sm:$0xff]   ;;  %v15666_v4 = vld [vmem:[#allocation3 + $0x370] ss:$8 sps:$4 sm:$0xff]  }
 0x2a6   : > { %2774 = vmatmul.mubr.bf16.gmra.mrb[144].mxu1 %v15660_v51 }
 0x2a7   : > { %19947 = vst [vmem:[#allocation61_spill] sm:$0xff] %v17500_v46  ;;  %2781 = vmatprep.mubr.bf16.mxu1 %v15661_v23 }
 0x2a9   : > { %v12723_v53 = vpop.f32.mrb[40].mxu0  ;;  %v12841_v43 = vpop.f32.mrb[40].mxu1 }
 0x2aa   : > { %v12724_v50 = vpop.f32.mrb[41].mxu0  ;;  %v12842_v56 = vpop.f32.mrb[41].mxu1 }
 0x2ab   : > { %v17508_v62 = vadd.f32 %v12724_v50, %v12723_v53  ;;  %v12726_v42 = vpop.f32.mrb[42].mxu0  ;;  %v17510_v13 = vadd.f32 %v12842_v56, %v12841_v43  ;;  %v12844_v48 = vpop.f32.mrb[42].mxu1 }
 0x2ac   : > { %v12727_v51 = vpop.f32.mrb[43].mxu0  ;;  %v12845_v35 = vpop.f32.mrb[43].mxu1 }
 0x2ad   : > { %19948 = vst [vmem:[#allocation62_spill] sm:$0xff] %v17508_v62  ;;  %v17512_v40 = vadd.f32 %v12727_v51, %v12726_v42  ;;  %v17514_v41 = vadd.f32 %v12845_v35, %v12844_v48  ;;  %v15667_v51 = vld [vmem:[#allocation3 + $0x384] ss:$8 sps:$4 sm:$0xff]   ;;  %v15669_v62 = vld [vmem:[#allocation3 + $0x380] ss:$8 sps:$4 sm:$0xff]  }
 0x2ae   : > { %2782 = vmatmul.mubr.bf16.gmra.mrb[148].mxu1 %v15663_v22 }
 0x2af   : > { %19949 = vst [vmem:[#allocation63_spill] sm:$0xff] %v17512_v40  ;;  %2789 = vmatprep.mubr.bf16.mxu1 %v15664_v61 }
 0x2b1   : > { %v12729_v53 = vpop.f32.mrb[44].mxu0  ;;  %v12847_v50 = vpop.f32.mrb[44].mxu1 }
 0x2b2   : > { %v12730_v43 = vpop.f32.mrb[45].mxu0  ;;  %v12848_v56 = vpop.f32.mrb[45].mxu1 }
 0x2b3   : > { %v17520_v46 = vadd.f32 %v12730_v43, %v12729_v53  ;;  %v12732_v1 = vpop.f32.mrb[46].mxu0  ;;  %v17522_v42 = vadd.f32 %v12848_v56, %v12847_v50  ;;  %v12850_v48 = vpop.f32.mrb[46].mxu1 }
 0x2b4   : > { %v12733_v22 = vpop.f32.mrb[47].mxu0  ;;  %v12851_v35 = vpop.f32.mrb[47].mxu1 }
 0x2b5   : > { %19950 = vst [vmem:[#allocation64_spill] sm:$0xff] %v17520_v46  ;;  %v17524_v45 = vadd.f32 %v12733_v22, %v12732_v1  ;;  %v17526_v23 = vadd.f32 %v12851_v35, %v12850_v48  ;;  %v15670_v22 = vld [vmem:[#allocation3 + $0x394] ss:$8 sps:$4 sm:$0xff]   ;;  %v15672_v46 = vld [vmem:[#allocation3 + $0x390] ss:$8 sps:$4 sm:$0xff]  }
 0x2b6   : > { %2790 = vmatmul.mubr.bf16.gmra.mrb[152].mxu1 %v15666_v4 }
 0x2b7   : > { %19951 = vst [vmem:[#allocation65_spill] sm:$0xff] %v17524_v45  ;;  %2797 = vmatprep.mubr.bf16.mxu1 %v15667_v51 }
 0x2b9   : > { %v12735_v53 = vpop.f32.mrb[48].mxu0  ;;  %v12853_v43 = vpop.f32.mrb[48].mxu1 }
 0x2ba   : > { %v12736_v50 = vpop.f32.mrb[49].mxu0  ;;  %v12854_v56 = vpop.f32.mrb[49].mxu1 }
 0x2bb   : > { %v17532_v40 = vadd.f32 %v12736_v50, %v12735_v53  ;;  %v12738_v0 = vpop.f32.mrb[50].mxu0  ;;  %v17534_v1 = vadd.f32 %v12854_v56, %v12853_v43  ;;  %v12856_v48 = vpop.f32.mrb[50].mxu1 }
 0x2bc   : > { %v12739_v4 = vpop.f32.mrb[51].mxu0  ;;  %v12857_v35 = vpop.f32.mrb[51].mxu1 }
 0x2bd   : > { %19952 = vst [vmem:[#allocation66_spill] sm:$0xff] %v17532_v40  ;;  %v17536_v25 = vadd.f32 %v12739_v4, %v12738_v0  ;;  %v17538_v61 = vadd.f32 %v12857_v35, %v12856_v48  ;;  %v15673_v4 = vld [vmem:[#allocation3 + $0x3a4] ss:$8 sps:$4 sm:$0xff]   ;;  %v15675_v40 = vld [vmem:[#allocation3 + $0x3a0] ss:$8 sps:$4 sm:$0xff]  }
 0x2be   : > { %2798 = vmatmul.mubr.bf16.gmra.mrb[156].mxu1 %v15669_v62 }
 0x2bf   : > { %19953 = vst [vmem:[#allocation67_spill] sm:$0xff] %v17536_v25  ;;  %2805 = vmatprep.mubr.bf16.mxu1 %v15670_v22 }
 0x2c1   : > { %v12741_v53 = vpop.f32.mrb[52].mxu0  ;;  %v12859_v50 = vpop.f32.mrb[52].mxu1 }
 0x2c2   : > { %v12742_v43 = vpop.f32.mrb[53].mxu0  ;;  %v12860_v56 = vpop.f32.mrb[53].mxu1 }
 0x2c3   : > { %v17544_v45 = vadd.f32 %v12742_v43, %v12741_v53  ;;  %v12744_v36 = vpop.f32.mrb[54].mxu0  ;;  %v17546_v0 = vadd.f32 %v12860_v56, %v12859_v50  ;;  %v12862_v48 = vpop.f32.mrb[54].mxu1 }
 0x2c4   : > { %v12745_v62 = vpop.f32.mrb[55].mxu0  ;;  %v12863_v35 = vpop.f32.mrb[55].mxu1 }
 0x2c5   : > { %19954 = vst [vmem:[#allocation68_spill] sm:$0xff] %v17544_v45  ;;  %v17548_v34 = vadd.f32 %v12745_v62, %v12744_v36  ;;  %v17550_v51 = vadd.f32 %v12863_v35, %v12862_v48  ;;  %v15676_v62 = vld [vmem:[#allocation3 + $0x3b4] ss:$8 sps:$4 sm:$0xff]   ;;  %v15678_v45 = vld [vmem:[#allocation3 + $0x3b0] ss:$8 sps:$4 sm:$0xff]  }
 0x2c6   : > { %2806 = vmatmul.mubr.bf16.gmra.mrb[160].mxu1 %v15672_v46 }
 0x2c7   : > { %19955 = vst [vmem:[#allocation69_spill] sm:$0xff] %v17548_v34  ;;  %2813 = vmatprep.mubr.bf16.mxu1 %v15673_v4 }
 0x2c9   : > { %v12747_v53 = vpop.f32.mrb[56].mxu0  ;;  %v12865_v43 = vpop.f32.mrb[56].mxu1 }
 0x2ca   : > { %v12748_v50 = vpop.f32.mrb[57].mxu0  ;;  %v12866_v56 = vpop.f32.mrb[57].mxu1 }
 0x2cb   : > { %v17556_v25 = vadd.f32 %v12748_v50, %v12747_v53  ;;  %v12750_v30 = vpop.f32.mrb[58].mxu0  ;;  %v17558_v36 = vadd.f32 %v12866_v56, %v12865_v43  ;;  %v12868_v48 = vpop.f32.mrb[58].mxu1 }
 0x2cc   : > { %v12751_v46 = vpop.f32.mrb[59].mxu0  ;;  %v12869_v35 = vpop.f32.mrb[59].mxu1 }
 0x2cd   : > { %19956 = vst [vmem:[#allocation70_spill] sm:$0xff] %v17556_v25  ;;  %v17560_v28 = vadd.f32 %v12751_v46, %v12750_v30  ;;  %v17562_v22 = vadd.f32 %v12869_v35, %v12868_v48  ;;  %v15679_v46 = vld [vmem:[#allocation3 + $0x3c4] ss:$8 sps:$4 sm:$0xff]   ;;  %v15681_v25 = vld [vmem:[#allocation3 + $0x3c0] ss:$8 sps:$4 sm:$0xff]  }
 0x2ce   : > { %2814 = vmatmul.mubr.bf16.gmra.mrb[164].mxu1 %v15675_v40 }
 0x2cf   : > { %19957 = vst [vmem:[#allocation71_spill] sm:$0xff] %v17560_v28  ;;  %2821 = vmatprep.mubr.bf16.mxu1 %v15676_v62  ;;  %v2263_v62 = vld [vmem:[#allocation5 + $0x4] sm:$0x3] }
 0x2d1   : > { %v12753_v53 = vpop.f32.mrb[60].mxu0  ;;  %v12921_v50 = vpop.f32.mrb[60].mxu1 }
 0x2d2   : > { %v12754_v43 = vpop.f32.mrb[61].mxu0  ;;  %v12922_v56 = vpop.f32.mrb[61].mxu1 }
 0x2d3   : > { %v17568_v34 = vadd.f32 %v12754_v43, %v12753_v53  ;;  %v12756_v24 = vpop.f32.mrb[62].mxu0  ;;  %v17570_v30 = vadd.f32 %v12922_v56, %v12921_v50  ;;  %v12924_v48 = vpop.f32.mrb[62].mxu1 }
 0x2d4   : > { %v12757_v40 = vpop.f32.mrb[63].mxu0  ;;  %v12925_v35 = vpop.f32.mrb[63].mxu1 }
 0x2d5   : > { %v17572_v37 = vadd.f32 %v12757_v40, %v12756_v24  ;;  %v17574_v4 = vadd.f32 %v12925_v35, %v12924_v48  ;;  %v15682_v48 = vld [vmem:[#allocation3 + $0x3d4] ss:$8 sps:$4 sm:$0xff]  }
 0x2d6   : > { %2822 = vmatmul.mubr.bf16.gmra.mrb[168].mxu1 %v15678_v45 }
 0x2d7   : > { %2829 = vmatprep.mubr.bf16.mxu1 %v15679_v46 }
 0x2d9   : > { %v12775_v53 = vpop.f32.mrb[64].mxu0  ;;  %v12927_v43 = vpop.f32.mrb[64].mxu1 }
 0x2da   : > { %v12776_v50 = vpop.f32.mrb[65].mxu0  ;;  %v12928_v56 = vpop.f32.mrb[65].mxu1 }
 0x2db   : > { %v12777_v28 = vadd.f32 %v12776_v50, %v12775_v53  ;;  %v12778_v54 = vpop.f32.mrb[66].mxu0  ;;  %v17580_v2 = vadd.f32 %v12928_v56, %v12927_v43  ;;  %v12930_v24 = vpop.f32.mrb[66].mxu1  ;;  %v17587_v53 = vand.u32 %v2263_v62, %v17369_v55  ;;  %v19958_v50 = vpack.c.bf16 %v17374_v60, %v17367_v52  ;;  %v15684_v56 = vld [vmem:[#allocation3 + $0x3d0] ss:$8 sps:$4 sm:$0xff]   ;;  %v15685_v62 = vld [vmem:[#allocation3 + $0x3e4] ss:$8 sps:$4 sm:$0xff]  }
 0x2dc   : > { %v12779_v40 = vpop.f32.mrb[67].mxu0  ;;  %v12931_v45 = vpop.f32.mrb[67].mxu1 }
 0x2dd   : > { %v12780_v35 = vadd.f32 %v12779_v40, %v12778_v54  ;;  %v17582_v21 = vadd.f32 %v12931_v45, %v12930_v24  ;;  %v15687_v45 = vld [vmem:[#allocation3 + $0x3e0] ss:$8 sps:$4 sm:$0xff]  }
 0x2de   : > { %2830 = vmatmul.mubr.bf16.gmra.mrb[172].mxu1 %v15681_v25 }
 0x2df   : > { %v1445_v46 = vpack.c.bf16 %v12780_v35, %v12777_v28  ;;  %2837 = vmatprep.mubr.bf16.mxu1 %v15682_v48  ;;  %v19959_v28 = vpack.c.bf16 %v17386_v17, %v17382_v10  ;;  %v19960_v10 = vpack.c.bf16 %v17398_v39, %v17394_v31  ;;  %v15708_v31 = vld [vmem:[#allocation3 + $0x550] ss:$8 sps:$4 sm:$0xff]  }
 0x2e1   : > { %14332 = vmatprep.mubr.msk.bf16.mxu0 %vm1463_vm2, %v1445_v46  ;;  %v12933_v43 = vpop.f32.mrb[68].mxu1 }
 0x2e2   : > { %14333 = vmatmul.mubr.msk.bf16.vlgmr.msra.gmra.mrb[68].mxu0 %vm1463_vm2, %v19958_v50  ;;  %v12934_v54 = vpop.f32.mrb[69].mxu1 }
 0x2e3   : > { %14336 = vmatprep.mubr.msk.bf16.mxu0 %vm1463_vm2, %v19959_v28  ;;  %v17598_v25 = vadd.f32 %v12934_v54, %v12933_v43  ;;  %v12936_v24 = vpop.f32.mrb[70].mxu1  ;;  %14365 = vmatpush3.bf16.msra.mxu0 %v17484_v19  ;;  %v19961_v19 = vpack.c.bf16 %v17410_v3, %v17406_v57  ;;  %v15688_v43 = vld [vmem:[#allocation3 + $0x3f4] ss:$8 sps:$4 sm:$0xff]   ;;  %v15690_v3 = vld [vmem:[#allocation3 + $0x3f0] ss:$8 sps:$4 sm:$0xff]   ;;  %v19963_v28 = vpack.c.bf16 %v17438_v29, %v17432_v11 }
 0x2e4   : > { %v12937_v48 = vpop.f32.mrb[71].mxu1  ;;  %14398 = vmatprep.subr.bf16.mxu0 %v17587_v53  ;;  %v19965_v11 = vpack.c.bf16 %v17470_v33, %v17464_v58  ;;  %v19967_v33 = vpack.c.bf16 %v17502_v7, %v17498_v18  ;;  %v19969_v7 = vpack.c.bf16 %v17526_v23, %v17522_v42  ;;  %v19971_v23 = vpack.c.bf16 %v17550_v51, %v17546_v0 }
 0x2e5   : > { %v17602_v40 = vadd.f32 %v12937_v48, %v12936_v24  ;;  %v19973_v51 = vpack.c.bf16 %v17372_v59, %v17365_v49  ;;  %v19974_v59 = vpack.c.bf16 %v17384_v16, %v17380_v6 }
 0x2e6   : > { %2838 = vmatmul.mubr.bf16.gmra.mrb[176].mxu1 %v15684_v56  ;;  %v19962_v56 = vpack.c.bf16 %v17422_v44, %v17418_v26  ;;  %v19964_v44 = vpack.c.bf16 %v17454_v5, %v17448_v63  ;;  %v19966_v5 = vpack.c.bf16 %v17489_v12, %v17480_v32  ;;  %v19968_v12 = vpack.c.bf16 %v17514_v41, %v17510_v13 }
 0x2e7   : > { %2845 = vmatprep.mubr.bf16.mxu1 %v15685_v62  ;;  %v19970_v41 = vpack.c.bf16 %v17538_v61, %v17534_v1  ;;  %v19972_v61 = vpack.c.bf16 %v17562_v22, %v17558_v36  ;;  %v15705_v22 = vld [vmem:[#allocation3 + $0x540] ss:$8 sps:$4 sm:$0xff]  }
 0x2e9   : > { %v12939_v60 = vpop.f32.mrb[72].mxu1 }
 0x2ea   : > { %14337 = vmatmul.mubr.msk.bf16.gmra.mrb[72].mxu0 %vm1463_vm2, %v19960_v10  ;;  %v12940_v17 = vpop.f32.mrb[73].mxu1 }
 0x2eb   : > { %14340 = vmatprep.mubr.msk.bf16.mxu0 %vm1463_vm2, %v19961_v19  ;;  %v17614_v35 = vadd.f32 %v12940_v17, %v12939_v60  ;;  %v12942_v46 = vpop.f32.mrb[74].mxu1 }
 0x2ec   : > { %v12943_v50 = vpop.f32.mrb[75].mxu1 }
 0x2ed   : > { %v17616_v54 = vadd.f32 %v12943_v50, %v12942_v46 }
 0x2ee   : > { %2846 = vmatmul.mubr.bf16.gmra.mrb[180].mxu1 %v15687_v45 }
 0x2ef   : > { %2853 = vmatprep.mubr.bf16.mxu1 %v15688_v43  ;;  %v20009_v43 = vld [vmem:[#allocation62_spill] sm:$0xff] }
 0x2f1   : > { %v12945_v39 = vpop.f32.mrb[76].mxu1 }
 0x2f2   : > { %14341 = vmatmul.mubr.msk.bf16.gmra.mrb[76].mxu0 %vm1463_vm2, %v19962_v56  ;;  %v12946_v57 = vpop.f32.mrb[77].mxu1 }
 0x2f3   : > { %14344 = vmatprep.mubr.msk.bf16.mxu0 %vm1463_vm2, %v19963_v28  ;;  %v17628_v24 = vadd.f32 %v12946_v57, %v12945_v39  ;;  %v12948_v62 = vpop.f32.mrb[78].mxu1 }
 0x2f4   : > { %v12949_v48 = vpop.f32.mrb[79].mxu1 }
 0x2f5   : > { %v17630_v60 = vadd.f32 %v12949_v48, %v12948_v62 }
 0x2f6   : > { %2854 = vmatmul.mubr.bf16.gmra.mrb[184].mxu1 %v15690_v3 }
 0x2f9   : > { %v12951_v26 = vpop.f32.mrb[80].mxu1 }
 0x2fa   : > { %14345 = vmatmul.mubr.msk.bf16.gmra.mrb[80].mxu0 %vm1463_vm2, %v19964_v44  ;;  %v12952_v17 = vpop.f32.mrb[81].mxu1  ;;  %v20003_v44 = vld [vmem:[#allocation46_spill] sm:$0xff] }
 0x2fb   : > { %14348 = vmatprep.mubr.msk.bf16.mxu0 %vm1463_vm2, %v19965_v11  ;;  %v17642_v29 = vadd.f32 %v12952_v17, %v12951_v26  ;;  %v12954_v45 = vpop.f32.mrb[82].mxu1 }
 0x2fc   : > { %v12955_v19 = vpop.f32.mrb[83].mxu1 }
 0x2fd   : > { %v17644_v46 = vadd.f32 %v12955_v19, %v12954_v45 }
 0x301   : > { %v12957_v50 = vpop.f32.mrb[84].mxu1 }
 0x302   : > { %14349 = vmatmul.mubr.msk.bf16.gmra.mrb[84].mxu0 %vm1463_vm2, %v19966_v5  ;;  %v12958_v63 = vpop.f32.mrb[85].mxu1 }
 0x303   : > { %14352 = vmatprep.mubr.msk.bf16.mxu0 %vm1463_vm2, %v19967_v33  ;;  %v17656_v58 = vadd.f32 %v12958_v63, %v12957_v50  ;;  %v12960_v39 = vpop.f32.mrb[86].mxu1  ;;  %v15691_v33 = vld [vmem:[#allocation3 + $0x500] ss:$8 sps:$4 sm:$0xff]  }
 0x304   : > { %v12961_v56 = vpop.f32.mrb[87].mxu1 }
 0x305   : > { %v17658_v57 = vadd.f32 %v12961_v56, %v12960_v39  ;;  %v15693_v56 = vld [vmem:[#allocation3 + $0x504] ss:$8 sps:$4 sm:$0xff]  }
 0x306   : > { %3965 = vmatprep.mubr.bf16.mxu1 %v15693_v56 }
 0x307   : > { %3966 = vmatmul.mubr.bf16.vlgmr.msra.gmra.mrb[188].mxu1 %v15691_v33  ;;  %v15697_v33 = vld [vmem:[#allocation3 + $0x524] ss:$8 sps:$4 sm:$0xff]  }
 0x308   : > { %13422 = vmatpush3.bf16.msra.mxu1 %v17228_v8 }
 0x309   : > { %v12963_v28 = vpop.f32.mrb[88].mxu1  ;;  %13423 = vmatprep.subr.bf16.mxu1 %v17230_v9 }
 0x30a   : > { %14353 = vmatmul.mubr.msk.bf16.gmra.mrb[88].mxu0 %vm1463_vm2, %v19968_v12  ;;  %v12964_v32 = vpop.f32.mrb[89].mxu1  ;;  %v2879_v12 = vld [vmem:[#allocation5 + $0x6] sm:$0x3] }
 0x30b   : > { %14356 = vmatprep.mubr.msk.bf16.mxu0 %vm1463_vm2, %v19969_v7  ;;  %v17670_v18 = vadd.f32 %v12964_v32, %v12963_v28  ;;  %v12966_v62 = vpop.f32.mrb[90].mxu1  ;;  %v17705_v36 = vand.u32 %v2879_v12, %v17369_v55  ;;  %v19975_v7 = vpack.c.bf16 %v17396_v38, %v17392_v27  ;;  %v19976_v38 = vld [vmem:[#allocation37_spill] sm:$0xff]  ;;  %v19983_v12 = vld [vmem:[#allocation38_spill] sm:$0xff] }
 0x30c   : > { %v12967_v48 = vpop.f32.mrb[91].mxu1  ;;  %13424 = vmatpush3.bf16.msra.mxu1 %v17239_v14 }
 0x30d   : > { %v17672_v26 = vadd.f32 %v12967_v48, %v12966_v62  ;;  %13425 = vmatprep.subr.bf16.mxu1 %v17243_v15 }
 0x310   : > { %13426 = vmatpush3.bf16.msra.mxu1 %v17251_v20 }
 0x311   : > { %v12969_v17 = vpop.f32.mrb[92].mxu1  ;;  %13427 = vmatprep.subr.bf16.mxu1 %v19976_v38 }
 0x312   : > { %14357 = vmatmul.mubr.msk.bf16.gmra.mrb[92].mxu0 %vm1463_vm2, %v19970_v41  ;;  %v12970_v13 = vpop.f32.mrb[93].mxu1  ;;  %v15696_v41 = vld [vmem:[#allocation3 + $0x510] ss:$8 sps:$4 sm:$0xff]  }
 0x313   : > { %14360 = vmatprep.mubr.msk.bf16.mxu0 %vm1463_vm2, %v19971_v23  ;;  %v17684_v42 = vadd.f32 %v12970_v13, %v12969_v17  ;;  %v12972_v11 = vpop.f32.mrb[94].mxu1  ;;  %v15694_v17 = vld [vmem:[#allocation3 + $0x514] ss:$8 sps:$4 sm:$0xff]  }
 0x314   : > { %v12973_v45 = vpop.f32.mrb[95].mxu1  ;;  %3973 = vmatprep.mubr.bf16.mxu1 %v15694_v17  ;;  %v19978_v23 = vld [vmem:[#allocation48_spill] sm:$0xff]  ;;  %13428 = vmatpush3.bf16.msra.mxu1 %v19983_v12  ;;  %v19986_v17 = vld [vmem:[#allocation41_spill] sm:$0xff] }
 0x315   : > { %v17686_v19 = vadd.f32 %v12973_v45, %v12972_v11  ;;  %3974 = vmatmul.mubr.bf16.gmra.mrb[192].mxu1 %v15696_v41  ;;  %v19987_v41 = vld [vmem:[#allocation53_spill] sm:$0xff] }
 0x316   : > { %3981 = vmatprep.mubr.bf16.mxu1 %v15697_v33 }
 0x319   : > { %v12975_v5 = vpop.f32.mrb[96].mxu1 }
 0x31a   : > { %14361 = vmatmul.mubr.msk.bf16.gmra.mrb[96].mxu0 %vm1463_vm2, %v19972_v61  ;;  %v12976_v1 = vpop.f32.mrb[97].mxu1  ;;  %v19981_v61 = vld [vmem:[#allocation50_spill] sm:$0xff] }
 0x31b   : > { %14366 = vmatprep.mubr.msk.bf16.mxu0 %vm1463_vm2, %v19973_v51  ;;  %v17698_v0 = vadd.f32 %v12976_v1, %v12975_v5  ;;  %v12978_v63 = vpop.f32.mrb[98].mxu1  ;;  %v19980_v5 = vld [vmem:[#allocation51_spill] sm:$0xff] }
 0x31c   : > { %v12979_v39 = vpop.f32.mrb[99].mxu1  ;;  %v19982_v1 = vpack.c.bf16 %v19980_v5, %v19981_v61 }
 0x31d   : > { %v17700_v28 = vadd.f32 %v12979_v39, %v12978_v63  ;;  %v15699_v39 = vld [vmem:[#allocation3 + $0x520] ss:$8 sps:$4 sm:$0xff]  }
 0x31e   : > { %3982 = vmatmul.mubr.bf16.gmra.mrb[196].mxu1 %v15699_v39  ;;  %v19993_v39 = vld [vmem:[#allocation42_spill] sm:$0xff] }
 0x321   : > { %v12981_v49 = vpop.f32.mrb[100].mxu1 }
 0x322   : > { %14367 = vmatmul.mubr.msk.bf16.vlgmr.msra.gmra.mrb[68].mxu0 %vm1463_vm2, %v19974_v59  ;;  %v12982_v32 = vpop.f32.mrb[101].mxu1  ;;  %v19984_v59 = vld [vmem:[#allocation39_spill] sm:$0xff] }
 0x323   : > { %14370 = vmatprep.mubr.msk.bf16.mxu0 %vm1463_vm2, %v19975_v7  ;;  %v17717_v62 = vadd.f32 %v12982_v32, %v12981_v49  ;;  %v12984_v48 = vpop.f32.mrb[102].mxu1  ;;  %14399 = vmatpush3.bf16.msra.mxu0 %v17587_v53  ;;  %v19977_v53 = vld [vmem:[#allocation49_spill] sm:$0xff]  ;;  %v19985_v7 = vld [vmem:[#allocation40_spill] sm:$0xff] }
 0x324   : > { %v12985_v13 = vpop.f32.mrb[103].mxu1  ;;  %14432 = vmatprep.subr.bf16.mxu0 %v17705_v36  ;;  %v19979_v11 = vpack.c.bf16 %v19977_v53, %v19978_v23  ;;  %13429 = vmatprep.subr.bf16.mxu1 %v19984_v59  ;;  %v19990_v23 = vld [vmem:[#allocation55_spill] sm:$0xff] }
 0x325   : > { %v17722_v6 = vadd.f32 %v12985_v13, %v12984_v48  ;;  %13430 = vmatpush3.bf16.msra.mxu1 %v19985_v7  ;;  %v19988_v13 = vld [vmem:[#allocation52_spill] sm:$0xff] }
 0x326   : > { %13431 = vmatprep.subr.bf16.mxu1 %v19986_v17 }
 0x329   : > { %v12987_v27 = vpop.f32.mrb[104].mxu1  ;;  %13432 = vmatpush3.bf16.msra.mxu1 %v19993_v39 }
 0x32a   : > { %14371 = vmatmul.mubr.msk.bf16.gmra.mrb[72].mxu0 %vm1463_vm2, %v19979_v11  ;;  %v12988_v45 = vpop.f32.mrb[105].mxu1  ;;  %v19991_v11 = vld [vmem:[#allocation54_spill] sm:$0xff] }
 0x32b   : > { %14374 = vmatprep.mubr.msk.bf16.mxu0 %vm1463_vm2, %v19982_v1  ;;  %v17737_v51 = vadd.f32 %v12988_v45, %v12987_v27  ;;  %v12990_v63 = vpop.f32.mrb[106].mxu1  ;;  %v19989_v27 = vpack.c.bf16 %v19987_v41, %v19988_v13  ;;  %v19992_v45 = vpack.c.bf16 %v19990_v23, %v19991_v11  ;;  %v15700_v1 = vld [vmem:[#allocation3 + $0x534] ss:$8 sps:$4 sm:$0xff]   ;;  %v19994_v41 = vld [vmem:[#allocation43_spill] sm:$0xff] }
 0x32c   : > { %v12991_v56 = vpop.f32.mrb[107].mxu1  ;;  %3989 = vmatprep.mubr.bf16.mxu1 %v15700_v1  ;;  %13433 = vmatprep.subr.bf16.mxu1 %v19994_v41  ;;  %v19998_v11 = vld [vmem:[#allocation56_spill] sm:$0xff] }
 0x32d   : > { %v17740_v49 = vadd.f32 %v12991_v56, %v12990_v63  ;;  %v15702_v63 = vld [vmem:[#allocation3 + $0x530] ss:$8 sps:$4 sm:$0xff]  }
 0x32e   : > { %3990 = vmatmul.mubr.bf16.gmra.mrb[200].mxu1 %v15702_v63  ;;  %v15703_v63 = vld [vmem:[#allocation3 + $0x544] ss:$8 sps:$4 sm:$0xff]  }
 0x32f   : > { %3997 = vmatprep.mubr.bf16.mxu1 %v15703_v63  ;;  %v15706_v63 = vld [vmem:[#allocation3 + $0x554] ss:$8 sps:$4 sm:$0xff]  }
 0x331   : > { %v12993_v48 = vpop.f32.mrb[108].mxu1 }
 0x332   : > { %14375 = vmatmul.mubr.msk.bf16.gmra.mrb[76].mxu0 %vm1463_vm2, %v19989_v27  ;;  %v12994_v53 = vpop.f32.mrb[109].mxu1  ;;  %v19995_v27 = vld [vmem:[#allocation44_spill] sm:$0xff] }
 0x333   : > { %14378 = vmatprep.mubr.msk.bf16.mxu0 %vm1463_vm2, %v19992_v45  ;;  %v17755_v5 = vadd.f32 %v12994_v53, %v12993_v48  ;;  %v12996_v61 = vpop.f32.mrb[110].mxu1  ;;  %13434 = vmatpush3.bf16.msra.mxu1 %v19995_v27  ;;  %v19996_v48 = vld [vmem:[#allocation45_spill] sm:$0xff] }
 0x334   : > { %v12997_v33 = vpop.f32.mrb[111].mxu1  ;;  %13435 = vmatprep.subr.bf16.mxu1 %v19996_v48  ;;  %v19997_v53 = vld [vmem:[#allocation57_spill] sm:$0xff] }
 0x335   : > { %v17758_v56 = vadd.f32 %v12997_v33, %v12996_v61  ;;  %v19999_v45 = vpack.c.bf16 %v19997_v53, %v19998_v11  ;;  %v20000_v61 = vld [vmem:[#allocation59_spill] sm:$0xff]  ;;  %v20001_v33 = vld [vmem:[#allocation58_spill] sm:$0xff] }
 0x336   : > { %v20002_v1 = vpack.c.bf16 %v20000_v61, %v20001_v33  ;;  %v20004_v53 = vld [vmem:[#allocation31_spill] sm:$0xff]  ;;  %3998 = vmatmul.mubr.bf16.gmra.mrb[204].mxu1 %v15705_v22  ;;  %v20005_v61 = vld [vmem:[#allocation61_spill] sm:$0xff]  ;;  %v20006_v33 = vld [vmem:[#allocation60_spill] sm:$0xff] }
 0x337   : > { %13436 = vmatpush3.bf16.msra.mxu1 %v20003_v44  ;;  %4005 = vmatprep.mubr.bf16.mxu1 %v15706_v63  ;;  %v15711_v63 = vld [vmem:[#allocation3 + $0x560] ss:$8 sps:$4 sm:$0xff]  }
 0x338   : > { %13550 = vmatprep.subr.bf16.mxu1 %v20004_v53 }
 0x339   : > { %v12999_v23 = vpop.f32.mrb[112].mxu1 }
 0x33a   : > { %14379 = vmatmul.mubr.msk.bf16.gmra.mrb[80].mxu0 %vm1463_vm2, %v19999_v45  ;;  %v13000_v32 = vpop.f32.mrb[113].mxu1 }
 0x33b   : > { %14382 = vmatprep.mubr.msk.bf16.mxu0 %vm1463_vm2, %v20002_v1  ;;  %v17773_v16 = vadd.f32 %v13000_v32, %v12999_v23  ;;  %v13002_v13 = vpop.f32.mrb[114].mxu1  ;;  %v20007_v32 = vpack.c.bf16 %v20005_v61, %v20006_v33  ;;  %v20008_v1 = vld [vmem:[#allocation63_spill] sm:$0xff]  ;;  %v20011_v33 = vld [vmem:[#allocation65_spill] sm:$0xff] }
 0x33c   : > { %v13003_v50 = vpop.f32.mrb[115].mxu1  ;;  %v20010_v10 = vpack.c.bf16 %v20008_v1, %v20009_v43  ;;  %v20014_v43 = vld [vmem:[#allocation67_spill] sm:$0xff] }
 0x33d   : > { %v17776_v3 = vadd.f32 %v13003_v50, %v13002_v13 }
 0x33e   : > { %4006 = vmatmul.mubr.bf16.gmra.mrb[208].mxu1 %v15708_v31 }
 0x341   : > { %v13005_v45 = vpop.f32.mrb[116].mxu1 }
 0x342   : > { %14383 = vmatmul.mubr.msk.bf16.gmra.mrb[84].mxu0 %vm1463_vm2, %v20007_v32  ;;  %v13006_v23 = vpop.f32.mrb[117].mxu1  ;;  %v20012_v32 = vld [vmem:[#allocation64_spill] sm:$0xff] }
 0x343   : > { %14386 = vmatprep.mubr.msk.bf16.mxu0 %vm1463_vm2, %v20010_v10  ;;  %v17789_v50 = vadd.f32 %v13006_v23, %v13005_v45  ;;  %v13008_v13 = vpop.f32.mrb[118].mxu1  ;;  %v20013_v47 = vpack.c.bf16 %v20011_v33, %v20012_v32  ;;  %v20015_v45 = vld [vmem:[#allocation66_spill] sm:$0xff]  ;;  %v20017_v33 = vld [vmem:[#allocation69_spill] sm:$0xff]  ;;  %v20018_v32 = vld [vmem:[#allocation68_spill] sm:$0xff] }
 0x344   : > { %v13009_v52 = vpop.f32.mrb[119].mxu1  ;;  %v20016_v23 = vpack.c.bf16 %v20014_v43, %v20015_v45  ;;  %v20019_v44 = vpack.c.bf16 %v20017_v33, %v20018_v32  ;;  %v20023_v33 = vpack.c.bf16 %v17572_v37, %v17568_v34 }
 0x345   : > { %v17791_v11 = vadd.f32 %v13009_v52, %v13008_v13  ;;  %v15709_v13 = vld [vmem:[#allocation3 + $0x564] ss:$8 sps:$4 sm:$0xff]  }
 0x346   : > { %4013 = vmatprep.mubr.bf16.mxu1 %v15709_v13  ;;  %v15714_v13 = vld [vmem:[#allocation3 + $0x570] ss:$8 sps:$4 sm:$0xff]  }
 0x347   : > { %4014 = vmatmul.mubr.bf16.gmra.mrb[212].mxu1 %v15711_v63 }
 0x349   : > { %v13011_v61 = vpop.f32.mrb[120].mxu1 }
 0x34a   : > { %14387 = vmatmul.mubr.msk.bf16.gmra.mrb[88].mxu0 %vm1463_vm2, %v20013_v47  ;;  %v13012_v10 = vpop.f32.mrb[121].mxu1 }
 0x34b   : > { %14390 = vmatprep.mubr.msk.bf16.mxu0 %vm1463_vm2, %v20016_v23  ;;  %v17803_v1 = vadd.f32 %v13012_v10, %v13011_v61  ;;  %v13014_v52 = vpop.f32.mrb[122].mxu1  ;;  %v20020_v61 = vld [vmem:[#allocation71_spill] sm:$0xff]  ;;  %v20021_v10 = vld [vmem:[#allocation70_spill] sm:$0xff] }
 0x34c   : > { %v13015_v55 = vpop.f32.mrb[123].mxu1  ;;  %v20022_v45 = vpack.c.bf16 %v20020_v61, %v20021_v10  ;;  %v15717_v10 = vld [vmem:[#allocation3 + $0x580] ss:$8 sps:$4 sm:$0xff]  }
 0x34d   : > { %v17805_v22 = vadd.f32 %v13015_v55, %v13014_v52  ;;  %v15712_v52 = vld [vmem:[#allocation3 + $0x574] ss:$8 sps:$4 sm:$0xff]  }
 0x34e   : > { %4021 = vmatprep.mubr.bf16.mxu1 %v15712_v52  ;;  %v20025_v52 = vpack.c.bf16 %v17582_v21, %v17580_v2 }
 0x34f   : > { %4022 = vmatmul.mubr.bf16.gmra.mrb[216].mxu1 %v15714_v13  ;;  %v20026_v13 = vpack.c.bf16 %v17602_v40, %v17598_v25  ;;  %v20027_v25 = vpack.c.bf16 %v17616_v54, %v17614_v35 }
 0x351   : > { %v13050_v47 = vpop.f32.mrb[124].mxu1 }
 0x352   : > { %14391 = vmatmul.mubr.msk.bf16.gmra.mrb[92].mxu0 %vm1463_vm2, %v20019_v44  ;;  %v13051_v43 = vpop.f32.mrb[125].mxu1 }
 0x353   : > { %14394 = vmatprep.mubr.msk.bf16.mxu0 %vm1463_vm2, %v20022_v45  ;;  %v17817_v23 = vadd.f32 %v13051_v43, %v13050_v47  ;;  %v13053_v55 = vpop.f32.mrb[126].mxu1  ;;  %v15715_v47 = vld [vmem:[#allocation3 + $0x584] ss:$8 sps:$4 sm:$0xff]   ;;  %v20024_v43 = vpack.c.bf16 %v17574_v4, %v17570_v30  ;;  %v15721_v30 = vld [vmem:[#allocation3 + $0x594] ss:$8 sps:$4 sm:$0xff]  }
 0x354   : > { %v13054_v48 = vpop.f32.mrb[127].mxu1  ;;  %4029 = vmatprep.mubr.bf16.mxu1 %v15715_v47 }
 0x355   : > { %v17819_v31 = vadd.f32 %v13054_v48, %v13053_v55 }
 0x357   : > { %v2862_v63 = vpack.c.bf16 %v17819_v31, %v17817_v23  ;;  %4030 = vmatmul.mubr.bf16.gmra.mrb[220].mxu1 %v15717_v10  ;;  %v15771_v23 = vld [vmem:[#allocation3 + $0x614] ss:$8 sps:$4 sm:$0xff]  }
 0x358   : > { %4037 = vmatprep.mubr.bf16.mxu1 %v15721_v30  ;;  %v20029_v30 = vpack.c.bf16 %v17644_v46, %v17642_v29 }
 0x359   : > { %v13056_v44 = vpop.f32.mrb[128].mxu1 }
 0x35a   : > { %14395 = vmatmul.mubr.msk.bf16.gmra.mrb[96].mxu0 %vm1463_vm2, %v20023_v33  ;;  %v13057_v32 = vpop.f32.mrb[129].mxu1 }
 0x35b   : > { %14400 = vmatprep.mubr.msk.bf16.mxu0 %vm1463_vm2, %v20024_v43  ;;  %v17831_v48 = vadd.f32 %v13057_v32, %v13056_v44  ;;  %v13059_v61 = vpop.f32.mrb[130].mxu1  ;;  %v15723_v32 = vld [vmem:[#allocation3 + $0x590] ss:$8 sps:$4 sm:$0xff]  }
 0x35c   : > { %v13060_v45 = vpop.f32.mrb[131].mxu1 }
 0x35d   : > { %v17833_v55 = vadd.f32 %v13060_v45, %v13059_v61  ;;  %v15727_v61 = vld [vmem:[#allocation3 + $0x5a4] ss:$8 sps:$4 sm:$0xff]  }
 0x35f   : > { %v2863_v34 = vpack.c.bf16 %v17833_v55, %v17831_v48  ;;  %4038 = vmatmul.mubr.bf16.gmra.mrb[224].mxu1 %v15723_v32 }
 0x360   : > { %4045 = vmatprep.mubr.bf16.mxu1 %v15727_v61  ;;  %v20032_v61 = vpack.c.bf16 %v17686_v19, %v17684_v42  ;;  %v15745_v19 = vld [vmem:[#allocation3 + $0x5d4] ss:$8 sps:$4 sm:$0xff]  }
 0x361   : > { %v13062_v37 = vpop.f32.mrb[132].mxu1 }
 0x362   : > { %14401 = vmatmul.mubr.msk.bf16.vlgmr.msra.gmra.mrb[68].mxu0 %vm1463_vm2, %v20025_v52  ;;  %v13063_v4 = vpop.f32.mrb[133].mxu1 }
 0x363   : > { %14404 = vmatprep.mubr.msk.bf16.mxu0 %vm1463_vm2, %v20026_v13  ;;  %v17845_v44 = vadd.f32 %v13063_v4, %v13062_v37  ;;  %v13065_v33 = vpop.f32.mrb[134].mxu1  ;;  %14433 = vmatpush3.bf16.msra.mxu0 %v17705_v36  ;;  %v20028_v36 = vpack.c.bf16 %v17630_v60, %v17628_v24  ;;  %v15729_v37 = vld [vmem:[#allocation3 + $0x5a0] ss:$8 sps:$4 sm:$0xff]   ;;  %v15733_v60 = vld [vmem:[#allocation3 + $0x5b4] ss:$8 sps:$4 sm:$0xff]   ;;  %v20030_v13 = vpack.c.bf16 %v17658_v57, %v17656_v58 }
 0x364   : > { %v13066_v47 = vpop.f32.mrb[135].mxu1  ;;  %13163 = vmatprep.subr.bf16.mxu0 %v20004_v53  ;;  %v15739_v57 = vld [vmem:[#allocation3 + $0x5c4] ss:$8 sps:$4 sm:$0xff]  }
 0x365   : > { %v17849_v21 = vadd.f32 %v13066_v47, %v13065_v33  ;;  %v15735_v47 = vld [vmem:[#allocation3 + $0x5b0] ss:$8 sps:$4 sm:$0xff]  }
 0x367   : > { %v2864_v2 = vpack.c.bf16 %v17849_v21, %v17845_v44  ;;  %4046 = vmatmul.mubr.bf16.gmra.mrb[228].mxu1 %v15729_v37  ;;  %v15741_v37 = vld [vmem:[#allocation3 + $0x5c0] ss:$8 sps:$4 sm:$0xff]   ;;  %v15777_v21 = vld [vmem:[#allocation3 + $0x624] ss:$8 sps:$4 sm:$0xff]  }
 0x368   : > { %4053 = vmatprep.mubr.bf16.mxu1 %v15733_v60 }
 0x369   : > { %v13068_v43 = vpop.f32.mrb[136].mxu1 }
 0x36a   : > { %14405 = vmatmul.mubr.msk.bf16.gmra.mrb[72].mxu0 %vm1463_vm2, %v20027_v25  ;;  %v13069_v40 = vpop.f32.mrb[137].mxu1 }
 0x36b   : > { %14408 = vmatprep.mubr.msk.bf16.mxu0 %vm1463_vm2, %v20028_v36  ;;  %v17861_v10 = vadd.f32 %v13069_v40, %v13068_v43  ;;  %v13071_v45 = vpop.f32.mrb[138].mxu1  ;;  %v20031_v40 = vpack.c.bf16 %v17672_v26, %v17670_v18 }
 0x36c   : > { %v13072_v52 = vpop.f32.mrb[139].mxu1 }
 0x36d   : > { %v17863_v4 = vadd.f32 %v13072_v52, %v13071_v45 }
 0x36f   : > { %v2865_v35 = vpack.c.bf16 %v17863_v4, %v17861_v10  ;;  %4054 = vmatmul.mubr.bf16.gmra.mrb[232].mxu1 %v15735_v47 }
 0x370   : > { %4061 = vmatprep.mubr.bf16.mxu1 %v15739_v57 }
 0x371   : > { %v13074_v54 = vpop.f32.mrb[140].mxu1 }
 0x372   : > { %14409 = vmatmul.mubr.msk.bf16.gmra.mrb[76].mxu0 %vm1463_vm2, %v20029_v30  ;;  %v13075_v24 = vpop.f32.mrb[141].mxu1  ;;  %v20033_v30 = vpack.c.bf16 %v17700_v28, %v17698_v0 }
 0x373   : > { %14412 = vmatprep.mubr.msk.bf16.mxu0 %vm1463_vm2, %v20030_v13  ;;  %v17875_v33 = vadd.f32 %v13075_v24, %v13074_v54  ;;  %v13077_v32 = vpop.f32.mrb[142].mxu1  ;;  %v20034_v24 = vpack.c.bf16 %v17722_v6, %v17717_v62  ;;  %v15751_v6 = vld [vmem:[#allocation3 + $0x5e4] ss:$8 sps:$4 sm:$0xff]  }
 0x374   : > { %v13078_v43 = vpop.f32.mrb[143].mxu1 }
 0x375   : > { %v17877_v25 = vadd.f32 %v13078_v43, %v13077_v32  ;;  %v15747_v32 = vld [vmem:[#allocation3 + $0x5d0] ss:$8 sps:$4 sm:$0xff]  }
 0x377   : > { %v2866_v29 = vpack.c.bf16 %v17877_v25, %v17875_v33  ;;  %4062 = vmatmul.mubr.bf16.gmra.mrb[236].mxu1 %v15741_v37  ;;  %v15783_v25 = vld [vmem:[#allocation3 + $0x634] ss:$8 sps:$4 sm:$0xff]  }
 0x378   : > { %4069 = vmatprep.mubr.bf16.mxu1 %v15745_v19  ;;  %v15759_v19 = vld [vmem:[#allocation3 + $0x5f0] ss:$8 sps:$4 sm:$0xff]  }
 0x379   : > { %v13080_v46 = vpop.f32.mrb[144].mxu1 }
 0x37a   : > { %14413 = vmatmul.mubr.msk.bf16.gmra.mrb[80].mxu0 %vm1463_vm2, %v20031_v40  ;;  %v13081_v58 = vpop.f32.mrb[145].mxu1  ;;  %v20036_v40 = vpack.c.bf16 %v17758_v56, %v17755_v5  ;;  %v15757_v56 = vld [vmem:[#allocation3 + $0x5f4] ss:$8 sps:$4 sm:$0xff]  }
 0x37b   : > { %14416 = vmatprep.mubr.msk.bf16.mxu0 %vm1463_vm2, %v20032_v61  ;;  %v17889_v36 = vadd.f32 %v13081_v58, %v13080_v46  ;;  %v13083_v45 = vpop.f32.mrb[146].mxu1  ;;  %v20035_v46 = vpack.c.bf16 %v17740_v49, %v17737_v51  ;;  %v15753_v61 = vld [vmem:[#allocation3 + $0x5e0] ss:$8 sps:$4 sm:$0xff]  }
 0x37c   : > { %v13084_v52 = vpop.f32.mrb[147].mxu1 }
 0x37d   : > { %v17891_v54 = vadd.f32 %v13084_v52, %v13083_v45  ;;  %v20037_v52 = vpack.c.bf16 %v17776_v3, %v17773_v16 }
 0x37f   : > { %v2867_v18 = vpack.c.bf16 %v17891_v54, %v17889_v36  ;;  %4070 = vmatmul.mubr.bf16.gmra.mrb[240].mxu1 %v15747_v32  ;;  %v20039_v32 = vpack.c.bf16 %v17805_v22, %v17803_v1 }
 0x380   : > { %4077 = vmatprep.mubr.bf16.mxu1 %v15751_v6 }
 0x381   : > { %v13086_v26 = vpop.f32.mrb[148].mxu1 }
 0x382   : > { %14417 = vmatmul.mubr.msk.bf16.gmra.mrb[84].mxu0 %vm1463_vm2, %v20033_v30  ;;  %v13087_v42 = vpop.f32.mrb[149].mxu1 }
 0x383   : > { %14420 = vmatprep.mubr.msk.bf16.mxu0 %vm1463_vm2, %v20034_v24  ;;  %v17903_v60 = vadd.f32 %v13087_v42, %v13086_v26  ;;  %v13089_v13 = vpop.f32.mrb[150].mxu1  ;;  %v20038_v26 = vpack.c.bf16 %v17791_v11, %v17789_v50  ;;  %v15765_v50 = vld [vmem:[#allocation3 + $0x604] ss:$8 sps:$4 sm:$0xff]  }
 0x384   : > { %v13090_v47 = vpop.f32.mrb[151].mxu1 }
 0x385   : > { %v17905_v43 = vadd.f32 %v13090_v47, %v13089_v13 }
 0x387   : > { %v2868_v0 = vpack.c.bf16 %v17905_v43, %v17903_v60  ;;  %4078 = vmatmul.mubr.bf16.gmra.mrb[244].mxu1 %v15753_v61  ;;  %v15789_v43 = vld [vmem:[#allocation3 + $0x644] ss:$8 sps:$4 sm:$0xff]  }
 0x388   : > { %4085 = vmatprep.mubr.bf16.mxu1 %v15757_v56  ;;  %v15781_v56 = vld [vmem:[#allocation3 + $0x630] ss:$8 sps:$4 sm:$0xff]  }
 0x389   : > { %v13092_v28 = vpop.f32.mrb[152].mxu1 }
 0x38a   : > { %14421 = vmatmul.mubr.msk.bf16.gmra.mrb[88].mxu0 %vm1463_vm2, %v20035_v46  ;;  %v13093_v62 = vpop.f32.mrb[153].mxu1  ;;  %v15763_v46 = vld [vmem:[#allocation3 + $0x600] ss:$8 sps:$4 sm:$0xff]  }
 0x38b   : > { %14424 = vmatprep.mubr.msk.bf16.mxu0 %vm1463_vm2, %v20036_v40  ;;  %v17917_v58 = vadd.f32 %v13093_v62, %v13092_v28  ;;  %v13095_v57 = vpop.f32.mrb[154].mxu1 }
 0x38c   : > { %v13096_v45 = vpop.f32.mrb[155].mxu1 }
 0x38d   : > { %v17919_v37 = vadd.f32 %v13096_v45, %v13095_v57  ;;  %v15769_v57 = vld [vmem:[#allocation3 + $0x610] ss:$8 sps:$4 sm:$0xff]  }
 0x38f   : > { %v2869_v51 = vpack.c.bf16 %v17919_v37, %v17917_v58  ;;  %4086 = vmatmul.mubr.bf16.gmra.mrb[248].mxu1 %v15759_v19  ;;  %v20041_v37 = vld [vmem:[#allocation46_spill] sm:$0xff] }
 0x390   : > { %4581 = vmatprep.mubr.bf16.mxu1 %v15765_v50  ;;  %v15793_v50 = vld [vmem:[#allocation3 + $0x650] ss:$8 sps:$4 sm:$0xff]  }
 0x391   : > { %v13098_v49 = vpop.f32.mrb[156].mxu1 }
 0x392   : > { %14425 = vmatmul.mubr.msk.bf16.gmra.mrb[92].mxu0 %vm1463_vm2, %v20037_v52  ;;  %v13099_v5 = vpop.f32.mrb[157].mxu1 }
 0x393   : > { %14428 = vmatprep.mubr.msk.bf16.mxu0 %vm1463_vm2, %v20038_v26  ;;  %v13101_v30 = vpop.f32.mrb[158].mxu1  ;;  %v17931_v42 = vadd.f32 %v13099_v5, %v13098_v49  ;;  %v15775_v49 = vld [vmem:[#allocation3 + $0x620] ss:$8 sps:$4 sm:$0xff]  }
 0x394   : > { %v13102_v24 = vpop.f32.mrb[159].mxu1 }
 0x395   : > { %v17933_v13 = vadd.f32 %v13102_v24, %v13101_v30  ;;  %v15787_v24 = vld [vmem:[#allocation3 + $0x640] ss:$8 sps:$4 sm:$0xff]  }
 0x397   : > { %v2870_v3 = vpack.c.bf16 %v17933_v13, %v17931_v42  ;;  %4582 = vmatmul.mubr.bf16.vlgmr.msra.gmra.mrb[252].mxu1 %v15763_v46  ;;  %v15795_v13 = vld [vmem:[#allocation3 + $0x654] ss:$8 sps:$4 sm:$0xff]  }
 0x398   : > { %13551 = vmatpush3.bf16.msra.mxu1 %v17228_v8  ;;  %4589 = vmatprep.mubr.bf16.mxu1 %v15771_v23  ;;  %v15799_v23 = vld [vmem:[#allocation3 + $0x660] ss:$8 sps:$4 sm:$0xff]  }
 0x399   : > { %v13104_v16 = vpop.f32.mrb[160].mxu1  ;;  %13552 = vmatprep.subr.bf16.mxu1 %v17230_v9 }
 0x39a   : > { %14429 = vmatmul.mubr.msk.bf16.gmra.mrb[96].mxu0 %vm1463_vm2, %v20039_v32  ;;  %v13105_v11 = vpop.f32.mrb[161].mxu1 }
 0x39b   : > { %14434 = vmatprep.mubr.msk.bf16.mxu0 %vm1463_vm2, %v2862_v63  ;;  %v13107_v47 = vpop.f32.mrb[162].mxu1  ;;  %v17945_v28 = vadd.f32 %v13105_v11, %v13104_v16 }
 0x39c   : > { %v13108_v62 = vpop.f32.mrb[163].mxu1  ;;  %13553 = vmatpush3.bf16.msra.mxu1 %v17239_v14 }
 0x39d   : > { %v17947_v6 = vadd.f32 %v13108_v62, %v13107_v47  ;;  %13554 = vmatprep.subr.bf16.mxu1 %v17243_v15 }
 0x39f   : > { %v2871_v22 = vpack.c.bf16 %v17947_v6, %v17945_v28  ;;  %4590 = vmatmul.mubr.bf16.gmra.mrb[0].mxu1 %v15769_v57  ;;  %v15801_v6 = vld [vmem:[#allocation3 + $0x664] ss:$8 sps:$4 sm:$0xff]  }
 0x3a0   : > { %13555 = vmatpush3.bf16.msra.mxu1 %v17251_v20  ;;  %4597 = vmatprep.mubr.bf16.mxu1 %v15777_v21  ;;  %v15816_v21 = vld [vmem:[#allocation3 + $0x694] ss:$8 sps:$4 sm:$0xff]  }
 0x3a1   : > { %v13110_v1 = vpop.f32.mrb[164].mxu1  ;;  %13556 = vmatprep.subr.bf16.mxu1 %v19976_v38 }
 0x3a2   : > { %14435 = vmatmul.mubr.msk.bf16.vlgmr.msra.gmra.mrb[68].mxu0 %vm1463_vm2, %v2863_v34  ;;  %v13111_v31 = vpop.f32.mrb[165].mxu1 }
 0x3a3   : > { %14438 = vmatprep.mubr.msk.bf16.mxu0 %vm1463_vm2, %v2864_v2  ;;  %v17961_v63 = vadd.f32 %v13111_v31, %v13110_v1  ;;  %v13113_v40 = vpop.f32.mrb[166].mxu1  ;;  %13164 = vmatpush3.bf16.msra.mxu0 %v17228_v8  ;;  %v4111_v8 = vld [vmem:[#allocation5 + $0xa] sm:$0x3] }
 0x3a4   : > { %v13114_v61 = vpop.f32.mrb[167].mxu1  ;;  %13165 = vmatprep.subr.bf16.mxu0 %v17230_v9  ;;  %13557 = vmatpush3.bf16.msra.mxu1 %v19983_v12 }
 0x3a5   : > { %v17965_v48 = vadd.f32 %v13114_v61, %v13113_v40  ;;  %13558 = vmatprep.subr.bf16.mxu1 %v19984_v59  ;;  %v15807_v61 = vld [vmem:[#allocation3 + $0x674] ss:$8 sps:$4 sm:$0xff]  }
 0x3a7   : > { %v2872_v55 = vpack.c.bf16 %v17965_v48, %v17961_v63  ;;  %13166 = vmatpush3.bf16.msra.mxu0 %v17239_v14  ;;  %4598 = vmatmul.mubr.bf16.gmra.mrb[4].mxu1 %v15775_v49  ;;  %v15805_v48 = vld [vmem:[#allocation3 + $0x670] ss:$8 sps:$4 sm:$0xff]  }
 0x3a8   : > { %13167 = vmatprep.subr.bf16.mxu0 %v17243_v15  ;;  %13559 = vmatpush3.bf16.msra.mxu1 %v19985_v7  ;;  %v15814_v49 = vld [vmem:[#allocation3 + $0x690] ss:$8 sps:$4 sm:$0xff]  }
 0x3a9   : > { %v13116_v34 = vpop.f32.mrb[168].mxu1  ;;  %13560 = vmatprep.subr.bf16.mxu1 %v19986_v17  ;;  %4605 = vmatprep.mubr.bf16.mxu1 %v15783_v25  ;;  %v15732_v25 = vld [vmem:[#allocation3 + $0x420] ss:$8 sps:$4 sm:$0xff]  }
 0x3aa   : > { %14439 = vmatmul.mubr.msk.bf16.gmra.mrb[72].mxu0 %vm1463_vm2, %v2865_v35  ;;  %v13117_v44 = vpop.f32.mrb[169].mxu1 }
 0x3ab   : > { %14442 = vmatprep.mubr.msk.bf16.mxu0 %vm1463_vm2, %v2866_v29  ;;  %v17983_v2 = vadd.f32 %v13117_v44, %v13116_v34  ;;  %v13119_v45 = vpop.f32.mrb[170].mxu1  ;;  %13168 = vmatpush3.bf16.msra.mxu0 %v17251_v20  ;;  %v15813_v34 = vld [vmem:[#allocation3 + $0x684] ss:$8 sps:$4 sm:$0xff]   ;;  %v15811_v44 = vld [vmem:[#allocation3 + $0x680] ss:$8 sps:$4 sm:$0xff]  }
 0x3ac   : > { %v13120_v52 = vpop.f32.mrb[171].mxu1  ;;  %13169 = vmatprep.subr.bf16.mxu0 %v19976_v38  ;;  %13561 = vmatpush3.bf16.msra.mxu1 %v19993_v39 }
 0x3ad   : > { %v13121_v10 = vadd.f32 %v13120_v52, %v13119_v45  ;;  %13562 = vmatprep.subr.bf16.mxu1 %v19994_v41  ;;  %v15724_v45 = vld [vmem:[#allocation3 + $0x414] ss:$8 sps:$4 sm:$0xff]   ;;  %v15819_v52 = vld [vmem:[#allocation3 + $0x6a4] ss:$8 sps:$4 sm:$0xff]  }
 0x3af   : > { %v2873_v4 = vpack.c.bf16 %v13121_v10, %v17983_v2  ;;  %13170 = vmatpush3.bf16.msra.mxu0 %v19983_v12  ;;  %4606 = vmatmul.mubr.bf16.gmra.mrb[8].mxu1 %v15781_v56  ;;  %v15718_v2 = vld [vmem:[#allocation3 + $0x400] ss:$8 sps:$4 sm:$0xff]   ;;  %v15726_v10 = vld [vmem:[#allocation3 + $0x410] ss:$8 sps:$4 sm:$0xff]  }
 0x3b0   : > { %13171 = vmatprep.subr.bf16.mxu0 %v19984_v59  ;;  %13563 = vmatpush3.bf16.msra.mxu1 %v19995_v27 }
 0x3b1   : > { %v13122_v35 = vpop.f32.mrb[172].mxu1  ;;  %4613 = vmatprep.mubr.bf16.mxu1 %v15789_v43  ;;  %v15738_v43 = vld [vmem:[#allocation3 + $0x430] ss:$8 sps:$4 sm:$0xff]  }
 0x3b2   : > { %14443 = vmatmul.mubr.msk.bf16.gmra.mrb[76].mxu0 %vm1463_vm2, %v2867_v18  ;;  %v13123_v33 = vpop.f32.mrb[173].mxu1 }
 0x3b3   : > { %14446 = vmatprep.mubr.msk.bf16.mxu0 %vm1463_vm2, %v2868_v0  ;;  %v13124_v29 = vadd.f32 %v13123_v33, %v13122_v35  ;;  %v13125_v5 = vpop.f32.mrb[174].mxu1  ;;  %13172 = vmatpush3.bf16.msra.mxu0 %v19985_v7  ;;  %v20040_v0 = vld [vmem:[#allocation45_spill] sm:$0xff] }
 0x3b4   : > { %v13126_v26 = vpop.f32.mrb[175].mxu1  ;;  %13173 = vmatprep.subr.bf16.mxu0 %v19986_v17  ;;  %13564 = vmatprep.subr.bf16.mxu1 %v20040_v0  ;;  %v15817_v35 = vld [vmem:[#allocation3 + $0x6a0] ss:$8 sps:$4 sm:$0xff]   ;;  %v15822_v33 = vld [vmem:[#allocation3 + $0x6b4] ss:$8 sps:$4 sm:$0xff]  }
 0x3b5   : > { %v13127_v36 = vadd.f32 %v13126_v26, %v13125_v5  ;;  %13565 = vmatpush3.bf16.msra.mxu1 %v20041_v37  ;;  %v15820_v26 = vld [vmem:[#allocation3 + $0x6b0] ss:$8 sps:$4 sm:$0xff]  }
 0x3b7   : > { %v2874_v54 = vpack.c.bf16 %v13127_v36, %v13124_v29  ;;  %13174 = vmatpush3.bf16.msra.mxu0 %v19993_v39  ;;  %4614 = vmatmul.mubr.bf16.gmra.mrb[12].mxu1 %v15787_v24  ;;  %v15736_v29 = vld [vmem:[#allocation3 + $0x434] ss:$8 sps:$4 sm:$0xff]  }
 0x3b8   : > { %13175 = vmatprep.subr.bf16.mxu0 %v19994_v41  ;;  %4621 = vmatprep.mubr.bf16.mxu1 %v15795_v13  ;;  %v15828_v13 = vld [vmem:[#allocation3 + $0x6d4] ss:$8 sps:$4 sm:$0xff]  }
 0x3b9   : > { %v13128_v18 = vpop.f32.mrb[176].mxu1  ;;  %v15882_v39 = vld [vmem:[#allocation3 + $0x7f4] ss:$8 sps:$4 sm:$0xff]  }
 0x3ba   : > { %14447 = vmatmul.mubr.msk.bf16.gmra.mrb[80].mxu0 %vm1463_vm2, %v2869_v51  ;;  %v13129_v60 = vpop.f32.mrb[177].mxu1 }
 0x3bb   : > { %14450 = vmatprep.mubr.msk.bf16.mxu0 %vm1463_vm2, %v2870_v3  ;;  %v13130_v30 = vadd.f32 %v13129_v60, %v13128_v18  ;;  %v13131_v19 = vpop.f32.mrb[178].mxu1  ;;  %13176 = vmatpush3.bf16.msra.mxu0 %v19995_v27  ;;  %v15825_v18 = vld [vmem:[#allocation3 + $0x6c4] ss:$8 sps:$4 sm:$0xff]  }
 0x3bc   : > { %v13132_v16 = vpop.f32.mrb[179].mxu1  ;;  %13177 = vmatprep.subr.bf16.mxu0 %v20040_v0  ;;  %v15879_v27 = vld [vmem:[#allocation3 + $0x7e4] ss:$8 sps:$4 sm:$0xff]  }
 0x3bd   : > { %v13133_v58 = vadd.f32 %v13132_v16, %v13131_v19  ;;  %v15742_v19 = vld [vmem:[#allocation3 + $0x444] ss:$8 sps:$4 sm:$0xff]  }
 0x3bf   : > { %v2875_v51 = vpack.c.bf16 %v13133_v58, %v13130_v30  ;;  %13178 = vmatpush3.bf16.msra.mxu0 %v20041_v37  ;;  %4622 = vmatmul.mubr.bf16.gmra.mrb[16].mxu1 %v15793_v50  ;;  %v15876_v37 = vld [vmem:[#allocation3 + $0x7d4] ss:$8 sps:$4 sm:$0xff]  }
 0x3c0   : > { %4629 = vmatprep.mubr.bf16.mxu1 %v15801_v6 }
 0x3c1   : > { %v13134_v32 = vpop.f32.mrb[180].mxu1 }
 0x3c2   : > { %14451 = vmatmul.mubr.msk.bf16.gmra.mrb[84].mxu0 %vm1463_vm2, %v2871_v22  ;;  %v13135_v42 = vpop.f32.mrb[181].mxu1 }
 0x3c3   : > { %14454 = vmatprep.mubr.msk.bf16.mxu0 %vm1463_vm2, %v2872_v55  ;;  %v13136_v3 = vadd.f32 %v13135_v42, %v13134_v32  ;;  %v13137_v11 = vpop.f32.mrb[182].mxu1  ;;  %v15720_v55 = vld [vmem:[#allocation3 + $0x404] ss:$8 sps:$4 sm:$0xff]  }
 0x3c4   : > { %v13138_v47 = vpop.f32.mrb[183].mxu1 }
 0x3c5   : > { %v13139_v46 = vadd.f32 %v13138_v47, %v13137_v11  ;;  %v15744_v11 = vld [vmem:[#allocation3 + $0x440] ss:$8 sps:$4 sm:$0xff]   ;;  %v15748_v47 = vld [vmem:[#allocation3 + $0x454] ss:$8 sps:$4 sm:$0xff]  }
 0x3c7   : > { %v2876_v62 = vpack.c.bf16 %v13139_v46, %v13136_v3  ;;  %4630 = vmatmul.mubr.bf16.gmra.mrb[20].mxu1 %v15799_v23  ;;  %v15873_v46 = vld [vmem:[#allocation3 + $0x7c4] ss:$8 sps:$4 sm:$0xff]  }
 0x3c8   : > { %4637 = vmatprep.mubr.bf16.mxu1 %v15807_v61 }
 0x3c9   : > { %v13140_v1 = vpop.f32.mrb[184].mxu1 }
 0x3ca   : > { %14455 = vmatmul.mubr.msk.bf16.gmra.mrb[88].mxu0 %vm1463_vm2, %v2873_v4  ;;  %v13141_v28 = vpop.f32.mrb[185].mxu1  ;;  %v15730_v4 = vld [vmem:[#allocation3 + $0x424] ss:$8 sps:$4 sm:$0xff]  }
 0x3cb   : > { %14458 = vmatprep.mubr.msk.bf16.mxu0 %vm1463_vm2, %v2874_v54  ;;  %v13142_v22 = vadd.f32 %v13141_v28, %v13140_v1  ;;  %v13143_v31 = vpop.f32.mrb[186].mxu1  ;;  %v15826_v28 = vld [vmem:[#allocation3 + $0x6d0] ss:$8 sps:$4 sm:$0xff]  }
 0x3cc   : > { %v13144_v63 = vpop.f32.mrb[187].mxu1 }
 0x3cd   : > { %v13145_v40 = vadd.f32 %v13144_v63, %v13143_v31  ;;  %v15831_v31 = vld [vmem:[#allocation3 + $0x6e4] ss:$8 sps:$4 sm:$0xff]   ;;  %v15750_v63 = vld [vmem:[#allocation3 + $0x450] ss:$8 sps:$4 sm:$0xff]  }
 0x3cf   : > { %v2877_v57 = vpack.c.bf16 %v13145_v40, %v13142_v22  ;;  %4638 = vmatmul.mubr.bf16.gmra.mrb[24].mxu1 %v15805_v48 }
 0x3d0   : > { %4645 = vmatprep.mubr.bf16.mxu1 %v15813_v34  ;;  %v15829_v34 = vld [vmem:[#allocation3 + $0x6e0] ss:$8 sps:$4 sm:$0xff]  }
 0x3d2   : > { %14459 = vmatmul.mubr.msk.bf16.gmra.mrb[92].mxu0 %vm1463_vm2, %v2875_v51  ;;  %v15823_v51 = vld [vmem:[#allocation3 + $0x6c0] ss:$8 sps:$4 sm:$0xff]  }
 0x3d3   : > { %14462 = vmatprep.mubr.msk.bf16.mxu0 %vm1463_vm2, %v2876_v62 }
 0x3d7   : > { %4646 = vmatmul.mubr.bf16.gmra.mrb[28].mxu1 %v15811_v44 }
 0x3d8   : > { %4653 = vmatprep.mubr.bf16.mxu1 %v15816_v21 }
 0x3da   : > { %14463 = vmatmul.mubr.msk.bf16.gmra.mrb[96].mxu0 %vm1463_vm2, %v2877_v57  ;;  %v13308_v5 = vpop.f32.mrb[188].mxu1  ;;  %v15754_v57 = vld [vmem:[#allocation3 + $0x464] ss:$8 sps:$4 sm:$0xff]  }
 0x3db   : > { %3349 = vmatprep.mubr.bf16.mxu0 %v15720_v55  ;;  %v13309_v56 = vpop.f32.mrb[189].mxu1 }
 0x3dc   : > { %v18035_v36 = vadd.f32 %v13309_v56, %v13308_v5  ;;  %v13311_v54 = vpop.f32.mrb[190].mxu1  ;;  %v15837_v56 = vld [vmem:[#allocation3 + $0x704] ss:$8 sps:$4 sm:$0xff]  }
 0x3dd   : > { %v13312_v60 = vpop.f32.mrb[191].mxu1 }
 0x3de   : > { %v18037_v30 = vadd.f32 %v13312_v60, %v13311_v54  ;;  %v15762_v54 = vld [vmem:[#allocation3 + $0x470] ss:$8 sps:$4 sm:$0xff]   ;;  %v15766_v60 = vld [vmem:[#allocation3 + $0x484] ss:$8 sps:$4 sm:$0xff]  }
 0x3df   : > { %4654 = vmatmul.mubr.bf16.gmra.mrb[32].mxu1 %v15814_v49  ;;  %v15756_v49 = vld [vmem:[#allocation3 + $0x460] ss:$8 sps:$4 sm:$0xff]  }
 0x3e0   : > { %4661 = vmatprep.mubr.bf16.mxu1 %v15819_v52 }
 0x3e2   : > { %3350 = vmatmul.mubr.bf16.vlgmr.msra.gmra.mrb[100].mxu0 %v15718_v2  ;;  %v15834_v2 = vld [vmem:[#allocation3 + $0x6f4] ss:$8 sps:$4 sm:$0xff]  }
 0x3e3   : > { %3357 = vmatprep.mubr.bf16.mxu0 %v15724_v45 }
 0x3e7   : > { %4662 = vmatmul.mubr.bf16.gmra.mrb[36].mxu1 %v15817_v35 }
 0x3e8   : > { %4669 = vmatprep.mubr.bf16.mxu1 %v15822_v33  ;;  %v13314_v16 = vpop.f32.mrb[192].mxu1 }
 0x3e9   : > { %v13315_v58 = vpop.f32.mrb[193].mxu1 }
 0x3ea   : > { %3358 = vmatmul.mubr.bf16.gmra.mrb[104].mxu0 %v15726_v10  ;;  %v18041_v32 = vadd.f32 %v13315_v58, %v13314_v16  ;;  %v13317_v42 = vpop.f32.mrb[194].mxu1  ;;  %v15760_v10 = vld [vmem:[#allocation3 + $0x474] ss:$8 sps:$4 sm:$0xff]   ;;  %v15835_v58 = vld [vmem:[#allocation3 + $0x700] ss:$8 sps:$4 sm:$0xff]  }
 0x3eb   : > { %3365 = vmatprep.mubr.bf16.mxu0 %v15730_v4  ;;  %v13318_v3 = vpop.f32.mrb[195].mxu1  ;;  %v15870_v4 = vld [vmem:[#allocation3 + $0x7b4] ss:$8 sps:$4 sm:$0xff]  }
 0x3ec   : > { %v18043_v50 = vadd.f32 %v13318_v3, %v13317_v42 }
 0x3ef   : > { %4670 = vmatmul.mubr.bf16.gmra.mrb[40].mxu1 %v15820_v26 }
 0x3f0   : > { %4677 = vmatprep.mubr.bf16.mxu1 %v15825_v18 }
 0x3f1   : > { %v13320_v62 = vpop.f32.mrb[196].mxu1 }
 0x3f2   : > { %3366 = vmatmul.mubr.bf16.gmra.mrb[108].mxu0 %v15732_v25  ;;  %v13321_v1 = vpop.f32.mrb[197].mxu1  ;;  %v15832_v25 = vld [vmem:[#allocation3 + $0x6f0] ss:$8 sps:$4 sm:$0xff]  }
 0x3f3   : > { %3373 = vmatprep.mubr.bf16.mxu0 %v15736_v29  ;;  %v18047_v6 = vadd.f32 %v13321_v1, %v13320_v62  ;;  %v13323_v22 = vpop.f32.mrb[198].mxu1  ;;  %v15772_v62 = vld [vmem:[#allocation3 + $0x494] ss:$8 sps:$4 sm:$0xff]   ;;  %v15867_v1 = vld [vmem:[#allocation3 + $0x7a4] ss:$8 sps:$4 sm:$0xff]  }
 0x3f4   : > { %v13324_v23 = vpop.f32.mrb[199].mxu1 }
 0x3f5   : > { %v18049_v40 = vadd.f32 %v13324_v23, %v13323_v22 }
 0x3f7   : > { %4678 = vmatmul.mubr.bf16.gmra.mrb[44].mxu1 %v15823_v51 }
 0x3f8   : > { %4685 = vmatprep.mubr.bf16.mxu1 %v15828_v13  ;;  %v15840_v13 = vld [vmem:[#allocation3 + $0x714] ss:$8 sps:$4 sm:$0xff]  }
 0x3fa   : > { %3374 = vmatmul.mubr.bf16.gmra.mrb[112].mxu0 %v15738_v43 }
 0x3fb   : > { %3381 = vmatprep.mubr.bf16.mxu0 %v15742_v19 }
 0x3ff   : > { %4686 = vmatmul.mubr.bf16.gmra.mrb[48].mxu1 %v15826_v28 }
 0x400   : > { %4693 = vmatprep.mubr.bf16.mxu1 %v15831_v31  ;;  %v15838_v31 = vld [vmem:[#allocation3 + $0x710] ss:$8 sps:$4 sm:$0xff]  }
 0x401   : > { %v13326_v48 = vpop.f32.mrb[200].mxu1 }
 0x402   : > { %3382 = vmatmul.mubr.bf16.gmra.mrb[116].mxu0 %v15744_v11  ;;  %v13327_v55 = vpop.f32.mrb[201].mxu1  ;;  %v15768_v11 = vld [vmem:[#allocation3 + $0x480] ss:$8 sps:$4 sm:$0xff]  }
 0x403   : > { %3389 = vmatprep.mubr.bf16.mxu0 %v15748_v47  ;;  %v18053_v44 = vadd.f32 %v13327_v55, %v13326_v48  ;;  %v13329_v21 = vpop.f32.mrb[202].mxu1  ;;  %v15774_v55 = vld [vmem:[#allocation3 + $0x490] ss:$8 sps:$4 sm:$0xff]  }
 0x404   : > { %v13330_v45 = vpop.f32.mrb[203].mxu1 }
 0x405   : > { %v18055_v52 = vadd.f32 %v13330_v45, %v13329_v21  ;;  %v15778_v21 = vld [vmem:[#allocation3 + $0x4a4] ss:$8 sps:$4 sm:$0xff]  }
 0x407   : > { %4694 = vmatmul.mubr.bf16.gmra.mrb[52].mxu1 %v15829_v34 }
 0x408   : > { %4701 = vmatprep.mubr.bf16.mxu1 %v15834_v2 }
 0x409   : > { %v13332_v35 = vpop.f32.mrb[204].mxu1 }
 0x40a   : > { %3390 = vmatmul.mubr.bf16.gmra.mrb[120].mxu0 %v15750_v63  ;;  %v13333_v33 = vpop.f32.mrb[205].mxu1 }
 0x40b   : > { %3397 = vmatprep.mubr.bf16.mxu0 %v15754_v57  ;;  %v18059_v29 = vadd.f32 %v13333_v33, %v13332_v35  ;;  %v13335_v5 = vpop.f32.mrb[206].mxu1  ;;  %v15843_v57 = vld [vmem:[#allocation3 + $0x724] ss:$8 sps:$4 sm:$0xff]  }
 0x40c   : > { %v13336_v26 = vpop.f32.mrb[207].mxu1 }
 0x40d   : > { %v18061_v18 = vadd.f32 %v13336_v26, %v13335_v5  ;;  %v15780_v5 = vld [vmem:[#allocation3 + $0x4a0] ss:$8 sps:$4 sm:$0xff]   ;;  %v15784_v26 = vld [vmem:[#allocation3 + $0x4b4] ss:$8 sps:$4 sm:$0xff]  }
 0x40f   : > { %4702 = vmatmul.mubr.bf16.gmra.mrb[56].mxu1 %v15832_v25 }
 0x410   : > { %5197 = vmatprep.mubr.bf16.mxu1 %v15837_v56 }
 0x411   : > { %v13338_v19 = vpop.f32.mrb[208].mxu1 }
 0x412   : > { %3398 = vmatmul.mubr.bf16.gmra.mrb[124].mxu0 %v15756_v49  ;;  %v13339_v16 = vpop.f32.mrb[209].mxu1 }
 0x413   : > { %3405 = vmatprep.mubr.bf16.mxu0 %v15760_v10  ;;  %v18065_v51 = vadd.f32 %v13339_v16, %v13338_v19  ;;  %v13341_v42 = vpop.f32.mrb[210].mxu1  ;;  %v15841_v10 = vld [vmem:[#allocation3 + $0x720] ss:$8 sps:$4 sm:$0xff]  }
 0x414   : > { %v13342_v3 = vpop.f32.mrb[211].mxu1 }
 0x415   : > { %v18067_v47 = vadd.f32 %v13342_v3, %v13341_v42  ;;  %v15846_v42 = vld [vmem:[#allocation3 + $0x734] ss:$8 sps:$4 sm:$0xff]   ;;  %v15844_v3 = vld [vmem:[#allocation3 + $0x730] ss:$8 sps:$4 sm:$0xff]  }
 0x417   : > { %5198 = vmatmul.mubr.bf16.vlgmr.msra.gmra.mrb[60].mxu1 %v15835_v58 }
 0x418   : > { %5205 = vmatprep.mubr.bf16.mxu1 %v15840_v13 }
 0x41a   : > { %3406 = vmatmul.mubr.bf16.gmra.mrb[128].mxu0 %v15762_v54  ;;  %v13344_v28 = vpop.f32.mrb[212].mxu1 }
 0x41b   : > { %3413 = vmatprep.mubr.bf16.mxu0 %v15766_v60  ;;  %v13345_v22 = vpop.f32.mrb[213].mxu1 }
 0x41c   : > { %v18071_v23 = vadd.f32 %v13345_v22, %v13344_v28  ;;  %v13347_v63 = vpop.f32.mrb[214].mxu1  ;;  %v15790_v28 = vld [vmem:[#allocation3 + $0x4c4] ss:$8 sps:$4 sm:$0xff]   ;;  %v15810_v22 = vld [vmem:[#allocation3 + $0x4f0] ss:$8 sps:$4 sm:$0xff]  }
 0x41d   : > { %v13348_v48 = vpop.f32.mrb[215].mxu1 }
 0x41e   : > { %v18073_v34 = vadd.f32 %v13348_v48, %v13347_v63 }
 0x41f   : > { %5206 = vmatmul.mubr.bf16.gmra.mrb[64].mxu1 %v15838_v31 }
 0x420   : > { %5213 = vmatprep.mubr.bf16.mxu1 %v15843_v57 }
 0x422   : > { %3414 = vmatmul.mubr.bf16.gmra.mrb[132].mxu0 %v15768_v11  ;;  %v13350_v45 = vpop.f32.mrb[216].mxu1  ;;  %v15786_v11 = vld [vmem:[#allocation3 + $0x4b0] ss:$8 sps:$4 sm:$0xff]  }
 0x423   : > { %3421 = vmatprep.mubr.bf16.mxu0 %v15772_v62  ;;  %v13351_v49 = vpop.f32.mrb[217].mxu1 }
 0x424   : > { %v18077_v35 = vadd.f32 %v13351_v49, %v13350_v45  ;;  %v13353_v33 = vpop.f32.mrb[218].mxu1  ;;  %v15847_v45 = vld [vmem:[#allocation3 + $0x740] ss:$8 sps:$4 sm:$0xff]  }
 0x425   : > { %v13354_v25 = vpop.f32.mrb[219].mxu1  ;;  %v15792_v49 = vld [vmem:[#allocation3 + $0x4c0] ss:$8 sps:$4 sm:$0xff]  }
 0x426   : > { %v18079_v56 = vadd.f32 %v13354_v25, %v13353_v33  ;;  %v3495_v33 = vld [vmem:[#allocation5 + $0x8] sm:$0x3]  ;;  %v15796_v25 = vld [vmem:[#allocation3 + $0x4d4] ss:$8 sps:$4 sm:$0xff]  }
 0x427   : > { %5214 = vmatmul.mubr.bf16.gmra.mrb[68].mxu1 %v15841_v10 }
 0x428   : > { %5221 = vmatprep.mubr.bf16.mxu1 %v15846_v42 }
 0x42a   : > { %3422 = vmatmul.mubr.bf16.gmra.mrb[136].mxu0 %v15774_v55  ;;  %v13356_v60 = vpop.f32.mrb[220].mxu1  ;;  %v15849_v55 = vld [vmem:[#allocation3 + $0x744] ss:$8 sps:$4 sm:$0xff]  }
 0x42b   : > { %3429 = vmatprep.mubr.bf16.mxu0 %v15778_v21  ;;  %v13357_v19 = vpop.f32.mrb[221].mxu1 }
 0x42c   : > { %v18083_v16 = vadd.f32 %v13357_v19, %v13356_v60  ;;  %v13359_v58 = vpop.f32.mrb[222].mxu1 }
 0x42d   : > { %v13360_v13 = vpop.f32.mrb[223].mxu1 }
 0x42e   : > { %v18085_v62 = vadd.f32 %v13360_v13, %v13359_v58 }
 0x42f   : > { %5222 = vmatmul.mubr.bf16.gmra.mrb[72].mxu1 %v15844_v3  ;;  %v15852_v3 = vld [vmem:[#allocation3 + $0x754] ss:$8 sps:$4 sm:$0xff]  }
 0x430   : > { %5229 = vmatprep.mubr.bf16.mxu1 %v15849_v55  ;;  %v15856_v55 = vld [vmem:[#allocation3 + $0x770] ss:$8 sps:$4 sm:$0xff]  }
 0x432   : > { %3430 = vmatmul.mubr.bf16.gmra.mrb[140].mxu0 %v15780_v5  ;;  %v13362_v31 = vpop.f32.mrb[224].mxu1  ;;  %v20042_v5 = vld [vmem:[#allocation47_spill] sm:$0xff] }
 0x433   : > { %3437 = vmatprep.mubr.bf16.mxu0 %v15784_v26  ;;  %v13363_v63 = vpop.f32.mrb[225].mxu1  ;;  %v3545_v26 = vand.u32 %v3495_v33, %v20042_v5 }
 0x434   : > { %v18089_v57 = vadd.f32 %v13363_v63, %v13362_v31  ;;  %v13365_v48 = vpop.f32.mrb[226].mxu1  ;;  %v15798_v31 = vld [vmem:[#allocation3 + $0x4d0] ss:$8 sps:$4 sm:$0xff]  }
 0x435   : > { %v13366_v21 = vpop.f32.mrb[227].mxu1  ;;  %14466 = vmatprep.subr.bf16.mxu0 %v3545_v26 }
 0x436   : > { %v18091_v10 = vadd.f32 %v13366_v21, %v13365_v48  ;;  %14467 = vmatpush3.bf16.msra.mxu0 %v3545_v26  ;;  %v15802_v48 = vld [vmem:[#allocation3 + $0x4e4] ss:$8 sps:$4 sm:$0xff]  }
 0x437   : > { %5230 = vmatmul.mubr.bf16.gmra.mrb[76].mxu1 %v15847_v45 }
 0x438   : > { %5237 = vmatprep.mubr.bf16.mxu1 %v15852_v3 }
 0x43a   : > { %3438 = vmatmul.mubr.bf16.gmra.mrb[144].mxu0 %v15786_v11  ;;  %v13368_v19 = vpop.f32.mrb[228].mxu1 }
 0x43b   : > { %3445 = vmatprep.mubr.bf16.mxu0 %v15790_v28  ;;  %v13369_v58 = vpop.f32.mrb[229].mxu1  ;;  %v15850_v28 = vld [vmem:[#allocation3 + $0x750] ss:$8 sps:$4 sm:$0xff]  }
 0x43c   : > { %v18096_v42 = vadd.f32 %v13369_v58, %v13368_v19  ;;  %v13371_v13 = vpop.f32.mrb[230].mxu1  ;;  %v15853_v19 = vld [vmem:[#allocation3 + $0x760] ss:$8 sps:$4 sm:$0xff]  }
 0x43d   : > { %v13372_v11 = vpop.f32.mrb[231].mxu1  ;;  %v15804_v58 = vld [vmem:[#allocation3 + $0x4e0] ss:$8 sps:$4 sm:$0xff]  }
 0x43e   : > { %v18098_v63 = vadd.f32 %v13372_v11, %v13371_v13  ;;  %v15808_v13 = vld [vmem:[#allocation3 + $0x4f4] ss:$8 sps:$4 sm:$0xff]  }
 0x43f   : > { %5238 = vmatmul.mubr.bf16.gmra.mrb[80].mxu1 %v15850_v28 }
 0x442   : > { %3446 = vmatmul.mubr.bf16.gmra.mrb[148].mxu0 %v15792_v49  ;;  %v13374_v21 = vpop.f32.mrb[232].mxu1 }
 0x443   : > { %3453 = vmatprep.mubr.bf16.mxu0 %v15796_v25  ;;  %v13375_v45 = vpop.f32.mrb[233].mxu1  ;;  %v15855_v25 = vld [vmem:[#allocation3 + $0x764] ss:$8 sps:$4 sm:$0xff]  }
 0x444   : > { %v18102_v49 = vadd.f32 %v13375_v45, %v13374_v21  ;;  %v13377_v33 = vpop.f32.mrb[234].mxu1  ;;  %5245 = vmatprep.mubr.bf16.mxu1 %v15855_v25  ;;  %v15858_v21 = vld [vmem:[#allocation3 + $0x774] ss:$8 sps:$4 sm:$0xff]  }
 0x445   : > { %v13378_v26 = vpop.f32.mrb[235].mxu1 }
 0x446   : > { %v18104_v60 = vadd.f32 %v13378_v26, %v13377_v33  ;;  %v15864_v33 = vld [vmem:[#allocation3 + $0x794] ss:$8 sps:$4 sm:$0xff]  }
 0x447   : > { %5246 = vmatmul.mubr.bf16.gmra.mrb[84].mxu1 %v15853_v19 }
 0x448   : > { %5253 = vmatprep.mubr.bf16.mxu1 %v15858_v21 }
 0x44a   : > { %3454 = vmatmul.mubr.bf16.gmra.mrb[152].mxu0 %v15798_v31  ;;  %v13380_v11 = vpop.f32.mrb[236].mxu1 }
 0x44b   : > { %3461 = vmatprep.mubr.bf16.mxu0 %v15802_v48  ;;  %v13381_v28 = vpop.f32.mrb[237].mxu1 }
 0x44c   : > { %v18108_v31 = vadd.f32 %v13381_v28, %v13380_v11  ;;  %v13383_v48 = vpop.f32.mrb[238].mxu1  ;;  %v15859_v28 = vld [vmem:[#allocation3 + $0x780] ss:$8 sps:$4 sm:$0xff]  }
 0x44d   : > { %v13384_v45 = vpop.f32.mrb[239].mxu1 }
 0x44e   : > { %v18110_v54 = vadd.f32 %v13384_v45, %v13383_v48 }
 0x44f   : > { %5254 = vmatmul.mubr.bf16.gmra.mrb[88].mxu1 %v15856_v55 }
 0x452   : > { %3462 = vmatmul.mubr.bf16.gmra.mrb[156].mxu0 %v15804_v58  ;;  %v13386_v25 = vpop.f32.mrb[240].mxu1 }
 0x453   : > { %3469 = vmatprep.mubr.bf16.mxu0 %v15808_v13  ;;  %v13387_v26 = vpop.f32.mrb[241].mxu1  ;;  %v15861_v13 = vld [vmem:[#allocation3 + $0x784] ss:$8 sps:$4 sm:$0xff]  }
 0x454   : > { %v18114_v19 = vadd.f32 %v13387_v26, %v13386_v25  ;;  %v13389_v58 = vpop.f32.mrb[242].mxu1  ;;  %5261 = vmatprep.mubr.bf16.mxu1 %v15861_v13  ;;  %v15862_v25 = vld [vmem:[#allocation3 + $0x790] ss:$8 sps:$4 sm:$0xff]  }
 0x455   : > { %v13390_v11 = vpop.f32.mrb[243].mxu1 }
 0x456   : > { %v18116_v3 = vadd.f32 %v13390_v11, %v13389_v58 }
 0x457   : > { %5262 = vmatmul.mubr.bf16.gmra.mrb[92].mxu1 %v15859_v28 }
 0x458   : > { %5269 = vmatprep.mubr.bf16.mxu1 %v15864_v33 }
 0x45a   : > { %3470 = vmatmul.mubr.bf16.gmra.mrb[160].mxu0 %v15810_v22  ;;  %v13392_v55 = vpop.f32.mrb[244].mxu1 }
 0x45b   : > { %v13393_v21 = vpop.f32.mrb[245].mxu1 }
 0x45c   : > { %v18120_v45 = vadd.f32 %v13393_v21, %v13392_v55  ;;  %v13395_v22 = vpop.f32.mrb[246].mxu1  ;;  %v15865_v55 = vld [vmem:[#allocation3 + $0x7a0] ss:$8 sps:$4 sm:$0xff]  }
 0x45d   : > { %v13396_v2 = vpop.f32.mrb[247].mxu1 }
 0x45e   : > { %v18122_v26 = vadd.f32 %v13396_v2, %v13395_v22 }
 0x45f   : > { %5270 = vmatmul.mubr.bf16.gmra.mrb[96].mxu1 %v15862_v25 }
 0x460   : > { %5277 = vmatprep.mubr.bf16.mxu1 %v15867_v1 }
 0x462   : > { %v13398_v13 = vpop.f32.mrb[248].mxu1 }
 0x463   : > { %v13399_v11 = vpop.f32.mrb[249].mxu1 }
 0x464   : > { %v18126_v28 = vadd.f32 %v13399_v11, %v13398_v13  ;;  %v13401_v48 = vpop.f32.mrb[250].mxu1  ;;  %v15868_v13 = vld [vmem:[#allocation3 + $0x7b0] ss:$8 sps:$4 sm:$0xff]  }
 0x465   : > { %v13402_v43 = vpop.f32.mrb[251].mxu1 }
 0x466   : > { %v18128_v21 = vadd.f32 %v13402_v43, %v13401_v48 }
 0x467   : > { %5278 = vmatmul.mubr.bf16.gmra.mrb[100].mxu1 %v15865_v55 }
 0x468   : > { %5285 = vmatprep.mubr.bf16.mxu1 %v15870_v4 }
 0x46a   : > { %v13437_v33 = vpop.f32.mrb[252].mxu1 }
 0x46b   : > { %v13438_v22 = vpop.f32.mrb[253].mxu1 }
 0x46c   : > { %v18132_v25 = vadd.f32 %v13438_v22, %v13437_v33  ;;  %v13440_v58 = vpop.f32.mrb[254].mxu1  ;;  %v15871_v33 = vld [vmem:[#allocation3 + $0x7c0] ss:$8 sps:$4 sm:$0xff]  }
 0x46d   : > { %v13441_v61 = vpop.f32.mrb[255].mxu1 }
 0x46e   : > { %v18134_v11 = vadd.f32 %v13441_v61, %v13440_v58 }
 0x46f   : > { %5286 = vmatmul.mubr.bf16.gmra.mrb[104].mxu1 %v15868_v13 }
 0x470   : > { %5293 = vmatprep.mubr.bf16.mxu1 %v15873_v46 }
 0x472   : > { %v13443_v1 = vpop.f32.mrb[0].mxu1 }
 0x473   : > { %v13444_v48 = vpop.f32.mrb[1].mxu1 }
 0x474   : > { %v18138_v55 = vadd.f32 %v13444_v48, %v13443_v1  ;;  %v13446_v2 = vpop.f32.mrb[2].mxu1  ;;  %v15874_v1 = vld [vmem:[#allocation3 + $0x7d0] ss:$8 sps:$4 sm:$0xff]  }
 0x475   : > { %v13447_v24 = vpop.f32.mrb[3].mxu1 }
 0x476   : > { %v18140_v22 = vadd.f32 %v13447_v24, %v13446_v2 }
 0x477   : > { %5294 = vmatmul.mubr.bf16.gmra.mrb[108].mxu1 %v15871_v33 }
 0x478   : > { %5301 = vmatprep.mubr.bf16.mxu1 %v15876_v37 }
 0x47a   : > { %v13449_v4 = vpop.f32.mrb[4].mxu1 }
 0x47b   : > { %v13450_v58 = vpop.f32.mrb[5].mxu1 }
 0x47c   : > { %v18144_v13 = vadd.f32 %v13450_v58, %v13449_v4  ;;  %v13452_v43 = vpop.f32.mrb[6].mxu1  ;;  %v15877_v4 = vld [vmem:[#allocation3 + $0x7e0] ss:$8 sps:$4 sm:$0xff]  }
 0x47d   : > { %v13453_v0 = vpop.f32.mrb[7].mxu1 }
 0x47e   : > { %v18146_v48 = vadd.f32 %v13453_v0, %v13452_v43 }
 0x47f   : > { %5302 = vmatmul.mubr.bf16.gmra.mrb[112].mxu1 %v15874_v1 }
 0x480   : > { %5309 = vmatprep.mubr.bf16.mxu1 %v15879_v27 }
 0x482   : > { %v13455_v46 = vpop.f32.mrb[8].mxu1 }
 0x483   : > { %v13456_v2 = vpop.f32.mrb[9].mxu1 }
 0x484   : > { %v18150_v33 = vadd.f32 %v13456_v2, %v13455_v46  ;;  %v13458_v61 = vpop.f32.mrb[10].mxu1  ;;  %v15880_v46 = vld [vmem:[#allocation3 + $0x7f0] ss:$8 sps:$4 sm:$0xff]  }
 0x485   : > { %v13459_v41 = vpop.f32.mrb[11].mxu1 }
 0x486   : > { %v18152_v58 = vadd.f32 %v13459_v41, %v13458_v61 }
 0x487   : > { %5310 = vmatmul.mubr.bf16.gmra.mrb[116].mxu1 %v15877_v4 }
 0x488   : > { %5317 = vmatprep.mubr.bf16.mxu1 %v15882_v39 }
 0x48a   : > { %v13461_v37 = vpop.f32.mrb[12].mxu1 }
 0x48b   : > { %v13462_v43 = vpop.f32.mrb[13].mxu1 }
 0x48c   : > { %v18156_v1 = vadd.f32 %v13462_v43, %v13461_v37  ;;  %v13464_v24 = vpop.f32.mrb[14].mxu1 }
 0x48d   : > { %v13465_v17 = vpop.f32.mrb[15].mxu1 }
 0x48e   : > { %v18158_v2 = vadd.f32 %v13465_v17, %v13464_v24 }
 0x48f   : > { %5318 = vmatmul.mubr.bf16.gmra.mrb[120].mxu1 %v15880_v46 }
 0x492   : > { %v13467_v27 = vpop.f32.mrb[16].mxu1 }
 0x493   : > { %v13468_v61 = vpop.f32.mrb[17].mxu1 }
 0x494   : > { %v18162_v4 = vadd.f32 %v13468_v61, %v13467_v27  ;;  %v13470_v0 = vpop.f32.mrb[18].mxu1 }
 0x495   : > { %v13471_v7 = vpop.f32.mrb[19].mxu1 }
 0x496   : > { %20043 = vst [vmem:[#allocation49_spill] sm:$0xff] %v18162_v4  ;;  %v18164_v59 = vadd.f32 %v13471_v7, %v13470_v0 }
 0x498   : > { %20044 = vst [vmem:[#allocation48_spill] sm:$0xff] %v18164_v59 }
 0x49a   : > { %v13473_v43 = vpop.f32.mrb[20].mxu1 }
 0x49b   : > { %v13474_v12 = vpop.f32.mrb[21].mxu1 }
 0x49c   : > { %v18168_v17 = vadd.f32 %v13474_v12, %v13473_v43  ;;  %v13476_v39 = vpop.f32.mrb[22].mxu1 }
 0x49d   : > { %v13477_v24 = vpop.f32.mrb[23].mxu1 }
 0x49e   : > { %20045 = vst [vmem:[#allocation51_spill] sm:$0xff] %v18168_v17  ;;  %v18170_v46 = vadd.f32 %v13477_v24, %v13476_v39  ;;  %v4161_v17 = vand.u32 %v4111_v8, %v20042_v5 }
 0x4a0   : > { %20046 = vst [vmem:[#allocation50_spill] sm:$0xff] %v18170_v46  ;;  %14500 = vmatprep.subr.bf16.mxu0 %v4161_v17 }
 0x4a2   : > { %v13479_v27 = vpop.f32.mrb[24].mxu1 }
 0x4a3   : > { %v13480_v61 = vpop.f32.mrb[25].mxu1 }
 0x4a4   : > { %v18174_v38 = vadd.f32 %v13480_v61, %v13479_v27  ;;  %v13482_v7 = vpop.f32.mrb[26].mxu1 }
 0x4a5   : > { %v13483_v0 = vpop.f32.mrb[27].mxu1 }
 0x4a6   : > { %20047 = vst [vmem:[#allocation53_spill] sm:$0xff] %v18174_v38  ;;  %v18176_v20 = vadd.f32 %v13483_v0, %v13482_v7 }
 0x4a8   : > { %20048 = vst [vmem:[#allocation52_spill] sm:$0xff] %v18176_v20 }
 0x4aa   : > { %v13485_v12 = vpop.f32.mrb[28].mxu1 }
 0x4ab   : > { %v13486_v43 = vpop.f32.mrb[29].mxu1 }
 0x4ac   : > { %v18180_v15 = vadd.f32 %v13486_v43, %v13485_v12  ;;  %v13488_v39 = vpop.f32.mrb[30].mxu1 }
 0x4ad   : > { %v13489_v14 = vpop.f32.mrb[31].mxu1 }
 0x4ae   : > { %20049 = vst [vmem:[#allocation55_spill] sm:$0xff] %v18180_v15  ;;  %v18182_v41 = vadd.f32 %v13489_v14, %v13488_v39 }
 0x4b0   : > { %20050 = vst [vmem:[#allocation54_spill] sm:$0xff] %v18182_v41 }
 0x4b2   : > { %v13491_v38 = vpop.f32.mrb[32].mxu1 }
 0x4b3   : > { %v13492_v43 = vpop.f32.mrb[33].mxu1 }
 0x4b4   : > { %v18187_v20 = vadd.f32 %v13492_v43, %v13491_v38  ;;  %v13494_v46 = vpop.f32.mrb[34].mxu1 }
 0x4b5   : > { %v13179_v24 = vpop.f32.mrb[100].mxu0  ;;  %v13495_v14 = vpop.f32.mrb[35].mxu1 }
 0x4b6   : > { %v13180_v9 = vpop.f32.mrb[101].mxu0  ;;  %20051 = vst [vmem:[#allocation57_spill] sm:$0xff] %v18187_v20  ;;  %v18190_v39 = vadd.f32 %v13495_v14, %v13494_v46 }
 0x4b7   : > { %v13181_v27 = vadd.f32 %v13180_v9, %v13179_v24  ;;  %v13182_v61 = vpop.f32.mrb[102].mxu0 }
 0x4b8   : > { %v13183_v7 = vpop.f32.mrb[103].mxu0  ;;  %20052 = vst [vmem:[#allocation56_spill] sm:$0xff] %v18190_v39 }
 0x4b9   : > { %v13184_v37 = vadd.f32 %v13183_v7, %v13182_v61 }
 0x4ba   : > { %v13497_v0 = vpop.f32.mrb[36].mxu1 }
 0x4bb   : > { %v3478_v12 = vpack.c.bf16 %v13184_v37, %v13181_v27  ;;  %v13498_v27 = vpop.f32.mrb[37].mxu1 }
 0x4bc   : > { %v18194_v38 = vadd.f32 %v13498_v27, %v13497_v0  ;;  %v13500_v43 = vpop.f32.mrb[38].mxu1 }
 0x4bd   : > { %v13185_v4 = vpop.f32.mrb[104].mxu0  ;;  %14468 = vmatprep.mubr.msk.bf16.mxu0 %vm1463_vm2, %v3478_v12  ;;  %v13501_v12 = vpop.f32.mrb[39].mxu1 }
 0x4be   : > { %v13186_v9 = vpop.f32.mrb[105].mxu0  ;;  %20053 = vst [vmem:[#allocation59_spill] sm:$0xff] %v18194_v38  ;;  %v18197_v46 = vadd.f32 %v13501_v12, %v13500_v43 }
 0x4bf   : > { %v13187_v8 = vadd.f32 %v13186_v9, %v13185_v4  ;;  %v13188_v24 = vpop.f32.mrb[106].mxu0 }
 0x4c0   : > { %v13189_v59 = vpop.f32.mrb[107].mxu0  ;;  %20054 = vst [vmem:[#allocation58_spill] sm:$0xff] %v18197_v46 }
 0x4c1   : > { %v13190_v7 = vadd.f32 %v13189_v59, %v13188_v24 }
 0x4c3   : > { %v3479_v37 = vpack.c.bf16 %v13190_v7, %v13187_v8  ;;  %v13503_v8 = vpop.f32.mrb[40].mxu1 }
 0x4c4   : > { %v13504_v0 = vpop.f32.mrb[41].mxu1 }
 0x4c5   : > { %v13191_v15 = vpop.f32.mrb[108].mxu0  ;;  %14469 = vmatmul.mubr.msk.bf16.vlgmr.msra.gmra.mrb[68].mxu0 %vm1463_vm2, %v3479_v37  ;;  %v18201_v27 = vadd.f32 %v13504_v0, %v13503_v8  ;;  %v13506_v61 = vpop.f32.mrb[42].mxu1 }
 0x4c6   : > { %v13192_v41 = vpop.f32.mrb[109].mxu0  ;;  %14501 = vmatpush3.bf16.msra.mxu0 %v4161_v17  ;;  %v13507_v37 = vpop.f32.mrb[43].mxu1 }
 0x4c7   : > { %v13193_v4 = vadd.f32 %v13192_v41, %v13191_v15  ;;  %v13194_v14 = vpop.f32.mrb[110].mxu0  ;;  %20055 = vst [vmem:[#allocation31_spill] sm:$0xff] %v18201_v27  ;;  %v18204_v43 = vadd.f32 %v13507_v37, %v13506_v61 }
 0x4c8   : > { %v13195_v9 = vpop.f32.mrb[111].mxu0 }
 0x4c9   : > { %v13196_v24 = vadd.f32 %v13195_v9, %v13194_v14  ;;  %20056 = vst [vmem:[#allocation61_spill] sm:$0xff] %v18204_v43 }
 0x4ca   : > { %v13509_v9 = vpop.f32.mrb[44].mxu1 }
 0x4cb   : > { %v3480_v7 = vpack.c.bf16 %v13196_v24, %v13193_v4  ;;  %v13510_v24 = vpop.f32.mrb[45].mxu1 }
 0x4cc   : > { %v18208_v8 = vadd.f32 %v13510_v24, %v13509_v9  ;;  %v13512_v0 = vpop.f32.mrb[46].mxu1 }
 0x4cd   : > { %v13197_v20 = vpop.f32.mrb[112].mxu0  ;;  %14472 = vmatprep.mubr.msk.bf16.mxu0 %vm1463_vm2, %v3480_v7  ;;  %v13513_v7 = vpop.f32.mrb[47].mxu1 }
 0x4ce   : > { %v13198_v17 = vpop.f32.mrb[113].mxu0  ;;  %20057 = vst [vmem:[#allocation60_spill] sm:$0xff] %v18208_v8  ;;  %v18211_v61 = vadd.f32 %v13513_v7, %v13512_v0 }
 0x4cf   : > { %v13199_v15 = vadd.f32 %v13198_v17, %v13197_v20  ;;  %v13200_v41 = vpop.f32.mrb[114].mxu0 }
 0x4d0   : > { %v13201_v12 = vpop.f32.mrb[115].mxu0  ;;  %20058 = vst [vmem:[#allocation63_spill] sm:$0xff] %v18211_v61 }
 0x4d1   : > { %v13202_v14 = vadd.f32 %v13201_v12, %v13200_v41 }
 0x4d2   : > { %v13515_v12 = vpop.f32.mrb[48].mxu1 }
 0x4d3   : > { %v3481_v4 = vpack.c.bf16 %v13202_v14, %v13199_v15  ;;  %v13516_v14 = vpop.f32.mrb[49].mxu1 }
 0x4d4   : > { %v18215_v9 = vadd.f32 %v13516_v14, %v13515_v12  ;;  %v13518_v24 = vpop.f32.mrb[50].mxu1 }
 0x4d5   : > { %v13203_v38 = vpop.f32.mrb[116].mxu0  ;;  %14473 = vmatmul.mubr.msk.bf16.gmra.mrb[72].mxu0 %vm1463_vm2, %v3481_v4  ;;  %v13519_v4 = vpop.f32.mrb[51].mxu1 }
 0x4d6   : > { %v13204_v46 = vpop.f32.mrb[117].mxu0  ;;  %20059 = vst [vmem:[#allocation62_spill] sm:$0xff] %v18215_v9  ;;  %v18218_v0 = vadd.f32 %v13519_v4, %v13518_v24 }
 0x4d7   : > { %v13205_v20 = vadd.f32 %v13204_v46, %v13203_v38  ;;  %v13206_v37 = vpop.f32.mrb[118].mxu0 }
 0x4d8   : > { %v13207_v17 = vpop.f32.mrb[119].mxu0  ;;  %20060 = vst [vmem:[#allocation65_spill] sm:$0xff] %v18218_v0 }
 0x4d9   : > { %v13208_v41 = vadd.f32 %v13207_v17, %v13206_v37 }
 0x4da   : > { %v13521_v17 = vpop.f32.mrb[52].mxu1 }
 0x4db   : > { %v3482_v15 = vpack.c.bf16 %v13208_v41, %v13205_v20  ;;  %v13522_v41 = vpop.f32.mrb[53].mxu1 }
 0x4dc   : > { %v18222_v12 = vadd.f32 %v13522_v41, %v13521_v17  ;;  %v13524_v14 = vpop.f32.mrb[54].mxu1 }
 0x4dd   : > { %v13209_v27 = vpop.f32.mrb[120].mxu0  ;;  %14476 = vmatprep.mubr.msk.bf16.mxu0 %vm1463_vm2, %v3482_v15  ;;  %v13525_v15 = vpop.f32.mrb[55].mxu1 }
 0x4de   : > { %v13210_v43 = vpop.f32.mrb[121].mxu0  ;;  %20061 = vst [vmem:[#allocation64_spill] sm:$0xff] %v18222_v12  ;;  %v18225_v24 = vadd.f32 %v13525_v15, %v13524_v14 }
 0x4df   : > { %v13211_v38 = vadd.f32 %v13210_v43, %v13209_v27  ;;  %v13212_v46 = vpop.f32.mrb[122].mxu0 }
 0x4e0   : > { %v13213_v7 = vpop.f32.mrb[123].mxu0  ;;  %20062 = vst [vmem:[#allocation67_spill] sm:$0xff] %v18225_v24 }
 0x4e1   : > { %v13214_v37 = vadd.f32 %v13213_v7, %v13212_v46 }
 0x4e2   : > { %v13527_v7 = vpop.f32.mrb[56].mxu1 }
 0x4e3   : > { %v3483_v20 = vpack.c.bf16 %v13214_v37, %v13211_v38  ;;  %v13528_v37 = vpop.f32.mrb[57].mxu1 }
 0x4e4   : > { %v18229_v17 = vadd.f32 %v13528_v37, %v13527_v7  ;;  %v13530_v41 = vpop.f32.mrb[58].mxu1 }
 0x4e5   : > { %v13215_v8 = vpop.f32.mrb[124].mxu0  ;;  %14477 = vmatmul.mubr.msk.bf16.gmra.mrb[76].mxu0 %vm1463_vm2, %v3483_v20  ;;  %v13531_v20 = vpop.f32.mrb[59].mxu1 }
 0x4e6   : > { %v13216_v61 = vpop.f32.mrb[125].mxu0  ;;  %20063 = vst [vmem:[#allocation66_spill] sm:$0xff] %v18229_v17  ;;  %v18232_v14 = vadd.f32 %v13531_v20, %v13530_v41 }
 0x4e7   : > { %v13217_v27 = vadd.f32 %v13216_v61, %v13215_v8  ;;  %v13218_v43 = vpop.f32.mrb[126].mxu0 }
 0x4e8   : > { %v13219_v4 = vpop.f32.mrb[127].mxu0  ;;  %20064 = vst [vmem:[#allocation69_spill] sm:$0xff] %v18232_v14 }
 0x4e9   : > { %v13220_v46 = vadd.f32 %v13219_v4, %v13218_v43 }
 0x4ea   : > { %v13566_v4 = vpop.f32.mrb[60].mxu1 }
 0x4eb   : > { %v3484_v38 = vpack.c.bf16 %v13220_v46, %v13217_v27  ;;  %v13567_v46 = vpop.f32.mrb[61].mxu1 }
 0x4ec   : > { %v18236_v7 = vadd.f32 %v13567_v46, %v13566_v4  ;;  %v13569_v37 = vpop.f32.mrb[62].mxu1 }
 0x4ed   : > { %v13221_v9 = vpop.f32.mrb[128].mxu0  ;;  %14480 = vmatprep.mubr.msk.bf16.mxu0 %vm1463_vm2, %v3484_v38  ;;  %v13570_v38 = vpop.f32.mrb[63].mxu1 }
 0x4ee   : > { %v13222_v0 = vpop.f32.mrb[129].mxu0  ;;  %20065 = vst [vmem:[#allocation68_spill] sm:$0xff] %v18236_v7  ;;  %v18239_v41 = vadd.f32 %v13570_v38, %v13569_v37 }
 0x4ef   : > { %v13223_v8 = vadd.f32 %v13222_v0, %v13221_v9  ;;  %v13224_v61 = vpop.f32.mrb[130].mxu0  ;;  %v4727_v9 = vld [vmem:[#allocation5 + $0xc] sm:$0x3] }
 0x4f0   : > { %v13225_v15 = vpop.f32.mrb[131].mxu0  ;;  %20066 = vst [vmem:[#allocation71_spill] sm:$0xff] %v18239_v41  ;;  %v18242_v39 = vand.u32 %v4727_v9, %v20042_v5 }
 0x4f1   : > { %v13226_v43 = vadd.f32 %v13225_v15, %v13224_v61 }
 0x4f2   : > { %14534 = vmatprep.subr.bf16.mxu0 %v18242_v39 }
 0x4f3   : > { %v3485_v27 = vpack.c.bf16 %v13226_v43, %v13223_v8  ;;  %v13572_v43 = vpop.f32.mrb[64].mxu1 }
 0x4f5   : > { %v13227_v12 = vpop.f32.mrb[132].mxu0  ;;  %14481 = vmatmul.mubr.msk.bf16.gmra.mrb[80].mxu0 %vm1463_vm2, %v3485_v27  ;;  %v13573_v27 = vpop.f32.mrb[65].mxu1 }
 0x4f6   : > { %v13228_v24 = vpop.f32.mrb[133].mxu0  ;;  %v18247_v46 = vadd.f32 %v13573_v27, %v13572_v43  ;;  %v13575_v37 = vpop.f32.mrb[66].mxu1 }
 0x4f7   : > { %v13229_v0 = vadd.f32 %v13228_v24, %v13227_v12  ;;  %v13230_v20 = vpop.f32.mrb[134].mxu0  ;;  %v13576_v12 = vpop.f32.mrb[67].mxu1 }
 0x4f8   : > { %v13231_v61 = vpop.f32.mrb[135].mxu0  ;;  %20067 = vst [vmem:[#allocation70_spill] sm:$0xff] %v18247_v46  ;;  %v18250_v9 = vadd.f32 %v13576_v12, %v13575_v37 }
 0x4f9   : > { %v13232_v15 = vadd.f32 %v13231_v61, %v13230_v20 }
 0x4fa   : > { %20068 = vst [vmem:[#allocation47_spill] sm:$0xff] %v18250_v9  ;;  %v13578_v8 = vpop.f32.mrb[68].mxu1 }
 0x4fb   : > { %v3486_v4 = vpack.c.bf16 %v13232_v15, %v13229_v0  ;;  %v13579_v15 = vpop.f32.mrb[69].mxu1 }
 0x4fc   : > { %v18254_v43 = vadd.f32 %v13579_v15, %v13578_v8  ;;  %v13581_v27 = vpop.f32.mrb[70].mxu1 }
 0x4fd   : > { %v13233_v38 = vpop.f32.mrb[136].mxu0  ;;  %14484 = vmatprep.mubr.msk.bf16.mxu0 %vm1463_vm2, %v3486_v4  ;;  %v13582_v4 = vpop.f32.mrb[71].mxu1 }
 0x4fe   : > { %v13234_v24 = vpop.f32.mrb[137].mxu0  ;;  %20069 = vst [vmem:[#allocation72_spill] sm:$0xff] %v18254_v43  ;;  %v18257_v37 = vadd.f32 %v13582_v4, %v13581_v27 }
 0x4ff   : > { %v13235_v59 = vadd.f32 %v13234_v24, %v13233_v38  ;;  %v13236_v17 = vpop.f32.mrb[138].mxu0 }
 0x500   : > { %v13237_v14 = vpop.f32.mrb[139].mxu0  ;;  %20070 = vst [vmem:[#allocation73_spill] sm:$0xff] %v18257_v37 }
 0x501   : > { %v13238_v61 = vadd.f32 %v13237_v14, %v13236_v17 }
 0x502   : > { %v13584_v14 = vpop.f32.mrb[72].mxu1 }
 0x503   : > { %v3487_v0 = vpack.c.bf16 %v13238_v61, %v13235_v59  ;;  %v13585_v61 = vpop.f32.mrb[73].mxu1 }
 0x504   : > { %v18261_v8 = vadd.f32 %v13585_v61, %v13584_v14  ;;  %v13587_v15 = vpop.f32.mrb[74].mxu1 }
 0x505   : > { %v13239_v7 = vpop.f32.mrb[140].mxu0  ;;  %14485 = vmatmul.mubr.msk.bf16.gmra.mrb[84].mxu0 %vm1463_vm2, %v3487_v0  ;;  %v13588_v0 = vpop.f32.mrb[75].mxu1 }
 0x506   : > { %v13240_v41 = vpop.f32.mrb[141].mxu0  ;;  %20071 = vst [vmem:[#allocation74_spill] sm:$0xff] %v18261_v8  ;;  %v18264_v27 = vadd.f32 %v13588_v0, %v13587_v15 }
 0x507   : > { %v13241_v38 = vadd.f32 %v13240_v41, %v13239_v7  ;;  %v13242_v12 = vpop.f32.mrb[142].mxu0 }
 0x508   : > { %v13243_v24 = vpop.f32.mrb[143].mxu0  ;;  %20072 = vst [vmem:[#allocation75_spill] sm:$0xff] %v18264_v27 }
 0x509   : > { %v13244_v17 = vadd.f32 %v13243_v24, %v13242_v12 }
 0x50a   : > { %v13590_v24 = vpop.f32.mrb[76].mxu1 }
 0x50b   : > { %v3488_v59 = vpack.c.bf16 %v13244_v17, %v13241_v38  ;;  %v13591_v17 = vpop.f32.mrb[77].mxu1 }
 0x50c   : > { %v18268_v14 = vadd.f32 %v13591_v17, %v13590_v24  ;;  %v13593_v61 = vpop.f32.mrb[78].mxu1 }
 0x50d   : > { %v13245_v46 = vpop.f32.mrb[144].mxu0  ;;  %14488 = vmatprep.mubr.msk.bf16.mxu0 %vm1463_vm2, %v3488_v59  ;;  %v13594_v59 = vpop.f32.mrb[79].mxu1 }
 0x50e   : > { %v13246_v9 = vpop.f32.mrb[145].mxu0  ;;  %20073 = vst [vmem:[#allocation76_spill] sm:$0xff] %v18268_v14  ;;  %v18271_v15 = vadd.f32 %v13594_v59, %v13593_v61 }
 0x50f   : > { %v13247_v7 = vadd.f32 %v13246_v9, %v13245_v46  ;;  %v13248_v41 = vpop.f32.mrb[146].mxu0 }
 0x510   : > { %v13249_v4 = vpop.f32.mrb[147].mxu0  ;;  %20074 = vst [vmem:[#allocation77_spill] sm:$0xff] %v18271_v15 }
 0x511   : > { %v13250_v12 = vadd.f32 %v13249_v4, %v13248_v41 }
 0x512   : > { %v13596_v4 = vpop.f32.mrb[80].mxu1 }
 0x513   : > { %v3489_v38 = vpack.c.bf16 %v13250_v12, %v13247_v7  ;;  %v13597_v12 = vpop.f32.mrb[81].mxu1 }
 0x514   : > { %v18275_v24 = vadd.f32 %v13597_v12, %v13596_v4  ;;  %v13599_v17 = vpop.f32.mrb[82].mxu1 }
 0x515   : > { %v13251_v43 = vpop.f32.mrb[148].mxu0  ;;  %14489 = vmatmul.mubr.msk.bf16.gmra.mrb[88].mxu0 %vm1463_vm2, %v3489_v38  ;;  %v13600_v38 = vpop.f32.mrb[83].mxu1 }
 0x516   : > { %v13252_v37 = vpop.f32.mrb[149].mxu0  ;;  %20075 = vst [vmem:[#allocation78_spill] sm:$0xff] %v18275_v24  ;;  %v18278_v61 = vadd.f32 %v13600_v38, %v13599_v17 }
 0x517   : > { %v13253_v46 = vadd.f32 %v13252_v37, %v13251_v43  ;;  %v13254_v9 = vpop.f32.mrb[150].mxu0 }
 0x518   : > { %v13255_v0 = vpop.f32.mrb[151].mxu0  ;;  %20076 = vst [vmem:[#allocation79_spill] sm:$0xff] %v18278_v61 }
 0x519   : > { %v13256_v41 = vadd.f32 %v13255_v0, %v13254_v9 }
 0x51a   : > { %v13602_v0 = vpop.f32.mrb[84].mxu1 }
 0x51b   : > { %v3490_v7 = vpack.c.bf16 %v13256_v41, %v13253_v46  ;;  %v13603_v41 = vpop.f32.mrb[85].mxu1 }
 0x51c   : > { %v18282_v4 = vadd.f32 %v13603_v41, %v13602_v0  ;;  %v13605_v12 = vpop.f32.mrb[86].mxu1 }
 0x51d   : > { %v13257_v8 = vpop.f32.mrb[152].mxu0  ;;  %14492 = vmatprep.mubr.msk.bf16.mxu0 %vm1463_vm2, %v3490_v7  ;;  %v13606_v7 = vpop.f32.mrb[87].mxu1 }
 0x51e   : > { %v13258_v27 = vpop.f32.mrb[153].mxu0  ;;  %v18285_v17 = vadd.f32 %v13606_v7, %v13605_v12 }
 0x51f   : > { %v13259_v43 = vadd.f32 %v13258_v27, %v13257_v8  ;;  %v13260_v37 = vpop.f32.mrb[154].mxu0 }
 0x520   : > { %v13261_v59 = vpop.f32.mrb[155].mxu0 }
 0x521   : > { %v13262_v9 = vadd.f32 %v13261_v59, %v13260_v37 }
 0x522   : > { %v13608_v59 = vpop.f32.mrb[88].mxu1 }
 0x523   : > { %v3491_v46 = vpack.c.bf16 %v13262_v9, %v13259_v43  ;;  %v13609_v9 = vpop.f32.mrb[89].mxu1 }
 0x524   : > { %v18289_v0 = vadd.f32 %v13609_v9, %v13608_v59  ;;  %v13611_v41 = vpop.f32.mrb[90].mxu1 }
 0x525   : > { %v13263_v14 = vpop.f32.mrb[156].mxu0  ;;  %14493 = vmatmul.mubr.msk.bf16.gmra.mrb[92].mxu0 %vm1463_vm2, %v3491_v46  ;;  %v13612_v46 = vpop.f32.mrb[91].mxu1 }
 0x526   : > { %v13264_v15 = vpop.f32.mrb[157].mxu0  ;;  %v18292_v12 = vadd.f32 %v13612_v46, %v13611_v41  ;;  %v20077_v41 = vpack.c.bf16 %v18037_v30, %v18035_v36  ;;  %v5343_v46 = vld [vmem:[#allocation5 + $0xe] sm:$0x3]  ;;  %v20079_v30 = vpack.c.bf16 %v18049_v40, %v18047_v6  ;;  %v20081_v40 = vpack.c.bf16 %v18061_v18, %v18059_v29 }
 0x527   : > { %v13265_v8 = vadd.f32 %v13264_v15, %v13263_v14  ;;  %v13266_v27 = vpop.f32.mrb[158].mxu0  ;;  %v20083_v29 = vpack.c.bf16 %v18073_v34, %v18071_v23  ;;  %v20085_v23 = vpack.c.bf16 %v18085_v62, %v18083_v16  ;;  %v20087_v16 = vpack.c.bf16 %v18098_v63, %v18096_v42 }
 0x528   : > { %v13267_v38 = vpop.f32.mrb[159].mxu0  ;;  %v5333_v20 = vpack.c.bf16 %v18292_v12, %v18289_v0  ;;  %v20089_v42 = vpack.c.bf16 %v18110_v54, %v18108_v31  ;;  %v15883_v0 = vld [vmem:[#allocation3 + $0x800] ss:$8 sps:$4 sm:$0xff]   ;;  %v15886_v12 = vld [vmem:[#allocation3 + $0x814] ss:$8 sps:$4 sm:$0xff]  }
 0x529   : > { %v13268_v37 = vadd.f32 %v13267_v38, %v13266_v27 }
 0x52a   : > { %v13614_v38 = vpop.f32.mrb[92].mxu1 }
 0x52b   : > { %v3492_v43 = vpack.c.bf16 %v13268_v37, %v13265_v8  ;;  %v13615_v37 = vpop.f32.mrb[93].mxu1 }
 0x52c   : > { %v18296_v59 = vadd.f32 %v13615_v37, %v13614_v38  ;;  %v13617_v9 = vpop.f32.mrb[94].mxu1 }
 0x52d   : > { %v13269_v24 = vpop.f32.mrb[160].mxu0  ;;  %14496 = vmatprep.mubr.msk.bf16.mxu0 %vm1463_vm2, %v3492_v43  ;;  %v13618_v43 = vpop.f32.mrb[95].mxu1 }
 0x52e   : > { %v13270_v61 = vpop.f32.mrb[161].mxu0 }
 0x52f   : > { %v13271_v14 = vadd.f32 %v13270_v61, %v13269_v24  ;;  %v13272_v15 = vpop.f32.mrb[162].mxu0  ;;  %v18303_v24 = vadd.f32 %v13618_v43, %v13617_v9 }
 0x530   : > { %v13273_v7 = vpop.f32.mrb[163].mxu0 }
 0x531   : > { %v13274_v27 = vadd.f32 %v13273_v7, %v13272_v15  ;;  %v5334_v61 = vpack.c.bf16 %v18303_v24, %v18296_v59  ;;  %v15888_v59 = vld [vmem:[#allocation3 + $0x810] ss:$8 sps:$4 sm:$0xff]   ;;  %v15889_v24 = vld [vmem:[#allocation3 + $0x824] ss:$8 sps:$4 sm:$0xff]  }
 0x532   : > { %v13620_v15 = vpop.f32.mrb[96].mxu1 }
 0x533   : > { %v3493_v8 = vpack.c.bf16 %v13274_v27, %v13271_v14  ;;  %v18308_v14 = vand.u32 %v5343_v46, %v20042_v5  ;;  %v13621_v7 = vpop.f32.mrb[97].mxu1  ;;  %v20080_v46 = vpack.c.bf16 %v18055_v52, %v18053_v44  ;;  %v20082_v44 = vpack.c.bf16 %v18067_v47, %v18065_v51 }
 0x534   : > { %v18310_v27 = vadd.f32 %v13621_v7, %v13620_v15  ;;  %v13623_v38 = vpop.f32.mrb[98].mxu1  ;;  %v20084_v51 = vpack.c.bf16 %v18079_v56, %v18077_v35  ;;  %v20086_v35 = vpack.c.bf16 %v18091_v10, %v18089_v57  ;;  %v20088_v57 = vpack.c.bf16 %v18104_v60, %v18102_v49 }
 0x535   : > { %14497 = vmatmul.mubr.msk.bf16.gmra.mrb[96].mxu0 %vm1463_vm2, %v3493_v8  ;;  %v20078_v8 = vpack.c.bf16 %v18043_v50, %v18041_v32  ;;  %v13624_v36 = vpop.f32.mrb[99].mxu1  ;;  %v20091_v49 = vpack.c.bf16 %v18122_v26, %v18120_v45  ;;  %v20096_v45 = vpack.c.bf16 %v18152_v58, %v18150_v33  ;;  %v20097_v26 = vpack.c.bf16 %v18158_v2, %v18156_v1  ;;  %v20107_v33 = vld [vmem:[#allocation54_spill] sm:$0xff]  ;;  %v20108_v58 = vld [vmem:[#allocation55_spill] sm:$0xff]  ;;  %v20110_v2 = vld [vmem:[#allocation56_spill] sm:$0xff] }
 0x536   : > { %14502 = vmatprep.mubr.msk.bf16.mxu0 %vm1463_vm2, %v20077_v41  ;;  %v18321_v37 = vadd.f32 %v13624_v36, %v13623_v38  ;;  %v20109_v1 = vpack.c.bf16 %v20107_v33, %v20108_v58  ;;  %v20145_v33 = vld [vmem:[#allocation74_spill] sm:$0xff] }
 0x538   : > { %v5335_v9 = vpack.c.bf16 %v18321_v37, %v18310_v27  ;;  %v15892_v27 = vld [vmem:[#allocation3 + $0x834] ss:$8 sps:$4 sm:$0xff]   ;;  %v15894_v37 = vld [vmem:[#allocation3 + $0x830] ss:$8 sps:$4 sm:$0xff]  }
 0x53a   : > { %v13626_v43 = vpop.f32.mrb[100].mxu1 }
 0x53b   : > { %v13627_v41 = vpop.f32.mrb[101].mxu1 }
 0x53c   : > { %v18326_v32 = vadd.f32 %v13627_v41, %v13626_v43  ;;  %v13629_v50 = vpop.f32.mrb[102].mxu1 }
 0x53d   : > { %14503 = vmatmul.mubr.msk.bf16.vlgmr.msra.gmra.mrb[68].mxu0 %vm1463_vm2, %v20078_v8  ;;  %v13630_v6 = vpop.f32.mrb[103].mxu1 }
 0x53e   : > { %14506 = vmatprep.mubr.msk.bf16.mxu0 %vm1463_vm2, %v20079_v30  ;;  %14535 = vmatpush3.bf16.msra.mxu0 %v18242_v39  ;;  %v18336_v39 = vadd.f32 %v13630_v6, %v13629_v50 }
 0x53f   : > { %14568 = vmatprep.subr.bf16.mxu0 %v18308_v14 }
 0x540   : > { %v5336_v15 = vpack.c.bf16 %v18336_v39, %v18326_v32  ;;  %v15897_v32 = vld [vmem:[#allocation3 + $0x840] ss:$8 sps:$4 sm:$0xff]   ;;  %v15898_v39 = vld [vmem:[#allocation3 + $0x854] ss:$8 sps:$4 sm:$0xff]  }
 0x542   : > { %v13632_v7 = vpop.f32.mrb[104].mxu1 }
 0x543   : > { %v13633_v38 = vpop.f32.mrb[105].mxu1 }
 0x544   : > { %v18340_v8 = vadd.f32 %v13633_v38, %v13632_v7  ;;  %v13635_v36 = vpop.f32.mrb[106].mxu1 }
 0x545   : > { %14507 = vmatmul.mubr.msk.bf16.gmra.mrb[72].mxu0 %vm1463_vm2, %v20080_v46  ;;  %v13636_v52 = vpop.f32.mrb[107].mxu1 }
 0x546   : > { %14510 = vmatprep.mubr.msk.bf16.mxu0 %vm1463_vm2, %v20081_v40  ;;  %v18350_v18 = vadd.f32 %v13636_v52, %v13635_v36 }
 0x548   : > { %v5337_v30 = vpack.c.bf16 %v18350_v18, %v18340_v8  ;;  %v15901_v8 = vld [vmem:[#allocation3 + $0x864] ss:$8 sps:$4 sm:$0xff]   ;;  %v15903_v18 = vld [vmem:[#allocation3 + $0x860] ss:$8 sps:$4 sm:$0xff]  }
 0x54a   : > { %v13638_v43 = vpop.f32.mrb[108].mxu1 }
 0x54b   : > { %v13639_v41 = vpop.f32.mrb[109].mxu1 }
 0x54c   : > { %v18354_v50 = vadd.f32 %v13639_v41, %v13638_v43  ;;  %v13641_v46 = vpop.f32.mrb[110].mxu1 }
 0x54d   : > { %14511 = vmatmul.mubr.msk.bf16.gmra.mrb[76].mxu0 %vm1463_vm2, %v20082_v44  ;;  %v13642_v47 = vpop.f32.mrb[111].mxu1 }
 0x54e   : > { %14514 = vmatprep.mubr.msk.bf16.mxu0 %vm1463_vm2, %v20083_v29  ;;  %v18364_v34 = vadd.f32 %v13642_v47, %v13641_v46 }
 0x550   : > { %v5338_v6 = vpack.c.bf16 %v18364_v34, %v18354_v50  ;;  %v15906_v50 = vld [vmem:[#allocation3 + $0x870] ss:$8 sps:$4 sm:$0xff]   ;;  %v15907_v34 = vld [vmem:[#allocation3 + $0x884] ss:$8 sps:$4 sm:$0xff]  }
 0x552   : > { %v13644_v40 = vpop.f32.mrb[112].mxu1 }
 0x553   : > { %v13645_v7 = vpop.f32.mrb[113].mxu1 }
 0x554   : > { %v18368_v38 = vadd.f32 %v13645_v7, %v13644_v40  ;;  %v13647_v36 = vpop.f32.mrb[114].mxu1  ;;  %v20090_v7 = vpack.c.bf16 %v18116_v3, %v18114_v19  ;;  %v20094_v3 = vpack.c.bf16 %v18140_v22, %v18138_v55  ;;  %v20095_v19 = vpack.c.bf16 %v18146_v48, %v18144_v13  ;;  %v20102_v55 = vld [vmem:[#allocation51_spill] sm:$0xff]  ;;  %v20105_v13 = vld [vmem:[#allocation53_spill] sm:$0xff] }
 0x555   : > { %14515 = vmatmul.mubr.msk.bf16.gmra.mrb[80].mxu0 %vm1463_vm2, %v20084_v51  ;;  %v13648_v56 = vpop.f32.mrb[115].mxu1 }
 0x556   : > { %14518 = vmatprep.mubr.msk.bf16.mxu0 %vm1463_vm2, %v20085_v23  ;;  %v18378_v62 = vadd.f32 %v13648_v56, %v13647_v36  ;;  %v20092_v36 = vpack.c.bf16 %v18128_v21, %v18126_v28  ;;  %v20098_v28 = vld [vmem:[#allocation48_spill] sm:$0xff]  ;;  %v20099_v21 = vld [vmem:[#allocation49_spill] sm:$0xff] }
 0x558   : > { %v5339_v44 = vpack.c.bf16 %v18378_v62, %v18368_v38  ;;  %v15910_v38 = vld [vmem:[#allocation3 + $0x894] ss:$8 sps:$4 sm:$0xff]   ;;  %v15912_v62 = vld [vmem:[#allocation3 + $0x890] ss:$8 sps:$4 sm:$0xff]  }
 0x55a   : > { %v13650_v52 = vpop.f32.mrb[116].mxu1 }
 0x55b   : > { %v13651_v29 = vpop.f32.mrb[117].mxu1 }
 0x55c   : > { %v18382_v43 = vadd.f32 %v13651_v29, %v13650_v52  ;;  %v13653_v41 = vpop.f32.mrb[118].mxu1  ;;  %v20114_v52 = vld [vmem:[#allocation59_spill] sm:$0xff] }
 0x55d   : > { %14519 = vmatmul.mubr.msk.bf16.gmra.mrb[84].mxu0 %vm1463_vm2, %v20086_v35  ;;  %v13654_v10 = vpop.f32.mrb[119].mxu1  ;;  %v20093_v35 = vpack.c.bf16 %v18134_v11, %v18132_v25  ;;  %v20100_v25 = vpack.c.bf16 %v20098_v28, %v20099_v21  ;;  %v20101_v11 = vld [vmem:[#allocation50_spill] sm:$0xff]  ;;  %v20137_v21 = vld [vmem:[#allocation73_spill] sm:$0xff] }
 0x55e   : > { %14522 = vmatprep.mubr.msk.bf16.mxu0 %vm1463_vm2, %v20087_v16  ;;  %v13655_v63 = vadd.f32 %v13654_v10, %v13653_v41  ;;  %v20103_v22 = vpack.c.bf16 %v20101_v11, %v20102_v55  ;;  %v20113_v16 = vld [vmem:[#allocation58_spill] sm:$0xff]  ;;  %v20117_v41 = vld [vmem:[#allocation31_spill] sm:$0xff]  ;;  %v20140_v55 = vld [vmem:[#allocation32_spill] sm:$0xff] }
 0x55f   : > { %v20115_v29 = vpack.c.bf16 %v20113_v16, %v20114_v52  ;;  %v20119_v10 = vld [vmem:[#allocation63_spill] sm:$0xff]  ;;  %v20151_v16 = vld [vmem:[#allocation37_spill] sm:$0xff]  ;;  %v20152_v52 = vld [vmem:[#allocation38_spill] sm:$0xff] }
 0x560   : > { %v5340_v46 = vpack.c.bf16 %v13655_v63, %v18382_v43  ;;  %v20116_v43 = vld [vmem:[#allocation61_spill] sm:$0xff] }
 0x562   : > { %v13656_v51 = vpop.f32.mrb[120].mxu1 }
 0x563   : > { %v13657_v47 = vpop.f32.mrb[121].mxu1 }
 0x564   : > { %v13658_v23 = vadd.f32 %v13657_v47, %v13656_v51  ;;  %v13659_v40 = vpop.f32.mrb[122].mxu1  ;;  %v20122_v51 = vld [vmem:[#allocation65_spill] sm:$0xff]  ;;  %v20123_v47 = vld [vmem:[#allocation62_spill] sm:$0xff] }
 0x565   : > { %14523 = vmatmul.mubr.msk.bf16.gmra.mrb[88].mxu0 %vm1463_vm2, %v20088_v57  ;;  %v13660_v60 = vpop.f32.mrb[123].mxu1  ;;  %v20118_v57 = vpack.c.bf16 %v20116_v43, %v20117_v41  ;;  %v20154_v43 = vld [vmem:[#allocation79_spill] sm:$0xff]  ;;  %v20155_v41 = vld [vmem:[#allocation78_spill] sm:$0xff] }
 0x566   : > { %14526 = vmatprep.mubr.msk.bf16.mxu0 %vm1463_vm2, %v20089_v42  ;;  %v13661_v54 = vadd.f32 %v13660_v60, %v13659_v40  ;;  %v20120_v42 = vld [vmem:[#allocation60_spill] sm:$0xff]  ;;  %v20125_v40 = vld [vmem:[#allocation67_spill] sm:$0xff] }
 0x567   : > { %v20121_v63 = vpack.c.bf16 %v20119_v10, %v20120_v42  ;;  %v20157_v10 = vpack.c.bf16 %v18285_v17, %v18282_v4  ;;  %v20158_v42 = vld [vmem:[#allocation40_spill] sm:$0xff]  ;;  %v20163_v17 = vld [vmem:[#allocation45_spill] sm:$0xff] }
 0x568   : > { %v5341_v31 = vpack.c.bf16 %v13661_v54, %v13658_v23  ;;  %v20124_v23 = vpack.c.bf16 %v20122_v51, %v20123_v47  ;;  %v20129_v54 = vld [vmem:[#allocation66_spill] sm:$0xff]  ;;  %v20161_v47 = vld [vmem:[#allocation43_spill] sm:$0xff]  ;;  %v20162_v4 = vld [vmem:[#allocation44_spill] sm:$0xff] }
 0x569   : > { %v20160_v51 = vld [vmem:[#allocation42_spill] sm:$0xff] }
 0x56d   : > { %14527 = vmatmul.mubr.msk.bf16.gmra.mrb[92].mxu0 %vm1463_vm2, %v20090_v7  ;;  %v20126_v7 = vld [vmem:[#allocation64_spill] sm:$0xff] }
 0x56e   : > { %14530 = vmatprep.mubr.msk.bf16.mxu0 %vm1463_vm2, %v20091_v49  ;;  %v20127_v60 = vpack.c.bf16 %v20125_v40, %v20126_v7  ;;  %v20128_v49 = vld [vmem:[#allocation69_spill] sm:$0xff]  ;;  %v15918_v40 = vld [vmem:[#allocation3 + $0x8b0] ss:$8 sps:$4 sm:$0xff]   ;;  %v15919_v7 = vld [vmem:[#allocation3 + $0x8c4] ss:$8 sps:$4 sm:$0xff]  }
 0x575   : > { %14531 = vmatmul.mubr.msk.bf16.gmra.mrb[96].mxu0 %vm1463_vm2, %v20092_v36  ;;  %v20130_v36 = vpack.c.bf16 %v20128_v49, %v20129_v54  ;;  %v5959_v49 = vld [vmem:[#allocation5 + $0x10] sm:$0x3]  ;;  %v15922_v54 = vld [vmem:[#allocation3 + $0x8d4] ss:$8 sps:$4 sm:$0xff]  }
 0x576   : > { %14536 = vmatprep.mubr.msk.bf16.mxu0 %vm1463_vm2, %v20093_v35  ;;  %v20131_v35 = vld [vmem:[#allocation71_spill] sm:$0xff] }
 0x57d   : > { %14537 = vmatmul.mubr.msk.bf16.vlgmr.msra.gmra.mrb[68].mxu0 %vm1463_vm2, %v20094_v3  ;;  %v20132_v3 = vld [vmem:[#allocation68_spill] sm:$0xff] }
 0x57e   : > { %14540 = vmatprep.mubr.msk.bf16.mxu0 %vm1463_vm2, %v20095_v19  ;;  %14569 = vmatpush3.bf16.msra.mxu0 %v18308_v14  ;;  %v20111_v14 = vld [vmem:[#allocation57_spill] sm:$0xff]  ;;  %v20133_v19 = vpack.c.bf16 %v20131_v35, %v20132_v3  ;;  %v15924_v35 = vld [vmem:[#allocation3 + $0x8d0] ss:$8 sps:$4 sm:$0xff]   ;;  %v15925_v3 = vld [vmem:[#allocation3 + $0x8e4] ss:$8 sps:$4 sm:$0xff]  }
 0x57f   : > { %13679 = vmatprep.subr.bf16.mxu0 %v20004_v53  ;;  %v20104_v53 = vld [vmem:[#allocation52_spill] sm:$0xff]  ;;  %v20112_v56 = vpack.c.bf16 %v20110_v2, %v20111_v14 }
 0x580   : > { %v20106_v48 = vpack.c.bf16 %v20104_v53, %v20105_v13  ;;  %v20142_v53 = vld [vmem:[#allocation34_spill] sm:$0xff]  ;;  %v20143_v13 = vld [vmem:[#allocation35_spill] sm:$0xff]  ;;  %v20148_v2 = vld [vmem:[#allocation76_spill] sm:$0xff] }
 0x585   : > { %14541 = vmatmul.mubr.msk.bf16.gmra.mrb[72].mxu0 %vm1463_vm2, %v20096_v45  ;;  %v20134_v45 = vld [vmem:[#allocation47_spill] sm:$0xff] }
 0x586   : > { %14544 = vmatprep.mubr.msk.bf16.mxu0 %vm1463_vm2, %v20097_v26  ;;  %v20135_v26 = vld [vmem:[#allocation70_spill] sm:$0xff] }
 0x587   : > { %v20136_v28 = vpack.c.bf16 %v20134_v45, %v20135_v26  ;;  %v15928_v45 = vld [vmem:[#allocation3 + $0x8f4] ss:$8 sps:$4 sm:$0xff]   ;;  %v15930_v26 = vld [vmem:[#allocation3 + $0x8f0] ss:$8 sps:$4 sm:$0xff]  }
 0x58d   : > { %14545 = vmatmul.mubr.msk.bf16.gmra.mrb[76].mxu0 %vm1463_vm2, %v20100_v25  ;;  %v20138_v25 = vld [vmem:[#allocation72_spill] sm:$0xff] }
 0x58e   : > { %14548 = vmatprep.mubr.msk.bf16.mxu0 %vm1463_vm2, %v20103_v22  ;;  %v20139_v11 = vpack.c.bf16 %v20137_v21, %v20138_v25  ;;  %v20141_v22 = vld [vmem:[#allocation33_spill] sm:$0xff] }
 0x595   : > { %14549 = vmatmul.mubr.msk.bf16.gmra.mrb[80].mxu0 %vm1463_vm2, %v20106_v48  ;;  %v20144_v48 = vld [vmem:[#allocation75_spill] sm:$0xff] }
 0x596   : > { %14552 = vmatprep.mubr.msk.bf16.mxu0 %vm1463_vm2, %v20109_v1  ;;  %v20146_v58 = vpack.c.bf16 %v20144_v48, %v20145_v33  ;;  %v20147_v1 = vld [vmem:[#allocation77_spill] sm:$0xff] }
 0x597   : > { %v20149_v14 = vpack.c.bf16 %v20147_v1, %v20148_v2 }
 0x59d   : > { %14553 = vmatmul.mubr.msk.bf16.gmra.mrb[84].mxu0 %vm1463_vm2, %v20112_v56  ;;  %v20150_v56 = vld [vmem:[#allocation36_spill] sm:$0xff] }
 0x59e   : > { %14556 = vmatprep.mubr.msk.bf16.mxu0 %vm1463_vm2, %v20115_v29  ;;  %v20153_v29 = vld [vmem:[#allocation39_spill] sm:$0xff] }
 0x5a5   : > { %14557 = vmatmul.mubr.msk.bf16.gmra.mrb[88].mxu0 %vm1463_vm2, %v20118_v57  ;;  %v20156_v57 = vpack.c.bf16 %v20154_v43, %v20155_v41 }
 0x5a6   : > { %14560 = vmatprep.mubr.msk.bf16.mxu0 %vm1463_vm2, %v20121_v63  ;;  %v20159_v63 = vld [vmem:[#allocation41_spill] sm:$0xff] }
 0x5ad   : > { %14561 = vmatmul.mubr.msk.bf16.gmra.mrb[92].mxu0 %vm1463_vm2, %v20124_v23  ;;  %v20164_v23 = vld [vmem:[#allocation46_spill] sm:$0xff] }
 0x5ae   : > { %14564 = vmatprep.mubr.msk.bf16.mxu0 %vm1463_vm2, %v20127_v60  ;;  %v15921_v60 = vld [vmem:[#allocation3 + $0x8c0] ss:$8 sps:$4 sm:$0xff]  }
 0x5b5   : > { %14565 = vmatmul.mubr.msk.bf16.gmra.mrb[96].mxu0 %vm1463_vm2, %v20130_v36  ;;  %v6009_v36 = vand.u32 %v5959_v49, %v20042_v5 }
 0x5b6   : > { %14570 = vmatprep.mubr.msk.bf16.mxu0 %vm1463_vm2, %v20133_v19  ;;  %v15927_v19 = vld [vmem:[#allocation3 + $0x8e0] ss:$8 sps:$4 sm:$0xff]  }
 0x5bd   : > { %14571 = vmatmul.mubr.msk.bf16.vlgmr.msra.gmra.mrb[68].mxu0 %vm1463_vm2, %v20136_v28 }
 0x5be   : > { %14574 = vmatprep.mubr.msk.bf16.mxu0 %vm1463_vm2, %v20139_v11  ;;  %13680 = vmatpush3.bf16.msra.mxu0 %v20140_v55 }
 0x5bf   : > { %13681 = vmatprep.subr.bf16.mxu0 %v20141_v22 }
 0x5c2   : > { %13682 = vmatpush3.bf16.msra.mxu0 %v20142_v53 }
 0x5c3   : > { %13683 = vmatprep.subr.bf16.mxu0 %v20143_v13 }
 0x5c5   : > { %14575 = vmatmul.mubr.msk.bf16.gmra.mrb[72].mxu0 %vm1463_vm2, %v20146_v58 }
 0x5c6   : > { %14578 = vmatprep.mubr.msk.bf16.mxu0 %vm1463_vm2, %v20149_v14  ;;  %13684 = vmatpush3.bf16.msra.mxu0 %v20150_v56 }
 0x5c7   : > { %13685 = vmatprep.subr.bf16.mxu0 %v20151_v16 }
 0x5ca   : > { %13686 = vmatpush3.bf16.msra.mxu0 %v20152_v52 }
 0x5cb   : > { %13687 = vmatprep.subr.bf16.mxu0 %v20153_v29 }
 0x5cd   : > { %14579 = vmatmul.mubr.msk.bf16.gmra.mrb[76].mxu0 %vm1463_vm2, %v20156_v57 }
 0x5ce   : > { %14582 = vmatprep.mubr.msk.bf16.mxu0 %vm1463_vm2, %v20157_v10  ;;  %13688 = vmatpush3.bf16.msra.mxu0 %v20158_v42 }
 0x5cf   : > { %13689 = vmatprep.subr.bf16.mxu0 %v20159_v63 }
 0x5d2   : > { %13690 = vmatpush3.bf16.msra.mxu0 %v20160_v51 }
 0x5d3   : > { %13691 = vmatprep.subr.bf16.mxu0 %v20161_v47 }
 0x5d5   : > { %14583 = vmatmul.mubr.msk.bf16.gmra.mrb[80].mxu0 %vm1463_vm2, %v5333_v20  ;;  %v15885_v20 = vld [vmem:[#allocation3 + $0x804] ss:$8 sps:$4 sm:$0xff]  }
 0x5d6   : > { %14586 = vmatprep.mubr.msk.bf16.mxu0 %vm1463_vm2, %v5334_v61  ;;  %13692 = vmatpush3.bf16.msra.mxu0 %v20162_v4  ;;  %v15891_v61 = vld [vmem:[#allocation3 + $0x820] ss:$8 sps:$4 sm:$0xff]  }
 0x5d7   : > { %13693 = vmatprep.subr.bf16.mxu0 %v20163_v17 }
 0x5da   : > { %13694 = vmatpush3.bf16.msra.mxu0 %v20164_v23 }
 0x5db   : > { %14602 = vmatprep.subr.bf16.mxu0 %v6009_v36 }
 0x5dd   : > { %14587 = vmatmul.mubr.msk.bf16.gmra.mrb[84].mxu0 %vm1463_vm2, %v5335_v9  ;;  %v15895_v9 = vld [vmem:[#allocation3 + $0x844] ss:$8 sps:$4 sm:$0xff]  }
 0x5de   : > { %14590 = vmatprep.mubr.msk.bf16.mxu0 %vm1463_vm2, %v5336_v15  ;;  %v15900_v15 = vld [vmem:[#allocation3 + $0x850] ss:$8 sps:$4 sm:$0xff]  }
 0x5e5   : > { %14591 = vmatmul.mubr.msk.bf16.gmra.mrb[88].mxu0 %vm1463_vm2, %v5337_v30  ;;  %v15904_v30 = vld [vmem:[#allocation3 + $0x874] ss:$8 sps:$4 sm:$0xff]  }
 0x5e6   : > { %14594 = vmatprep.mubr.msk.bf16.mxu0 %vm1463_vm2, %v5338_v6  ;;  %v15909_v6 = vld [vmem:[#allocation3 + $0x880] ss:$8 sps:$4 sm:$0xff]  }
 0x5ed   : > { %14595 = vmatmul.mubr.msk.bf16.gmra.mrb[92].mxu0 %vm1463_vm2, %v5339_v44  ;;  %v15913_v44 = vld [vmem:[#allocation3 + $0x8a4] ss:$8 sps:$4 sm:$0xff]  }
 0x5ee   : > { %14598 = vmatprep.mubr.msk.bf16.mxu0 %vm1463_vm2, %v5340_v46  ;;  %v15915_v46 = vld [vmem:[#allocation3 + $0x8a0] ss:$8 sps:$4 sm:$0xff]  }
 0x5f5   : > { %14599 = vmatmul.mubr.msk.bf16.gmra.mrb[96].mxu0 %vm1463_vm2, %v5341_v31  ;;  %v15916_v31 = vld [vmem:[#allocation3 + $0x8b4] ss:$8 sps:$4 sm:$0xff]  }
 0x5f6   : > { %5813 = vmatprep.mubr.bf16.mxu0 %v15885_v20 }
 0x5fd   : > { %5814 = vmatmul.mubr.bf16.vlgmr.msra.gmra.mrb[164].mxu0 %v15883_v0 }
 0x5fe   : > { %5821 = vmatprep.mubr.bf16.mxu0 %v15886_v12  ;;  %14603 = vmatpush3.bf16.msra.mxu0 %v6009_v36 }
 0x605   : > { %5822 = vmatmul.mubr.bf16.gmra.mrb[168].mxu0 %v15888_v59 }
 0x606   : > { %5829 = vmatprep.mubr.bf16.mxu0 %v15889_v24 }
 0x60d   : > { %5830 = vmatmul.mubr.bf16.gmra.mrb[172].mxu0 %v15891_v61 }
 0x60e   : > { %5837 = vmatprep.mubr.bf16.mxu0 %v15892_v27 }
 0x615   : > { %5838 = vmatmul.mubr.bf16.gmra.mrb[176].mxu0 %v15894_v37 }
 0x616   : > { %5845 = vmatprep.mubr.bf16.mxu0 %v15895_v9 }
 0x61d   : > { %5846 = vmatmul.mubr.bf16.gmra.mrb[180].mxu0 %v15897_v32 }
 0x61e   : > { %5853 = vmatprep.mubr.bf16.mxu0 %v15898_v39 }
 0x625   : > { %5854 = vmatmul.mubr.bf16.gmra.mrb[184].mxu0 %v15900_v15 }
 0x626   : > { %5861 = vmatprep.mubr.bf16.mxu0 %v15901_v8 }
 0x62d   : > { %5862 = vmatmul.mubr.bf16.gmra.mrb[188].mxu0 %v15903_v18 }
 0x62e   : > { %5869 = vmatprep.mubr.bf16.mxu0 %v15904_v30 }
 0x635   : > { %5870 = vmatmul.mubr.bf16.gmra.mrb[192].mxu0 %v15906_v50 }
 0x636   : > { %5877 = vmatprep.mubr.bf16.mxu0 %v15907_v34 }
 0x63d   : > { %5878 = vmatmul.mubr.bf16.gmra.mrb[196].mxu0 %v15909_v6 }
 0x63e   : > { %5885 = vmatprep.mubr.bf16.mxu0 %v15910_v38 }
 0x645   : > { %5886 = vmatmul.mubr.bf16.gmra.mrb[200].mxu0 %v15912_v62 }
 0x646   : > { %5893 = vmatprep.mubr.bf16.mxu0 %v15913_v44 }
 0x64d   : > { %5894 = vmatmul.mubr.bf16.gmra.mrb[204].mxu0 %v15915_v46 }
 0x64e   : > { %5901 = vmatprep.mubr.bf16.mxu0 %v15916_v31 }
 0x655   : > { %5902 = vmatmul.mubr.bf16.gmra.mrb[208].mxu0 %v15918_v40 }
 0x656   : > { %5909 = vmatprep.mubr.bf16.mxu0 %v15919_v7 }
 0x65d   : > { %5910 = vmatmul.mubr.bf16.gmra.mrb[212].mxu0 %v15921_v60 }
 0x65e   : > { %5917 = vmatprep.mubr.bf16.mxu0 %v15922_v54 }
 0x665   : > { %5918 = vmatmul.mubr.bf16.gmra.mrb[216].mxu0 %v15924_v35 }
 0x666   : > { %5925 = vmatprep.mubr.bf16.mxu0 %v15925_v3 }
 0x66d   : > { %5926 = vmatmul.mubr.bf16.gmra.mrb[220].mxu0 %v15927_v19 }
 0x66e   : > { %5933 = vmatprep.mubr.bf16.mxu0 %v15928_v45 }
 0x675   : > { %5934 = vmatmul.mubr.bf16.gmra.mrb[224].mxu0 %v15930_v26 }
 0x6d0   : > { %v13695_v28 = vpop.f32.mrb[164].mxu0 }
 0x6d1   : > { %v13696_v21 = vpop.f32.mrb[165].mxu0 }
 0x6d2   : > { %v13697_v25 = vadd.f32 %v13696_v21, %v13695_v28  ;;  %v13698_v11 = vpop.f32.mrb[166].mxu0 }
 0x6d3   : > { %v13699_v55 = vpop.f32.mrb[167].mxu0 }
 0x6d4   : > { %v13700_v5 = vadd.f32 %v13699_v55, %v13698_v11 }
 0x6d6   : > { %v5942_v22 = vpack.c.bf16 %v13700_v5, %v13697_v25 }
 0x6d8   : > { %v13701_v53 = vpop.f32.mrb[168].mxu0  ;;  %14604 = vmatprep.mubr.msk.bf16.mxu0 %vm1463_vm2, %v5942_v22 }
 0x6d9   : > { %v13702_v13 = vpop.f32.mrb[169].mxu0 }
 0x6da   : > { %v13703_v48 = vadd.f32 %v13702_v13, %v13701_v53  ;;  %v13704_v33 = vpop.f32.mrb[170].mxu0 }
 0x6db   : > { %v13705_v58 = vpop.f32.mrb[171].mxu0 }
 0x6dc   : > { %v13706_v1 = vadd.f32 %v13705_v58, %v13704_v33 }
 0x6de   : > { %v5943_v2 = vpack.c.bf16 %v13706_v1, %v13703_v48 }
 0x6e0   : > { %v13707_v14 = vpop.f32.mrb[172].mxu0  ;;  %14605 = vmatmul.mubr.msk.bf16.vlgmr.msra.gmra.mrb[68].mxu0 %vm1463_vm2, %v5943_v2 }
 0x6e1   : > { %v13708_v56 = vpop.f32.mrb[173].mxu0 }
 0x6e2   : > { %v13709_v16 = vadd.f32 %v13708_v56, %v13707_v14  ;;  %v13710_v52 = vpop.f32.mrb[174].mxu0 }
 0x6e3   : > { %v13711_v29 = vpop.f32.mrb[175].mxu0 }
 0x6e4   : > { %v13712_v43 = vadd.f32 %v13711_v29, %v13710_v52 }
 0x6e6   : > { %v5944_v41 = vpack.c.bf16 %v13712_v43, %v13709_v16 }
 0x6e8   : > { %v13713_v57 = vpop.f32.mrb[176].mxu0  ;;  %14608 = vmatprep.mubr.msk.bf16.mxu0 %vm1463_vm2, %v5944_v41 }
 0x6e9   : > { %v13714_v10 = vpop.f32.mrb[177].mxu0 }
 0x6ea   : > { %v13715_v42 = vadd.f32 %v13714_v10, %v13713_v57  ;;  %v13716_v63 = vpop.f32.mrb[178].mxu0 }
 0x6eb   : > { %v13717_v51 = vpop.f32.mrb[179].mxu0 }
 0x6ec   : > { %v13718_v47 = vadd.f32 %v13717_v51, %v13716_v63 }
 0x6ee   : > { %v5945_v4 = vpack.c.bf16 %v13718_v47, %v13715_v42 }
 0x6f0   : > { %v13719_v17 = vpop.f32.mrb[180].mxu0  ;;  %14609 = vmatmul.mubr.msk.bf16.gmra.mrb[72].mxu0 %vm1463_vm2, %v5945_v4 }
 0x6f1   : > { %v13720_v23 = vpop.f32.mrb[181].mxu0 }
 0x6f2   : > { %v13721_v20 = vadd.f32 %v13720_v23, %v13719_v17  ;;  %v13722_v0 = vpop.f32.mrb[182].mxu0 }
 0x6f3   : > { %v13723_v12 = vpop.f32.mrb[183].mxu0 }
 0x6f4   : > { %v13724_v59 = vadd.f32 %v13723_v12, %v13722_v0 }
 0x6f6   : > { %v5946_v24 = vpack.c.bf16 %v13724_v59, %v13721_v20 }
 0x6f8   : > { %v13725_v61 = vpop.f32.mrb[184].mxu0  ;;  %14612 = vmatprep.mubr.msk.bf16.mxu0 %vm1463_vm2, %v5946_v24 }
 0x6f9   : > { %v13726_v27 = vpop.f32.mrb[185].mxu0 }
 0x6fa   : > { %v13727_v37 = vadd.f32 %v13726_v27, %v13725_v61  ;;  %v13728_v9 = vpop.f32.mrb[186].mxu0 }
 0x6fb   : > { %v13729_v32 = vpop.f32.mrb[187].mxu0 }
 0x6fc   : > { %v13730_v39 = vadd.f32 %v13729_v32, %v13728_v9 }
 0x6fe   : > { %v5947_v15 = vpack.c.bf16 %v13730_v39, %v13727_v37 }
 0x700   : > { %v13731_v8 = vpop.f32.mrb[188].mxu0  ;;  %14613 = vmatmul.mubr.msk.bf16.gmra.mrb[76].mxu0 %vm1463_vm2, %v5947_v15 }
 0x701   : > { %v13732_v18 = vpop.f32.mrb[189].mxu0 }
 0x702   : > { %v13733_v30 = vadd.f32 %v13732_v18, %v13731_v8  ;;  %v13734_v50 = vpop.f32.mrb[190].mxu0 }
 0x703   : > { %v13735_v34 = vpop.f32.mrb[191].mxu0 }
 0x704   : > { %v13736_v6 = vadd.f32 %v13735_v34, %v13734_v50 }
 0x706   : > { %v5948_v38 = vpack.c.bf16 %v13736_v6, %v13733_v30 }
 0x708   : > { %v13737_v62 = vpop.f32.mrb[192].mxu0  ;;  %14616 = vmatprep.mubr.msk.bf16.mxu0 %vm1463_vm2, %v5948_v38 }
 0x709   : > { %v13738_v44 = vpop.f32.mrb[193].mxu0 }
 0x70a   : > { %v13739_v46 = vadd.f32 %v13738_v44, %v13737_v62  ;;  %v13740_v31 = vpop.f32.mrb[194].mxu0 }
 0x70b   : > { %v13741_v40 = vpop.f32.mrb[195].mxu0 }
 0x70c   : > { %v13742_v7 = vadd.f32 %v13741_v40, %v13740_v31  ;;  %v18561_v31 = vld [vmem:[#allocation7] ss:$0 sm:$0xff] }
 0x70e   : > { %v5949_v60 = vpack.c.bf16 %v13742_v7, %v13739_v46 }
 0x710   : > { %v13743_v49 = vpop.f32.mrb[196].mxu0  ;;  %14617 = vmatmul.mubr.msk.bf16.gmra.mrb[80].mxu0 %vm1463_vm2, %v5949_v60 }
 0x711   : > { %v13744_v54 = vpop.f32.mrb[197].mxu0 }
 0x712   : > { %v13745_v36 = vadd.f32 %v13744_v54, %v13743_v49  ;;  %v13746_v35 = vpop.f32.mrb[198].mxu0 }
 0x713   : > { %v13747_v3 = vpop.f32.mrb[199].mxu0 }
 0x714   : > { %v13748_v19 = vadd.f32 %v13747_v3, %v13746_v35 }
 0x716   : > { %v5950_v45 = vpack.c.bf16 %v13748_v19, %v13745_v36 }
 0x718   : > { %v13749_v26 = vpop.f32.mrb[200].mxu0  ;;  %14620 = vmatprep.mubr.msk.bf16.mxu0 %vm1463_vm2, %v5950_v45 }
 0x719   : > { %v13750_v28 = vpop.f32.mrb[201].mxu0 }
 0x71a   : > { %v13751_v21 = vadd.f32 %v13750_v28, %v13749_v26  ;;  %v13752_v25 = vpop.f32.mrb[202].mxu0 }
 0x71b   : > { %v13753_v11 = vpop.f32.mrb[203].mxu0 }
 0x71c   : > { %v13754_v55 = vadd.f32 %v13753_v11, %v13752_v25 }
 0x71e   : > { %v5951_v5 = vpack.c.bf16 %v13754_v55, %v13751_v21 }
 0x720   : > { %v13755_v22 = vpop.f32.mrb[204].mxu0  ;;  %14621 = vmatmul.mubr.msk.bf16.gmra.mrb[84].mxu0 %vm1463_vm2, %v5951_v5 }
 0x721   : > { %v13756_v53 = vpop.f32.mrb[205].mxu0 }
 0x722   : > { %v13757_v13 = vadd.f32 %v13756_v53, %v13755_v22  ;;  %v13758_v48 = vpop.f32.mrb[206].mxu0 }
 0x723   : > { %v13759_v33 = vpop.f32.mrb[207].mxu0 }
 0x724   : > { %v13760_v58 = vadd.f32 %v13759_v33, %v13758_v48 }
 0x726   : > { %v5952_v1 = vpack.c.bf16 %v13760_v58, %v13757_v13 }
 0x728   : > { %v13761_v2 = vpop.f32.mrb[208].mxu0  ;;  %14624 = vmatprep.mubr.msk.bf16.mxu0 %vm1463_vm2, %v5952_v1 }
 0x729   : > { %v13762_v14 = vpop.f32.mrb[209].mxu0 }
 0x72a   : > { %v13763_v56 = vadd.f32 %v13762_v14, %v13761_v2  ;;  %v13764_v16 = vpop.f32.mrb[210].mxu0 }
 0x72b   : > { %v13765_v52 = vpop.f32.mrb[211].mxu0 }
 0x72c   : > { %v13766_v29 = vadd.f32 %v13765_v52, %v13764_v16 }
 0x72e   : > { %v5953_v43 = vpack.c.bf16 %v13766_v29, %v13763_v56 }
 0x730   : > { %v13767_v41 = vpop.f32.mrb[212].mxu0  ;;  %14625 = vmatmul.mubr.msk.bf16.gmra.mrb[88].mxu0 %vm1463_vm2, %v5953_v43 }
 0x731   : > { %v13768_v57 = vpop.f32.mrb[213].mxu0 }
 0x732   : > { %v13769_v10 = vadd.f32 %v13768_v57, %v13767_v41  ;;  %v13770_v42 = vpop.f32.mrb[214].mxu0 }
 0x733   : > { %v13771_v63 = vpop.f32.mrb[215].mxu0 }
 0x734   : > { %v13772_v51 = vadd.f32 %v13771_v63, %v13770_v42 }
 0x736   : > { %v5954_v47 = vpack.c.bf16 %v13772_v51, %v13769_v10 }
 0x738   : > { %v13773_v4 = vpop.f32.mrb[216].mxu0  ;;  %14628 = vmatprep.mubr.msk.bf16.mxu0 %vm1463_vm2, %v5954_v47 }
 0x739   : > { %v13774_v17 = vpop.f32.mrb[217].mxu0 }
 0x73a   : > { %v13775_v23 = vadd.f32 %v13774_v17, %v13773_v4  ;;  %v13776_v20 = vpop.f32.mrb[218].mxu0 }
 0x73b   : > { %v13777_v0 = vpop.f32.mrb[219].mxu0 }
 0x73c   : > { %v13778_v12 = vadd.f32 %v13777_v0, %v13776_v20 }
 0x73e   : > { %v5955_v59 = vpack.c.bf16 %v13778_v12, %v13775_v23 }
 0x740   : > { %v13779_v24 = vpop.f32.mrb[220].mxu0  ;;  %14629 = vmatmul.mubr.msk.bf16.gmra.mrb[92].mxu0 %vm1463_vm2, %v5955_v59 }
 0x741   : > { %v13780_v61 = vpop.f32.mrb[221].mxu0 }
 0x742   : > { %v13781_v27 = vadd.f32 %v13780_v61, %v13779_v24  ;;  %v13782_v37 = vpop.f32.mrb[222].mxu0 }
 0x743   : > { %v13783_v9 = vpop.f32.mrb[223].mxu0 }
 0x744   : > { %v13784_v32 = vadd.f32 %v13783_v9, %v13782_v37 }
 0x746   : > { %v5956_v39 = vpack.c.bf16 %v13784_v32, %v13781_v27 }
 0x748   : > { %v13785_v15 = vpop.f32.mrb[224].mxu0  ;;  %14632 = vmatprep.mubr.msk.bf16.mxu0 %vm1463_vm2, %v5956_v39 }
 0x749   : > { %v13786_v8 = vpop.f32.mrb[225].mxu0 }
 0x74a   : > { %v13787_v18 = vadd.f32 %v13786_v8, %v13785_v15  ;;  %v13788_v30 = vpop.f32.mrb[226].mxu0 }
 0x74b   : > { %v13789_v50 = vpop.f32.mrb[227].mxu0 }
 0x74c   : > { %v13790_v34 = vadd.f32 %v13789_v50, %v13788_v30 }
 0x74e   : > { %v5957_v6 = vpack.c.bf16 %v13790_v34, %v13787_v18 }
 0x750   : > { %14633 = vmatmul.mubr.msk.bf16.gmra.mrb[96].mxu0 %vm1463_vm2, %v5957_v6 }
 0x7b3   : > { %v14606_v38 = vpop.f32.mrb[68].mxu0 }
 0x7b4   : > { %v6045_v62 = vpop.f32.mrb[69].mxu0  ;;  %v18572_v49 = vadd.f32 %v14606_v38, %v18561_v31 }
 0x7b5   : > { %v14607_v44 = vpop.f32.mrb[70].mxu0  ;;  %v18567_v7 = vadd.f32 %v18561_v31, %v6045_v62 }
 0x7b6   : > { %v6048_v46 = vpop.f32.mrb[71].mxu0  ;;  %v6316_v28 = vmul.f32 %v18572_v49, %v18572_v49  ;;  %v18585_v25 = vadd.f32 %v14607_v44, %v18561_v31  ;;  %v6247_v53 = vsel %vm19883_vm3, %v18572_v49, 0.0 }
 0x7b7   : > { %v18564_v40 = vadd.f32 %v18561_v31, %v6048_v46  ;;  %v6314_v54 = vmul.f32 %v18567_v7, %v18567_v7  ;;  %v6244_v35 = vsel %vm19883_vm3, %v18567_v7, 0.0 }
 0x7b8   : > { %v6349_v48 = vsel %vm19883_vm3, %v6316_v28, 0.0  ;;  %v6317_v33 = vmul.f32 %v18585_v25, %v18585_v25  ;;  %v6249_v14 = vsel %vm19883_vm3, %v18585_v25, 0.0 }
 0x7b9   : > { %v6315_v60 = vmul.f32 %v18564_v40, %v18564_v40  ;;  %v6245_v36 = vsel %vm19883_vm3, %v18564_v40, 0.0  ;;  %v6346_v21 = vsel %vm19883_vm3, %v6314_v54, 0.0 }
 0x7ba   : > { %v6246_v45 = vadd.f32 %v6245_v36, %v6244_v35  ;;  %v6351_v52 = vsel %vm19883_vm3, %v6317_v33, 0.0 }
 0x7bb   : > { %v6347_v3 = vsel %vm19883_vm3, %v6315_v60, 0.0 }
 0x7bc   : > { %v6348_v5 = vadd.f32 %v6347_v3, %v6346_v21  ;;  %v6248_v13 = vadd.f32 %v6247_v53, %v6246_v45 }
 0x7be   : > { %v6350_v2 = vadd.f32 %v6349_v48, %v6348_v5  ;;  %v6250_v16 = vadd.f32 %v6249_v14, %v6248_v13 }
 0x7c0   : > { %v6352_v57 = vadd.f32 %v6351_v52, %v6350_v2 }
 0x7c3   : > { %v14610_v19 = vpop.f32.mrb[72].mxu0 }
 0x7c4   : > { %v6061_v26 = vpop.f32.mrb[73].mxu0  ;;  %v18609_v10 = vadd.f32 %v14610_v19, %v18561_v31 }
 0x7c5   : > { %v18588_v11 = vadd.f32 %v18561_v31, %v6061_v26  ;;  %v14611_v55 = vpop.f32.mrb[74].mxu0 }
 0x7c6   : > { %v6064_v22 = vpop.f32.mrb[75].mxu0  ;;  %v6320_v4 = vmul.f32 %v18609_v10, %v18609_v10  ;;  %v18617_v17 = vadd.f32 %v14611_v55, %v18561_v31  ;;  %v6255_v12 = vsel %vm19883_vm3, %v18609_v10, 0.0 }
 0x7c7   : > { %v6318_v58 = vmul.f32 %v18588_v11, %v18588_v11  ;;  %v18598_v1 = vadd.f32 %v18561_v31, %v6064_v22  ;;  %v6251_v56 = vsel %vm19883_vm3, %v18588_v11, 0.0 }
 0x7c8   : > { %v6252_v41 = vadd.f32 %v6251_v56, %v6250_v16  ;;  %v6357_v37 = vsel %vm19883_vm3, %v6320_v4, 0.0  ;;  %v6321_v9 = vmul.f32 %v18617_v17, %v18617_v17  ;;  %v6257_v8 = vsel %vm19883_vm3, %v18617_v17, 0.0 }
 0x7c9   : > { %v6353_v29 = vsel %vm19883_vm3, %v6318_v58, 0.0  ;;  %v6319_v43 = vmul.f32 %v18598_v1, %v18598_v1  ;;  %v6253_v42 = vsel %vm19883_vm3, %v18598_v1, 0.0 }
 0x7ca   : > { %v6354_v63 = vadd.f32 %v6353_v29, %v6352_v57  ;;  %v6254_v47 = vadd.f32 %v6253_v42, %v6252_v41  ;;  %v6359_v50 = vsel %vm19883_vm3, %v6321_v9, 0.0 }
 0x7cb   : > { %v6355_v51 = vsel %vm19883_vm3, %v6319_v43, 0.0 }
 0x7cc   : > { %v6356_v20 = vadd.f32 %v6355_v51, %v6354_v63  ;;  %v6256_v61 = vadd.f32 %v6255_v12, %v6254_v47 }
 0x7ce   : > { %v6358_v15 = vadd.f32 %v6357_v37, %v6356_v20  ;;  %v6258_v30 = vadd.f32 %v6257_v8, %v6256_v61 }
 0x7d0   : > { %v6360_v62 = vadd.f32 %v6359_v50, %v6358_v15 }
 0x7d3   : > { %v14614_v23 = vpop.f32.mrb[76].mxu0 }
 0x7d4   : > { %v6077_v0 = vpop.f32.mrb[77].mxu0  ;;  %v18641_v44 = vadd.f32 %v14614_v23, %v18561_v31 }
 0x7d5   : > { %v18622_v59 = vadd.f32 %v18561_v31, %v6077_v0  ;;  %v14615_v24 = vpop.f32.mrb[78].mxu0 }
 0x7d6   : > { %v6080_v27 = vpop.f32.mrb[79].mxu0  ;;  %v6324_v35 = vmul.f32 %v18641_v44, %v18641_v44  ;;  %v18649_v3 = vadd.f32 %v14615_v24, %v18561_v31  ;;  %v6263_v45 = vsel %vm19883_vm3, %v18641_v44, 0.0 }
 0x7d7   : > { %v6322_v32 = vmul.f32 %v18622_v59, %v18622_v59  ;;  %v18630_v39 = vadd.f32 %v18561_v31, %v6080_v27  ;;  %v6259_v18 = vsel %vm19883_vm3, %v18622_v59, 0.0 }
 0x7d8   : > { %v6260_v38 = vadd.f32 %v6259_v18, %v6258_v30  ;;  %v6365_v55 = vsel %vm19883_vm3, %v6324_v35, 0.0  ;;  %v6325_v5 = vmul.f32 %v18649_v3, %v18649_v3  ;;  %v6265_v33 = vsel %vm19883_vm3, %v18649_v3, 0.0 }
 0x7d9   : > { %v6361_v34 = vsel %vm19883_vm3, %v6322_v32, 0.0  ;;  %v6323_v6 = vmul.f32 %v18630_v39, %v18630_v39  ;;  %v6261_v46 = vsel %vm19883_vm3, %v18630_v39, 0.0 }
 0x7da   : > { %v6362_v60 = vadd.f32 %v6361_v34, %v6360_v62  ;;  %v6262_v36 = vadd.f32 %v6261_v46, %v6260_v38  ;;  %v6367_v16 = vsel %vm19883_vm3, %v6325_v5, 0.0 }
 0x7db   : > { %v6363_v54 = vsel %vm19883_vm3, %v6323_v6, 0.0 }
 0x7dc   : > { %v6364_v19 = vadd.f32 %v6363_v54, %v6362_v60  ;;  %v6264_v28 = vadd.f32 %v6263_v45, %v6262_v36 }
 0x7de   : > { %v6366_v13 = vadd.f32 %v6365_v55, %v6364_v19  ;;  %v6266_v56 = vadd.f32 %v6265_v33, %v6264_v28 }
 0x7e0   : > { %v6368_v41 = vadd.f32 %v6367_v16, %v6366_v13 }
 0x7e3   : > { %v14618_v26 = vpop.f32.mrb[80].mxu0 }
 0x7e4   : > { %v6093_v21 = vpop.f32.mrb[81].mxu0  ;;  %v18673_v57 = vadd.f32 %v14618_v26, %v18561_v31 }
 0x7e5   : > { %v18657_v22 = vadd.f32 %v18561_v31, %v6093_v21  ;;  %v14619_v53 = vpop.f32.mrb[82].mxu0 }
 0x7e6   : > { %v6096_v48 = vpop.f32.mrb[83].mxu0  ;;  %v18679_v47 = vadd.f32 %v14619_v53, %v18561_v31  ;;  %v6328_v23 = vmul.f32 %v18673_v57, %v18673_v57  ;;  %v6271_v0 = vsel %vm19883_vm3, %v18673_v57, 0.0 }
 0x7e7   : > { %v6267_v58 = vsel %vm19883_vm3, %v18657_v22, 0.0  ;;  %v6326_v2 = vmul.f32 %v18657_v22, %v18657_v22  ;;  %v18666_v14 = vadd.f32 %v18561_v31, %v6096_v48 }
 0x7e8   : > { %v6268_v43 = vadd.f32 %v6267_v58, %v6266_v56  ;;  %v6329_v12 = vmul.f32 %v18679_v47, %v18679_v47  ;;  %v6373_v61 = vsel %vm19883_vm3, %v6328_v23, 0.0  ;;  %v6273_v32 = vsel %vm19883_vm3, %v18679_v47, 0.0 }
 0x7e9   : > { %v6369_v52 = vsel %vm19883_vm3, %v6326_v2, 0.0  ;;  %v6327_v29 = vmul.f32 %v18666_v14, %v18666_v14  ;;  %v6269_v42 = vsel %vm19883_vm3, %v18666_v14, 0.0 }
 0x7ea   : > { %v6370_v63 = vadd.f32 %v6369_v52, %v6368_v41  ;;  %v6270_v4 = vadd.f32 %v6269_v42, %v6268_v43  ;;  %v6375_v30 = vsel %vm19883_vm3, %v6329_v12, 0.0 }
 0x7eb   : > { %v6371_v51 = vsel %vm19883_vm3, %v6327_v29, 0.0 }
 0x7ec   : > { %v6372_v20 = vadd.f32 %v6371_v51, %v6370_v63  ;;  %v6272_v24 = vadd.f32 %v6271_v0, %v6270_v4 }
 0x7ee   : > { %v6374_v37 = vadd.f32 %v6373_v61, %v6372_v20  ;;  %v6274_v50 = vadd.f32 %v6273_v32, %v6272_v24 }
 0x7f0   : > { %v6376_v54 = vadd.f32 %v6375_v30, %v6374_v37 }
 0x7f3   : > { %v14622_v27 = vpop.f32.mrb[84].mxu0 }
 0x7f4   : > { %v6109_v9 = vpop.f32.mrb[85].mxu0  ;;  %v18691_v15 = vadd.f32 %v14622_v27, %v18561_v31 }
 0x7f5   : > { %v18694_v8 = vadd.f32 %v18561_v31, %v6109_v9  ;;  %v14623_v18 = vpop.f32.mrb[86].mxu0 }
 0x7f6   : > { %v6112_v34 = vpop.f32.mrb[87].mxu0  ;;  %v18702_v62 = vadd.f32 %v14623_v18, %v18561_v31  ;;  %v6332_v36 = vmul.f32 %v18691_v15, %v18691_v15  ;;  %v6279_v21 = vsel %vm19883_vm3, %v18691_v15, 0.0 }
 0x7f7   : > { %v6275_v6 = vsel %vm19883_vm3, %v18694_v8, 0.0  ;;  %v6330_v38 = vmul.f32 %v18694_v8, %v18694_v8  ;;  %v18705_v46 = vadd.f32 %v18561_v31, %v6112_v34 }
 0x7f8   : > { %v6276_v60 = vadd.f32 %v6275_v6, %v6274_v50  ;;  %v6333_v55 = vmul.f32 %v18702_v62, %v18702_v62  ;;  %v6381_v48 = vsel %vm19883_vm3, %v6332_v36, 0.0  ;;  %v6281_v33 = vsel %vm19883_vm3, %v18702_v62, 0.0 }
 0x7f9   : > { %v6377_v35 = vsel %vm19883_vm3, %v6330_v38, 0.0  ;;  %v6277_v19 = vsel %vm19883_vm3, %v18705_v46, 0.0  ;;  %v6331_v45 = vmul.f32 %v18705_v46, %v18705_v46 }
 0x7fa   : > { %v6378_v26 = vadd.f32 %v6377_v35, %v6376_v54  ;;  %v6278_v28 = vadd.f32 %v6277_v19, %v6276_v60  ;;  %v6383_v56 = vsel %vm19883_vm3, %v6333_v55, 0.0 }
 0x7fb   : > { %v6379_v5 = vsel %vm19883_vm3, %v6331_v45, 0.0  ;;  %v15933_v45 = vld [vmem:[#allocation8 + $0x4] ss:$8 sps:$4 sm:$0xff]  }
 0x7fc   : > { %v6280_v53 = vadd.f32 %v6279_v21, %v6278_v28  ;;  %v6380_v13 = vadd.f32 %v6379_v5, %v6378_v26  ;;  %6677 = vmatprep.mubr.bf16.mxu1 %v15933_v45  ;;  %v15936_v5 = vld [vmem:[#allocation8 + $0x104] ss:$8 sps:$4 sm:$0xff]  }
 0x7fd   : > { %7540 = vmatprep.mubr.bf16.mxu0 %v15936_v5 }
 0x7fe   : > { %v6382_v58 = vadd.f32 %v6381_v48, %v6380_v13  ;;  %v6282_v2 = vadd.f32 %v6281_v33, %v6280_v53 }
 0x800   : > { %v6384_v16 = vadd.f32 %v6383_v56, %v6382_v58 }
 0x803   : > { %v14626_v52 = vpop.f32.mrb[88].mxu0 }
 0x804   : > { %v6125_v29 = vpop.f32.mrb[89].mxu0  ;;  %v18724_v43 = vadd.f32 %v14626_v52, %v18561_v31 }
 0x805   : > { %v18727_v41 = vadd.f32 %v18561_v31, %v6125_v29  ;;  %v14627_v42 = vpop.f32.mrb[90].mxu0 }
 0x806   : > { %v6128_v63 = vpop.f32.mrb[91].mxu0  ;;  %v18734_v23 = vadd.f32 %v14627_v42, %v18561_v31  ;;  %v6336_v12 = vmul.f32 %v18724_v43, %v18724_v43  ;;  %v6287_v32 = vsel %vm19883_vm3, %v18724_v43, 0.0 }
 0x807   : > { %v6283_v51 = vsel %vm19883_vm3, %v18727_v41, 0.0  ;;  %v6334_v4 = vmul.f32 %v18727_v41, %v18727_v41  ;;  %v18737_v20 = vadd.f32 %v18561_v31, %v6128_v63 }
 0x808   : > { %v6284_v0 = vadd.f32 %v6283_v51, %v6282_v2  ;;  %v6337_v18 = vmul.f32 %v18734_v23, %v18734_v23  ;;  %v6389_v6 = vsel %vm19883_vm3, %v6336_v12, 0.0  ;;  %v6289_v38 = vsel %vm19883_vm3, %v18734_v23, 0.0 }
 0x809   : > { %v6385_v24 = vsel %vm19883_vm3, %v6334_v4, 0.0  ;;  %v6285_v61 = vsel %vm19883_vm3, %v18737_v20, 0.0  ;;  %v6335_v27 = vmul.f32 %v18737_v20, %v18737_v20 }
 0x80a   : > { %v6386_v37 = vadd.f32 %v6385_v24, %v6384_v16  ;;  %v6286_v9 = vadd.f32 %v6285_v61, %v6284_v0  ;;  %v6391_v36 = vsel %vm19883_vm3, %v6337_v18, 0.0 }
 0x80b   : > { %v6387_v30 = vsel %vm19883_vm3, %v6335_v27, 0.0 }
 0x80c   : > { %v6288_v50 = vadd.f32 %v6287_v32, %v6286_v9  ;;  %v6388_v34 = vadd.f32 %v6387_v30, %v6386_v37 }
 0x80e   : > { %v6390_v60 = vadd.f32 %v6389_v6, %v6388_v34  ;;  %v6290_v54 = vadd.f32 %v6289_v38, %v6288_v50 }
 0x810   : > { %v6392_v35 = vadd.f32 %v6391_v36, %v6390_v60 }
 0x813   : > { %v14630_v19 = vpop.f32.mrb[92].mxu0 }
 0x814   : > { %v6141_v26 = vpop.f32.mrb[93].mxu0  ;;  %v18756_v28 = vadd.f32 %v14630_v19, %v18561_v31 }
 0x815   : > { %v18759_v21 = vadd.f32 %v18561_v31, %v6141_v26  ;;  %v14631_v55 = vpop.f32.mrb[94].mxu0 }
 0x816   : > { %v6144_v53 = vpop.f32.mrb[95].mxu0  ;;  %v18766_v33 = vadd.f32 %v14631_v55, %v18561_v31  ;;  %v6340_v56 = vmul.f32 %v18756_v28, %v18756_v28  ;;  %v6295_v51 = vsel %vm19883_vm3, %v18756_v28, 0.0 }
 0x817   : > { %v6291_v13 = vsel %vm19883_vm3, %v18759_v21, 0.0  ;;  %v6338_v48 = vmul.f32 %v18759_v21, %v18759_v21  ;;  %v18769_v58 = vadd.f32 %v18561_v31, %v6144_v53 }
 0x818   : > { %v6292_v2 = vadd.f32 %v6291_v13, %v6290_v54  ;;  %v6341_v4 = vmul.f32 %v18766_v33, %v18766_v33  ;;  %v6397_v61 = vsel %vm19883_vm3, %v6340_v56, 0.0  ;;  %v6297_v27 = vsel %vm19883_vm3, %v18766_v33, 0.0 }
 0x819   : > { %v6393_v16 = vsel %vm19883_vm3, %v6338_v48, 0.0  ;;  %v6293_v52 = vsel %vm19883_vm3, %v18769_v58, 0.0  ;;  %v6339_v29 = vmul.f32 %v18769_v58, %v18769_v58 }
 0x81a   : > { %v6394_v42 = vadd.f32 %v6393_v16, %v6392_v35  ;;  %v6294_v63 = vadd.f32 %v6293_v52, %v6292_v2  ;;  %v6399_v32 = vsel %vm19883_vm3, %v6341_v4, 0.0 }
 0x81b   : > { %v6395_v0 = vsel %vm19883_vm3, %v6339_v29, 0.0 }
 0x81c   : > { %v6296_v12 = vadd.f32 %v6295_v51, %v6294_v63  ;;  %v6396_v24 = vadd.f32 %v6395_v0, %v6394_v42 }
 0x81e   : > { %v6398_v37 = vadd.f32 %v6397_v61, %v6396_v24  ;;  %v6298_v9 = vadd.f32 %v6297_v27, %v6296_v12 }
 0x820   : > { %v6400_v18 = vadd.f32 %v6399_v32, %v6398_v37 }
 0x823   : > { %v14634_v30 = vpop.f32.mrb[96].mxu0 }
 0x824   : > { %v6157_v50 = vpop.f32.mrb[97].mxu0  ;;  %v18788_v34 = vadd.f32 %v14634_v30, %v18561_v31 }
 0x825   : > { %v18791_v6 = vadd.f32 %v18561_v31, %v6157_v50  ;;  %v14635_v38 = vpop.f32.mrb[98].mxu0 }
 0x826   : > { %v6160_v60 = vpop.f32.mrb[99].mxu0  ;;  %v18798_v35 = vadd.f32 %v14635_v38, %v18561_v31  ;;  %v6344_v26 = vmul.f32 %v18788_v34, %v18788_v34  ;;  %v6303_v2 = vsel %vm19883_vm3, %v18788_v34, 0.0 }
 0x827   : > { %v6299_v54 = vsel %vm19883_vm3, %v18791_v6, 0.0  ;;  %v6342_v36 = vmul.f32 %v18791_v6, %v18791_v6  ;;  %v18801_v19 = vadd.f32 %v18561_v31, %v6160_v60 }
 0x828   : > { %v6300_v45 = vadd.f32 %v6299_v54, %v6298_v9  ;;  %v6345_v31 = vmul.f32 %v18798_v35, %v18798_v35  ;;  %v6405_v29 = vsel %vm19883_vm3, %v6344_v26, 0.0  ;;  %v6305_v42 = vsel %vm19883_vm3, %v18798_v35, 0.0 }
 0x829   : > { %v6401_v55 = vsel %vm19883_vm3, %v6342_v36, 0.0  ;;  %v6301_v5 = vsel %vm19883_vm3, %v18801_v19, 0.0  ;;  %v6343_v53 = vmul.f32 %v18801_v19, %v18801_v19 }
 0x82a   : > { %v6402_v13 = vadd.f32 %v6401_v55, %v6400_v18  ;;  %v6302_v48 = vadd.f32 %v6301_v5, %v6300_v45  ;;  %v6407_v4 = vsel %vm19883_vm3, %v6345_v31, 0.0 }
 0x82b   : > { %v6403_v56 = vsel %vm19883_vm3, %v6343_v53, 0.0 }
 0x82c   : > { %v6304_v16 = vadd.f32 %v6303_v2, %v6302_v48  ;;  %v6404_v52 = vadd.f32 %v6403_v56, %v6402_v13 }
 0x82e   : > { %v6306_v63 = vadd.f32 %v6305_v42, %v6304_v16  ;;  %v6406_v51 = vadd.f32 %v6405_v29, %v6404_v52 }
 0x830   : > { %v6307_v0 = vrot.slane %v6306_v63, 4  ;;  %v6408_v12 = vadd.f32 %v6407_v4, %v6406_v51 }
 0x832   : > { %v6308_v24 = vadd.f32 %v6307_v0, %v6306_v63  ;;  %v6409_v61 = vrot.slane %v6408_v12, 4 }
 0x834   : > { %v6309_v27 = vrot.slane %v6308_v24, 2  ;;  %v6410_v37 = vadd.f32 %v6409_v61, %v6408_v12 }
 0x836   : > { %v6310_v9 = vadd.f32 %v6309_v27, %v6308_v24  ;;  %v6411_v32 = vrot.slane %v6410_v37, 2 }
 0x838   : > { %v6311_v18 = vrot.slane %v6310_v9, 1  ;;  %v6412_v30 = vadd.f32 %v6411_v32, %v6410_v37 }
 0x83a   : > { %v6312_v50 = vadd.f32 %v6311_v18, %v6310_v9  ;;  %v6413_v38 = vrot.slane %v6412_v30, 1 }
 0x83c   : > { %v18819_v60 = vmul.f32 0.00390625, %v6312_v50  ;;  %v6414_v54 = vadd.f32 %v6413_v38, %v6412_v30 }
 0x83e   : > { %v6415_v36 = vmul.f32 0.00390625, %v6414_v54  ;;  %v6416_v45 = vmul.f32 %v18819_v60, %v18819_v60  ;;  %v6447_v26 = vsub.f32 %v18791_v6, %v18819_v60  ;;  %v6448_v55 = vsub.f32 %v18801_v19, %v18819_v60 }
 0x83f   : > { %v6435_v13 = vsub.f32 %v18694_v8, %v18819_v60  ;;  %v6436_v48 = vsub.f32 %v18705_v46, %v18819_v60  ;;  %v6437_v31 = vsub.f32 %v18691_v15, %v18819_v60  ;;  %v6438_v56 = vsub.f32 %v18702_v62, %v18819_v60 }
 0x840   : > { %v6417_v5 = vsub.f32 %v6415_v36, %v6416_v45  ;;  %v6439_v6 = vsub.f32 %v18727_v41, %v18819_v60  ;;  %v6440_v19 = vsub.f32 %v18737_v20, %v18819_v60  ;;  %v6441_v16 = vsub.f32 %v18724_v43, %v18819_v60 }
 0x841   : > { %v6442_v8 = vsub.f32 %v18734_v23, %v18819_v60  ;;  %v6443_v46 = vsub.f32 %v18759_v21, %v18819_v60  ;;  %v6444_v15 = vsub.f32 %v18769_v58, %v18819_v60  ;;  %v6445_v62 = vsub.f32 %v18756_v28, %v18819_v60 }
 0x842   : > { %v6418_v53 = vmax.f32 %v6417_v5, 0.0  ;;  %v6446_v41 = vsub.f32 %v18766_v33, %v18819_v60  ;;  %v6449_v20 = vsub.f32 %v18788_v34, %v18819_v60  ;;  %v6450_v43 = vsub.f32 %v18798_v35, %v18819_v60 }
 0x843   : > { %v6419_v23 = vsub.f32 %v18567_v7, %v18819_v60  ;;  %v6420_v21 = vsub.f32 %v18564_v40, %v18819_v60  ;;  %v6421_v58 = vsub.f32 %v18572_v49, %v18819_v60  ;;  %v6422_v28 = vsub.f32 %v18585_v25, %v18819_v60 }
 0x844   : > { %v6451_v2 = vadd.f32 1e-05, %v6418_v53  ;;  %v6423_v33 = vsub.f32 %v18588_v11, %v18819_v60  ;;  %v6424_v34 = vsub.f32 %v18598_v1, %v18819_v60  ;;  %v6425_v35 = vsub.f32 %v18609_v10, %v18819_v60 }
 0x845   : > { %v6426_v7 = vsub.f32 %v18617_v17, %v18819_v60  ;;  %v6427_v40 = vsub.f32 %v18622_v59, %v18819_v60  ;;  %v6428_v49 = vsub.f32 %v18630_v39, %v18819_v60  ;;  %v6429_v25 = vsub.f32 %v18641_v44, %v18819_v60 }
 0x846   : > { %16319 = vrsqrt.f32 %v6451_v2  ;;  %v6430_v11 = vsub.f32 %v18649_v3, %v18819_v60  ;;  %v6431_v1 = vsub.f32 %v18657_v22, %v18819_v60  ;;  %v6432_v10 = vsub.f32 %v18666_v14, %v18819_v60 }
 0x847   : > { %v6433_v17 = vsub.f32 %v18673_v57, %v18819_v60  ;;  %v6434_v59 = vsub.f32 %v18679_v47, %v18819_v60 }
 0x850   : > { %v16320_v52 = vpop.eup %16319 }
 0x851   : > { %v6481_v39 = vmul.f32 %v16320_v52, %v6447_v26  ;;  %v6482_v29 = vmul.f32 %v16320_v52, %v6448_v55  ;;  %v18887_v42 = vmul.f32 %v16320_v52, %v6419_v23  ;;  %v18889_v44 = vmul.f32 %v16320_v52, %v6420_v21 }
 0x852   : > { %v18891_v3 = vmul.f32 %v16320_v52, %v6421_v58  ;;  %v18893_v63 = vmul.f32 %v16320_v52, %v6422_v28  ;;  %v18895_v22 = vmul.f32 %v16320_v52, %v6423_v33  ;;  %v18897_v51 = vmul.f32 %v16320_v52, %v6424_v34 }
 0x853   : > { %vm6513_vm4 = vcmp.ge.f32.partialorder %v6481_v39, 0.0  ;;  %vm6514_vm5 = vcmp.ge.f32.partialorder %v6482_v29, 0.0  ;;  %v6545_v14 = vmul.f32 0.2, %v6481_v39  ;;  %v6546_v57 = vmul.f32 0.2, %v6482_v29 }
 0x854   : > { %v18899_v4 = vmul.f32 %v16320_v52, %v6425_v35  ;;  %v18901_v47 = vmul.f32 %v16320_v52, %v6426_v7  ;;  %v18903_v0 = vmul.f32 %v16320_v52, %v6427_v40  ;;  %v18905_v12 = vmul.f32 %v16320_v52, %v6428_v49 }
 0x855   : > { %v6577_v24 = vsel %vm6513_vm4, %v6481_v39, %v6545_v14  ;;  %v6578_v61 = vsel %vm6514_vm5, %v6482_v29, %v6546_v57  ;;  %v18907_v27 = vmul.f32 %v16320_v52, %v6429_v25  ;;  %v18909_v37 = vmul.f32 %v16320_v52, %v6430_v11 }
 0x856   : > { %v18911_v9 = vpack.c.bf16 %v6578_v61, %v6577_v24  ;;  %v18913_v32 = vmul.f32 %v16320_v52, %v6431_v1  ;;  %v18915_v18 = vmul.f32 %v16320_v52, %v6432_v10  ;;  %v18917_v30 = vmul.f32 %v16320_v52, %v6433_v17 }
 0x857   : > { %v18919_v50 = vmul.f32 %v16320_v52, %v6434_v59  ;;  %v18921_v38 = vmul.f32 %v16320_v52, %v6435_v13  ;;  %v18923_v60 = vmul.f32 %v16320_v52, %v6436_v48  ;;  %v18925_v54 = vmul.f32 %v16320_v52, %v6437_v31 }
 0x858   : > { %v18927_v36 = vmul.f32 %v16320_v52, %v6438_v56  ;;  %v18929_v45 = vmul.f32 %v16320_v52, %v6439_v6  ;;  %v18931_v26 = vmul.f32 %v16320_v52, %v6440_v19  ;;  %v18933_v55 = vmul.f32 %v16320_v52, %v6441_v16 }
 0x859   : > { %v18935_v5 = vmul.f32 %v16320_v52, %v6442_v8  ;;  %v18937_v53 = vmul.f32 %v16320_v52, %v6443_v46  ;;  %v18939_v2 = vmul.f32 %v16320_v52, %v6444_v15  ;;  %v18941_v13 = vmul.f32 %v16320_v52, %v6445_v62 }
 0x85a   : > { %v18943_v48 = vmul.f32 %v16320_v52, %v6446_v41  ;;  %v18945_v31 = vmul.f32 %v16320_v52, %v6449_v20  ;;  %v18947_v56 = vmul.f32 %v16320_v52, %v6450_v43  ;;  %vm6485_vm6 = vcmp.ge.f32.partialorder %v18887_v42, 0.0 }
 0x85b   : > { %vm6486_vm7 = vcmp.ge.f32.partialorder %v18889_v44, 0.0  ;;  %vm6487_vm8 = vcmp.ge.f32.partialorder %v18891_v3, 0.0  ;;  %vm6488_vm9 = vcmp.ge.f32.partialorder %v18893_v63, 0.0  ;;  %vm6489_vm10 = vcmp.ge.f32.partialorder %v18895_v22, 0.0 }
 0x85c   : > { %vm6490_vm11 = vcmp.ge.f32.partialorder %v18897_v51, 0.0  ;;  %vm6491_vm12 = vcmp.ge.f32.partialorder %v18899_v4, 0.0  ;;  %vm6492_vm13 = vcmp.ge.f32.partialorder %v18901_v47, 0.0  ;;  %vm6496_vm1 = vcmp.ge.f32.partialorder %v18909_v37, 0.0 }
 0x85d   : > { %v6517_v6 = vmul.f32 0.2, %v18887_v42  ;;  %v6518_v19 = vmul.f32 0.2, %v18889_v44  ;;  %vm6501_vm14 = vcmp.ge.f32.partialorder %v18921_v38, 0.0  ;;  %vm6502_vm15 = vcmp.ge.f32.partialorder %v18923_v60, 0.0 }
 0x85e   : > { %v6519_v16 = vmul.f32 0.2, %v18891_v3  ;;  %v6520_v8 = vmul.f32 0.2, %v18893_v63  ;;  %v6521_v46 = vmul.f32 0.2, %v18895_v22 }
 0x85f   : > { %vm6507_vm3 = vcmp.ge.f32.partialorder %v18933_v55, 0.0  ;;  %v6522_v15 = vmul.f32 0.2, %v18897_v51  ;;  %v6523_v62 = vmul.f32 0.2, %v18899_v4  ;;  %v6549_v20 = vsel %vm6485_vm6, %v18887_v42, %v6517_v6 }
 0x860   : > { %v6524_v41 = vmul.f32 0.2, %v18901_v47  ;;  %vm6510_vm4 = vcmp.ge.f32.partialorder %v18939_v2, 0.0  ;;  %vm6511_vm2 = vcmp.ge.f32.partialorder %v18941_v13, 0.0  ;;  %v6525_v43 = vmul.f32 0.2, %v18903_v0 }
 0x861   : > { %v6526_v23 = vmul.f32 0.2, %v18905_v12  ;;  %v6527_v21 = vmul.f32 0.2, %v18907_v27  ;;  %v6550_v58 = vsel %vm6486_vm7, %v18889_v44, %v6518_v19  ;;  %vm6512_vm6 = vcmp.ge.f32.partialorder %v18943_v48, 0.0 }
 0x862   : > { %vm6515_vm0 = vcmp.ge.f32.partialorder %v18945_v31, 0.0  ;;  %vm6516_vm5 = vcmp.ge.f32.partialorder %v18947_v56, 0.0  ;;  %v6528_v28 = vmul.f32 0.2, %v18909_v37  ;;  %v6529_v33 = vmul.f32 0.2, %v18913_v32 }
 0x863   : > { %v6530_v34 = vmul.f32 0.2, %v18915_v18  ;;  %v6551_v35 = vsel %vm6487_vm8, %v18891_v3, %v6519_v16  ;;  %v6531_v7 = vmul.f32 0.2, %v18917_v30  ;;  %v6532_v40 = vmul.f32 0.2, %v18919_v50 }
 0x864   : > { %v6533_v49 = vmul.f32 0.2, %v18921_v38  ;;  %v6552_v25 = vsel %vm6488_vm9, %v18893_v63, %v6520_v8  ;;  %v6534_v11 = vmul.f32 0.2, %v18923_v60  ;;  %v6535_v52 = vmul.f32 0.2, %v18925_v54 }
 0x865   : > { %v6536_v1 = vmul.f32 0.2, %v18927_v36  ;;  %v6553_v10 = vsel %vm6489_vm10, %v18895_v22, %v6521_v46  ;;  %v6537_v17 = vmul.f32 0.2, %v18929_v45  ;;  %v6538_v59 = vmul.f32 0.2, %v18931_v26 }
 0x866   : > { %v6539_v39 = vmul.f32 0.2, %v18933_v55  ;;  %v6554_v29 = vsel %vm6490_vm11, %v18897_v51, %v6522_v15  ;;  %v6540_v42 = vmul.f32 0.2, %v18935_v5  ;;  %v6541_v44 = vmul.f32 0.2, %v18937_v53 }
 0x867   : > { %v6542_v3 = vmul.f32 0.2, %v18939_v2  ;;  %v6555_v63 = vsel %vm6491_vm12, %v18899_v4, %v6523_v62  ;;  %v6543_v22 = vmul.f32 0.2, %v18941_v13  ;;  %v6544_v14 = vmul.f32 0.2, %v18943_v48 }
 0x868   : > { %v6547_v57 = vmul.f32 0.2, %v18945_v31  ;;  %v6556_v51 = vsel %vm6492_vm13, %v18901_v47, %v6524_v41  ;;  %v6548_v24 = vmul.f32 0.2, %v18947_v56  ;;  %vm20165_vm7 = vcmp.ge.f32.partialorder %v18903_v0, 0.0 }
 0x869   : > { %v6557_v61 = vsel %vm20165_vm7, %v18903_v0, %v6525_v43  ;;  %vm20166_vm8 = vcmp.ge.f32.partialorder %v18905_v12, 0.0  ;;  %vm20167_vm9 = vcmp.ge.f32.partialorder %v18907_v27, 0.0  ;;  %v6560_v19 = vsel %vm6496_vm1, %v18909_v37, %v6528_v28  ;;  %v15934_v28 = vld [vmem:[#allocation8 + $0x100] ss:$8 sps:$4 sm:$0xff]  }
 0x86a   : > { %v6558_v4 = vsel %vm20166_vm8, %v18905_v12, %v6526_v23  ;;  %v6559_v6 = vsel %vm20167_vm9, %v18907_v27, %v6527_v21  ;;  %vm20168_vm10 = vcmp.ge.f32.partialorder %v18913_v32, 0.0  ;;  %vm20169_vm11 = vcmp.ge.f32.partialorder %v18915_v18, 0.0 }
 0x86b   : > { %v6561_v47 = vsel %vm20168_vm10, %v18913_v32, %v6529_v33  ;;  %v6562_v0 = vsel %vm20169_vm11, %v18915_v18, %v6530_v34  ;;  %vm20170_vm12 = vcmp.ge.f32.partialorder %v18917_v30, 0.0  ;;  %vm20171_vm13 = vcmp.ge.f32.partialorder %v18919_v50, 0.0  ;;  %v15939_v33 = vld [vmem:[#allocation8 + $0x14] ss:$8 sps:$4 sm:$0xff]  }
 0x86c   : > { %v6563_v12 = vsel %vm20170_vm12, %v18917_v30, %v6531_v7  ;;  %v6564_v27 = vsel %vm20171_vm13, %v18919_v50, %v6532_v40  ;;  %v6565_v37 = vsel %vm6501_vm14, %v18921_v38, %v6533_v49  ;;  %v6566_v32 = vsel %vm6502_vm15, %v18923_v60, %v6534_v11  ;;  %v15940_v34 = vld [vmem:[#allocation8 + $0x114] ss:$8 sps:$4 sm:$0xff]   ;;  %v15942_v7 = vld [vmem:[#allocation8 + $0x110] ss:$8 sps:$4 sm:$0xff]   ;;  %v15945_v40 = vld [vmem:[#allocation8 + $0x24] ss:$8 sps:$4 sm:$0xff]  }
 0x86d   : > { %vm20172_vm1 = vcmp.ge.f32.partialorder %v18925_v54, 0.0  ;;  %vm20173_vm7 = vcmp.ge.f32.partialorder %v18927_v36, 0.0  ;;  %vm20174_vm8 = vcmp.ge.f32.partialorder %v18929_v45, 0.0  ;;  %vm20175_vm9 = vcmp.ge.f32.partialorder %v18931_v26, 0.0  ;;  %v15946_v49 = vld [vmem:[#allocation8 + $0x124] ss:$8 sps:$4 sm:$0xff]  }
 0x86e   : > { %v6567_v18 = vsel %vm20172_vm1, %v18925_v54, %v6535_v52  ;;  %v6568_v30 = vsel %vm20173_vm7, %v18927_v36, %v6536_v1  ;;  %v6569_v50 = vsel %vm20174_vm8, %v18929_v45, %v6537_v17  ;;  %v6570_v38 = vsel %vm20175_vm9, %v18931_v26, %v6538_v59  ;;  %v15948_v11 = vld [vmem:[#allocation8 + $0x120] ss:$8 sps:$4 sm:$0xff]   ;;  %v15951_v52 = vld [vmem:[#allocation8 + $0x34] ss:$8 sps:$4 sm:$0xff]   ;;  %v15954_v17 = vld [vmem:[#allocation8 + $0x130] ss:$8 sps:$4 sm:$0xff]  }
 0x86f   : > { %v6571_v60 = vsel %vm6507_vm3, %v18933_v55, %v6539_v39  ;;  %vm20176_vm14 = vcmp.ge.f32.partialorder %v18935_v5, 0.0  ;;  %vm20177_vm15 = vcmp.ge.f32.partialorder %v18937_v53, 0.0  ;;  %v6574_v45 = vsel %vm6510_vm4, %v18939_v2, %v6542_v3  ;;  %v15952_v1 = vld [vmem:[#allocation8 + $0x134] ss:$8 sps:$4 sm:$0xff]   ;;  %v15957_v59 = vld [vmem:[#allocation8 + $0x44] ss:$8 sps:$4 sm:$0xff]  }
 0x870   : > { %v6572_v54 = vsel %vm20176_vm14, %v18935_v5, %v6540_v42  ;;  %v6573_v36 = vsel %vm20177_vm15, %v18937_v53, %v6541_v44  ;;  %v6575_v26 = vsel %vm6511_vm2, %v18941_v13, %v6543_v22  ;;  %v6576_v55 = vsel %vm6512_vm6, %v18943_v48, %v6544_v14  ;;  %v15960_v39 = vld [vmem:[#allocation8 + $0x144] ss:$8 sps:$4 sm:$0xff]   ;;  %v15958_v42 = vld [vmem:[#allocation8 + $0x140] ss:$8 sps:$4 sm:$0xff]   ;;  %v15963_v44 = vld [vmem:[#allocation8 + $0x54] ss:$8 sps:$4 sm:$0xff]  }
 0x871   : > { %v6579_v5 = vsel %vm6515_vm0, %v18945_v31, %v6547_v57  ;;  %v6580_v53 = vsel %vm6516_vm5, %v18947_v56, %v6548_v24  ;;  %v19099_v16 = vpack.c.bf16 %v6550_v58, %v6549_v20  ;;  %v19101_v8 = vpack.c.bf16 %v6552_v25, %v6551_v35  ;;  %v15931_v58 = vld [vmem:[#allocation8] ss:$8 sps:$4 sm:$0xff]   ;;  %v15937_v35 = vld [vmem:[#allocation8 + $0x10] ss:$8 sps:$4 sm:$0xff]   ;;  %v15964_v3 = vld [vmem:[#allocation8 + $0x154] ss:$8 sps:$4 sm:$0xff]  }
 0x872   : > { %v19103_v2 = vpack.c.bf16 %v6554_v29, %v6553_v10  ;;  %v19105_v46 = vpack.c.bf16 %v6556_v51, %v6555_v63  ;;  %v19107_v13 = vpack.c.bf16 %v6558_v4, %v6557_v61  ;;  %v19109_v15 = vpack.c.bf16 %v6560_v19, %v6559_v6  ;;  %v15943_v25 = vld [vmem:[#allocation8 + $0x20] ss:$8 sps:$4 sm:$0xff]   ;;  %v15949_v10 = vld [vmem:[#allocation8 + $0x30] ss:$8 sps:$4 sm:$0xff]   ;;  %v15969_v14 = vld [vmem:[#allocation8 + $0x64] ss:$8 sps:$4 sm:$0xff]  }
 0x873   : > { %v19111_v48 = vpack.c.bf16 %v6562_v0, %v6561_v47  ;;  %v19113_v62 = vpack.c.bf16 %v6564_v27, %v6563_v12  ;;  %v19115_v31 = vpack.c.bf16 %v6566_v32, %v6565_v37  ;;  %v19117_v41 = vpack.c.bf16 %v6568_v30, %v6567_v18  ;;  %v15955_v29 = vld [vmem:[#allocation8 + $0x40] ss:$8 sps:$4 sm:$0xff]   ;;  %v15961_v63 = vld [vmem:[#allocation8 + $0x50] ss:$8 sps:$4 sm:$0xff]   ;;  %v15970_v57 = vld [vmem:[#allocation8 + $0x164] ss:$8 sps:$4 sm:$0xff]  }
 0x874   : > { %v19119_v56 = vpack.c.bf16 %v6570_v38, %v6569_v50  ;;  %v19121_v20 = vpack.c.bf16 %v6572_v54, %v6571_v60  ;;  %v19123_v43 = vpack.c.bf16 %v6574_v45, %v6573_v36  ;;  %v19125_v23 = vpack.c.bf16 %v6576_v55, %v6575_v26  ;;  %v15966_v22 = vld [vmem:[#allocation8 + $0x150] ss:$8 sps:$4 sm:$0xff]   ;;  %v15967_v51 = vld [vmem:[#allocation8 + $0x60] ss:$8 sps:$4 sm:$0xff]   ;;  %v15975_v61 = vld [vmem:[#allocation8 + $0x74] ss:$8 sps:$4 sm:$0xff]  }
 0x875   : > { %20178 = vst [vmem:[#allocation48_spill] sm:$0xff] %v19113_v62  ;;  %v19127_v21 = vpack.c.bf16 %v6580_v53, %v6579_v5  ;;  %13808 = vmatprep.subr.bf16.mxu1 %v19115_v31  ;;  %13992 = vmatprep.subr.bf16.mxu0 %v19115_v31  ;;  %v15972_v24 = vld [vmem:[#allocation8 + $0x160] ss:$8 sps:$4 sm:$0xff]   ;;  %v15978_v4 = vld [vmem:[#allocation8 + $0x174] ss:$8 sps:$4 sm:$0xff]   ;;  %vm20180_vm3 = vcmask 261120  }
 0x876   : > { %13809 = vmatpush3.bf16.msra.mxu1 %v19099_v16  ;;  %13993 = vmatpush3.bf16.msra.mxu0 %v19099_v16  ;;  %v15973_v6 = vld [vmem:[#allocation8 + $0x70] ss:$8 sps:$4 sm:$0xff]   ;;  %v15981_v47 = vld [vmem:[#allocation8 + $0x184] ss:$8 sps:$4 sm:$0xff]   ;;  %v15979_v0 = vld [vmem:[#allocation8 + $0x180] ss:$8 sps:$4 sm:$0xff]  }
 0x877   : > { %20179 = vst [vmem:[#allocation49_spill] sm:$0xff] %v19127_v21  ;;  %13810 = vmatprep.subr.bf16.mxu1 %v19117_v41  ;;  %13994 = vmatprep.subr.bf16.mxu0 %v19117_v41  ;;  %v15976_v19 = vld [vmem:[#allocation8 + $0x170] ss:$8 sps:$4 sm:$0xff]   ;;  %v15984_v37 = vld [vmem:[#allocation10] sm:$0xff]   ;;  %vm20181_vm0 = vmmov %vm20180_vm3 }
 0x878   : > { %v15982_v12 = vld [vmem:[#allocation10 + $0x10] sm:$0xff]   ;;  %v15983_v27 = vld [vmem:[#allocation10 + $0x18] sm:$0xff]   ;;  %vm20182_vm2 = vmmov %vm20181_vm0 }
 0x879   : > { %vm20183_vm4 = vmmov %vm20181_vm0 }
 0x87a   : > { %13811 = vmatpush3.bf16.msra.mxu1 %v19101_v8  ;;  %13995 = vmatpush3.bf16.msra.mxu0 %v19101_v8  ;;  %vm20184_vm5 = vmmov %vm20181_vm0 }
 0x87b   : > { %13812 = vmatprep.subr.bf16.mxu1 %v19119_v56  ;;  %13996 = vmatprep.subr.bf16.mxu0 %v19119_v56  ;;  %vm20185_vm6 = vmmov %vm20181_vm0 }
 0x87c   : > { %vm20186_vm10 = vmmov %vm20181_vm0 }
 0x87d   : > { %vm20187_vm11 = vmmov %vm20181_vm0 }
 0x87e   : > { %13813 = vmatpush3.bf16.msra.mxu1 %v19103_v2  ;;  %13997 = vmatpush3.bf16.msra.mxu0 %v19103_v2  ;;  %vm20188_vm12 = vmmov %vm20181_vm0 }
 0x87f   : > { %13814 = vmatprep.subr.bf16.mxu1 %v19121_v20  ;;  %13998 = vmatprep.subr.bf16.mxu0 %v19121_v20  ;;  %vm20189_vm13 = vmmov %vm20181_vm0 }
 0x880   : > { %vm20190_vm1 = vmmov %vm20181_vm0 }
 0x881   : > { %vm20191_vm7 = vmmov %vm20181_vm0 }
 0x882   : > { %13815 = vmatpush3.bf16.msra.mxu1 %v19105_v46  ;;  %13999 = vmatpush3.bf16.msra.mxu0 %v19105_v46  ;;  %vm20192_vm8 = vmmov %vm20181_vm0 }
 0x883   : > { %13816 = vmatprep.subr.bf16.mxu1 %v19123_v43  ;;  %14000 = vmatprep.subr.bf16.mxu0 %v19123_v43  ;;  %vm20193_vm9 = vmmov %vm20181_vm0 }
 0x884   : > { %vm20194_vm14 = vmmov %vm20181_vm0 }
 0x885   : > { %vm20195_vm15 = vmmov %vm20181_vm0 }
 0x886   : > { %13817 = vmatpush3.bf16.msra.mxu1 %v19107_v13  ;;  %14001 = vmatpush3.bf16.msra.mxu0 %v19107_v13 }
 0x887   : > { %13818 = vmatprep.subr.bf16.mxu1 %v19125_v23  ;;  %14002 = vmatprep.subr.bf16.mxu0 %v19125_v23 }
 0x88a   : > { %13819 = vmatpush3.bf16.msra.mxu1 %v19109_v15  ;;  %14003 = vmatpush3.bf16.msra.mxu0 %v19109_v15 }
 0x88b   : > { %13820 = vmatprep.subr.bf16.mxu1 %v18911_v9  ;;  %14004 = vmatprep.subr.bf16.mxu0 %v18911_v9 }
 0x88e   : > { %13821 = vmatpush3.bf16.msra.mxu1 %v19111_v48  ;;  %14005 = vmatpush3.bf16.msra.mxu0 %v19111_v48 }
 0x88f   : > { %13822 = vmatprep.subr.bf16.mxu1 %v19127_v21  ;;  %14006 = vmatprep.subr.bf16.mxu0 %v19127_v21 }
 0x892   : > { %13823 = vmatpush3.bf16.msra.mxu1 %v19113_v62  ;;  %14007 = vmatpush3.bf16.msra.mxu0 %v19113_v62 }
 0x893   : > { %13848 = vmatprep.subr.bf16.mxu1 %v19115_v31  ;;  %14038 = vmatprep.subr.bf16.mxu0 %v19115_v31 }
 0x895   : > { %6678 = vmatmul.mubr.bf16.vlgmr.msra.gmra.mrb[124].mxu1 %v15931_v58  ;;  %7541 = vmatmul.mubr.bf16.vlgmr.msra.gmra.mrb[228].mxu0 %v15934_v28 }
 0x896   : > { %13849 = vmatpush3.bf16.msra.mxu1 %v19099_v16  ;;  %14039 = vmatpush3.bf16.msra.mxu0 %v19099_v16 }
 0x897   : > { %13850 = vmatprep.subr.bf16.mxu1 %v19117_v41  ;;  %14040 = vmatprep.subr.bf16.mxu0 %v19117_v41 }
 0x898   : > { %6685 = vmatprep.mubr.bf16.mxu1 %v15939_v33  ;;  %7548 = vmatprep.mubr.bf16.mxu0 %v15940_v34 }
 0x89a   : > { %13851 = vmatpush3.bf16.msra.mxu1 %v19101_v8  ;;  %14041 = vmatpush3.bf16.msra.mxu0 %v19101_v8 }
 0x89b   : > { %13852 = vmatprep.subr.bf16.mxu1 %v19119_v56  ;;  %14042 = vmatprep.subr.bf16.mxu0 %v19119_v56 }
 0x89d   : > { %6686 = vmatmul.mubr.bf16.gmra.mrb[128].mxu1 %v15937_v35  ;;  %7549 = vmatmul.mubr.bf16.gmra.mrb[232].mxu0 %v15942_v7 }
 0x89e   : > { %13853 = vmatpush3.bf16.msra.mxu1 %v19103_v2  ;;  %14043 = vmatpush3.bf16.msra.mxu0 %v19103_v2 }
 0x89f   : > { %13854 = vmatprep.subr.bf16.mxu1 %v19121_v20  ;;  %14044 = vmatprep.subr.bf16.mxu0 %v19121_v20 }
 0x8a0   : > { %6693 = vmatprep.mubr.bf16.mxu1 %v15945_v40  ;;  %7556 = vmatprep.mubr.bf16.mxu0 %v15946_v49 }
 0x8a2   : > { %13855 = vmatpush3.bf16.msra.mxu1 %v19105_v46  ;;  %14045 = vmatpush3.bf16.msra.mxu0 %v19105_v46 }
 0x8a3   : > { %13856 = vmatprep.subr.bf16.mxu1 %v19123_v43  ;;  %14046 = vmatprep.subr.bf16.mxu0 %v19123_v43 }
 0x8a5   : > { %6694 = vmatmul.mubr.bf16.gmra.mrb[132].mxu1 %v15943_v25  ;;  %7557 = vmatmul.mubr.bf16.gmra.mrb[236].mxu0 %v15948_v11 }
 0x8a6   : > { %13857 = vmatpush3.bf16.msra.mxu1 %v19107_v13  ;;  %14047 = vmatpush3.bf16.msra.mxu0 %v19107_v13 }
 0x8a7   : > { %13858 = vmatprep.subr.bf16.mxu1 %v19125_v23  ;;  %14048 = vmatprep.subr.bf16.mxu0 %v19125_v23 }
 0x8a8   : > { %6701 = vmatprep.mubr.bf16.mxu1 %v15951_v52  ;;  %7564 = vmatprep.mubr.bf16.mxu0 %v15952_v1 }
 0x8aa   : > { %13859 = vmatpush3.bf16.msra.mxu1 %v19109_v15  ;;  %14049 = vmatpush3.bf16.msra.mxu0 %v19109_v15 }
 0x8ab   : > { %13860 = vmatprep.subr.bf16.mxu1 %v18911_v9  ;;  %14050 = vmatprep.subr.bf16.mxu0 %v18911_v9 }
 0x8ad   : > { %6702 = vmatmul.mubr.bf16.gmra.mrb[136].mxu1 %v15949_v10  ;;  %7565 = vmatmul.mubr.bf16.gmra.mrb[240].mxu0 %v15954_v17 }
 0x8ae   : > { %13861 = vmatpush3.bf16.msra.mxu1 %v19111_v48  ;;  %14051 = vmatpush3.bf16.msra.mxu0 %v19111_v48 }
 0x8af   : > { %13862 = vmatprep.subr.bf16.mxu1 %v19127_v21  ;;  %14052 = vmatprep.subr.bf16.mxu0 %v19127_v21 }
 0x8b0   : > { %6799 = vmatprep.mubr.bf16.mxu1 %v15957_v59  ;;  %7760 = vmatprep.mubr.bf16.mxu0 %v15960_v39 }
 0x8b2   : > { %13863 = vmatpush3.bf16.msra.mxu1 %v19113_v62  ;;  %14053 = vmatpush3.bf16.msra.mxu0 %v19113_v62 }
 0x8b3   : > { %14084 = vmatprep.subr.bf16.mxu0 %v19115_v31  ;;  %14636 = vmatprep.subr.bf16.mxu1 %v15982_v12 }
 0x8b5   : > { %6800 = vmatmul.mubr.bf16.vlgmr.msra.gmra.mrb[140].mxu1 %v15955_v29  ;;  %7761 = vmatmul.mubr.bf16.vlgmr.msra.gmra.mrb[244].mxu0 %v15958_v42 }
 0x8b6   : > { %14085 = vmatpush3.bf16.msra.mxu0 %v19099_v16  ;;  %6807 = vmatprep.mubr.bf16.mxu1 %v15963_v44 }
 0x8b7   : > { %14086 = vmatprep.subr.bf16.mxu0 %v19117_v41  ;;  %7768 = vmatprep.mubr.bf16.mxu0 %v15964_v3 }
 0x8b8   : > { %14637 = vmatpush3.bf16.msra.mxu1 %v15982_v12 }
 0x8b9   : > { %14638 = vmatprep.subr.bf16.mxu1 %v15983_v27 }
 0x8ba   : > { %14087 = vmatpush3.bf16.msra.mxu0 %v19101_v8 }
 0x8bb   : > { %14088 = vmatprep.subr.bf16.mxu0 %v19119_v56 }
 0x8bc   : > { %14639 = vmatpush3.bf16.msra.mxu1 %v15983_v27 }
 0x8bd   : > { %6808 = vmatmul.mubr.bf16.gmra.mrb[144].mxu1 %v15961_v63  ;;  %7769 = vmatmul.mubr.bf16.gmra.mrb[248].mxu0 %v15966_v22 }
 0x8be   : > { %14089 = vmatpush3.bf16.msra.mxu0 %v19103_v2  ;;  %6815 = vmatprep.mubr.bf16.mxu1 %v15969_v14 }
 0x8bf   : > { %14090 = vmatprep.subr.bf16.mxu0 %v19121_v20  ;;  %7776 = vmatprep.mubr.bf16.mxu0 %v15970_v57 }
 0x8c0   : > { %14648 = vmatprep.subr.bf16.mxu1 %v15984_v37 }
 0x8c2   : > { %14091 = vmatpush3.bf16.msra.mxu0 %v19105_v46 }
 0x8c3   : > { %14092 = vmatprep.subr.bf16.mxu0 %v19123_v43 }
 0x8c5   : > { %6816 = vmatmul.mubr.bf16.gmra.mrb[148].mxu1 %v15967_v51  ;;  %7777 = vmatmul.mubr.bf16.gmra.mrb[252].mxu0 %v15972_v24 }
 0x8c6   : > { %14093 = vmatpush3.bf16.msra.mxu0 %v19107_v13  ;;  %6823 = vmatprep.mubr.bf16.mxu1 %v15975_v61 }
 0x8c7   : > { %14094 = vmatprep.subr.bf16.mxu0 %v19125_v23  ;;  %7784 = vmatprep.mubr.bf16.mxu0 %v15978_v4 }
 0x8ca   : > { %14095 = vmatpush3.bf16.msra.mxu0 %v19109_v15 }
 0x8cb   : > { %14096 = vmatprep.subr.bf16.mxu0 %v18911_v9 }
 0x8cd   : > { %6824 = vmatmul.mubr.bf16.gmra.mrb[152].mxu1 %v15973_v6  ;;  %7785 = vmatmul.mubr.bf16.gmra.mrb[0].mxu0 %v15976_v19  ;;  %v15985_v19 = vld [vmem:[#allocation10 + $0x8] sm:$0xff]  }
 0x8ce   : > { %14097 = vmatpush3.bf16.msra.mxu0 %v19111_v48  ;;  %7980 = vmatprep.mubr.bf16.mxu0 %v15981_v47 }
 0x8cf   : > { %14098 = vmatprep.subr.bf16.mxu0 %v19127_v21 }
 0x8d2   : > { %14099 = vmatpush3.bf16.msra.mxu0 %v19113_v62 }
 0x8d3   : > { %14130 = vmatprep.subr.bf16.mxu0 %v19115_v31 }
 0x8d5   : > { %7981 = vmatmul.mubr.bf16.vlgmr.msra.gmra.mrb[4].mxu0 %v15979_v0 }
 0x8d6   : > { %14131 = vmatpush3.bf16.msra.mxu0 %v19099_v16 }
 0x8d7   : > { %14132 = vmatprep.subr.bf16.mxu0 %v19117_v41 }
 0x8da   : > { %14133 = vmatpush3.bf16.msra.mxu0 %v19101_v8 }
 0x8db   : > { %14134 = vmatprep.subr.bf16.mxu0 %v19119_v56 }
 0x8de   : > { %14135 = vmatpush3.bf16.msra.mxu0 %v19103_v2 }
 0x8df   : > { %14136 = vmatprep.subr.bf16.mxu0 %v19121_v20 }
 0x8e2   : > { %14137 = vmatpush3.bf16.msra.mxu0 %v19105_v46 }
 0x8e3   : > { %14138 = vmatprep.subr.bf16.mxu0 %v19123_v43 }
 0x8e6   : > { %14139 = vmatpush3.bf16.msra.mxu0 %v19107_v13 }
 0x8e7   : > { %14140 = vmatprep.subr.bf16.mxu0 %v19125_v23 }
 0x8ea   : > { %14141 = vmatpush3.bf16.msra.mxu0 %v19109_v15 }
 0x8eb   : > { %14142 = vmatprep.subr.bf16.mxu0 %v18911_v9 }
 0x8ee   : > { %14143 = vmatpush3.bf16.msra.mxu0 %v19111_v48 }
 0x8ef   : > { %14144 = vmatprep.subr.bf16.mxu0 %v19127_v21 }
 0x8f2   : > { %14145 = vmatpush3.bf16.msra.mxu0 %v19113_v62 }
 0x968   : > { %v13824_v32 = vpop.f32.mrb[124].mxu1 }
 0x969   : > { %v13825_v18 = vpop.f32.mrb[125].mxu1 }
 0x96a   : > { %v19225_v30 = vadd.f32 %v13825_v18, %v13824_v32  ;;  %v13827_v50 = vpop.f32.mrb[126].mxu1 }
 0x96b   : > { %v13828_v38 = vpop.f32.mrb[127].mxu1 }
 0x96c   : > { %v13829_v60 = vadd.f32 %v13828_v38, %v13827_v50 }
 0x96e   : > { %v6710_v54 = vpack.c.bf16 %v13829_v60, %v19225_v30 }
 0x970   : > { %v13830_v36 = vpop.f32.mrb[128].mxu1 }
 0x971   : > { %v13831_v45 = vpop.f32.mrb[129].mxu1 }
 0x972   : > { %v13832_v26 = vadd.f32 %v13831_v45, %v13830_v36  ;;  %v13833_v55 = vpop.f32.mrb[130].mxu1 }
 0x973   : > { %v13834_v5 = vpop.f32.mrb[131].mxu1 }
 0x974   : > { %v13835_v53 = vadd.f32 %v13834_v5, %v13833_v55  ;;  %v15986_v5 = vld [vmem:[#allocation8 + $0x80] ss:$8 sps:$4 sm:$0xff]  }
 0x976   : > { %v6711_v58 = vpack.c.bf16 %v13835_v53, %v13832_v26  ;;  %v15993_v53 = vld [vmem:[#allocation8 + $0x94] ss:$8 sps:$4 sm:$0xff]  }
 0x978   : > { %v13836_v28 = vpop.f32.mrb[132].mxu1 }
 0x979   : > { %v13837_v33 = vpop.f32.mrb[133].mxu1 }
 0x97a   : > { %v13838_v34 = vadd.f32 %v13837_v33, %v13836_v28  ;;  %v13839_v35 = vpop.f32.mrb[134].mxu1  ;;  %v15991_v28 = vld [vmem:[#allocation8 + $0x90] ss:$8 sps:$4 sm:$0xff]   ;;  %v15996_v33 = vld [vmem:[#allocation8 + $0xa4] ss:$8 sps:$4 sm:$0xff]  }
 0x97b   : > { %v13840_v7 = vpop.f32.mrb[135].mxu1 }
 0x97c   : > { %v13841_v40 = vadd.f32 %v13840_v7, %v13839_v35  ;;  %v15999_v35 = vld [vmem:[#allocation8 + $0xb4] ss:$8 sps:$4 sm:$0xff]   ;;  %v15997_v7 = vld [vmem:[#allocation8 + $0xb0] ss:$8 sps:$4 sm:$0xff]  }
 0x97e   : > { %v6712_v49 = vpack.c.bf16 %v13841_v40, %v13838_v34  ;;  %v15994_v34 = vld [vmem:[#allocation8 + $0xa0] ss:$8 sps:$4 sm:$0xff]   ;;  %v16012_v40 = vld [vmem:[#allocation8 + $0x190] ss:$8 sps:$4 sm:$0xff]  }
 0x980   : > { %v13842_v25 = vpop.f32.mrb[136].mxu1 }
 0x981   : > { %v13843_v11 = vpop.f32.mrb[137].mxu1 }
 0x982   : > { %v13844_v52 = vadd.f32 %v13843_v11, %v13842_v25  ;;  %v13845_v1 = vpop.f32.mrb[138].mxu1  ;;  %v16017_v25 = vld [vmem:[#allocation8 + $0x1a4] ss:$8 sps:$4 sm:$0xff]   ;;  %v16015_v11 = vld [vmem:[#allocation8 + $0x1a0] ss:$8 sps:$4 sm:$0xff]  }
 0x983   : > { %v13846_v10 = vpop.f32.mrb[139].mxu1 }
 0x984   : > { %v13847_v17 = vadd.f32 %v13846_v10, %v13845_v1  ;;  %v16018_v1 = vld [vmem:[#allocation8 + $0x1b0] ss:$8 sps:$4 sm:$0xff]   ;;  %v16023_v10 = vld [vmem:[#allocation8 + $0x1c4] ss:$8 sps:$4 sm:$0xff]  }
 0x986   : > { %v6713_v59 = vpack.c.bf16 %v13847_v17, %v13844_v52  ;;  %v16020_v52 = vld [vmem:[#allocation8 + $0x1b4] ss:$8 sps:$4 sm:$0xff]   ;;  %v16021_v17 = vld [vmem:[#allocation8 + $0x1c0] ss:$8 sps:$4 sm:$0xff]  }
 0x988   : > { %v13864_v39 = vpop.f32.mrb[140].mxu1 }
 0x989   : > { %v13865_v29 = vpop.f32.mrb[141].mxu1 }
 0x98a   : > { %v13866_v42 = vadd.f32 %v13865_v29, %v13864_v39  ;;  %v13867_v44 = vpop.f32.mrb[142].mxu1  ;;  %v16024_v39 = vld [vmem:[#allocation8 + $0x1d0] ss:$8 sps:$4 sm:$0xff]   ;;  %v16029_v29 = vld [vmem:[#allocation8 + $0x1e4] ss:$8 sps:$4 sm:$0xff]  }
 0x98b   : > { %v13868_v3 = vpop.f32.mrb[143].mxu1 }
 0x98c   : > { %v13869_v63 = vadd.f32 %v13868_v3, %v13867_v44  ;;  %v16032_v44 = vld [vmem:[#allocation8 + $0x1f4] ss:$8 sps:$4 sm:$0xff]   ;;  %v16030_v3 = vld [vmem:[#allocation8 + $0x1f0] ss:$8 sps:$4 sm:$0xff]  }
 0x98e   : > { %v6832_v22 = vpack.c.bf16 %v13869_v63, %v13866_v42  ;;  %v16027_v42 = vld [vmem:[#allocation8 + $0x1e0] ss:$8 sps:$4 sm:$0xff]  }
 0x990   : > { %v13870_v14 = vpop.f32.mrb[144].mxu1  ;;  %14640 = vmatprep.mubr.msk.bf16.mxu1 %vm20180_vm3, %v6832_v22  ;;  %vm20197_vm3 = vmmov %vm20181_vm0 }
 0x991   : > { %v13871_v57 = vpop.f32.mrb[145].mxu1 }
 0x992   : > { %v13872_v51 = vadd.f32 %v13871_v57, %v13870_v14  ;;  %v13873_v24 = vpop.f32.mrb[146].mxu1 }
 0x993   : > { %v13874_v61 = vpop.f32.mrb[147].mxu1 }
 0x994   : > { %v13875_v4 = vadd.f32 %v13874_v61, %v13873_v24 }
 0x996   : > { %v6833_v6 = vpack.c.bf16 %v13875_v4, %v13872_v51 }
 0x998   : > { %14641 = vmatmul.mubr.msk.bf16.vlgmr.msra.gmra.mrb[156].mxu1 %vm20181_vm0, %v6833_v6  ;;  %v13876_v47 = vpop.f32.mrb[148].mxu1 }
 0x999   : > { %14649 = vmatpush3.bf16.msra.mxu1 %v15984_v37  ;;  %v13877_v0 = vpop.f32.mrb[149].mxu1  ;;  %v15988_v37 = vld [vmem:[#allocation8 + $0x84] ss:$8 sps:$4 sm:$0xff]  }
 0x99a   : > { %14650 = vmatprep.subr.bf16.mxu1 %v15985_v19  ;;  %v13878_v12 = vadd.f32 %v13877_v0, %v13876_v47  ;;  %v13879_v27 = vpop.f32.mrb[150].mxu1 }
 0x99b   : > { %v13880_v32 = vpop.f32.mrb[151].mxu1 }
 0x99c   : > { %v13881_v18 = vadd.f32 %v13880_v32, %v13879_v27 }
 0x99d   : > { %14651 = vmatpush3.bf16.msra.mxu1 %v15985_v19 }
 0x99e   : > { %13900 = vmatprep.subr.bf16.mxu1 %v19115_v31  ;;  %v6834_v30 = vpack.c.bf16 %v13881_v18, %v13878_v12 }
 0x9a0   : > { %v13882_v50 = vpop.f32.mrb[152].mxu1  ;;  %14644 = vmatprep.mubr.msk.bf16.mxu1 %vm20182_vm2, %v6834_v30  ;;  %vm20200_vm2 = vmmov %vm20181_vm0 }
 0x9a1   : > { %v13883_v38 = vpop.f32.mrb[153].mxu1 }
 0x9a2   : > { %v13884_v60 = vadd.f32 %v13883_v38, %v13882_v50  ;;  %v13885_v36 = vpop.f32.mrb[154].mxu1 }
 0x9a3   : > { %v13886_v45 = vpop.f32.mrb[155].mxu1 }
 0x9a4   : > { %v13887_v26 = vadd.f32 %v13886_v45, %v13885_v36 }
 0x9a6   : > { %v6835_v55 = vpack.c.bf16 %v13887_v26, %v13884_v60 }
 0x9a8   : > { %14645 = vmatmul.mubr.msk.bf16.gmra.mrb[160].mxu1 %vm20183_vm4, %v6835_v55  ;;  %vm20202_vm4 = vmmov %vm20181_vm0 }
 0x9a9   : > { %14652 = vmatprep.mubr.msk.bf16.mxu1 %vm20184_vm5, %v6710_v54  ;;  %v15989_v54 = vld [vmem:[#allocation10 + $0x20] sm:$0xff]   ;;  %vm20204_vm5 = vmmov %vm20181_vm0 }
 0x9b0   : > { %14653 = vmatmul.mubr.msk.bf16.vlgmr.msra.gmra.mrb[156].mxu1 %vm20185_vm6, %v6711_v58  ;;  %v15990_v58 = vld [vmem:[#allocation10 + $0x28] sm:$0xff]   ;;  %vm20206_vm6 = vmmov %vm20181_vm0 }
 0x9b1   : > { %13901 = vmatpush3.bf16.msra.mxu1 %v19099_v16  ;;  %14656 = vmatprep.mubr.msk.bf16.mxu1 %vm20186_vm10, %v6712_v49  ;;  %v16014_v49 = vld [vmem:[#allocation8 + $0x194] ss:$8 sps:$4 sm:$0xff]   ;;  %vm20208_vm10 = vmmov %vm20181_vm0 }
 0x9b2   : > { %13902 = vmatprep.subr.bf16.mxu1 %v19117_v41  ;;  %7988 = vmatprep.mubr.bf16.mxu0 %v16014_v49  ;;  %v16009_v49 = vld [vmem:[#allocation8 + $0xf0] ss:$8 sps:$4 sm:$0xff]  }
 0x9b3   : > { %7989 = vmatmul.mubr.bf16.gmra.mrb[8].mxu0 %v16012_v40  ;;  %v16011_v40 = vld [vmem:[#allocation8 + $0xf4] ss:$8 sps:$4 sm:$0xff]  }
 0x9b4   : > { %7996 = vmatprep.mubr.bf16.mxu0 %v16017_v25  ;;  %v14008_v25 = vpop.f32.mrb[228].mxu0 }
 0x9b5   : > { %13903 = vmatpush3.bf16.msra.mxu1 %v19101_v8 }
 0x9b6   : > { %13904 = vmatprep.subr.bf16.mxu1 %v19119_v56 }
 0x9b8   : > { %14657 = vmatmul.mubr.msk.bf16.gmra.mrb[160].mxu1 %vm20187_vm11, %v6713_v59  ;;  %v16026_v59 = vld [vmem:[#allocation8 + $0x1d4] ss:$8 sps:$4 sm:$0xff]   ;;  %vm20210_vm11 = vmmov %vm20181_vm0 }
 0x9b9   : > { %13905 = vmatpush3.bf16.msra.mxu1 %v19103_v2  ;;  %7100 = vmatprep.mubr.bf16.mxu1 %v15988_v37 }
 0x9ba   : > { %13906 = vmatprep.subr.bf16.mxu1 %v19121_v20 }
 0x9bb   : > { %7997 = vmatmul.mubr.bf16.gmra.mrb[12].mxu0 %v16015_v11  ;;  %v14009_v11 = vpop.f32.mrb[229].mxu0 }
 0x9bc   : > { %8004 = vmatprep.mubr.bf16.mxu0 %v16020_v52  ;;  %v14011_v52 = vpop.f32.mrb[230].mxu0 }
 0x9bd   : > { %13907 = vmatpush3.bf16.msra.mxu1 %v19105_v46 }
 0x9be   : > { %13908 = vmatprep.subr.bf16.mxu1 %v19123_v43 }
 0x9c1   : > { %13909 = vmatpush3.bf16.msra.mxu1 %v19107_v13 }
 0x9c2   : > { %13910 = vmatprep.subr.bf16.mxu1 %v19125_v23 }
 0x9c3   : > { %8005 = vmatmul.mubr.bf16.gmra.mrb[16].mxu0 %v16018_v1  ;;  %v14012_v1 = vpop.f32.mrb[231].mxu0 }
 0x9c4   : > { %8200 = vmatprep.mubr.bf16.mxu0 %v16023_v10  ;;  %v19272_v10 = vadd.f32 %v14009_v11, %v14008_v25 }
 0x9c5   : > { %13911 = vmatpush3.bf16.msra.mxu1 %v19109_v15 }
 0x9c6   : > { %13912 = vmatprep.subr.bf16.mxu1 %v18911_v9 }
 0x9c9   : > { %13913 = vmatpush3.bf16.msra.mxu1 %v19111_v48 }
 0x9ca   : > { %13914 = vmatprep.subr.bf16.mxu1 %v19127_v21 }
 0x9cb   : > { %8201 = vmatmul.mubr.bf16.vlgmr.msra.gmra.mrb[20].mxu0 %v16021_v17  ;;  %v19274_v17 = vadd.f32 %v14012_v1, %v14011_v52 }
 0x9cc   : > { %8208 = vmatprep.mubr.bf16.mxu0 %v16026_v59 }
 0x9cd   : > { %13915 = vmatpush3.bf16.msra.mxu1 %v19113_v62 }
 0x9ce   : > { %14660 = vmatprep.subr.bf16.mxu1 %v15989_v54 }
 0x9d0   : > { %7101 = vmatmul.mubr.bf16.vlgmr.msra.gmra.mrb[164].mxu1 %v15986_v5 }
 0x9d1   : > { %14661 = vmatpush3.bf16.msra.mxu1 %v15989_v54  ;;  %7108 = vmatprep.mubr.bf16.mxu1 %v15993_v53  ;;  %v16002_v53 = vld [vmem:[#allocation8 + $0xc4] ss:$8 sps:$4 sm:$0xff]  }
 0x9d2   : > { %14662 = vmatprep.subr.bf16.mxu1 %v15990_v58 }
 0x9d3   : > { %8209 = vmatmul.mubr.bf16.gmra.mrb[24].mxu0 %v16024_v39  ;;  %v14014_v39 = vpop.f32.mrb[232].mxu0 }
 0x9d4   : > { %8216 = vmatprep.mubr.bf16.mxu0 %v16029_v29  ;;  %v14015_v29 = vpop.f32.mrb[233].mxu0 }
 0x9d5   : > { %14663 = vmatpush3.bf16.msra.mxu1 %v15990_v58 }
 0x9d6   : > { %13946 = vmatprep.subr.bf16.mxu1 %v19115_v31 }
 0x9d8   : > { %7109 = vmatmul.mubr.bf16.gmra.mrb[168].mxu1 %v15991_v28  ;;  %v16000_v28 = vld [vmem:[#allocation8 + $0xc0] ss:$8 sps:$4 sm:$0xff]  }
 0x9d9   : > { %7116 = vmatprep.mubr.bf16.mxu1 %v15996_v33  ;;  %v16005_v33 = vld [vmem:[#allocation8 + $0xd4] ss:$8 sps:$4 sm:$0xff]  }
 0x9db   : > { %8217 = vmatmul.mubr.bf16.gmra.mrb[28].mxu0 %v16027_v42  ;;  %v14017_v42 = vpop.f32.mrb[234].mxu0 }
 0x9dc   : > { %8224 = vmatprep.mubr.bf16.mxu0 %v16032_v44  ;;  %v14018_v44 = vpop.f32.mrb[235].mxu0 }
 0x9e0   : > { %7117 = vmatmul.mubr.bf16.gmra.mrb[172].mxu1 %v15994_v34  ;;  %v16003_v34 = vld [vmem:[#allocation8 + $0xd0] ss:$8 sps:$4 sm:$0xff]  }
 0x9e1   : > { %7124 = vmatprep.mubr.bf16.mxu1 %v15999_v35  ;;  %v16008_v35 = vld [vmem:[#allocation8 + $0xe4] ss:$8 sps:$4 sm:$0xff]  }
 0x9e3   : > { %8225 = vmatmul.mubr.bf16.gmra.mrb[32].mxu0 %v16030_v3  ;;  %v19278_v3 = vadd.f32 %v14015_v29, %v14014_v39  ;;  %v19314_v39 = vld [vmem:[#allocation10 + $0x40] sm:$0xff]  }
 0x9e8   : > { %7125 = vmatmul.mubr.bf16.gmra.mrb[176].mxu1 %v15997_v7  ;;  %v16006_v7 = vld [vmem:[#allocation8 + $0xe0] ss:$8 sps:$4 sm:$0xff]  }
 0xaa3   : > { %v13916_v63 = vpop.f32.mrb[164].mxu1 }
 0xaa4   : > { %v13917_v22 = vpop.f32.mrb[165].mxu1 }
 0xaa5   : > { %v13918_v14 = vadd.f32 %v13917_v22, %v13916_v63  ;;  %v13919_v57 = vpop.f32.mrb[166].mxu1  ;;  %v19280_v63 = vadd.f32 %v14018_v44, %v14017_v42 }
 0xaa6   : > { %v13920_v51 = vpop.f32.mrb[167].mxu1 }
 0xaa7   : > { %v13921_v24 = vadd.f32 %v13920_v51, %v13919_v57 }
 0xaa9   : > { %v7133_v61 = vpack.c.bf16 %v13921_v24, %v13918_v14  ;;  %v14020_v14 = vpop.f32.mrb[236].mxu0 }
 0xaaa   : > { %v14021_v57 = vpop.f32.mrb[237].mxu0 }
 0xaab   : > { %v13922_v4 = vpop.f32.mrb[168].mxu1  ;;  %14664 = vmatprep.mubr.msk.bf16.mxu1 %vm20188_vm12, %v7133_v61  ;;  %v14023_v51 = vpop.f32.mrb[238].mxu0  ;;  %v19284_v61 = vadd.f32 %v14021_v57, %v14020_v14  ;;  %vm20212_vm12 = vmmov %vm20181_vm0 }
 0xaac   : > { %v13923_v6 = vpop.f32.mrb[169].mxu1  ;;  %v14024_v24 = vpop.f32.mrb[239].mxu0 }
 0xaad   : > { %v13924_v19 = vadd.f32 %v13923_v6, %v13922_v4  ;;  %v13925_v47 = vpop.f32.mrb[170].mxu1  ;;  %v19286_v4 = vadd.f32 %v14024_v24, %v14023_v51 }
 0xaae   : > { %v13926_v0 = vpop.f32.mrb[171].mxu1 }
 0xaaf   : > { %v13927_v12 = vadd.f32 %v13926_v0, %v13925_v47 }
 0xab1   : > { %v7134_v27 = vpack.c.bf16 %v13927_v12, %v13924_v19  ;;  %v14026_v19 = vpop.f32.mrb[240].mxu0 }
 0xab2   : > { %v14027_v47 = vpop.f32.mrb[241].mxu0 }
 0xab3   : > { %14665 = vmatmul.mubr.msk.bf16.vlgmr.msra.gmra.mrb[156].mxu1 %vm20189_vm13, %v7134_v27  ;;  %v13928_v32 = vpop.f32.mrb[172].mxu1  ;;  %v14029_v0 = vpop.f32.mrb[242].mxu0  ;;  %v19290_v27 = vadd.f32 %v14027_v47, %v14026_v19  ;;  %vm20214_vm13 = vmmov %vm20181_vm0 }
 0xab4   : > { %13947 = vmatpush3.bf16.msra.mxu1 %v19099_v16  ;;  %v13929_v18 = vpop.f32.mrb[173].mxu1  ;;  %v14030_v12 = vpop.f32.mrb[243].mxu0 }
 0xab5   : > { %13948 = vmatprep.subr.bf16.mxu1 %v19117_v41  ;;  %v13930_v30 = vadd.f32 %v13929_v18, %v13928_v32  ;;  %v13931_v50 = vpop.f32.mrb[174].mxu1  ;;  %v19292_v32 = vadd.f32 %v14030_v12, %v14029_v0 }
 0xab6   : > { %v13932_v38 = vpop.f32.mrb[175].mxu1 }
 0xab7   : > { %v13933_v60 = vadd.f32 %v13932_v38, %v13931_v50  ;;  %v16033_v50 = vld [vmem:[#allocation10 + $0x30] sm:$0xff]  }
 0xab8   : > { %13949 = vmatpush3.bf16.msra.mxu1 %v19101_v8 }
 0xab9   : > { %13950 = vmatprep.subr.bf16.mxu1 %v19119_v56  ;;  %v7135_v36 = vpack.c.bf16 %v13933_v60, %v13930_v30  ;;  %v14054_v30 = vpop.f32.mrb[244].mxu0 }
 0xaba   : > { %v14055_v38 = vpop.f32.mrb[245].mxu0 }
 0xabb   : > { %v13934_v45 = vpop.f32.mrb[176].mxu1  ;;  %14668 = vmatprep.mubr.msk.bf16.mxu1 %vm20190_vm1, %v7135_v36  ;;  %v14057_v60 = vpop.f32.mrb[246].mxu0  ;;  %vm20216_vm1 = vmmov %vm20181_vm0 }
 0xabc   : > { %13951 = vmatpush3.bf16.msra.mxu1 %v19103_v2  ;;  %v13935_v26 = vpop.f32.mrb[177].mxu1  ;;  %v14058_v36 = vpop.f32.mrb[247].mxu0 }
 0xabd   : > { %13952 = vmatprep.subr.bf16.mxu1 %v19121_v20  ;;  %v13936_v55 = vadd.f32 %v13935_v26, %v13934_v45  ;;  %v13937_v37 = vpop.f32.mrb[178].mxu1  ;;  %v19296_v45 = vadd.f32 %v14055_v38, %v14054_v30  ;;  %v19298_v26 = vadd.f32 %v14058_v36, %v14057_v60 }
 0xabe   : > { %v13938_v54 = vpop.f32.mrb[179].mxu1 }
 0xabf   : > { %v13939_v5 = vadd.f32 %v13938_v54, %v13937_v37  ;;  %v14060_v54 = vpop.f32.mrb[248].mxu0 }
 0xac0   : > { %13953 = vmatpush3.bf16.msra.mxu1 %v19105_v46 }
 0xac1   : > { %13954 = vmatprep.subr.bf16.mxu1 %v19123_v43  ;;  %v7136_v58 = vpack.c.bf16 %v13939_v5, %v13936_v55  ;;  %v16034_v55 = vld [vmem:[#allocation10 + $0x38] sm:$0xff]   ;;  %v14061_v5 = vpop.f32.mrb[249].mxu0 }
 0xac3   : > { %14669 = vmatmul.mubr.msk.bf16.gmra.mrb[160].mxu1 %vm20191_vm7, %v7136_v58  ;;  %vm20218_vm7 = vmmov %vm20181_vm0 }
 0xac4   : > { %13955 = vmatpush3.bf16.msra.mxu1 %v19107_v13  ;;  %7320 = vmatprep.mubr.bf16.mxu1 %v16002_v53  ;;  %v14063_v53 = vpop.f32.mrb[250].mxu0 }
 0xac5   : > { %13956 = vmatprep.subr.bf16.mxu1 %v19125_v23  ;;  %v14064_v58 = vpop.f32.mrb[251].mxu0 }
 0xac8   : > { %13957 = vmatpush3.bf16.msra.mxu1 %v19109_v15 }
 0xac9   : > { %13958 = vmatprep.subr.bf16.mxu1 %v18911_v9 }
 0xacc   : > { %13959 = vmatpush3.bf16.msra.mxu1 %v19111_v48 }
 0xacd   : > { %13960 = vmatprep.subr.bf16.mxu1 %v19127_v21 }
 0xad0   : > { %13961 = vmatpush3.bf16.msra.mxu1 %v19113_v62 }
 0xad1   : > { %14672 = vmatprep.subr.bf16.mxu1 %v16033_v50 }
 0xad3   : > { %7321 = vmatmul.mubr.bf16.vlgmr.msra.gmra.mrb[180].mxu1 %v16000_v28  ;;  %v19302_v28 = vadd.f32 %v14061_v5, %v14060_v54 }
 0xad4   : > { %7328 = vmatprep.mubr.bf16.mxu1 %v16005_v33  ;;  %14673 = vmatpush3.bf16.msra.mxu1 %v16033_v50  ;;  %v19304_v33 = vadd.f32 %v14064_v58, %v14063_v53 }
 0xad5   : > { %14674 = vmatprep.subr.bf16.mxu1 %v16034_v55 }
 0xad8   : > { %14675 = vmatpush3.bf16.msra.mxu1 %v16034_v55 }
 0xad9   : > { %14684 = vmatprep.subr.bf16.mxu1 %v19314_v39 }
 0xadb   : > { %7329 = vmatmul.mubr.bf16.gmra.mrb[184].mxu1 %v16003_v34 }
 0xadc   : > { %7336 = vmatprep.mubr.bf16.mxu1 %v16008_v35  ;;  %v14066_v35 = vpop.f32.mrb[252].mxu0 }
 0xae3   : > { %7337 = vmatmul.mubr.bf16.gmra.mrb[188].mxu1 %v16006_v7  ;;  %v14067_v7 = vpop.f32.mrb[253].mxu0 }
 0xae4   : > { %7344 = vmatprep.mubr.bf16.mxu1 %v16011_v40  ;;  %v14069_v40 = vpop.f32.mrb[254].mxu0  ;;  %v19308_v25 = vadd.f32 %v14067_v7, %v14066_v35 }
 0xaeb   : > { %7345 = vmatmul.mubr.bf16.gmra.mrb[192].mxu1 %v16009_v49  ;;  %v14070_v49 = vpop.f32.mrb[255].mxu0 }
 0xaec   : > { %v19310_v11 = vadd.f32 %v14070_v49, %v14069_v40  ;;  %v14072_v1 = vpop.f32.mrb[0].mxu0 }
 0xaed   : > { %v14073_v29 = vpop.f32.mrb[1].mxu0 }
 0xaee   : > { %v14075_v42 = vpop.f32.mrb[2].mxu0  ;;  %v19317_v14 = vadd.f32 %v14073_v29, %v14072_v1 }
 0xaef   : > { %v14076_v44 = vpop.f32.mrb[3].mxu0 }
 0xaf0   : > { %v19319_v57 = vadd.f32 %v14076_v44, %v14075_v42  ;;  %v14100_v24 = vpop.f32.mrb[4].mxu0 }
 0xaf1   : > { %v14101_v19 = vpop.f32.mrb[5].mxu0 }
 0xaf2   : > { %v14103_v47 = vpop.f32.mrb[6].mxu0  ;;  %v19323_v12 = vadd.f32 %v14101_v19, %v14100_v24 }
 0xaf3   : > { %v14104_v0 = vpop.f32.mrb[7].mxu0 }
 0xaf4   : > { %v19325_v30 = vadd.f32 %v14104_v0, %v14103_v47  ;;  %v14106_v38 = vpop.f32.mrb[8].mxu0 }
 0xaf5   : > { %v14107_v60 = vpop.f32.mrb[9].mxu0 }
 0xaf6   : > { %v14109_v36 = vpop.f32.mrb[10].mxu0  ;;  %v19329_v54 = vadd.f32 %v14107_v60, %v14106_v38 }
 0xaf7   : > { %v14110_v55 = vpop.f32.mrb[11].mxu0 }
 0xaf8   : > { %v19331_v5 = vadd.f32 %v14110_v55, %v14109_v36  ;;  %v14112_v58 = vpop.f32.mrb[12].mxu0 }
 0xaf9   : > { %v14113_v35 = vpop.f32.mrb[13].mxu0 }
 0xafa   : > { %v14115_v7 = vpop.f32.mrb[14].mxu0  ;;  %v19335_v49 = vadd.f32 %v14113_v35, %v14112_v58 }
 0xafb   : > { %v14116_v40 = vpop.f32.mrb[15].mxu0 }
 0xafc   : > { %v19337_v1 = vadd.f32 %v14116_v40, %v14115_v7  ;;  %v14118_v42 = vpop.f32.mrb[16].mxu0 }
 0xafd   : > { %v14119_v44 = vpop.f32.mrb[17].mxu0 }
 0xafe   : > { %v14121_v24 = vpop.f32.mrb[18].mxu0  ;;  %v19341_v47 = vadd.f32 %v14119_v44, %v14118_v42 }
 0xaff   : > { %v14122_v19 = vpop.f32.mrb[19].mxu0 }
 0xb00   : > { %v19343_v0 = vadd.f32 %v14122_v19, %v14121_v24  ;;  %v14146_v60 = vpop.f32.mrb[20].mxu0 }
 0xb01   : > { %v14147_v36 = vpop.f32.mrb[21].mxu0 }
 0xb02   : > { %v14149_v55 = vpop.f32.mrb[22].mxu0  ;;  %v19347_v35 = vadd.f32 %v14147_v36, %v14146_v60 }
 0xb03   : > { %v14150_v58 = vpop.f32.mrb[23].mxu0 }
 0xb04   : > { %v19349_v7 = vadd.f32 %v14150_v58, %v14149_v55  ;;  %v14152_v29 = vpop.f32.mrb[24].mxu0 }
 0xb05   : > { %v14153_v53 = vpop.f32.mrb[25].mxu0 }
 0xb06   : > { %v19353_v42 = vadd.f32 %v14153_v53, %v14152_v29  ;;  %v14155_v44 = vpop.f32.mrb[26].mxu0 }
 0xb07   : > { %v14156_v24 = vpop.f32.mrb[27].mxu0 }
 0xb08   : > { %v19355_v19 = vadd.f32 %v14156_v24, %v14155_v44  ;;  %v14158_v50 = vpop.f32.mrb[28].mxu0 }
 0xb09   : > { %v14159_v51 = vpop.f32.mrb[29].mxu0 }
 0xb0a   : > { %v14161_v60 = vpop.f32.mrb[30].mxu0  ;;  %v19359_v55 = vadd.f32 %v14159_v51, %v14158_v50 }
 0xb0b   : > { %v14162_v36 = vpop.f32.mrb[31].mxu0 }
 0xb0c   : > { %v19361_v58 = vadd.f32 %v14162_v36, %v14161_v60  ;;  %v14164_v53 = vpop.f32.mrb[32].mxu0 }
 0xb0d   : > { %v14165_v29 = vpop.f32.mrb[33].mxu0 }
 0xb0e   : > { %v19365_v52 = vadd.f32 %v14165_v29, %v14164_v53  ;;  %v14167_v44 = vpop.f32.mrb[34].mxu0 }
 0xb0f   : > { %v14168_v24 = vpop.f32.mrb[35].mxu0 }
 0xb10   : > { %v19367_v34 = vadd.f32 %v14168_v24, %v14167_v44  ;;  %v16036_v24 = vld [vmem:[#allocation10 + $0x48] sm:$0xff]  }
 0xba6   : > { %v13962_v37 = vpop.f32.mrb[180].mxu1 }
 0xba7   : > { %v13963_v18 = vpop.f32.mrb[181].mxu1 }
 0xba8   : > { %v13964_v51 = vadd.f32 %v13963_v18, %v13962_v37  ;;  %v13965_v50 = vpop.f32.mrb[182].mxu1 }
 0xba9   : > { %v13966_v60 = vpop.f32.mrb[183].mxu1 }
 0xbaa   : > { %v13967_v36 = vadd.f32 %v13966_v60, %v13965_v50 }
 0xbac   : > { %v7353_v6 = vpack.c.bf16 %v13967_v36, %v13964_v51  ;;  %v16037_v51 = vld [vmem:[#allocation10 + $0x50] sm:$0xff]  }
 0xbae   : > { %v13968_v22 = vpop.f32.mrb[184].mxu1  ;;  %14676 = vmatprep.mubr.msk.bf16.mxu1 %vm20192_vm8, %v7353_v6  ;;  %vm20220_vm8 = vmmov %vm20181_vm0 }
 0xbaf   : > { %v13969_v40 = vpop.f32.mrb[185].mxu1 }
 0xbb0   : > { %v13970_v53 = vadd.f32 %v13969_v40, %v13968_v22  ;;  %v13971_v29 = vpop.f32.mrb[186].mxu1 }
 0xbb1   : > { %v13972_v59 = vpop.f32.mrb[187].mxu1 }
 0xbb2   : > { %v13973_v62 = vadd.f32 %v13972_v59, %v13971_v29 }
 0xbb4   : > { %v7354_v44 = vpack.c.bf16 %v13973_v62, %v13970_v53 }
 0xbb6   : > { %v13974_v21 = vpop.f32.mrb[188].mxu1  ;;  %14677 = vmatmul.mubr.msk.bf16.vlgmr.msra.gmra.mrb[156].mxu1 %vm20193_vm9, %v7354_v44  ;;  %v20199_v44 = vpack.c.bf16 %v19286_v4, %v19284_v61  ;;  %v20207_v61 = vpack.c.bf16 %v19310_v11, %v19308_v25  ;;  %v16041_v4 = vld [vmem:[#allocation10 + $0x70] sm:$0xff]   ;;  %v20219_v25 = vpack.c.bf16 %v19349_v7, %v19347_v35  ;;  %v20221_v11 = vpack.c.bf16 %v19355_v19, %v19353_v42  ;;  %vm20222_vm9 = vmmov %vm20181_vm0 }
 0xbb7   : > { %v13975_v38 = vpop.f32.mrb[189].mxu1  ;;  %14685 = vmatpush3.bf16.msra.mxu1 %v19314_v39  ;;  %v16038_v39 = vld [vmem:[#allocation10 + $0x58] sm:$0xff]  }
 0xbb8   : > { %v13976_v18 = vadd.f32 %v13975_v38, %v13974_v21  ;;  %v13977_v37 = vpop.f32.mrb[190].mxu1  ;;  %14686 = vmatprep.subr.bf16.mxu1 %v16036_v24  ;;  %v20196_v21 = vpack.c.bf16 %v19274_v17, %v19272_v10  ;;  %v20198_v38 = vpack.c.bf16 %v19280_v63, %v19278_v3  ;;  %v20201_v10 = vpack.c.bf16 %v19292_v32, %v19290_v27  ;;  %v16040_v3 = vld [vmem:[#allocation10 + $0x68] sm:$0xff]  }
 0xbb9   : > { %v13978_v50 = vpop.f32.mrb[191].mxu1  ;;  %v20203_v17 = vpack.c.bf16 %v19298_v26, %v19296_v45  ;;  %v20205_v63 = vpack.c.bf16 %v19304_v33, %v19302_v28  ;;  %v20209_v27 = vpack.c.bf16 %v19319_v57, %v19317_v14  ;;  %v20211_v32 = vpack.c.bf16 %v19325_v30, %v19323_v12  ;;  %v16042_v45 = vld [vmem:[#allocation10 + $0x78] sm:$0xff]   ;;  %v16045_v14 = vld [vmem:[#allocation8 + $0x204] ss:$8 sps:$4 sm:$0xff]  }
 0xbba   : > { %v13979_v60 = vadd.f32 %v13978_v50, %v13977_v37  ;;  %v20213_v26 = vpack.c.bf16 %v19331_v5, %v19329_v54  ;;  %v20215_v28 = vpack.c.bf16 %v19337_v1, %v19335_v49  ;;  %v20217_v33 = vpack.c.bf16 %v19343_v0, %v19341_v47 }
 0xbbb   : > { %14687 = vmatpush3.bf16.msra.mxu1 %v16036_v24  ;;  %v16039_v24 = vld [vmem:[#allocation10 + $0x60] sm:$0xff]   ;;  %v20225_v57 = vpack.c.bf16 %v19367_v34, %v19365_v52 }
 0xbbc   : > { %v7355_v6 = vpack.c.bf16 %v13979_v60, %v13976_v18  ;;  %14696 = vmatprep.subr.bf16.mxu1 %v16037_v51 }
 0xbbe   : > { %v13980_v22 = vpop.f32.mrb[192].mxu1  ;;  %14680 = vmatprep.mubr.msk.bf16.mxu1 %vm20194_vm14, %v7355_v6  ;;  %vm20224_vm14 = vmmov %vm20181_vm0 }
 0xbbf   : > { %v13981_v62 = vpop.f32.mrb[193].mxu1 }
 0xbc0   : > { %v13982_v59 = vadd.f32 %v13981_v62, %v13980_v22  ;;  %v13983_v40 = vpop.f32.mrb[194].mxu1 }
 0xbc1   : > { %v13984_v36 = vpop.f32.mrb[195].mxu1 }
 0xbc2   : > { %v13985_v53 = vadd.f32 %v13984_v36, %v13983_v40  ;;  %v16749_v36 = vmov 0.0  }
 0xbc3   : > { %14744 = vmatprep.subr.bf16.mxu0 %v16749_v36 }
 0xbc4   : > { %v7356_v29 = vpack.c.bf16 %v13985_v53, %v13982_v59  ;;  %v12426_v53 = vld [vmem:[#allocation11] ss:$0 sm:$0xff] }
 0xbc6   : > { %14681 = vmatmul.mubr.msk.bf16.gmra.mrb[160].mxu1 %vm20195_vm15, %v7356_v29  ;;  %vm20226_vm15 = vmmov %vm20181_vm0 }
 0xbc7   : > { %14688 = vmatprep.mubr.msk.bf16.mxu1 %vm20197_vm3, %v20196_v21  ;;  %vm20229_vm3 = vmmov %vm20181_vm0 }
 0xbce   : > { %14689 = vmatmul.mubr.msk.bf16.vlgmr.msra.gmra.mrb[156].mxu1 %vm20181_vm0, %v20198_v38 }
 0xbcf   : > { %14692 = vmatprep.mubr.msk.bf16.mxu1 %vm20200_vm2, %v20199_v44  ;;  %14697 = vmatpush3.bf16.msra.mxu1 %v16037_v51  ;;  %vm20230_vm2 = vmmov %vm20181_vm0 }
 0xbd0   : > { %14698 = vmatprep.subr.bf16.mxu1 %v16038_v39 }
 0xbd3   : > { %14699 = vmatpush3.bf16.msra.mxu1 %v16038_v39 }
 0xbd4   : > { %14708 = vmatprep.subr.bf16.mxu1 %v16039_v24 }
 0xbd6   : > { %14693 = vmatmul.mubr.msk.bf16.gmra.mrb[160].mxu1 %vm20202_vm4, %v20201_v10  ;;  %vm20231_vm4 = vmmov %vm20181_vm0 }
 0xbd7   : > { %14700 = vmatprep.mubr.msk.bf16.mxu1 %vm20204_vm5, %v20203_v17  ;;  %vm16750_vm5 = vmmov 0  }
 0xbd8   : > { %14752 = vmatprep.mubr.msk.bf16.mxu0 %vm16750_vm5, %v16749_v36 }
 0xbde   : > { %14701 = vmatmul.mubr.msk.bf16.vlgmr.msra.gmra.mrb[156].mxu1 %vm20206_vm6, %v20205_v63  ;;  %vm8574_vm6 = vcmask 523264  }
 0xbdf   : > { %14704 = vmatprep.mubr.msk.bf16.mxu1 %vm20208_vm10, %v20207_v61  ;;  %14709 = vmatpush3.bf16.msra.mxu1 %v16039_v24 }
 0xbe0   : > { %14710 = vmatprep.subr.bf16.mxu1 %v16040_v3 }
 0xbe3   : > { %14711 = vmatpush3.bf16.msra.mxu1 %v16040_v3 }
 0xbe4   : > { %14720 = vmatprep.subr.bf16.mxu1 %v16041_v4 }
 0xbe6   : > { %14705 = vmatmul.mubr.msk.bf16.gmra.mrb[160].mxu1 %vm20210_vm11, %v20209_v27 }
 0xbe7   : > { %14712 = vmatprep.mubr.msk.bf16.mxu1 %vm20212_vm12, %v20211_v32 }
 0xbee   : > { %14713 = vmatmul.mubr.msk.bf16.vlgmr.msra.gmra.mrb[156].mxu1 %vm20214_vm13, %v20213_v26 }
 0xbef   : > { %14721 = vmatpush3.bf16.msra.mxu1 %v16041_v4  ;;  %14716 = vmatprep.mubr.msk.bf16.mxu1 %vm20216_vm1, %v20215_v28 }
 0xbf0   : > { %14722 = vmatprep.subr.bf16.mxu1 %v16042_v45 }
 0xbf3   : > { %14723 = vmatpush3.bf16.msra.mxu1 %v16042_v45 }
 0xbf4   : > { %14176 = vmatprep.subr.bf16.mxu1 %v19115_v31  ;;  %v20223_v31 = vpack.c.bf16 %v19361_v58, %v19359_v55 }
 0xbf6   : > { %14717 = vmatmul.mubr.msk.bf16.gmra.mrb[160].mxu1 %vm20218_vm7, %v20217_v33 }
 0xbf7   : > { %14724 = vmatprep.mubr.msk.bf16.mxu1 %vm20220_vm8, %v20219_v25 }
 0xbfe   : > { %14725 = vmatmul.mubr.msk.bf16.vlgmr.msra.gmra.mrb[156].mxu1 %vm20222_vm9, %v20221_v11 }
 0xbff   : > { %14177 = vmatpush3.bf16.msra.mxu1 %v19099_v16  ;;  %14728 = vmatprep.mubr.msk.bf16.mxu1 %vm20224_vm14, %v20223_v31  ;;  %v20227_v16 = vld [vmem:[#allocation49_spill] sm:$0xff] }
 0xc00   : > { %14178 = vmatprep.subr.bf16.mxu1 %v19117_v41  ;;  %v16048_v41 = vld [vmem:[#allocation8 + $0x214] ss:$8 sps:$4 sm:$0xff]  }
 0xc03   : > { %14179 = vmatpush3.bf16.msra.mxu1 %v19101_v8  ;;  %v16043_v8 = vld [vmem:[#allocation8 + $0x200] ss:$8 sps:$4 sm:$0xff]  }
 0xc04   : > { %14180 = vmatprep.subr.bf16.mxu1 %v19119_v56  ;;  %v16051_v56 = vld [vmem:[#allocation8 + $0x224] ss:$8 sps:$4 sm:$0xff]  }
 0xc06   : > { %14729 = vmatmul.mubr.msk.bf16.gmra.mrb[160].mxu1 %vm20226_vm15, %v20225_v57 }
 0xc07   : > { %14181 = vmatpush3.bf16.msra.mxu1 %v19103_v2  ;;  %8420 = vmatprep.mubr.bf16.mxu1 %v16045_v14  ;;  %v20228_v2 = vld [vmem:[#allocation48_spill] sm:$0xff] }
 0xc08   : > { %14182 = vmatprep.subr.bf16.mxu1 %v19121_v20  ;;  %v16054_v20 = vld [vmem:[#allocation8 + $0x234] ss:$8 sps:$4 sm:$0xff]  }
 0xc0b   : > { %14183 = vmatpush3.bf16.msra.mxu1 %v19105_v46  ;;  %v16046_v46 = vld [vmem:[#allocation8 + $0x210] ss:$8 sps:$4 sm:$0xff]  }
 0xc0c   : > { %14184 = vmatprep.subr.bf16.mxu1 %v19123_v43 }
 0xc0f   : > { %14185 = vmatpush3.bf16.msra.mxu1 %v19107_v13  ;;  %v16049_v13 = vld [vmem:[#allocation8 + $0x220] ss:$8 sps:$4 sm:$0xff]  }
 0xc10   : > { %14186 = vmatprep.subr.bf16.mxu1 %v19125_v23 }
 0xc13   : > { %14187 = vmatpush3.bf16.msra.mxu1 %v19109_v15  ;;  %v16052_v15 = vld [vmem:[#allocation8 + $0x230] ss:$8 sps:$4 sm:$0xff]  }
 0xc14   : > { %14188 = vmatprep.subr.bf16.mxu1 %v18911_v9  ;;  %v16055_v9 = vld [vmem:[#allocation10 + $0x80] sm:$0xff]  }
 0xc17   : > { %14189 = vmatpush3.bf16.msra.mxu1 %v19111_v48  ;;  %v16056_v48 = vld [vmem:[#allocation10 + $0x88] sm:$0xff]  }
 0xc18   : > { %14190 = vmatprep.subr.bf16.mxu1 %v20227_v16 }
 0xc1b   : > { %14191 = vmatpush3.bf16.msra.mxu1 %v20228_v2 }
 0xc1c   : > { %14732 = vmatprep.subr.bf16.mxu1 %v16055_v9 }
 0xc1e   : > { %8421 = vmatmul.mubr.bf16.vlgmr.msra.gmra.mrb[196].mxu1 %v16043_v8 }
 0xc1f   : > { %8428 = vmatprep.mubr.bf16.mxu1 %v16048_v41  ;;  %14733 = vmatpush3.bf16.msra.mxu1 %v16055_v9 }
 0xc20   : > { %14734 = vmatprep.subr.bf16.mxu1 %v16056_v48 }
 0xc23   : > { %14735 = vmatpush3.bf16.msra.mxu1 %v16056_v48 }
 0xc24   : > { %14780 = vmatprep.subr.bf16.mxu1 %v16749_v36 }
 0xc26   : > { %8429 = vmatmul.mubr.bf16.gmra.mrb[200].mxu1 %v16046_v46 }
 0xc27   : > { %8436 = vmatprep.mubr.bf16.mxu1 %v16051_v56 }
 0xc2e   : > { %8437 = vmatmul.mubr.bf16.gmra.mrb[204].mxu1 %v16049_v13 }
 0xc2f   : > { %8444 = vmatprep.mubr.bf16.mxu1 %v16054_v20 }
 0xc36   : > { %8445 = vmatmul.mubr.bf16.gmra.mrb[208].mxu1 %v16052_v15 }
 0xcf1   : > { %v14192_v43 = vpop.f32.mrb[196].mxu1 }
 0xcf2   : > { %v14193_v23 = vpop.f32.mrb[197].mxu1 }
 0xcf3   : > { %v14194_v34 = vadd.f32 %v14193_v23, %v14192_v43  ;;  %v14195_v52 = vpop.f32.mrb[198].mxu1 }
 0xcf4   : > { %v14196_v12 = vpop.f32.mrb[199].mxu1 }
 0xcf5   : > { %v14197_v30 = vadd.f32 %v14196_v12, %v14195_v52 }
 0xcf7   : > { %v8453_v54 = vpack.c.bf16 %v14197_v30, %v14194_v34 }
 0xcf9   : > { %v14198_v5 = vpop.f32.mrb[200].mxu1  ;;  %14736 = vmatprep.mubr.msk.bf16.mxu1 %vm20229_vm3, %v8453_v54  ;;  %vm9902_vm3 = vcmask 130048  }
 0xcfa   : > { %v14199_v49 = vpop.f32.mrb[201].mxu1 }
 0xcfb   : > { %v14200_v1 = vadd.f32 %v14199_v49, %v14198_v5  ;;  %v14201_v47 = vpop.f32.mrb[202].mxu1 }
 0xcfc   : > { %v14202_v0 = vpop.f32.mrb[203].mxu1 }
 0xcfd   : > { %v14203_v35 = vadd.f32 %v14202_v0, %v14201_v47 }
 0xcff   : > { %v8454_v7 = vpack.c.bf16 %v14203_v35, %v14200_v1 }
 0xd01   : > { %14737 = vmatmul.mubr.msk.bf16.vlgmr.msra.gmra.mrb[156].mxu1 %vm20181_vm0, %v8454_v7  ;;  %v14204_v42 = vpop.f32.mrb[204].mxu1  ;;  %vm11584_vm0 = vcmask 1043456  }
 0xd02   : > { %v14205_v19 = vpop.f32.mrb[205].mxu1 }
 0xd03   : > { %v14206_v55 = vadd.f32 %v14205_v19, %v14204_v42  ;;  %v14207_v58 = vpop.f32.mrb[206].mxu1 }
 0xd04   : > { %v14208_v18 = vpop.f32.mrb[207].mxu1 }
 0xd05   : > { %v14209_v37 = vadd.f32 %v14208_v18, %v14207_v58 }
 0xd07   : > { %v8455_v51 = vpack.c.bf16 %v14209_v37, %v14206_v55 }
 0xd09   : > { %v14210_v50 = vpop.f32.mrb[208].mxu1  ;;  %14740 = vmatprep.mubr.msk.bf16.mxu1 %vm20230_vm2, %v8455_v51 }
 0xd0a   : > { %v14211_v60 = vpop.f32.mrb[209].mxu1 }
 0xd0b   : > { %v14212_v6 = vadd.f32 %v14211_v60, %v14210_v50  ;;  %v14213_v22 = vpop.f32.mrb[210].mxu1 }
 0xd0c   : > { %v14214_v62 = vpop.f32.mrb[211].mxu1 }
 0xd0d   : > { %v14215_v59 = vadd.f32 %v14214_v62, %v14213_v22 }
 0xd0f   : > { %v8456_v40 = vpack.c.bf16 %v14215_v59, %v14212_v6 }
 0xd11   : > { %14741 = vmatmul.mubr.msk.bf16.gmra.mrb[160].mxu1 %vm20231_vm4, %v8456_v40 }
 0xd12   : > { %14788 = vmatprep.mubr.msk.bf16.mxu1 %vm16750_vm5, %v16749_v36 }
 0xdd4   : > { %v14738_v29 = vpop.f32.mrb[156].mxu1 }
 0xdd5   : > { %v8520_v21 = vpop.f32.mrb[157].mxu1  ;;  %v19466_v39 = vadd.f32 %v14738_v29, %v12426_v53 }
 0xdd6   : > { %v19468_v38 = vadd.f32 %v12426_v53, %v8520_v21  ;;  %v14739_v44 = vpop.f32.mrb[158].mxu1 }
 0xdd7   : > { %v8523_v24 = vpop.f32.mrb[159].mxu1  ;;  %v19472_v17 = vadd.f32 %v14739_v44, %v12426_v53  ;;  %v8599_v63 = vmul.f32 %v19466_v39, %v19466_v39  ;;  %v8578_v45 = vsel %vm8574_vm6, %v19466_v39, 0.0 }
 0xdd8   : > { %v8597_v10 = vmul.f32 %v19468_v38, %v19468_v38  ;;  %v19474_v3 = vadd.f32 %v12426_v53, %v8523_v24  ;;  %v8575_v61 = vsel %vm8574_vm6, %v19468_v38, 0.0 }
 0xdd9   : > { %v8600_v28 = vmul.f32 %v19472_v17, %v19472_v17  ;;  %v8608_v31 = vsel %vm8574_vm6, %v8599_v63, 0.0  ;;  %v8580_v14 = vsel %vm8574_vm6, %v19472_v17, 0.0 }
 0xdda   : > { %v8576_v4 = vsel %vm8574_vm6, %v19474_v3, 0.0  ;;  %v8598_v27 = vmul.f32 %v19474_v3, %v19474_v3  ;;  %v8605_v26 = vsel %vm8574_vm6, %v8597_v10, 0.0 }
 0xddb   : > { %v8577_v32 = vadd.f32 %v8576_v4, %v8575_v61  ;;  %v8610_v8 = vsel %vm8574_vm6, %v8600_v28, 0.0 }
 0xddc   : > { %v8606_v33 = vsel %vm8574_vm6, %v8598_v27, 0.0 }
 0xddd   : > { %v8579_v25 = vadd.f32 %v8578_v45, %v8577_v32  ;;  %v8607_v11 = vadd.f32 %v8606_v33, %v8605_v26 }
 0xddf   : > { %v8609_v57 = vadd.f32 %v8608_v31, %v8607_v11  ;;  %v8581_v16 = vadd.f32 %v8580_v14, %v8579_v25 }
 0xde1   : > { %v8611_v2 = vadd.f32 %v8610_v8, %v8609_v57 }
 0xde4   : > { %v14742_v41 = vpop.f32.mrb[160].mxu1 }
 0xde5   : > { %v8536_v46 = vpop.f32.mrb[161].mxu1  ;;  %v8572_v56 = vadd.f32 %v14742_v41, %v12426_v53 }
 0xde6   : > { %v8570_v13 = vadd.f32 %v12426_v53, %v8536_v46  ;;  %v14743_v20 = vpop.f32.mrb[162].mxu1 }
 0xde7   : > { %v8539_v15 = vpop.f32.mrb[163].mxu1  ;;  %v8573_v43 = vadd.f32 %v14743_v20, %v12426_v53  ;;  %v8603_v52 = vmul.f32 %v8572_v56, %v8572_v56  ;;  %v8586_v1 = vsel %vm8574_vm6, %v8572_v56, 0.0 }
 0xde8   : > { %v8582_v9 = vsel %vm8574_vm6, %v8570_v13, 0.0  ;;  %v8601_v48 = vmul.f32 %v8570_v13, %v8570_v13  ;;  %v8571_v23 = vadd.f32 %v12426_v53, %v8539_v15 }
 0xde9   : > { %v8583_v34 = vadd.f32 %v8582_v9, %v8581_v16  ;;  %v8604_v47 = vmul.f32 %v8573_v43, %v8573_v43  ;;  %v8616_v42 = vsel %vm8574_vm6, %v8603_v52, 0.0  ;;  %v8588_v19 = vsel %vm8574_vm6, %v8573_v43, 0.0 }
 0xdea   : > { %v8612_v12 = vsel %vm8574_vm6, %v8601_v48, 0.0  ;;  %v8584_v30 = vsel %vm8574_vm6, %v8571_v23, 0.0  ;;  %v8602_v54 = vmul.f32 %v8571_v23, %v8571_v23 }
 0xdeb   : > { %v8613_v5 = vadd.f32 %v8612_v12, %v8611_v2  ;;  %v8585_v49 = vadd.f32 %v8584_v30, %v8583_v34  ;;  %v8618_v18 = vsel %vm8574_vm6, %v8604_v47, 0.0 }
 0xdec   : > { %v8614_v0 = vsel %vm8574_vm6, %v8602_v54, 0.0 }
 0xded   : > { %v8587_v35 = vadd.f32 %v8586_v1, %v8585_v49  ;;  %v8615_v7 = vadd.f32 %v8614_v0, %v8613_v5 }
 0xdef   : > { %v8589_v55 = vadd.f32 %v8588_v19, %v8587_v35  ;;  %v8617_v58 = vadd.f32 %v8616_v42, %v8615_v7  ;;  %v16057_v35 = vld [vmem:[#allocation13] sm:$0xff]   ;;  %v16058_v7 = vld [vmem:[#allocation13 + $0x8] sm:$0xff]   ;;  %v16060_v19 = vld [vmem:[#allocation14 + $0x28] sm:$0xff]  }
 0xdf0   : > { %v16059_v42 = vld [vmem:[#allocation14 + $0x20] sm:$0xff]  }
 0xdf1   : > { %v8590_v37 = vrot.slane %v8589_v55, 4  ;;  %v8619_v51 = vadd.f32 %v8618_v18, %v8617_v58  ;;  %v16067_v58 = vld [vmem:[#allocation14 + $0x8] sm:$0xff]   ;;  %v16069_v18 = vld [vmem:[#allocation14 + $0x10] sm:$0xff]  }
 0xdf3   : > { %v8591_v50 = vadd.f32 %v8590_v37, %v8589_v55  ;;  %v8620_v60 = vrot.slane %v8619_v51, 4  ;;  %v16066_v55 = vld [vmem:[#allocation14] sm:$0xff]   ;;  %v16061_v37 = vld [vmem:[#allocation14 + $0x30] sm:$0xff]  }
 0xdf4   : > { %14781 = vmatpush3.bf16.msra.mxu1 %v16066_v55  ;;  %v16089_v55 = vld [vmem:[#allocation14 + $0xb8] sm:$0xff]  }
 0xdf5   : > { %v8592_v6 = vrot.slane %v8591_v50, 2  ;;  %v8621_v22 = vadd.f32 %v8620_v60, %v8619_v51  ;;  %14782 = vmatprep.subr.bf16.mxu1 %v16749_v36  ;;  %v16070_v51 = vld [vmem:[#allocation14 + $0x18] sm:$0xff]  }
 0xdf7   : > { %v8593_v62 = vadd.f32 %v8592_v6, %v8591_v50  ;;  %v8622_v59 = vrot.slane %v8621_v22, 2  ;;  %v16062_v50 = vld [vmem:[#allocation14 + $0x38] sm:$0xff]  }
 0xdf8   : > { %14783 = vmatpush3.bf16.msra.mxu1 %v16067_v58 }
 0xdf9   : > { %v8594_v40 = vrot.slane %v8593_v62, 1  ;;  %v8623_v53 = vadd.f32 %v8622_v59, %v8621_v22  ;;  %14784 = vmatprep.subr.bf16.mxu1 %v16749_v36 }
 0xdfb   : > { %v8595_v29 = vadd.f32 %v8594_v40, %v8593_v62  ;;  %v8624_v21 = vrot.slane %v8623_v53, 1  ;;  %v16074_v40 = vld [vmem:[#allocation14 + $0x40] sm:$0xff]  }
 0xdfc   : > { %14785 = vmatpush3.bf16.msra.mxu1 %v16069_v18 }
 0xdfd   : > { %v8596_v44 = vmul.f32 0.015625, %v8595_v29  ;;  %v8625_v24 = vadd.f32 %v8624_v21, %v8623_v53  ;;  %14786 = vmatprep.subr.bf16.mxu1 %v16749_v36  ;;  %v16075_v53 = vld [vmem:[#allocation14 + $0x48] sm:$0xff]  }
 0xdff   : > { %v8626_v10 = vmul.f32 0.015625, %v8625_v24  ;;  %v8627_v63 = vmul.f32 %v8596_v44, %v8596_v44  ;;  %v8634_v61 = vsub.f32 %v8570_v13, %v8596_v44  ;;  %v8635_v4 = vsub.f32 %v8571_v23, %v8596_v44 }
 0xe00   : > { %v8630_v27 = vsub.f32 %v19468_v38, %v8596_v44  ;;  %v8631_v32 = vsub.f32 %v19474_v3, %v8596_v44  ;;  %v8632_v45 = vsub.f32 %v19466_v39, %v8596_v44  ;;  %v8633_v26 = vsub.f32 %v19472_v17, %v8596_v44  ;;  %14787 = vmatpush3.bf16.msra.mxu1 %v16070_v51  ;;  %v16090_v51 = vld [vmem:[#allocation14 + $0xc0] sm:$0xff]  }
 0xe01   : > { %v8628_v28 = vsub.f32 %v8626_v10, %v8627_v63  ;;  %v8636_v33 = vsub.f32 %v8572_v56, %v8596_v44  ;;  %v8637_v25 = vsub.f32 %v8573_v43, %v8596_v44  ;;  %14804 = vmatprep.subr.bf16.mxu1 %v16749_v36  ;;  %v16063_v63 = vld [vmem:[#allocation13 + $0x10] sm:$0xff]  }
 0xe03   : > { %v8629_v11 = vmax.f32 %v8628_v28, 0.0  ;;  %v16077_v28 = vld [vmem:[#allocation14 + $0x58] sm:$0xff]  }
 0xe05   : > { %v8638_v31 = vadd.f32 1e-05, %v8629_v11 }
 0xe07   : > { %16321 = vrsqrt.f32 %v8638_v31 }
 0xe11   : > { %v16322_v14 = vpop.eup %16321 }
 0xe12   : > { %v8644_v57 = vmul.f32 %v16322_v14, %v8634_v61  ;;  %v8645_v16 = vmul.f32 %v16322_v14, %v8635_v4  ;;  %v8640_v8 = vmul.f32 %v16322_v14, %v8630_v27  ;;  %v8641_v2 = vmul.f32 %v16322_v14, %v8631_v32  ;;  %v16064_v61 = vld [vmem:[#allocation13 + $0x18] sm:$0xff]   ;;  %v16065_v4 = vld [vmem:[#allocation13 + $0x20] sm:$0xff]   ;;  %v16068_v27 = vld [vmem:[#allocation13 + $0x28] sm:$0xff]  }
 0xe13   : > { %v8642_v41 = vmul.f32 %v16322_v14, %v8632_v45  ;;  %v8643_v46 = vmul.f32 %v16322_v14, %v8633_v26  ;;  %v8646_v38 = vmul.f32 %v16322_v14, %v8636_v33  ;;  %v8647_v13 = vmul.f32 %v16322_v14, %v8637_v25  ;;  %v16071_v32 = vld [vmem:[#allocation13 + $0x30] sm:$0xff]   ;;  %v16076_v45 = vld [vmem:[#allocation14 + $0x50] sm:$0xff]   ;;  %v16073_v33 = vld [vmem:[#allocation13 + $0x40] sm:$0xff]  }
 0xe14   : > { %vm8652_vm10 = vcmp.ge.f32.partialorder %v8644_v57, 0.0  ;;  %vm8653_vm11 = vcmp.ge.f32.partialorder %v8645_v16, 0.0  ;;  %v8660_v39 = vmul.f32 0.2, %v8644_v57  ;;  %v8661_v3 = vmul.f32 0.2, %v8645_v16 }
 0xe15   : > { %vm8648_vm12 = vcmp.ge.f32.partialorder %v8640_v8, 0.0  ;;  %vm8649_vm13 = vcmp.ge.f32.partialorder %v8641_v2, 0.0  ;;  %v8656_v17 = vmul.f32 0.2, %v8640_v8  ;;  %v8657_v56 = vmul.f32 0.2, %v8641_v2 }
 0xe16   : > { %v8668_v20 = vsel %vm8652_vm10, %v8644_v57, %v8660_v39  ;;  %v8669_v15 = vsel %vm8653_vm11, %v8645_v16, %v8661_v3  ;;  %vm8650_vm1 = vcmp.ge.f32.partialorder %v8642_v41, 0.0  ;;  %vm8651_vm7 = vcmp.ge.f32.partialorder %v8643_v46, 0.0  ;;  %v16072_v26 = vld [vmem:[#allocation13 + $0x38] sm:$0xff]   ;;  %v16078_v3 = vld [vmem:[#allocation14 + $0x60] sm:$0xff]  }
 0xe17   : > { %v19506_v9 = vpack.c.bf16 %v8669_v15, %v8668_v20  ;;  %v8664_v48 = vsel %vm8648_vm12, %v8640_v8, %v8656_v17  ;;  %v8665_v43 = vsel %vm8649_vm13, %v8641_v2, %v8657_v56  ;;  %v8658_v23 = vmul.f32 0.2, %v8642_v41  ;;  %v16079_v20 = vld [vmem:[#allocation14 + $0x68] sm:$0xff]   ;;  %v16080_v15 = vld [vmem:[#allocation14 + $0x70] sm:$0xff]  }
 0xe18   : > { %v19508_v34 = vpack.c.bf16 %v8665_v43, %v8664_v48  ;;  %v8659_v52 = vmul.f32 0.2, %v8643_v46  ;;  %vm8654_vm8 = vcmp.ge.f32.partialorder %v8646_v38, 0.0  ;;  %vm8655_vm9 = vcmp.ge.f32.partialorder %v8647_v13, 0.0 }
 0xe19   : > { %v8666_v12 = vsel %vm8650_vm1, %v8642_v41, %v8658_v23  ;;  %v8662_v30 = vmul.f32 0.2, %v8646_v38  ;;  %v8663_v54 = vmul.f32 0.2, %v8647_v13 }
 0xe1a   : > { %14745 = vmatpush3.bf16.msra.mxu0 %v19508_v34  ;;  %v8667_v5 = vsel %vm8651_vm7, %v8643_v46, %v8659_v52 }
 0xe1b   : > { %14746 = vmatprep.subr.bf16.mxu0 %v16749_v36  ;;  %v19512_v49 = vpack.c.bf16 %v8667_v5, %v8666_v12  ;;  %v8670_v1 = vsel %vm8654_vm8, %v8646_v38, %v8662_v30  ;;  %v8671_v47 = vsel %vm8655_vm9, %v8647_v13, %v8663_v54  ;;  %v16083_v30 = vld [vmem:[#allocation14 + $0x88] sm:$0xff]   ;;  %v16084_v54 = vld [vmem:[#allocation14 + $0x90] sm:$0xff]   ;;  %v16085_v5 = vld [vmem:[#allocation14 + $0x98] sm:$0xff]  }
 0xe1c   : > { %v19514_v0 = vpack.c.bf16 %v8671_v47, %v8670_v1 }
 0xe1e   : > { %14747 = vmatpush3.bf16.msra.mxu0 %v19512_v49 }
 0xe1f   : > { %14748 = vmatprep.subr.bf16.mxu0 %v16749_v36 }
 0xe22   : > { %14749 = vmatpush3.bf16.msra.mxu0 %v19506_v9 }
 0xe23   : > { %14750 = vmatprep.subr.bf16.mxu0 %v16749_v36 }
 0xe26   : > { %14751 = vmatpush3.bf16.msra.mxu0 %v19514_v0 }
 0xe27   : > { %14756 = vmatprep.subr.bf16.mxu0 %v16749_v36 }
 0xe29   : > { %14753 = vmatmul.mubr.msk.bf16.vlgmr.msra.gmra.mrb[36].mxu0 %vm8574_vm6, %v16057_v35 }
 0xe2a   : > { %14757 = vmatpush3.bf16.msra.mxu0 %v19508_v34  ;;  %14764 = vmatprep.mubr.msk.bf16.mxu0 %vm16750_vm5, %v16749_v36 }
 0xe2b   : > { %14758 = vmatprep.subr.bf16.mxu0 %v16749_v36 }
 0xe2e   : > { %14759 = vmatpush3.bf16.msra.mxu0 %v19512_v49 }
 0xe2f   : > { %14760 = vmatprep.subr.bf16.mxu0 %v16749_v36 }
 0xe32   : > { %14761 = vmatpush3.bf16.msra.mxu0 %v19506_v9 }
 0xe33   : > { %14762 = vmatprep.subr.bf16.mxu0 %v16749_v36 }
 0xe36   : > { %14763 = vmatpush3.bf16.msra.mxu0 %v19514_v0 }
 0xe37   : > { %14768 = vmatprep.subr.bf16.mxu0 %v16749_v36 }
 0xe39   : > { %14765 = vmatmul.mubr.msk.bf16.vlgmr.msra.gmra.mrb[40].mxu0 %vm8574_vm6, %v16058_v7 }
 0xe3a   : > { %14769 = vmatpush3.bf16.msra.mxu0 %v16059_v42  ;;  %14776 = vmatprep.mubr.msk.bf16.mxu0 %vm16750_vm5, %v16749_v36  ;;  %v16087_v42 = vld [vmem:[#allocation14 + $0xa8] sm:$0xff]  }
 0xe3b   : > { %14770 = vmatprep.subr.bf16.mxu0 %v16749_v36 }
 0xe3e   : > { %14771 = vmatpush3.bf16.msra.mxu0 %v16060_v19  ;;  %v16088_v19 = vld [vmem:[#allocation14 + $0xb0] sm:$0xff]  }
 0xe3f   : > { %14772 = vmatprep.subr.bf16.mxu0 %v16749_v36 }
 0xe42   : > { %14773 = vmatpush3.bf16.msra.mxu0 %v16061_v37 }
 0xe43   : > { %14774 = vmatprep.subr.bf16.mxu0 %v16749_v36 }
 0xe46   : > { %14775 = vmatpush3.bf16.msra.mxu0 %v16062_v50 }
 0xe47   : > { %14792 = vmatprep.subr.bf16.mxu0 %v16749_v36 }
 0xefc   : > { %v8720_v60 = vpop.f32.mrb[36].mxu0 }
 0xefd   : > { %v14754_v6 = vpop.f32.mrb[37].mxu0 }
 0xefe   : > { %v8723_v22 = vpop.f32.mrb[38].mxu0  ;;  %v16091_v6 = vld [vmem:[#allocation14 + $0xc8] sm:$0xff]  }
 0xeff   : > { %v8727_v62 = vpack.c.bf16 %v8723_v22, %v8720_v60  ;;  %v14755_v59 = vpop.f32.mrb[39].mxu0  ;;  %v16092_v22 = vld [vmem:[#allocation14 + $0xd0] sm:$0xff]  }
 0xf01   : > { %14789 = vmatmul.mubr.msk.bf16.vlgmr.msra.gmra.mrb[212].mxu1 %vm8574_vm6, %v8727_v62  ;;  %v16093_v62 = vld [vmem:[#allocation14 + $0xd8] sm:$0xff]  }
 0xf02   : > { %14812 = vmatprep.mubr.msk.bf16.mxu1 %vm16750_vm5, %v16749_v36  ;;  %14805 = vmatpush3.bf16.msra.mxu1 %v16074_v40 }
 0xf03   : > { %14806 = vmatprep.subr.bf16.mxu1 %v16749_v36 }
 0xf06   : > { %14807 = vmatpush3.bf16.msra.mxu1 %v16075_v53 }
 0xf07   : > { %14808 = vmatprep.subr.bf16.mxu1 %v16749_v36 }
 0xf0a   : > { %14809 = vmatpush3.bf16.msra.mxu1 %v16076_v45 }
 0xf0b   : > { %14810 = vmatprep.subr.bf16.mxu1 %v16749_v36 }
 0xf0c   : > { %v8781_v29 = vpop.f32.mrb[40].mxu0 }
 0xf0d   : > { %v14766_v21 = vpop.f32.mrb[41].mxu0 }
 0xf0e   : > { %v8784_v44 = vpop.f32.mrb[42].mxu0  ;;  %14811 = vmatpush3.bf16.msra.mxu1 %v16077_v28  ;;  %v16099_v28 = vld [vmem:[#allocation14 + $0x108] sm:$0xff]  }
 0xf0f   : > { %v8788_v24 = vpack.c.bf16 %v8784_v44, %v8781_v29  ;;  %v14767_v10 = vpop.f32.mrb[43].mxu0  ;;  %14828 = vmatprep.subr.bf16.mxu1 %v16749_v36  ;;  %v16094_v29 = vld [vmem:[#allocation14 + $0xe0] sm:$0xff]  }
 0xf10   : > { %v16096_v10 = vld [vmem:[#allocation14 + $0xf0] sm:$0xff]  }
 0xf11   : > { %14777 = vmatmul.mubr.msk.bf16.vlgmr.msra.gmra.mrb[44].mxu0 %vm8574_vm6, %v8788_v24  ;;  %v16095_v24 = vld [vmem:[#allocation14 + $0xe8] sm:$0xff]  }
 0xf12   : > { %14793 = vmatpush3.bf16.msra.mxu0 %v19508_v34  ;;  %14800 = vmatprep.mubr.msk.bf16.mxu0 %vm16750_vm5, %v16749_v36 }
 0xf13   : > { %14794 = vmatprep.subr.bf16.mxu0 %v16749_v36 }
 0xf16   : > { %14795 = vmatpush3.bf16.msra.mxu0 %v19512_v49 }
 0xf17   : > { %14796 = vmatprep.subr.bf16.mxu0 %v16749_v36 }
 0xf1a   : > { %14797 = vmatpush3.bf16.msra.mxu0 %v19506_v9 }
 0xf1b   : > { %14798 = vmatprep.subr.bf16.mxu0 %v16749_v36 }
 0xf1e   : > { %14799 = vmatpush3.bf16.msra.mxu0 %v19514_v0 }
 0xf1f   : > { %14816 = vmatprep.subr.bf16.mxu0 %v16749_v36 }
 0xf21   : > { %14801 = vmatmul.mubr.msk.bf16.vlgmr.msra.gmra.mrb[48].mxu0 %vm8574_vm6, %v16063_v63  ;;  %v16097_v63 = vld [vmem:[#allocation14 + $0xf8] sm:$0xff]  }
 0xf22   : > { %14817 = vmatpush3.bf16.msra.mxu0 %v19508_v34  ;;  %14824 = vmatprep.mubr.msk.bf16.mxu0 %vm16750_vm5, %v16749_v36 }
 0xf23   : > { %14818 = vmatprep.subr.bf16.mxu0 %v16749_v36 }
 0xf26   : > { %14819 = vmatpush3.bf16.msra.mxu0 %v19512_v49 }
 0xf27   : > { %14820 = vmatprep.subr.bf16.mxu0 %v16749_v36 }
 0xf2a   : > { %14821 = vmatpush3.bf16.msra.mxu0 %v19506_v9 }
 0xf2b   : > { %14822 = vmatprep.subr.bf16.mxu0 %v16749_v36 }
 0xf2e   : > { %14823 = vmatpush3.bf16.msra.mxu0 %v19514_v0 }
 0xf2f   : > { %14840 = vmatprep.subr.bf16.mxu0 %v16749_v36 }
 0xf31   : > { %14825 = vmatmul.mubr.msk.bf16.vlgmr.msra.gmra.mrb[52].mxu0 %vm8574_vm6, %v16064_v61 }
 0xf32   : > { %14841 = vmatpush3.bf16.msra.mxu0 %v19508_v34  ;;  %14848 = vmatprep.mubr.msk.bf16.mxu0 %vm16750_vm5, %v16749_v36 }
 0xf33   : > { %14842 = vmatprep.subr.bf16.mxu0 %v16749_v36 }
 0xf36   : > { %14843 = vmatpush3.bf16.msra.mxu0 %v19512_v49 }
 0xf37   : > { %14844 = vmatprep.subr.bf16.mxu0 %v16749_v36 }
 0xf3a   : > { %14845 = vmatpush3.bf16.msra.mxu0 %v19506_v9 }
 0xf3b   : > { %14846 = vmatprep.subr.bf16.mxu0 %v16749_v36 }
 0xf3e   : > { %14847 = vmatpush3.bf16.msra.mxu0 %v19514_v0 }
 0xf3f   : > { %14864 = vmatprep.subr.bf16.mxu0 %v16749_v36 }
 0xf41   : > { %14849 = vmatmul.mubr.msk.bf16.vlgmr.msra.gmra.mrb[56].mxu0 %vm8574_vm6, %v16065_v4 }
 0xf42   : > { %14865 = vmatpush3.bf16.msra.mxu0 %v19508_v34  ;;  %14872 = vmatprep.mubr.msk.bf16.mxu0 %vm16750_vm5, %v16749_v36 }
 0xf43   : > { %14866 = vmatprep.subr.bf16.mxu0 %v16749_v36 }
 0xf46   : > { %14867 = vmatpush3.bf16.msra.mxu0 %v19512_v49 }
 0xf47   : > { %14868 = vmatprep.subr.bf16.mxu0 %v16749_v36 }
 0xf4a   : > { %14869 = vmatpush3.bf16.msra.mxu0 %v19506_v9 }
 0xf4b   : > { %14870 = vmatprep.subr.bf16.mxu0 %v16749_v36 }
 0xf4e   : > { %14871 = vmatpush3.bf16.msra.mxu0 %v19514_v0 }
 0xf4f   : > { %14888 = vmatprep.subr.bf16.mxu0 %v16749_v36 }
 0xf51   : > { %14873 = vmatmul.mubr.msk.bf16.vlgmr.msra.gmra.mrb[60].mxu0 %vm8574_vm6, %v16068_v27 }
 0xf52   : > { %14889 = vmatpush3.bf16.msra.mxu0 %v19508_v34  ;;  %14896 = vmatprep.mubr.msk.bf16.mxu0 %vm16750_vm5, %v16749_v36 }
 0xf53   : > { %14890 = vmatprep.subr.bf16.mxu0 %v16749_v36 }
 0xf56   : > { %14891 = vmatpush3.bf16.msra.mxu0 %v19512_v49 }
 0xf57   : > { %14892 = vmatprep.subr.bf16.mxu0 %v16749_v36 }
 0xf5a   : > { %14893 = vmatpush3.bf16.msra.mxu0 %v19506_v9 }
 0xf5b   : > { %14894 = vmatprep.subr.bf16.mxu0 %v16749_v36 }
 0xf5e   : > { %14895 = vmatpush3.bf16.msra.mxu0 %v19514_v0 }
 0xf5f   : > { %14912 = vmatprep.subr.bf16.mxu0 %v16749_v36 }
 0xf61   : > { %14897 = vmatmul.mubr.msk.bf16.vlgmr.msra.gmra.mrb[64].mxu0 %vm8574_vm6, %v16071_v32  ;;  %v16098_v32 = vld [vmem:[#allocation14 + $0x100] sm:$0xff]  }
 0xf62   : > { %14913 = vmatpush3.bf16.msra.mxu0 %v19508_v34  ;;  %14920 = vmatprep.mubr.msk.bf16.mxu0 %vm16750_vm5, %v16749_v36 }
 0xf63   : > { %14914 = vmatprep.subr.bf16.mxu0 %v16749_v36 }
 0xf66   : > { %14915 = vmatpush3.bf16.msra.mxu0 %v19512_v49 }
 0xf67   : > { %14916 = vmatprep.subr.bf16.mxu0 %v16749_v36 }
 0xf6a   : > { %14917 = vmatpush3.bf16.msra.mxu0 %v19506_v9 }
 0xf6b   : > { %14918 = vmatprep.subr.bf16.mxu0 %v16749_v36 }
 0xf6e   : > { %14919 = vmatpush3.bf16.msra.mxu0 %v19514_v0 }
 0xf6f   : > { %14936 = vmatprep.subr.bf16.mxu0 %v16749_v36 }
 0xf71   : > { %14921 = vmatmul.mubr.msk.bf16.vlgmr.msra.gmra.mrb[100].mxu0 %vm8574_vm6, %v16072_v26 }
 0xf72   : > { %14937 = vmatpush3.bf16.msra.mxu0 %v19508_v34  ;;  %14944 = vmatprep.mubr.msk.bf16.mxu0 %vm16750_vm5, %v16749_v36  ;;  %v16082_v34 = vld [vmem:[#allocation14 + $0x80] sm:$0xff]  }
 0xf73   : > { %14938 = vmatprep.subr.bf16.mxu0 %v16749_v36 }
 0xf76   : > { %14939 = vmatpush3.bf16.msra.mxu0 %v19512_v49 }
 0xf77   : > { %14940 = vmatprep.subr.bf16.mxu0 %v16749_v36 }
 0xf7a   : > { %14941 = vmatpush3.bf16.msra.mxu0 %v19506_v9  ;;  %v16081_v9 = vld [vmem:[#allocation14 + $0x78] sm:$0xff]  }
 0xf7b   : > { %14942 = vmatprep.subr.bf16.mxu0 %v16749_v36 }
 0xf7e   : > { %14943 = vmatpush3.bf16.msra.mxu0 %v19514_v0  ;;  %v16086_v0 = vld [vmem:[#allocation14 + $0xa0] sm:$0xff]  }
 0xf7f   : > { %14960 = vmatprep.subr.bf16.mxu0 %v16749_v36 }
 0xf81   : > { %14945 = vmatmul.mubr.msk.bf16.vlgmr.msra.gmra.mrb[104].mxu0 %vm8574_vm6, %v16073_v33  ;;  %v16100_v33 = vld [vmem:[#allocation14 + $0x110] sm:$0xff]  }
 0xf82   : > { %14962 = vmatprep.mubr.msk.bf16.mxu0 %vm16750_vm5, %v16749_v36 }
 0xfd4   : > { %v8927_v25 = vpop.f32.mrb[212].mxu1 }
 0xfd5   : > { %v14790_v11 = vpop.f32.mrb[213].mxu1 }
 0xfd6   : > { %v8930_v31 = vpop.f32.mrb[214].mxu1 }
 0xfd7   : > { %v14791_v14 = vpop.f32.mrb[215].mxu1 }
 0xfe4   : > { %v8859_v57 = vpop.f32.mrb[44].mxu0 }
 0xfe5   : > { %v14778_v16 = vpop.f32.mrb[45].mxu0  ;;  %v19631_v8 = vadd.f32 %v8927_v25, %v8859_v57  ;;  %v16101_v25 = vld [vmem:[#allocation14 + $0x118] sm:$0xff]  }
 0xfe6   : > { %v8862_v2 = vpop.f32.mrb[46].mxu0 }
 0xfe7   : > { %v14779_v41 = vpop.f32.mrb[47].mxu0  ;;  %v19633_v46 = vadd.f32 %v8930_v31, %v8862_v2 }
 0xff4   : > { %v8979_v38 = vpop.f32.mrb[48].mxu0 }
 0xff5   : > { %v14802_v13 = vpop.f32.mrb[49].mxu0 }
 0xff6   : > { %v8982_v39 = vpop.f32.mrb[50].mxu0 }
 0xff7   : > { %v8986_v17 = vpack.c.bf16 %v8982_v39, %v8979_v38  ;;  %v14803_v56 = vpop.f32.mrb[51].mxu0 }
 0xff9   : > { %14813 = vmatmul.mubr.msk.bf16.vlgmr.msra.gmra.mrb[216].mxu1 %vm8574_vm6, %v8986_v17 }
 0xffa   : > { %14829 = vmatpush3.bf16.msra.mxu1 %v16078_v3  ;;  %14836 = vmatprep.mubr.msk.bf16.mxu1 %vm16750_vm5, %v16749_v36 }
 0xffb   : > { %14830 = vmatprep.subr.bf16.mxu1 %v16749_v36 }
 0xffe   : > { %14831 = vmatpush3.bf16.msra.mxu1 %v16079_v20 }
 0xfff   : > { %14832 = vmatprep.subr.bf16.mxu1 %v16749_v36 }
0x1002   : > { %14833 = vmatpush3.bf16.msra.mxu1 %v16080_v15 }
0x1003   : > { %14834 = vmatprep.subr.bf16.mxu1 %v16749_v36 }
0x1004   : > { %v9111_v48 = vpop.f32.mrb[52].mxu0 }
0x1005   : > { %v14826_v43 = vpop.f32.mrb[53].mxu0 }
0x1006   : > { %v9114_v23 = vpop.f32.mrb[54].mxu0  ;;  %14835 = vmatpush3.bf16.msra.mxu1 %v16081_v9 }
0x1007   : > { %v9118_v52 = vpack.c.bf16 %v9114_v23, %v9111_v48  ;;  %14852 = vmatprep.subr.bf16.mxu1 %v16749_v36  ;;  %v14827_v12 = vpop.f32.mrb[55].mxu0 }
0x1009   : > { %14837 = vmatmul.mubr.msk.bf16.vlgmr.msra.gmra.mrb[220].mxu1 %vm8574_vm6, %v9118_v52 }
0x100a   : > { %14853 = vmatpush3.bf16.msra.mxu1 %v16082_v34  ;;  %14860 = vmatprep.mubr.msk.bf16.mxu1 %vm16750_vm5, %v16749_v36 }
0x100b   : > { %14854 = vmatprep.subr.bf16.mxu1 %v16749_v36 }
0x100e   : > { %14855 = vmatpush3.bf16.msra.mxu1 %v16083_v30 }
0x100f   : > { %14856 = vmatprep.subr.bf16.mxu1 %v16749_v36 }
0x1012   : > { %14857 = vmatpush3.bf16.msra.mxu1 %v16084_v54 }
0x1013   : > { %14858 = vmatprep.subr.bf16.mxu1 %v16749_v36 }
0x1014   : > { %v9243_v49 = vpop.f32.mrb[56].mxu0 }
0x1015   : > { %v14850_v1 = vpop.f32.mrb[57].mxu0 }
0x1016   : > { %v9246_v47 = vpop.f32.mrb[58].mxu0  ;;  %14859 = vmatpush3.bf16.msra.mxu1 %v16085_v5 }
0x1017   : > { %v9250_v35 = vpack.c.bf16 %v9246_v47, %v9243_v49  ;;  %14876 = vmatprep.subr.bf16.mxu1 %v16749_v36  ;;  %v14851_v7 = vpop.f32.mrb[59].mxu0 }
0x1019   : > { %14861 = vmatmul.mubr.msk.bf16.vlgmr.msra.gmra.mrb[224].mxu1 %vm8574_vm6, %v9250_v35 }
0x101a   : > { %14877 = vmatpush3.bf16.msra.mxu1 %v16086_v0  ;;  %14884 = vmatprep.mubr.msk.bf16.mxu1 %vm16750_vm5, %v16749_v36 }
0x101b   : > { %14878 = vmatprep.subr.bf16.mxu1 %v16749_v36 }
0x101e   : > { %14879 = vmatpush3.bf16.msra.mxu1 %v16087_v42 }
0x101f   : > { %14880 = vmatprep.subr.bf16.mxu1 %v16749_v36 }
0x1022   : > { %14881 = vmatpush3.bf16.msra.mxu1 %v16088_v19 }
0x1023   : > { %14882 = vmatprep.subr.bf16.mxu1 %v16749_v36 }
0x1024   : > { %v9375_v58 = vpop.f32.mrb[60].mxu0 }
0x1025   : > { %v14874_v18 = vpop.f32.mrb[61].mxu0 }
0x1026   : > { %v9378_v37 = vpop.f32.mrb[62].mxu0  ;;  %14883 = vmatpush3.bf16.msra.mxu1 %v16089_v55 }
0x1027   : > { %v9382_v50 = vpack.c.bf16 %v9378_v37, %v9375_v58  ;;  %14900 = vmatprep.subr.bf16.mxu1 %v16749_v36  ;;  %v14875_v60 = vpop.f32.mrb[63].mxu0 }
0x1029   : > { %14885 = vmatmul.mubr.msk.bf16.vlgmr.msra.gmra.mrb[228].mxu1 %vm8574_vm6, %v9382_v50 }
0x102a   : > { %14901 = vmatpush3.bf16.msra.mxu1 %v16090_v51  ;;  %14908 = vmatprep.mubr.msk.bf16.mxu1 %vm16750_vm5, %v16749_v36 }
0x102b   : > { %14902 = vmatprep.subr.bf16.mxu1 %v16749_v36 }
0x102e   : > { %14903 = vmatpush3.bf16.msra.mxu1 %v16091_v6  ;;  %v12490_v6 = vld [vmem:[#allocation16] ss:$0 sm:$0xff] }
0x102f   : > { %14904 = vmatprep.subr.bf16.mxu1 %v16749_v36 }
0x1032   : > { %14905 = vmatpush3.bf16.msra.mxu1 %v16092_v22 }
0x1033   : > { %14906 = vmatprep.subr.bf16.mxu1 %v16749_v36 }
0x1034   : > { %v9507_v59 = vpop.f32.mrb[64].mxu0 }
0x1035   : > { %v14898_v40 = vpop.f32.mrb[65].mxu0 }
0x1036   : > { %v9510_v53 = vpop.f32.mrb[66].mxu0  ;;  %14907 = vmatpush3.bf16.msra.mxu1 %v16093_v62 }
0x1037   : > { %v9514_v21 = vpack.c.bf16 %v9510_v53, %v9507_v59  ;;  %14924 = vmatprep.subr.bf16.mxu1 %v16749_v36  ;;  %v14899_v44 = vpop.f32.mrb[67].mxu0 }
0x1039   : > { %14909 = vmatmul.mubr.msk.bf16.vlgmr.msra.gmra.mrb[232].mxu1 %vm8574_vm6, %v9514_v21 }
0x103a   : > { %14925 = vmatpush3.bf16.msra.mxu1 %v16094_v29  ;;  %14932 = vmatprep.mubr.msk.bf16.mxu1 %vm16750_vm5, %v16749_v36 }
0x103b   : > { %14926 = vmatprep.subr.bf16.mxu1 %v16749_v36 }
0x103e   : > { %14927 = vmatpush3.bf16.msra.mxu1 %v16095_v24 }
0x103f   : > { %14928 = vmatprep.subr.bf16.mxu1 %v16749_v36 }
0x1042   : > { %14929 = vmatpush3.bf16.msra.mxu1 %v16096_v10 }
0x1043   : > { %14930 = vmatprep.subr.bf16.mxu1 %v16749_v36 }
0x1044   : > { %v9639_v61 = vpop.f32.mrb[100].mxu0 }
0x1045   : > { %v14922_v4 = vpop.f32.mrb[101].mxu0 }
0x1046   : > { %v9642_v27 = vpop.f32.mrb[102].mxu0  ;;  %14931 = vmatpush3.bf16.msra.mxu1 %v16097_v63 }
0x1047   : > { %v9646_v45 = vpack.c.bf16 %v9642_v27, %v9639_v61  ;;  %14948 = vmatprep.subr.bf16.mxu1 %v16749_v36  ;;  %v14923_v26 = vpop.f32.mrb[103].mxu0 }
0x1049   : > { %14933 = vmatmul.mubr.msk.bf16.vlgmr.msra.gmra.mrb[236].mxu1 %vm8574_vm6, %v9646_v45 }
0x104a   : > { %14949 = vmatpush3.bf16.msra.mxu1 %v16098_v32  ;;  %14956 = vmatprep.mubr.msk.bf16.mxu1 %vm16750_vm5, %v16749_v36 }
0x104b   : > { %14950 = vmatprep.subr.bf16.mxu1 %v16749_v36 }
0x104e   : > { %14951 = vmatpush3.bf16.msra.mxu1 %v16099_v28 }
0x104f   : > { %14952 = vmatprep.subr.bf16.mxu1 %v16749_v36 }
0x1052   : > { %14953 = vmatpush3.bf16.msra.mxu1 %v16100_v33 }
0x1053   : > { %14954 = vmatprep.subr.bf16.mxu1 %v16749_v36 }
0x1054   : > { %v9771_v11 = vpop.f32.mrb[104].mxu0 }
0x1055   : > { %v14946_v31 = vpop.f32.mrb[105].mxu0 }
0x1056   : > { %v9774_v14 = vpop.f32.mrb[106].mxu0  ;;  %14955 = vmatpush3.bf16.msra.mxu1 %v16101_v25 }
0x1057   : > { %v9778_v57 = vpack.c.bf16 %v9774_v14, %v9771_v11  ;;  %v14947_v16 = vpop.f32.mrb[107].mxu0  ;;  %14966 = vmatprep.subr.bf16.mxu1 %v16749_v36 }
0x1059   : > { %14957 = vmatmul.mubr.msk.bf16.vlgmr.msra.gmra.mrb[240].mxu1 %vm8574_vm6, %v9778_v57 }
0x105a   : > { %14968 = vmatprep.mubr.msk.bf16.mxu1 %vm16750_vm5, %v16749_v36 }
0x10cc   : > { %v9057_v2 = vpop.f32.mrb[216].mxu1 }
0x10cd   : > { %v9064_v41 = vadd.f32 %v9057_v2, %v19631_v8  ;;  %v14814_v38 = vpop.f32.mrb[217].mxu1 }
0x10ce   : > { %v9060_v13 = vpop.f32.mrb[218].mxu1 }
0x10cf   : > { %v9065_v39 = vadd.f32 %v9060_v13, %v19633_v46  ;;  %v14815_v3 = vpop.f32.mrb[219].mxu1 }
0x10dc   : > { %v9189_v17 = vpop.f32.mrb[220].mxu1 }
0x10dd   : > { %v9196_v56 = vadd.f32 %v9189_v17, %v9064_v41  ;;  %v14838_v20 = vpop.f32.mrb[221].mxu1 }
0x10de   : > { %v9192_v15 = vpop.f32.mrb[222].mxu1 }
0x10df   : > { %v9197_v9 = vadd.f32 %v9192_v15, %v9065_v39  ;;  %v14839_v48 = vpop.f32.mrb[223].mxu1 }
0x10ec   : > { %v9321_v43 = vpop.f32.mrb[224].mxu1 }
0x10ed   : > { %v9328_v23 = vadd.f32 %v9321_v43, %v9196_v56  ;;  %v14862_v34 = vpop.f32.mrb[225].mxu1 }
0x10ee   : > { %v9324_v52 = vpop.f32.mrb[226].mxu1 }
0x10ef   : > { %v9329_v12 = vadd.f32 %v9324_v52, %v9197_v9  ;;  %v14863_v30 = vpop.f32.mrb[227].mxu1  ;;  %v9964_v52 = vld [vmem:[#allocation17 + $0x2] sm:$0x3] }
0x10f0   : > { %v16102_v30 = vld [vmem:[#allocation19 + $0x80] ss:$8 sps:$4 sm:$0xff]  }
0x10fc   : > { %v9453_v54 = vpop.f32.mrb[228].mxu1 }
0x10fd   : > { %v9460_v5 = vadd.f32 %v9453_v54, %v9328_v23  ;;  %v14886_v8 = vpop.f32.mrb[229].mxu1  ;;  %v16104_v23 = vld [vmem:[#allocation19 + $0x84] ss:$8 sps:$4 sm:$0xff]   ;;  %v16107_v54 = vld [vmem:[#allocation19 + $0x94] ss:$8 sps:$4 sm:$0xff]  }
0x10fe   : > { %v9456_v49 = vpop.f32.mrb[230].mxu1  ;;  %v16110_v8 = vld [vmem:[#allocation19 + $0xa4] ss:$8 sps:$4 sm:$0xff]  }
0x10ff   : > { %v9461_v1 = vadd.f32 %v9456_v49, %v9329_v12  ;;  %v14887_v47 = vpop.f32.mrb[231].mxu1  ;;  %v9901_v12 = vld [vmem:[#allocation17] sm:$0x3]  ;;  %v16108_v49 = vld [vmem:[#allocation19 + $0xa0] ss:$8 sps:$4 sm:$0xff]  }
0x1100   : > { %v16111_v47 = vld [vmem:[#allocation19 + $0xb0] ss:$8 sps:$4 sm:$0xff]  }
0x110c   : > { %v9585_v46 = vpop.f32.mrb[232].mxu1 }
0x110d   : > { %v9592_v0 = vadd.f32 %v9585_v46, %v9460_v5  ;;  %v14910_v35 = vpop.f32.mrb[233].mxu1  ;;  %v16105_v5 = vld [vmem:[#allocation19 + $0x90] ss:$8 sps:$4 sm:$0xff]   ;;  %v16116_v46 = vld [vmem:[#allocation19 + $0xc4] ss:$8 sps:$4 sm:$0xff]  }
0x110e   : > { %v9588_v7 = vpop.f32.mrb[234].mxu1  ;;  %v16119_v35 = vld [vmem:[#allocation19 + $0xd4] ss:$8 sps:$4 sm:$0xff]  }
0x110f   : > { %v9593_v42 = vadd.f32 %v9588_v7, %v9461_v1  ;;  %v14911_v19 = vpop.f32.mrb[235].mxu1  ;;  %v16113_v1 = vld [vmem:[#allocation19 + $0xb4] ss:$8 sps:$4 sm:$0xff]   ;;  %v16117_v7 = vld [vmem:[#allocation19 + $0xd0] ss:$8 sps:$4 sm:$0xff]  }
0x1110   : > { %v16120_v19 = vld [vmem:[#allocation19 + $0xe0] ss:$8 sps:$4 sm:$0xff]  }
0x111c   : > { %v9717_v55 = vpop.f32.mrb[236].mxu1 }
0x111d   : > { %v9724_v58 = vadd.f32 %v9717_v55, %v9592_v0  ;;  %v14934_v18 = vpop.f32.mrb[237].mxu1  ;;  %v16114_v0 = vld [vmem:[#allocation19 + $0xc0] ss:$8 sps:$4 sm:$0xff]   ;;  %v16125_v55 = vld [vmem:[#allocation19 + $0xf4] ss:$8 sps:$4 sm:$0xff]  }
0x111e   : > { %v9720_v37 = vpop.f32.mrb[238].mxu1  ;;  %v16128_v18 = vld [vmem:[#allocation19 + $0x4] ss:$8 sps:$4 sm:$0xff]  }
0x111f   : > { %v9725_v51 = vadd.f32 %v9720_v37, %v9593_v42  ;;  %v14935_v50 = vpop.f32.mrb[239].mxu1  ;;  %v16122_v42 = vld [vmem:[#allocation19 + $0xe4] ss:$8 sps:$4 sm:$0xff]   ;;  %v16126_v37 = vld [vmem:[#allocation19] ss:$8 sps:$4 sm:$0xff]  }
0x1120   : > { %v16129_v50 = vld [vmem:[#allocation19 + $0x10] ss:$8 sps:$4 sm:$0xff]  }
0x112c   : > { %v9849_v60 = vpop.f32.mrb[240].mxu1 }
0x112d   : > { %v9856_v22 = vadd.f32 %v9849_v60, %v9724_v58  ;;  %v14958_v62 = vpop.f32.mrb[241].mxu1  ;;  %v16123_v58 = vld [vmem:[#allocation19 + $0xf0] ss:$8 sps:$4 sm:$0xff]   ;;  %v16134_v60 = vld [vmem:[#allocation19 + $0x24] ss:$8 sps:$4 sm:$0xff]  }
0x112e   : > { %v9852_v59 = vpop.f32.mrb[242].mxu1  ;;  %v16135_v62 = vld [vmem:[#allocation19 + $0x30] ss:$8 sps:$4 sm:$0xff]  }
0x112f   : > { %v9865_v40 = vadd.f32 %v12490_v6, %v9856_v22  ;;  %v9857_v53 = vadd.f32 %v9852_v59, %v9725_v51  ;;  %v14959_v29 = vpop.f32.mrb[243].mxu1  ;;  %v16131_v51 = vld [vmem:[#allocation19 + $0x14] ss:$8 sps:$4 sm:$0xff]   ;;  %v16140_v59 = vld [vmem:[#allocation19 + $0x44] ss:$8 sps:$4 sm:$0xff]  }
0x1130   : > { %v16137_v22 = vld [vmem:[#allocation19 + $0x34] ss:$8 sps:$4 sm:$0xff]   ;;  %v16141_v29 = vld [vmem:[#allocation19 + $0x50] ss:$8 sps:$4 sm:$0xff]  }
0x1131   : > { %v9866_v21 = vadd.f32 %v12490_v6, %v9857_v53  ;;  %v9875_v44 = vmul.f32 %v9865_v40, %v9865_v40  ;;  %v16132_v6 = vld [vmem:[#allocation19 + $0x20] ss:$8 sps:$4 sm:$0xff]   ;;  %v16143_v53 = vld [vmem:[#allocation19 + $0x54] ss:$8 sps:$4 sm:$0xff]  }
0x1133   : > { %v9867_v24 = vadd.f32 %v9866_v21, %v9865_v40  ;;  %v9876_v10 = vmul.f32 %v9866_v21, %v9866_v21 }
0x1135   : > { %v9868_v63 = vrot.slane %v9867_v24, 4  ;;  %v9877_v61 = vadd.f32 %v9876_v10, %v9875_v44  ;;  %v16144_v44 = vld [vmem:[#allocation19 + $0x60] ss:$8 sps:$4 sm:$0xff]   ;;  %v16147_v10 = vld [vmem:[#allocation19 + $0x70] ss:$8 sps:$4 sm:$0xff]  }
0x1137   : > { %v9869_v4 = vadd.f32 %v9868_v63, %v9867_v24  ;;  %v9878_v27 = vrot.slane %v9877_v61, 4  ;;  %v16149_v24 = vld [vmem:[#allocation19 + $0x74] ss:$8 sps:$4 sm:$0xff]   ;;  %v16751_v63 = vmov 0  }
0x1139   : > { %v9870_v32 = vrot.slane %v9869_v4, 2  ;;  %v9879_v45 = vadd.f32 %v9878_v27, %v9877_v61  ;;  %v16152_v61 = vld [vmem:[#allocation19 + $0x104] ss:$8 sps:$4 sm:$0xff]  }
0x113b   : > { %v9871_v26 = vadd.f32 %v9870_v32, %v9869_v4  ;;  %v9880_v28 = vrot.slane %v9879_v45, 2 }
0x113d   : > { %v9872_v33 = vrot.slane %v9871_v26, 1  ;;  %v9881_v25 = vadd.f32 %v9880_v28, %v9879_v45  ;;  %v16150_v28 = vld [vmem:[#allocation19 + $0x100] ss:$8 sps:$4 sm:$0xff]  }
0x113f   : > { %v9873_v11 = vadd.f32 %v9872_v33, %v9871_v26  ;;  %v9882_v31 = vrot.slane %v9881_v25, 1 }
0x1141   : > { %v9874_v14 = vmul.f32 0.0625, %v9873_v11  ;;  %v9883_v57 = vadd.f32 %v9882_v31, %v9881_v25  ;;  %v16155_v11 = vld [vmem:[#allocation19 + $0x114] ss:$8 sps:$4 sm:$0xff]  }
0x1143   : > { %v9884_v16 = vmul.f32 0.0625, %v9883_v57  ;;  %v9885_v2 = vmul.f32 %v9874_v14, %v9874_v14  ;;  %v9888_v41 = vsub.f32 %v9865_v40, %v9874_v14  ;;  %v9889_v38 = vsub.f32 %v9866_v21, %v9874_v14  ;;  %v16138_v40 = vld [vmem:[#allocation19 + $0x40] ss:$8 sps:$4 sm:$0xff]   ;;  %v16146_v21 = vld [vmem:[#allocation19 + $0x64] ss:$8 sps:$4 sm:$0xff]  }
0x1145   : > { %v9886_v13 = vsub.f32 %v9884_v16, %v9885_v2  ;;  %v16153_v16 = vld [vmem:[#allocation19 + $0x110] ss:$8 sps:$4 sm:$0xff]   ;;  %v16158_v2 = vld [vmem:[#allocation19 + $0x124] ss:$8 sps:$4 sm:$0xff]  }
0x1147   : > { %v9887_v39 = vmax.f32 %v9886_v13, 0.0  ;;  %v16161_v13 = vld [vmem:[#allocation19 + $0x184] ss:$8 sps:$4 sm:$0xff]  }
0x1149   : > { %v9890_v3 = vadd.f32 1e-05, %v9887_v39  ;;  %v16164_v39 = vld [vmem:[#allocation19 + $0x134] ss:$8 sps:$4 sm:$0xff]  }
0x114b   : > { %16323 = vrsqrt.f32 %v9890_v3  ;;  %v16162_v3 = vld [vmem:[#allocation19 + $0x130] ss:$8 sps:$4 sm:$0xff]  }
0x1155   : > { %v16324_v17 = vpop.eup %16323 }
0x1156   : > { %v9892_v56 = vmul.f32 %v16324_v17, %v9888_v41  ;;  %v9893_v20 = vmul.f32 %v16324_v17, %v9889_v38  ;;  %v10269_v41 = vld [vmem:[#allocation17 + $0x4] sm:$0x3]  ;;  %v16156_v38 = vld [vmem:[#allocation19 + $0x120] ss:$8 sps:$4 sm:$0xff]   ;;  %v16170_v17 = vld [vmem:[#allocation19 + $0x144] ss:$8 sps:$4 sm:$0xff]  }
0x1158   : > { %vm9894_vm14 = vcmp.ge.f32.partialorder %v9892_v56, 0.0  ;;  %vm9895_vm15 = vcmp.ge.f32.partialorder %v9893_v20, 0.0  ;;  %v9896_v15 = vmul.f32 0.2, %v9892_v56  ;;  %v9897_v9 = vmul.f32 0.2, %v9893_v20 }
0x115a   : > { %v9898_v48 = vsel %vm9894_vm14, %v9892_v56, %v9896_v15  ;;  %v9899_v43 = vsel %vm9895_vm15, %v9893_v20, %v9897_v9  ;;  %v10455_v56 = vld [vmem:[#allocation17 + $0x6] sm:$0x3]  ;;  %v16159_v20 = vld [vmem:[#allocation19 + $0x180] ss:$8 sps:$4 sm:$0xff]  }
0x115b   : > { %v19682_v34 = vpack.c.bf16 %v9899_v43, %v9898_v48  ;;  %v16167_v15 = vld [vmem:[#allocation19 + $0x194] ss:$8 sps:$4 sm:$0xff]   ;;  %v16168_v9 = vld [vmem:[#allocation19 + $0x140] ss:$8 sps:$4 sm:$0xff]   ;;  %v16165_v43 = vld [vmem:[#allocation19 + $0x190] ss:$8 sps:$4 sm:$0xff]  }
0x115c   : > { %v16176_v48 = vld [vmem:[#allocation19 + $0x154] ss:$8 sps:$4 sm:$0xff]  }
0x115d   : > { %14961 = vmatpush3.bf16.msra.mxu0 %v19682_v34  ;;  %14967 = vmatpush3.bf16.msra.mxu1 %v19682_v34 }
0x115e   : > { %10106 = vmatprep.subr.bf16.mxu0 %v16104_v23  ;;  %10227 = vmatprep.subr.bf16.mxu1 %v16128_v18  ;;  %v16173_v23 = vld [vmem:[#allocation19 + $0x1a4] ss:$8 sps:$4 sm:$0xff]  }
0x1160   : > { %14969 = vmatmul.mubr.msk.bf16.vlgmr.msra.gmra.mrb[244].mxu1 %vm9902_vm3, %v9964_v52  ;;  %14963 = vmatmul.mubr.msk.bf16.vlgmr.msra.gmra.mrb[108].mxu0 %vm9902_vm3, %v9901_v12  ;;  %v16174_v52 = vld [vmem:[#allocation19 + $0x150] ss:$8 sps:$4 sm:$0xff]   ;;  %v16182_v12 = vld [vmem:[#allocation19 + $0x164] ss:$8 sps:$4 sm:$0xff]  }
0x1161   : > { %10107 = vmatpush1.bf16.msra.mxu0 %v16102_v30  ;;  %10228 = vmatpush1.bf16.msra.mxu1 %v16126_v37  ;;  %v16171_v30 = vld [vmem:[#allocation19 + $0x1a0] ss:$8 sps:$4 sm:$0xff]  }
0x1162   : > { %10108 = vmatprep.subr.bf16.mxu0 %v16107_v54  ;;  %10229 = vmatprep.subr.bf16.mxu1 %v16131_v51  ;;  %v16179_v54 = vld [vmem:[#allocation19 + $0x1b4] ss:$8 sps:$4 sm:$0xff]  }
0x1163   : > { %10138 = vmatprep.mubr.bf16.mxu0 %v16751_v63  ;;  %10259 = vmatprep.mubr.bf16.mxu1 %v16751_v63 }
0x1165   : > { %10109 = vmatpush1.bf16.msra.mxu0 %v16105_v5  ;;  %10230 = vmatpush1.bf16.msra.mxu1 %v16129_v50  ;;  %v16180_v5 = vld [vmem:[#allocation19 + $0x160] ss:$8 sps:$4 sm:$0xff]  }
0x1166   : > { %10110 = vmatprep.subr.bf16.mxu0 %v16110_v8  ;;  %10231 = vmatprep.subr.bf16.mxu1 %v16134_v60  ;;  %v16177_v8 = vld [vmem:[#allocation19 + $0x1b0] ss:$8 sps:$4 sm:$0xff]  }
0x1169   : > { %10111 = vmatpush1.bf16.msra.mxu0 %v16108_v49  ;;  %10232 = vmatpush1.bf16.msra.mxu1 %v16132_v6  ;;  %v16185_v49 = vld [vmem:[#allocation19 + $0x1c4] ss:$8 sps:$4 sm:$0xff]  }
0x116a   : > { %10112 = vmatprep.subr.bf16.mxu0 %v16113_v1  ;;  %10233 = vmatprep.subr.bf16.mxu1 %v16137_v22  ;;  %v16183_v1 = vld [vmem:[#allocation19 + $0x1c0] ss:$8 sps:$4 sm:$0xff]  }
0x116d   : > { %10113 = vmatpush1.bf16.msra.mxu0 %v16111_v47  ;;  %10234 = vmatpush1.bf16.msra.mxu1 %v16135_v62  ;;  %v16186_v47 = vld [vmem:[#allocation19 + $0x170] ss:$8 sps:$4 sm:$0xff]  }
0x116e   : > { %10114 = vmatprep.subr.bf16.mxu0 %v16116_v46  ;;  %10235 = vmatprep.subr.bf16.mxu1 %v16140_v59  ;;  %v16188_v46 = vld [vmem:[#allocation19 + $0x174] ss:$8 sps:$4 sm:$0xff]  }
0x1171   : > { %10115 = vmatpush1.bf16.msra.mxu0 %v16114_v0  ;;  %10236 = vmatpush1.bf16.msra.mxu1 %v16138_v40  ;;  %v16189_v0 = vld [vmem:[#allocation19 + $0x1d0] ss:$8 sps:$4 sm:$0xff]  }
0x1172   : > { %10116 = vmatprep.subr.bf16.mxu0 %v16119_v35  ;;  %10237 = vmatprep.subr.bf16.mxu1 %v16143_v53  ;;  %v16191_v35 = vld [vmem:[#allocation19 + $0x1d4] ss:$8 sps:$4 sm:$0xff]  }
0x1175   : > { %10117 = vmatpush1.bf16.msra.mxu0 %v16117_v7  ;;  %10238 = vmatpush1.bf16.msra.mxu1 %v16141_v29  ;;  %v16192_v7 = vld [vmem:[#allocation19 + $0x1e0] ss:$8 sps:$4 sm:$0xff]  }
0x1176   : > { %10118 = vmatprep.subr.bf16.mxu0 %v16122_v42  ;;  %10239 = vmatprep.subr.bf16.mxu1 %v16146_v21  ;;  %v16194_v42 = vld [vmem:[#allocation19 + $0x1e4] ss:$8 sps:$4 sm:$0xff]  }
0x1177   : > { %v16200_v21 = vld [vmem:[#allocation19 + $0x204] ss:$8 sps:$4 sm:$0xff]  }
0x1179   : > { %10119 = vmatpush1.bf16.msra.mxu0 %v16120_v19  ;;  %10240 = vmatpush1.bf16.msra.mxu1 %v16144_v44  ;;  %v16195_v19 = vld [vmem:[#allocation19 + $0x1f0] ss:$8 sps:$4 sm:$0xff]  }
0x117a   : > { %10120 = vmatprep.subr.bf16.mxu0 %v16125_v55  ;;  %10241 = vmatprep.subr.bf16.mxu1 %v16149_v24  ;;  %v16197_v55 = vld [vmem:[#allocation19 + $0x1f4] ss:$8 sps:$4 sm:$0xff]  }
0x117d   : > { %10121 = vmatpush1.bf16.msra.mxu0 %v16123_v58  ;;  %10242 = vmatpush1.bf16.msra.mxu1 %v16147_v10 }
0x117e   : > { %14972 = vmatprep.subr.bf16.mxu0 %v16749_v36  ;;  %10411 = vmatprep.subr.bf16.mxu1 %v16152_v61  ;;  %v10641_v61 = vld [vmem:[#allocation17 + $0x8] sm:$0x3] }
0x1233   : > { %v10002_v4 = vpop.f32.mrb[244].mxu1  ;;  %v9940_v27 = vpop.f32.mrb[108].mxu0 }
0x1234   : > { %v10008_v32 = vpack.c.bf16 %v10002_v4, %v10002_v4  ;;  %v14970_v45 = vpop.f32.mrb[245].mxu1  ;;  %v9946_v26 = vpack.c.bf16 %v9940_v27, %v9940_v27  ;;  %v14964_v33 = vpop.f32.mrb[109].mxu0  ;;  %v16198_v27 = vld [vmem:[#allocation19 + $0x200] ss:$8 sps:$4 sm:$0xff]  }
0x1235   : > { %v10005_v25 = vpop.f32.mrb[246].mxu1  ;;  %v9943_v31 = vpop.f32.mrb[110].mxu0 }
0x1236   : > { %10139 = vmatmul.mubr.bf16.vlgmr.msra.gmra.mrb[112].mxu0 %v10008_v32  ;;  %v14971_v14 = vpop.f32.mrb[247].mxu1  ;;  %10260 = vmatmul.mubr.bf16.vlgmr.msra.gmra.mrb[248].mxu1 %v9946_v26  ;;  %v14965_v57 = vpop.f32.mrb[111].mxu0  ;;  %v16209_v32 = vld [vmem:[#allocation19 + $0x284] ss:$8 sps:$4 sm:$0xff]   ;;  %v16203_v26 = vld [vmem:[#allocation19 + $0x214] ss:$8 sps:$4 sm:$0xff]  }
0x1237   : > { %14973 = vmatpush3.bf16.msra.mxu0 %v19682_v34  ;;  %14974 = vmatprep.mubr.msk.bf16.mxu0 %vm16750_vm5, %v16749_v36  ;;  %v16201_v25 = vld [vmem:[#allocation19 + $0x210] ss:$8 sps:$4 sm:$0xff]   ;;  %v16207_v14 = vld [vmem:[#allocation19 + $0x280] ss:$8 sps:$4 sm:$0xff]  }
0x1238   : > { %14978 = vmatprep.subr.bf16.mxu0 %v16749_v36  ;;  %10412 = vmatpush1.bf16.msra.mxu1 %v16150_v28  ;;  %v10827_v31 = vld [vmem:[#allocation17 + $0xa] sm:$0x3]  ;;  %v16204_v57 = vld [vmem:[#allocation19 + $0x220] ss:$8 sps:$4 sm:$0xff]  }
0x1239   : > { %10413 = vmatprep.subr.bf16.mxu1 %v16155_v11  ;;  %10443 = vmatprep.mubr.bf16.mxu1 %v16751_v63  ;;  %v16206_v11 = vld [vmem:[#allocation19 + $0x224] ss:$8 sps:$4 sm:$0xff]  }
0x123c   : > { %10414 = vmatpush1.bf16.msra.mxu1 %v16153_v16  ;;  %v16215_v16 = vld [vmem:[#allocation19 + $0x294] ss:$8 sps:$4 sm:$0xff]  }
0x123d   : > { %10415 = vmatprep.subr.bf16.mxu1 %v16158_v2  ;;  %v16212_v2 = vld [vmem:[#allocation19 + $0x234] ss:$8 sps:$4 sm:$0xff]  }
0x123e   : > { %14975 = vmatmul.mubr.msk.bf16.vlgmr.msra.gmra.mrb[116].mxu0 %vm9902_vm3, %v10269_v41  ;;  %v16213_v41 = vld [vmem:[#allocation19 + $0x290] ss:$8 sps:$4 sm:$0xff]  }
0x123f   : > { %14979 = vmatpush3.bf16.msra.mxu0 %v19682_v34  ;;  %14980 = vmatprep.mubr.msk.bf16.mxu0 %vm16750_vm5, %v16749_v36 }
0x1240   : > { %10597 = vmatprep.subr.bf16.mxu0 %v16161_v13  ;;  %10416 = vmatpush1.bf16.msra.mxu1 %v16156_v38  ;;  %v16210_v38 = vld [vmem:[#allocation19 + $0x230] ss:$8 sps:$4 sm:$0xff]   ;;  %v16221_v13 = vld [vmem:[#allocation19 + $0x2a4] ss:$8 sps:$4 sm:$0xff]  }
0x1241   : > { %10417 = vmatprep.subr.bf16.mxu1 %v16164_v39  ;;  %v16218_v39 = vld [vmem:[#allocation19 + $0x244] ss:$8 sps:$4 sm:$0xff]  }
0x1244   : > { %10418 = vmatpush1.bf16.msra.mxu1 %v16162_v3  ;;  %v16219_v3 = vld [vmem:[#allocation19 + $0x2a0] ss:$8 sps:$4 sm:$0xff]  }
0x1245   : > { %10419 = vmatprep.subr.bf16.mxu1 %v16170_v17  ;;  %v16216_v17 = vld [vmem:[#allocation19 + $0x240] ss:$8 sps:$4 sm:$0xff]  }
0x1246   : > { %14981 = vmatmul.mubr.msk.bf16.vlgmr.msra.gmra.mrb[120].mxu0 %vm9902_vm3, %v10455_v56  ;;  %v16227_v56 = vld [vmem:[#allocation19 + $0x2b4] ss:$8 sps:$4 sm:$0xff]  }
0x1247   : > { %10598 = vmatpush1.bf16.msra.mxu0 %v16159_v20  ;;  %10629 = vmatprep.mubr.bf16.mxu0 %v16751_v63  ;;  %v16224_v20 = vld [vmem:[#allocation19 + $0x254] ss:$8 sps:$4 sm:$0xff]  }
0x1248   : > { %10599 = vmatprep.subr.bf16.mxu0 %v16167_v15  ;;  %10420 = vmatpush1.bf16.msra.mxu1 %v16168_v9  ;;  %v16225_v15 = vld [vmem:[#allocation19 + $0x2b0] ss:$8 sps:$4 sm:$0xff]  }
0x1249   : > { %10421 = vmatprep.subr.bf16.mxu1 %v16176_v48  ;;  %v16222_v9 = vld [vmem:[#allocation19 + $0x250] ss:$8 sps:$4 sm:$0xff]   ;;  %v16228_v48 = vld [vmem:[#allocation19 + $0x260] ss:$8 sps:$4 sm:$0xff]  }
0x124b   : > { %10600 = vmatpush1.bf16.msra.mxu0 %v16165_v43  ;;  %v16230_v43 = vld [vmem:[#allocation19 + $0x264] ss:$8 sps:$4 sm:$0xff]  }
0x124c   : > { %10601 = vmatprep.subr.bf16.mxu0 %v16173_v23  ;;  %10422 = vmatpush1.bf16.msra.mxu1 %v16174_v52  ;;  %v16231_v23 = vld [vmem:[#allocation19 + $0x2c0] ss:$8 sps:$4 sm:$0xff]   ;;  %v16233_v52 = vld [vmem:[#allocation19 + $0x2c4] ss:$8 sps:$4 sm:$0xff]  }
0x124d   : > { %10423 = vmatprep.subr.bf16.mxu1 %v16182_v12  ;;  %v16236_v12 = vld [vmem:[#allocation19 + $0x274] ss:$8 sps:$4 sm:$0xff]  }
0x124f   : > { %10602 = vmatpush1.bf16.msra.mxu0 %v16171_v30  ;;  %v16239_v30 = vld [vmem:[#allocation19 + $0x2d4] ss:$8 sps:$4 sm:$0xff]  }
0x1250   : > { %10603 = vmatprep.subr.bf16.mxu0 %v16179_v54  ;;  %10424 = vmatpush1.bf16.msra.mxu1 %v16180_v5  ;;  %v16234_v54 = vld [vmem:[#allocation19 + $0x270] ss:$8 sps:$4 sm:$0xff]  }
0x1251   : > { %10425 = vmatprep.subr.bf16.mxu1 %v16188_v46  ;;  %v16237_v5 = vld [vmem:[#allocation19 + $0x2d0] ss:$8 sps:$4 sm:$0xff]  }
0x1253   : > { %10604 = vmatpush1.bf16.msra.mxu0 %v16177_v8  ;;  %v16240_v8 = vld [vmem:[#allocation19 + $0x2e0] ss:$8 sps:$4 sm:$0xff]  }
0x1254   : > { %10605 = vmatprep.subr.bf16.mxu0 %v16185_v49  ;;  %10426 = vmatpush1.bf16.msra.mxu1 %v16186_v47  ;;  %v16242_v49 = vld [vmem:[#allocation19 + $0x2e4] ss:$8 sps:$4 sm:$0xff]   ;;  %v16243_v47 = vld [vmem:[#allocation19 + $0x2f0] ss:$8 sps:$4 sm:$0xff]  }
0x1255   : > { %14984 = vmatprep.subr.bf16.mxu1 %v16749_v36 }
0x1257   : > { %10606 = vmatpush1.bf16.msra.mxu0 %v16183_v1  ;;  %v16245_v1 = vld [vmem:[#allocation19 + $0x2f4] ss:$8 sps:$4 sm:$0xff]  }
0x1258   : > { %10607 = vmatprep.subr.bf16.mxu0 %v16191_v35 }
0x125b   : > { %10608 = vmatpush1.bf16.msra.mxu0 %v16189_v0 }
0x125c   : > { %10609 = vmatprep.subr.bf16.mxu0 %v16194_v42 }
0x125f   : > { %10610 = vmatpush1.bf16.msra.mxu0 %v16192_v7 }
0x1260   : > { %10611 = vmatprep.subr.bf16.mxu0 %v16197_v55 }
0x1263   : > { %10612 = vmatpush1.bf16.msra.mxu0 %v16195_v19 }
0x1264   : > { %14990 = vmatprep.subr.bf16.mxu0 %v16749_v36 }
0x1309   : > { %v10140_v58 = vpop.f32.mrb[112].mxu0  ;;  %v10261_v18 = vpop.f32.mrb[248].mxu1 }
0x130a   : > { %v10142_v37 = vpop.f32.mrb[113].mxu0  ;;  %v19704_v51 = vadd.f32 %v10261_v18, %v10140_v58  ;;  %v10263_v50 = vpop.f32.mrb[249].mxu1 }
0x130b   : > { %v10144_v60 = vpop.f32.mrb[114].mxu0  ;;  %v19706_v6 = vadd.f32 %v10263_v50, %v10142_v37  ;;  %v10265_v22 = vpop.f32.mrb[250].mxu1 }
0x130c   : > { %v10145_v62 = vpop.f32.mrb[115].mxu0  ;;  %v10266_v59 = vpop.f32.mrb[251].mxu1  ;;  %v16248_v22 = vld [vmem:[#allocation19 + $0x304] ss:$8 sps:$4 sm:$0xff]  }
0x1311   : > { %v10307_v40 = vpop.f32.mrb[116].mxu0 }
0x1312   : > { %v10313_v53 = vpack.c.bf16 %v10307_v40, %v10307_v40  ;;  %v14976_v29 = vpop.f32.mrb[117].mxu0 }
0x1313   : > { %v10310_v44 = vpop.f32.mrb[118].mxu0  ;;  %v11013_v29 = vld [vmem:[#allocation17 + $0xc] sm:$0x3] }
0x1314   : > { %10444 = vmatmul.mubr.bf16.vlgmr.msra.gmra.mrb[252].mxu1 %v10313_v53  ;;  %v14977_v24 = vpop.f32.mrb[119].mxu0  ;;  %v16246_v44 = vld [vmem:[#allocation19 + $0x300] ss:$8 sps:$4 sm:$0xff]  }
0x1315   : > { %14985 = vmatpush3.bf16.msra.mxu1 %v19682_v34  ;;  %14986 = vmatprep.mubr.msk.bf16.mxu1 %vm16750_vm5, %v16749_v36  ;;  %v16257_v24 = vld [vmem:[#allocation19 + $0x384] ss:$8 sps:$4 sm:$0xff]  }
0x1316   : > { %10783 = vmatprep.subr.bf16.mxu1 %v16200_v21 }
0x1319   : > { %v10493_v10 = vpop.f32.mrb[120].mxu0 }
0x131a   : > { %v10499_v4 = vpack.c.bf16 %v10493_v10, %v10493_v10  ;;  %v14982_v45 = vpop.f32.mrb[121].mxu0 }
0x131b   : > { %v10496_v28 = vpop.f32.mrb[122].mxu0  ;;  %v16254_v45 = vld [vmem:[#allocation19 + $0x324] ss:$8 sps:$4 sm:$0xff]  }
0x131c   : > { %10630 = vmatmul.mubr.bf16.vlgmr.msra.gmra.mrb[124].mxu0 %v10499_v4  ;;  %14987 = vmatmul.mubr.msk.bf16.vlgmr.msra.gmra.mrb[0].mxu1 %vm9902_vm3, %v10641_v61  ;;  %v14983_v33 = vpop.f32.mrb[123].mxu0  ;;  %v16251_v61 = vld [vmem:[#allocation19 + $0x314] ss:$8 sps:$4 sm:$0xff]   ;;  %v16255_v28 = vld [vmem:[#allocation19 + $0x380] ss:$8 sps:$4 sm:$0xff]  }
0x131d   : > { %14991 = vmatpush3.bf16.msra.mxu0 %v19682_v34  ;;  %14992 = vmatprep.mubr.msk.bf16.mxu0 %vm16750_vm5, %v16749_v36  ;;  %v16252_v33 = vld [vmem:[#allocation19 + $0x320] ss:$8 sps:$4 sm:$0xff]  }
0x131e   : > { %10784 = vmatpush1.bf16.msra.mxu1 %v16198_v27  ;;  %10969 = vmatprep.subr.bf16.mxu0 %v16209_v32  ;;  %v16249_v32 = vld [vmem:[#allocation19 + $0x310] ss:$8 sps:$4 sm:$0xff]  }
0x131f   : > { %10785 = vmatprep.subr.bf16.mxu1 %v16203_v26  ;;  %10815 = vmatprep.mubr.bf16.mxu1 %v16751_v63  ;;  %v11199_v26 = vld [vmem:[#allocation17 + $0xe] sm:$0x3] }
0x1322   : > { %10786 = vmatpush1.bf16.msra.mxu1 %v16201_v25  ;;  %v16263_v25 = vld [vmem:[#allocation19 + $0x394] ss:$8 sps:$4 sm:$0xff]  }
0x1323   : > { %10787 = vmatprep.subr.bf16.mxu1 %v16206_v11  ;;  %v16260_v11 = vld [vmem:[#allocation19 + $0x334] ss:$8 sps:$4 sm:$0xff]  }
0x1324   : > { %14993 = vmatmul.mubr.msk.bf16.vlgmr.msra.gmra.mrb[128].mxu0 %vm9902_vm3, %v10827_v31  ;;  %v16261_v31 = vld [vmem:[#allocation19 + $0x390] ss:$8 sps:$4 sm:$0xff]  }
0x1325   : > { %10970 = vmatpush1.bf16.msra.mxu0 %v16207_v14  ;;  %11001 = vmatprep.mubr.bf16.mxu0 %v16751_v63  ;;  %v16258_v14 = vld [vmem:[#allocation19 + $0x330] ss:$8 sps:$4 sm:$0xff]  }
0x1326   : > { %10788 = vmatpush1.bf16.msra.mxu1 %v16204_v57  ;;  %10971 = vmatprep.subr.bf16.mxu0 %v16215_v16  ;;  %v16269_v57 = vld [vmem:[#allocation19 + $0x3a4] ss:$8 sps:$4 sm:$0xff]  }
0x1327   : > { %10789 = vmatprep.subr.bf16.mxu1 %v16212_v2  ;;  %v16266_v16 = vld [vmem:[#allocation19 + $0x344] ss:$8 sps:$4 sm:$0xff]   ;;  %v16267_v2 = vld [vmem:[#allocation19 + $0x3a0] ss:$8 sps:$4 sm:$0xff]  }
0x1329   : > { %10972 = vmatpush1.bf16.msra.mxu0 %v16213_v41  ;;  %v16264_v41 = vld [vmem:[#allocation19 + $0x340] ss:$8 sps:$4 sm:$0xff]  }
0x132a   : > { %10790 = vmatpush1.bf16.msra.mxu1 %v16210_v38  ;;  %10973 = vmatprep.subr.bf16.mxu0 %v16221_v13  ;;  %v16275_v38 = vld [vmem:[#allocation19 + $0x3b4] ss:$8 sps:$4 sm:$0xff]  }
0x132b   : > { %10791 = vmatprep.subr.bf16.mxu1 %v16218_v39  ;;  %v16272_v13 = vld [vmem:[#allocation19 + $0x354] ss:$8 sps:$4 sm:$0xff]   ;;  %v16273_v39 = vld [vmem:[#allocation19 + $0x3b0] ss:$8 sps:$4 sm:$0xff]  }
0x132d   : > { %10974 = vmatpush1.bf16.msra.mxu0 %v16219_v3  ;;  %v16270_v3 = vld [vmem:[#allocation19 + $0x350] ss:$8 sps:$4 sm:$0xff]  }
0x132e   : > { %10792 = vmatpush1.bf16.msra.mxu1 %v16216_v17  ;;  %10975 = vmatprep.subr.bf16.mxu0 %v16227_v56  ;;  %v16276_v17 = vld [vmem:[#allocation19 + $0x360] ss:$8 sps:$4 sm:$0xff]   ;;  %v16278_v56 = vld [vmem:[#allocation19 + $0x364] ss:$8 sps:$4 sm:$0xff]  }
0x132f   : > { %10793 = vmatprep.subr.bf16.mxu1 %v16224_v20  ;;  %v16279_v20 = vld [vmem:[#allocation19 + $0x3c0] ss:$8 sps:$4 sm:$0xff]  }
0x1331   : > { %10976 = vmatpush1.bf16.msra.mxu0 %v16225_v15  ;;  %v16281_v15 = vld [vmem:[#allocation19 + $0x3c4] ss:$8 sps:$4 sm:$0xff]  }
0x1332   : > { %10794 = vmatpush1.bf16.msra.mxu1 %v16222_v9  ;;  %10977 = vmatprep.subr.bf16.mxu0 %v16233_v52  ;;  %v16284_v9 = vld [vmem:[#allocation19 + $0x374] ss:$8 sps:$4 sm:$0xff]   ;;  %v16288_v52 = vld [vmem:[#allocation19 + $0x3e0] ss:$8 sps:$4 sm:$0xff]  }
0x1333   : > { %10795 = vmatprep.subr.bf16.mxu1 %v16230_v43  ;;  %v16282_v43 = vld [vmem:[#allocation19 + $0x370] ss:$8 sps:$4 sm:$0xff]  }
0x1335   : > { %10978 = vmatpush1.bf16.msra.mxu0 %v16231_v23  ;;  %v16285_v23 = vld [vmem:[#allocation19 + $0x3d0] ss:$8 sps:$4 sm:$0xff]  }
0x1336   : > { %10796 = vmatpush1.bf16.msra.mxu1 %v16228_v48  ;;  %10979 = vmatprep.subr.bf16.mxu0 %v16239_v30  ;;  %v16287_v48 = vld [vmem:[#allocation19 + $0x3d4] ss:$8 sps:$4 sm:$0xff]  }
0x1337   : > { %10797 = vmatprep.subr.bf16.mxu1 %v16236_v12  ;;  %v16290_v12 = vld [vmem:[#allocation19 + $0x3e4] ss:$8 sps:$4 sm:$0xff]   ;;  %v16293_v30 = vld [vmem:[#allocation19 + $0x3f4] ss:$8 sps:$4 sm:$0xff]  }
0x1339   : > { %10980 = vmatpush1.bf16.msra.mxu0 %v16237_v5 }
0x133a   : > { %10798 = vmatpush1.bf16.msra.mxu1 %v16234_v54  ;;  %10981 = vmatprep.subr.bf16.mxu0 %v16242_v49  ;;  %v16291_v54 = vld [vmem:[#allocation19 + $0x3f0] ss:$8 sps:$4 sm:$0xff]  }
0x133b   : > { %14996 = vmatprep.subr.bf16.mxu1 %v16749_v36 }
0x133d   : > { %10982 = vmatpush1.bf16.msra.mxu0 %v16240_v8 }
0x133e   : > { %10983 = vmatprep.subr.bf16.mxu0 %v16245_v1 }
0x1341   : > { %10984 = vmatpush1.bf16.msra.mxu0 %v16243_v47 }
0x1342   : > { %15002 = vmatprep.subr.bf16.mxu0 %v16749_v36 }
0x13e7   : > { %v10445_v46 = vpop.f32.mrb[252].mxu1 }
0x13e8   : > { %v10452_v0 = vadd.f32 %v10445_v46, %v19704_v51  ;;  %v10447_v35 = vpop.f32.mrb[253].mxu1 }
0x13e9   : > { %v10453_v7 = vadd.f32 %v10447_v35, %v19706_v6  ;;  %v10449_v42 = vpop.f32.mrb[254].mxu1 }
0x13ea   : > { %v10450_v19 = vpop.f32.mrb[255].mxu1 }
0x13ef   : > { %v10631_v55 = vpop.f32.mrb[124].mxu0  ;;  %v10679_v58 = vpop.f32.mrb[0].mxu1 }
0x13f0   : > { %v19722_v18 = vadd.f32 %v10631_v55, %v10452_v0  ;;  %v10685_v37 = vpack.c.bf16 %v10679_v58, %v10679_v58  ;;  %v10633_v50 = vpop.f32.mrb[125].mxu0  ;;  %v14988_v60 = vpop.f32.mrb[1].mxu1  ;;  %v16296_v58 = vld [vmem:[#allocation19 + $0x404] ss:$8 sps:$4 sm:$0xff]  }
0x13f1   : > { %v19724_v62 = vadd.f32 %v10633_v50, %v10453_v7  ;;  %v10635_v59 = vpop.f32.mrb[126].mxu0  ;;  %v10682_v40 = vpop.f32.mrb[2].mxu1 }
0x13f2   : > { %10816 = vmatmul.mubr.bf16.vlgmr.msra.gmra.mrb[4].mxu1 %v10685_v37  ;;  %v10636_v53 = vpop.f32.mrb[127].mxu0  ;;  %v14989_v51 = vpop.f32.mrb[3].mxu1  ;;  %v16294_v40 = vld [vmem:[#allocation19 + $0x400] ss:$8 sps:$4 sm:$0xff]  }
0x13f3   : > { %14997 = vmatpush3.bf16.msra.mxu1 %v19682_v34  ;;  %14998 = vmatprep.mubr.msk.bf16.mxu1 %vm16750_vm5, %v16749_v36  ;;  %v16299_v51 = vld [vmem:[#allocation19 + $0x414] ss:$8 sps:$4 sm:$0xff]  }
0x13f4   : > { %11155 = vmatprep.subr.bf16.mxu1 %v16248_v22 }
0x13f7   : > { %v10865_v6 = vpop.f32.mrb[128].mxu0 }
0x13f8   : > { %v10871_v21 = vpack.c.bf16 %v10865_v6, %v10865_v6  ;;  %v14994_v10 = vpop.f32.mrb[129].mxu0 }
0x13f9   : > { %v10868_v4 = vpop.f32.mrb[130].mxu0  ;;  %v16303_v10 = vld [vmem:[#allocation19 + $0x430] ss:$8 sps:$4 sm:$0xff]  }
0x13fa   : > { %11002 = vmatmul.mubr.bf16.vlgmr.msra.gmra.mrb[132].mxu0 %v10871_v21  ;;  %14999 = vmatmul.mubr.msk.bf16.vlgmr.msra.gmra.mrb[8].mxu1 %vm9902_vm3, %v11013_v29  ;;  %v14995_v27 = vpop.f32.mrb[131].mxu0  ;;  %v16306_v4 = vld [vmem:[#allocation19 + $0x440] ss:$8 sps:$4 sm:$0xff]  }
0x13fb   : > { %15003 = vmatpush3.bf16.msra.mxu0 %v19682_v34  ;;  %15004 = vmatprep.mubr.msk.bf16.mxu0 %vm16750_vm5, %v16749_v36  ;;  %v16311_v27 = vld [vmem:[#allocation19 + $0x454] ss:$8 sps:$4 sm:$0xff]  }
0x13fc   : > { %11156 = vmatpush1.bf16.msra.mxu1 %v16246_v44  ;;  %11341 = vmatprep.subr.bf16.mxu0 %v16257_v24  ;;  %v16297_v44 = vld [vmem:[#allocation19 + $0x410] ss:$8 sps:$4 sm:$0xff]   ;;  %v16305_v24 = vld [vmem:[#allocation19 + $0x434] ss:$8 sps:$4 sm:$0xff]  }
0x13fd   : > { %11157 = vmatprep.subr.bf16.mxu1 %v16251_v61  ;;  %11187 = vmatprep.mubr.bf16.mxu1 %v16751_v63  ;;  %v16308_v61 = vld [vmem:[#allocation19 + $0x444] ss:$8 sps:$4 sm:$0xff]  }
0x1400   : > { %11158 = vmatpush1.bf16.msra.mxu1 %v16249_v32  ;;  %v16309_v32 = vld [vmem:[#allocation19 + $0x450] ss:$8 sps:$4 sm:$0xff]  }
0x1401   : > { %11159 = vmatprep.subr.bf16.mxu1 %v16254_v45  ;;  %v16312_v45 = vld [vmem:[#allocation19 + $0x460] ss:$8 sps:$4 sm:$0xff]  }
0x1402   : > { %15005 = vmatmul.mubr.msk.bf16.vlgmr.msra.gmra.mrb[136].mxu0 %vm9902_vm3, %v11199_v26  ;;  %v16317_v26 = vld [vmem:[#allocation19 + $0x474] ss:$8 sps:$4 sm:$0xff]  }
0x1403   : > { %11342 = vmatpush1.bf16.msra.mxu0 %v16255_v28  ;;  %11373 = vmatprep.mubr.bf16.mxu0 %v16751_v63  ;;  %v16315_v28 = vld [vmem:[#allocation19 + $0x470] ss:$8 sps:$4 sm:$0xff]  }
0x1404   : > { %11160 = vmatpush1.bf16.msra.mxu1 %v16252_v33  ;;  %11343 = vmatprep.subr.bf16.mxu0 %v16263_v25 }
0x1405   : > { %11161 = vmatprep.subr.bf16.mxu1 %v16260_v11 }
0x1407   : > { %11344 = vmatpush1.bf16.msra.mxu0 %v16261_v31 }
0x1408   : > { %11162 = vmatpush1.bf16.msra.mxu1 %v16258_v14  ;;  %11345 = vmatprep.subr.bf16.mxu0 %v16269_v57 }
0x1409   : > { %11163 = vmatprep.subr.bf16.mxu1 %v16266_v16 }
0x140b   : > { %11346 = vmatpush1.bf16.msra.mxu0 %v16267_v2 }
0x140c   : > { %11164 = vmatpush1.bf16.msra.mxu1 %v16264_v41  ;;  %11347 = vmatprep.subr.bf16.mxu0 %v16275_v38 }
0x140d   : > { %11165 = vmatprep.subr.bf16.mxu1 %v16272_v13 }
0x140f   : > { %11348 = vmatpush1.bf16.msra.mxu0 %v16273_v39 }
0x1410   : > { %11166 = vmatpush1.bf16.msra.mxu1 %v16270_v3  ;;  %11349 = vmatprep.subr.bf16.mxu0 %v16281_v15 }
0x1411   : > { %11167 = vmatprep.subr.bf16.mxu1 %v16278_v56 }
0x1413   : > { %11350 = vmatpush1.bf16.msra.mxu0 %v16279_v20 }
0x1414   : > { %11168 = vmatpush1.bf16.msra.mxu1 %v16276_v17  ;;  %11351 = vmatprep.subr.bf16.mxu0 %v16287_v48 }
0x1415   : > { %11169 = vmatprep.subr.bf16.mxu1 %v16284_v9  ;;  %v11572_v9 = vlaneseq }
0x1417   : > { %11352 = vmatpush1.bf16.msra.mxu0 %v16285_v23  ;;  %v11573_v48 = vshrl.u32 %v11572_v9, 7  ;;  %v11570_v23 = vld [vmem:[#allocation20] sm:$0x3] }
0x1418   : > { %11170 = vmatpush1.bf16.msra.mxu1 %v16282_v43  ;;  %11353 = vmatprep.subr.bf16.mxu0 %v16290_v12 }
0x1419   : > { %15008 = vmatprep.subr.bf16.mxu1 %v16749_v36  ;;  %v11574_v43 = vsub.s32 0, %v11573_v48 }
0x141b   : > { %11354 = vmatpush1.bf16.msra.mxu0 %v16288_v52  ;;  %v11578_v52 = vsub.s32 1, %v11573_v48  ;;  %v11575_v12 = vrot.slane %v11570_v23, %v11574_v43 }
0x141c   : > { %11355 = vmatprep.subr.bf16.mxu0 %v16293_v30 }
0x141f   : > { %11356 = vmatpush1.bf16.msra.mxu0 %v16291_v54  ;;  %v11579_v54 = vrot.slane %v11570_v23, %v11578_v52 }
0x14c5   : > { %v10817_v5 = vpop.f32.mrb[4].mxu1 }
0x14c6   : > { %v10824_v8 = vadd.f32 %v10817_v5, %v19722_v18  ;;  %v10819_v49 = vpop.f32.mrb[5].mxu1 }
0x14c7   : > { %v10825_v1 = vadd.f32 %v10819_v49, %v19724_v62  ;;  %v10821_v47 = vpop.f32.mrb[6].mxu1  ;;  %v11385_v62 = vld [vmem:[#allocation17 + $0x10] sm:$0x3] }
0x14c8   : > { %v10822_v46 = vpop.f32.mrb[7].mxu1 }
0x14cd   : > { %v11003_v0 = vpop.f32.mrb[132].mxu0  ;;  %v11051_v35 = vpop.f32.mrb[8].mxu1 }
0x14ce   : > { %v11010_v7 = vadd.f32 %v11003_v0, %v10824_v8  ;;  %v11057_v42 = vpack.c.bf16 %v11051_v35, %v11051_v35  ;;  %v11005_v19 = vpop.f32.mrb[133].mxu0  ;;  %v15000_v55 = vpop.f32.mrb[9].mxu1 }
0x14cf   : > { %v11011_v37 = vadd.f32 %v11005_v19, %v10825_v1  ;;  %v11007_v50 = vpop.f32.mrb[134].mxu0  ;;  %v11054_v60 = vpop.f32.mrb[10].mxu1 }
0x14d0   : > { %11188 = vmatmul.mubr.bf16.vlgmr.msra.gmra.mrb[12].mxu1 %v11057_v42  ;;  %v11008_v22 = vpop.f32.mrb[135].mxu0  ;;  %v15001_v59 = vpop.f32.mrb[11].mxu1 }
0x14d1   : > { %15009 = vmatpush3.bf16.msra.mxu1 %v19682_v34  ;;  %15010 = vmatprep.mubr.msk.bf16.mxu1 %vm16750_vm5, %v16749_v36  ;;  %v16302_v34 = vld [vmem:[#allocation19 + $0x424] ss:$8 sps:$4 sm:$0xff]   ;;  %v16300_v36 = vld [vmem:[#allocation19 + $0x420] ss:$8 sps:$4 sm:$0xff]   ;;  %vm11659_vm5 = vcmask 0  }
0x14d2   : > { %11527 = vmatprep.subr.bf16.mxu1 %v16296_v58 }
0x14d5   : > { %v11237_v18 = vpop.f32.mrb[136].mxu0 }
0x14d6   : > { %v11243_v53 = vpack.c.bf16 %v11237_v18, %v11237_v18  ;;  %v15006_v6 = vpop.f32.mrb[137].mxu0 }
0x14d7   : > { %v11240_v29 = vpop.f32.mrb[138].mxu0 }
0x14d8   : > { %11374 = vmatmul.mubr.bf16.vlgmr.msra.gmra.mrb[140].mxu0 %v11243_v53  ;;  %15011 = vmatmul.mubr.msk.bf16.vlgmr.msra.gmra.mrb[16].mxu1 %vm9902_vm3, %v11385_v62  ;;  %v15007_v21 = vpop.f32.mrb[139].mxu0 }
0x14d9   : > { %11528 = vmatpush1.bf16.msra.mxu1 %v16294_v40  ;;  %11559 = vmatprep.mubr.bf16.mxu1 %v16751_v63  ;;  %v16314_v63 = vld [vmem:[#allocation19 + $0x464] ss:$8 sps:$4 sm:$0xff]  }
0x14da   : > { %11529 = vmatprep.subr.bf16.mxu1 %v16299_v51 }
0x14dd   : > { %11530 = vmatpush1.bf16.msra.mxu1 %v16297_v44 }
0x14de   : > { %11531 = vmatprep.subr.bf16.mxu1 %v16302_v34 }
0x14e1   : > { %11532 = vmatpush1.bf16.msra.mxu1 %v16300_v36 }
0x14e2   : > { %11533 = vmatprep.subr.bf16.mxu1 %v16305_v24 }
0x14e5   : > { %11534 = vmatpush1.bf16.msra.mxu1 %v16303_v10 }
0x14e6   : > { %11535 = vmatprep.subr.bf16.mxu1 %v16308_v61 }
0x14e9   : > { %11536 = vmatpush1.bf16.msra.mxu1 %v16306_v4 }
0x14ea   : > { %11537 = vmatprep.subr.bf16.mxu1 %v16311_v27 }
0x14ed   : > { %11538 = vmatpush1.bf16.msra.mxu1 %v16309_v32 }
0x14ee   : > { %11539 = vmatprep.subr.bf16.mxu1 %v16314_v63 }
0x14f1   : > { %11540 = vmatpush1.bf16.msra.mxu1 %v16312_v45 }
0x14f2   : > { %11541 = vmatprep.subr.bf16.mxu1 %v16317_v26 }
0x14f5   : > { %11542 = vmatpush1.bf16.msra.mxu1 %v16315_v28 }
0x15a3   : > { %v11189_v33 = vpop.f32.mrb[12].mxu1 }
0x15a4   : > { %v11196_v25 = vadd.f32 %v11189_v33, %v11010_v7  ;;  %v11191_v11 = vpop.f32.mrb[13].mxu1 }
0x15a5   : > { %v11197_v31 = vadd.f32 %v11191_v11, %v11011_v37  ;;  %v11193_v14 = vpop.f32.mrb[14].mxu1 }
0x15a6   : > { %v11194_v57 = vpop.f32.mrb[15].mxu1 }
0x15ab   : > { %v11375_v16 = vpop.f32.mrb[140].mxu0  ;;  %v11423_v2 = vpop.f32.mrb[16].mxu1 }
0x15ac   : > { %v11382_v41 = vadd.f32 %v11375_v16, %v11196_v25  ;;  %v11429_v38 = vpack.c.bf16 %v11423_v2, %v11423_v2  ;;  %v11377_v13 = vpop.f32.mrb[141].mxu0  ;;  %v15012_v39 = vpop.f32.mrb[17].mxu1 }
0x15ad   : > { %v11383_v3 = vadd.f32 %v11377_v13, %v11197_v31  ;;  %v11426_v17 = vpop.f32.mrb[18].mxu1  ;;  %v11379_v56 = vpop.f32.mrb[142].mxu0 }
0x15ae   : > { %11560 = vmatmul.mubr.bf16.vlgmr.msra.gmra.mrb[20].mxu1 %v11429_v38  ;;  %v15013_v20 = vpop.f32.mrb[19].mxu1  ;;  %v11380_v15 = vpop.f32.mrb[143].mxu0  ;;  %v11639_v17 = vld [vmem:[#allocation22] sm:$0xff] }
0x15af   : > { %v11641_v48 = vcombine.high %v11639_v17, %v11639_v17 }
0x1681   : > { %v11561_v30 = vpop.f32.mrb[20].mxu1 }
0x1682   : > { %v11568_v5 = vadd.f32 %v11561_v30, %v11382_v41  ;;  %v11563_v8 = vpop.f32.mrb[21].mxu1 }
0x1683   : > { %v11569_v49 = vadd.f32 %v11563_v8, %v11383_v3  ;;  %v11565_v1 = vpop.f32.mrb[22].mxu1 }
0x1684   : > { %v11582_v47 = vadd.f32 %v11575_v12, %v11568_v5  ;;  %v11566_v46 = vpop.f32.mrb[23].mxu1 }
0x1685   : > { %v11583_v0 = vadd.f32 %v11579_v54, %v11569_v49 }
0x1686   : > { %v11585_v35 = vsel %vm11584_vm0, %v11582_v47, 0.0  ;;  %v11601_v7 = vmul.f32 %v11582_v47, %v11582_v47 }
0x1687   : > { %v11586_v42 = vrot.slane %v11585_v35, 4  ;;  %v11592_v19 = vsel %vm11584_vm0, %v11583_v0, 0.0  ;;  %v11602_v55 = vmul.f32 %v11583_v0, %v11583_v0 }
0x1688   : > { %v11603_v58 = vsel %vm11584_vm0, %v11601_v7, 0.0  ;;  %v11593_v37 = vrot.slane %v11592_v19, 4 }
0x1689   : > { %v11587_v50 = vadd.f32 %v11586_v42, %v11585_v35  ;;  %v11604_v60 = vrot.slane %v11603_v58, 4  ;;  %v11610_v22 = vsel %vm11584_vm0, %v11602_v55, 0.0  ;;  %v11657_v42 = vld [vmem:[#allocation2] sm:$0x1] }
0x168a   : > { %v11594_v59 = vadd.f32 %v11593_v37, %v11592_v19  ;;  %v11611_v18 = vrot.slane %v11610_v22, 4 }
0x168b   : > { %v11588_v62 = vrot.slane %v11587_v50, 2  ;;  %v11605_v40 = vadd.f32 %v11604_v60, %v11603_v58 }
0x168c   : > { %v11595_v53 = vrot.slane %v11594_v59, 2  ;;  %v11612_v51 = vadd.f32 %v11611_v18, %v11610_v22 }
0x168d   : > { %v11589_v6 = vadd.f32 %v11588_v62, %v11587_v50  ;;  %v11606_v29 = vrot.slane %v11605_v40, 2 }
0x168e   : > { %v11596_v21 = vadd.f32 %v11595_v53, %v11594_v59  ;;  %v11613_v44 = vrot.slane %v11612_v51, 2 }
0x168f   : > { %v11590_v34 = vrot.slane %v11589_v6, 1  ;;  %v11607_v36 = vadd.f32 %v11606_v29, %v11605_v40 }
0x1690   : > { %v11597_v24 = vrot.slane %v11596_v21, 1  ;;  %v11614_v10 = vadd.f32 %v11613_v44, %v11612_v51 }
0x1691   : > { %v11591_v61 = vadd.f32 %v11590_v34, %v11589_v6  ;;  %v11608_v4 = vrot.slane %v11607_v36, 1 }
0x1692   : > { %v11598_v27 = vadd.f32 %v11597_v24, %v11596_v21  ;;  %v11615_v32 = vrot.slane %v11614_v10, 1 }
0x1693   : > { %v11599_v45 = vmul.f32 0.25, %v11591_v61  ;;  %v11609_v63 = vadd.f32 %v11608_v4, %v11607_v36 }
0x1694   : > { %v11600_v26 = vmul.f32 0.25, %v11598_v27  ;;  %v11616_v28 = vadd.f32 %v11615_v32, %v11614_v10 }
0x1695   : > { %v11617_v33 = vmul.f32 0.25, %v11609_v63  ;;  %v11619_v25 = vmul.f32 %v11599_v45, %v11599_v45  ;;  %v11625_v13 = vsub.f32 %v11582_v47, %v11599_v45 }
0x1696   : > { %v11618_v11 = vmul.f32 0.25, %v11616_v28  ;;  %v11620_v31 = vmul.f32 %v11600_v26, %v11600_v26  ;;  %v11626_v3 = vsub.f32 %v11583_v0, %v11600_v26 }
0x1697   : > { %v11621_v14 = vsub.f32 %v11617_v33, %v11619_v25 }
0x1698   : > { %v11622_v57 = vsub.f32 %v11618_v11, %v11620_v31 }
0x1699   : > { %v11623_v16 = vmax.f32 %v11621_v14, 0.0 }
0x169a   : > { %v11624_v2 = vmax.f32 %v11622_v57, 0.0 }
0x169b   : > { %v11627_v41 = vadd.f32 1e-05, %v11623_v16 }
0x169c   : > { %v11628_v38 = vadd.f32 1e-05, %v11624_v2 }
0x169d   : > { %16325 = vrsqrt.f32 %v11627_v41 }
0x169e   : > { %16327 = vrsqrt.f32 %v11628_v38 }
0x16a7   : > { %v16326_v39 = vpop.eup %16325 }
0x16a8   : > { %v16328_v56 = vpop.eup %16327  ;;  %v11631_v20 = vmul.f32 %v16326_v39, %v11625_v13 }
0x16a9   : > { %v11632_v15 = vmul.f32 %v16328_v56, %v11626_v3 }
0x16aa   : > { %vm11633_vm2 = vcmp.ge.f32.partialorder %v11631_v20, 0.0  ;;  %v11635_v9 = vmul.f32 0.2, %v11631_v20 }
0x16ab   : > { %vm11634_vm4 = vcmp.ge.f32.partialorder %v11632_v15, 0.0  ;;  %v11636_v43 = vmul.f32 0.2, %v11632_v15 }
0x16ac   : > { %v11637_v23 = vsel %vm11633_vm2, %v11631_v20, %v11635_v9 }
0x16ad   : > { %v11638_v52 = vsel %vm11634_vm4, %v11632_v15, %v11636_v43  ;;  %v11643_v12 = vmul.f32 %v11639_v17, %v11637_v23 }
0x16ae   : > { %v11644_v30 = vmul.f32 %v11641_v48, %v11638_v52 }
0x16af   : > { %v11645_v54 = vsel %vm11584_vm0, %v11643_v12, 0.0 }
0x16b0   : > { %v11646_v5 = vsel %vm11584_vm0, %v11644_v30, 0.0 }
0x16b1   : > { %v11647_v8 = vadd.f32 %v11646_v5, %v11645_v54 }
0x16b3   : > { %11648 = vadd.xlane.f32.xlu0 %v11647_v8 }
0x1740   : > { %v11649_v49 = vpop.xlane.xlu0 %11648 }
0x1741   : > { %v11650_v1 = vsel %vm11584_vm0, %v11649_v49, 0.0 }
0x1742   : > { %v11651_v47 = vrot.slane %v11650_v1, 4 }
0x1744   : > { %v11652_v46 = vadd.f32 %v11651_v47, %v11650_v1 }
0x1746   : > { %v11653_v0 = vrot.slane %v11652_v46, 2 }
0x1748   : > { %v11654_v35 = vadd.f32 %v11653_v0, %v11652_v46 }
0x174a   : > { %v11655_v7 = vrot.slane %v11654_v35, 1 }
0x174c   : > { %v11656_v19 = vadd.f32 %v11655_v7, %v11654_v35 }
0x174e   : > { %v11658_v55 = vadd.f32 %v11657_v42, %v11656_v19 }
0x1750   : > { %11660 = vst.msk [vmem:[%s671_s28] sm:$0x1] %vm11659_vm5, %v11658_v55 }
0x1751 PF: > { %s20233_s1 = sld [smem:[#allocation30_spill]] }
0x1757   : > { %s34_s20 = sadd.s32 1, %s20233_s1  }
0x1758   : > { %p31_p7 = scmp.ge.s32.totalorder %s34_s20, 4  }
0x175a   :  { %33 = sbr.rel (!%p31_p7) target bundleno = 12 (0xc), region = 227 }
0x1761   :  { %11678 = vsyncpa [#allocation4], 1 }
0x1762   :  { %11680 = vsyncpa [#allocation4 + $0x1], 1 }
0x1763   :  { %11681 = vsyncpa [#allocation6], 1 }
0x1764   :  { %11682 = vsyncpa [#allocation9], 1 }
0x1765   :  { %11683 = vsyncpa [#allocation12], 1 }
0x1766   :  { %11684 = vsyncpa [#allocation15], 1 }
0x1767   :  { %11685 = vsyncpa [#allocation18], 1 }
0x1768   :  { %11686 = vsyncpa [#allocation21], 1 }

</bundles_post_ra>
